<compile_context>
chip_gen: v7x
topology: tpu7x:2x2x1
jax: 0.10.0
libtpu: 0.0.40
codegen_flags: <defaults>
</compile_context>

<pallas_src>
import functools

import jax
import jax.numpy as jnp
from jax.experimental import pallas as pl
from jax.experimental.pallas import tpu as pltpu

EPS = 1e-5
VMEM_SPEC = pl.BlockSpec(memory_space=pltpu.MemorySpace.VMEM)
VMEM_LIMIT = 64 * 1024 * 1024   # re-derived for v7x's 64 MiB physical VMEM


def _round_up(x, m):
    return (x + m - 1) // m * m


# ----------------------------- Pallas kernels ------------------------------

def _bn_scale_shift(y, g, beta, inv_count):
    """Training-mode BN (biased variance) from one-pass sums.

    Zero-padded rows contribute 0 to both sums and are excluded from the
    divisor, so the statistics are exactly the full-batch (N, OH, OW) stats.
    TODO(synk): one-pass E[y^2]-E[y]^2 cancels catastrophically for very large
    batches; switch to a centered / two-pass formulation when batch is scaled.
    """
    s1 = jnp.sum(y, axis=0, keepdims=True)
    s2 = jnp.sum(y * y, axis=0, keepdims=True)
    mean = s1 * inv_count
    var = jnp.maximum(s2 * inv_count - mean * mean, 0.0)
    scale = g * jax.lax.rsqrt(var + EPS)
    shift = beta - mean * scale
    return scale, shift


def _pool_bn_relu(y, scale, shift, rp, rp8):
    """2x2 max pool fused with BN + ReLU.

    BN is a per-channel affine, so max over the four parities of BN(y) equals
    max(scale*max4, scale*min4) + shift for ANY sign of scale; BN/ReLU are
    therefore applied only to the pooled (1/4-size) array.
    """
    y0 = y[0 * rp8:0 * rp8 + rp]
    y1 = y[1 * rp8:1 * rp8 + rp]
    y2 = y[2 * rp8:2 * rp8 + rp]
    y3 = y[3 * rp8:3 * rp8 + rp]
    mx = jnp.maximum(jnp.maximum(y0, y1), jnp.maximum(y2, y3))
    mn = jnp.minimum(jnp.minimum(y0, y1), jnp.minimum(y2, y3))
    return jnp.maximum(jnp.maximum(mx * scale, mn * scale) + shift, 0.0)


def conv_bn_relu_pool_kernel(p_ref, w_ref, g_ref, beta_ref, o_ref,
                             *, rp, rp8, inv_count):
    """Fused conv (single im2col matmul) + BatchNorm(train) + ReLU + 2x2 pool.

    p_ref : (R_all, Kp) bf16. Rows: four 2x2-pool parity blocks of rp rows
            (each zero-padded to rp8), then optional BN-only remainder rows.
    w_ref : (Kp, Cout) bf16.   g / beta : (1, Cout) f32.
    o_ref : (rp, Cout) bf16 pooled activations, rows ordered (n, ph, pw).
    """
    y = jnp.dot(p_ref[...], w_ref[...], preferred_element_type=jnp.float32)
    scale, shift = _bn_scale_shift(y, g_ref[...], beta_ref[...], inv_count)
    o_ref[...] = _pool_bn_relu(y, scale, shift, rp, rp8).astype(o_ref.dtype)


def conv4_head_kernel(p_ref, w4_ref, g_ref, beta_ref,
                      w1_ref, b1_ref, w2_ref, b2_ref, w3_ref, b3_ref,
                      o_ref, *, rp, rp8, inv_count):
    """Layer-4 conv+BN+ReLU+pool fused with Linear(64,120)+ReLU ->
    Linear(120,84)+ReLU -> Linear(84,10) -> LogSoftmax.

    The pooled layer-4 activation (N, 64) stays in VMEM.  FC matrices are
    padded to 128 lanes; padded logit columns carry a -1e30 bias so they
    vanish under softmax; the (N, 128) block is stored lane-dense.
    """
    y = jnp.dot(p_ref[...], w4_ref[...], preferred_element_type=jnp.float32)
    scale, shift = _bn_scale_shift(y, g_ref[...], beta_ref[...], inv_count)
    x = _pool_bn_relu(y, scale, shift, rp, rp8)                  # (N, 64) f32

    h = jnp.dot(x.astype(jnp.bfloat16), w1_ref[...],
                preferred_element_type=jnp.float32) + b1_ref[...]
    h = jnp.maximum(h, 0.0)
    h = jnp.dot(h.astype(jnp.bfloat16), w2_ref[...],
                preferred_element_type=jnp.float32) + b2_ref[...]
    h = jnp.maximum(h, 0.0)
    logits = jnp.dot(h.astype(jnp.bfloat16), w3_ref[...],
                     preferred_element_type=jnp.float32) + b3_ref[...]
    m = jnp.max(logits, axis=1, keepdims=True)
    lse = m + jnp.log(jnp.sum(jnp.exp(logits - m), axis=1, keepdims=True))
    o_ref[...] = logits - lse


# ------------------------------- JAX glue -----------------------------------

def _im2col_pool_parts(x, kh, kw, pad):
    """bf16 im2col patches stacked as 4 pool-parity blocks (+ BN-only rest).

    Returns (P, (N, PH, PW, rp, rp8, inv_count)) where block b of P occupies
    rows [b*rp8, b*rp8+rp); rows rp..rp8 of each block are zeros (they add 0
    to the BN sums and the divisor uses the true count, so stats are exact).
    """
    if pad > 0:
        x = jnp.pad(x, ((0, 0), (pad, pad), (pad, pad), (0, 0)))
    N, H, W, C = x.shape
    OH, OW = H - kh + 1, W - kw + 1
    PH, PW = OH // 2, OW // 2
    K = kh * kw * C
    Kp = _round_up(K, 16)                 # bf16 sublane-align the contraction

    # im2col on tiny bf16 tensors (plain XLA glue).  Column order (i, j, ci)
    # matches w.reshape(kh*kw*Cin, Cout) in _conv_weight -- keep in sync.
    cols = [x[:, i:i + OH, j:j + OW, :] for i in range(kh) for j in range(kw)]
    pat = jnp.concatenate(cols, axis=-1)                     # (N, OH, OW, K)
    if Kp != K:
        pat = jnp.pad(pat, ((0, 0), (0, 0), (0, 0), (0, Kp - K)))

    rp = N * PH * PW
    rp8 = _round_up(rp, 8)

    def rows(p2d, r8):
        return jnp.pad(p2d, ((0, r8 - p2d.shape[0]), (0, 0)))

    blocks = [rows(pat[:, di:2 * PH:2, dj:2 * PW:2, :].reshape(rp, Kp), rp8)
              for di in (0, 1) for dj in (0, 1)]
    # Conv-output positions dropped by floor-mode pooling: BN statistics only.
    rem = []
    if OH > 2 * PH:
        rem.append(pat[:, 2 * PH:, :, :].reshape(N * (OH - 2 * PH) * OW, Kp))
    if OW > 2 * PW:
        rem.append(pat[:, :2 * PH, 2 * PW:, :].reshape(N * 2 * PH * (OW - 2 * PW), Kp))
    if rem:
        rem = jnp.concatenate(rem, axis=0)
        blocks.append(rows(rem, _round_up(rem.shape[0], 8)))

    P = jnp.concatenate(blocks, axis=0)                       # (R_all, Kp)
    return P, (N, PH, PW, rp, rp8, 1.0 / float(N * OH * OW))


def _conv_weight(w, Kp):
    kh, kw, cin, cout = w.shape
    K = kh * kw * cin
    w2 = w.reshape(K, cout)
    if Kp != K:
        w2 = jnp.pad(w2, ((0, Kp - K), (0, 0)))
    return w2.astype(jnp.bfloat16)


def conv_bn_relu_pool(x, w, gamma, beta, *, kh, kw, pad):
    """x: (N,H,W,Cin) bf16 -> pooled (N, OH//2, OW//2, Cout) bf16.

    Conv bias intentionally omitted: training-mode BN's mean subtraction
    cancels it exactly.
    """
    P, (N, PH, PW, rp, rp8, inv_count) = _im2col_pool_parts(x, kh, kw, pad)
    cout = w.shape[-1]
    out = pl.pallas_call(
        functools.partial(conv_bn_relu_pool_kernel,
                          rp=rp, rp8=rp8, inv_count=inv_count),
        out_shape=jax.ShapeDtypeStruct((rp, cout), jnp.bfloat16),
        in_specs=[VMEM_SPEC] * 4,
        out_specs=VMEM_SPEC,
        compiler_params=pltpu.CompilerParams(vmem_limit_bytes=VMEM_LIMIT),
    )(P, _conv_weight(w, P.shape[1]),
      gamma.reshape(1, cout), beta.reshape(1, cout))
    return out.reshape(N, PH, PW, cout)


def conv4_and_head(x, w, gamma, beta, fw1, fb1, fw2, fb2, fw3, fb3):
    """Fused layer-4 (Conv 3x3 pad 1 + BN + ReLU + 2x2 pool) + MLP head."""
    P, (N, PH, PW, rp, rp8, inv_count) = _im2col_pool_parts(x, 3, 3, 1)
    assert PH == 1 and PW == 1 and rp == N          # (N,1,1,64) == head input
    cout = w.shape[-1]
    H1 = H2 = DO = 128
    NEG = -1e30

    w1p = jnp.pad(fw1, ((0, 0), (0, H1 - fw1.shape[1]))).astype(jnp.bfloat16)
    b1p = jnp.pad(fb1.reshape(1, -1), ((0, 0), (0, H1 - fb1.shape[0])))
    w2p = jnp.pad(fw2, ((0, H1 - fw2.shape[0]),
                        (0, H2 - fw2.shape[1]))).astype(jnp.bfloat16)
    b2p = jnp.pad(fb2.reshape(1, -1), ((0, 0), (0, H2 - fb2.shape[0])))
    w3p = jnp.pad(fw3, ((0, H2 - fw3.shape[0]),
                        (0, DO - fw3.shape[1]))).astype(jnp.bfloat16)
    b3p = jnp.pad(fb3.reshape(1, -1), ((0, 0), (0, DO - fb3.shape[0])),
                  constant_values=NEG)

    out = pl.pallas_call(
        functools.partial(conv4_head_kernel,
                          rp=rp, rp8=rp8, inv_count=inv_count),
        out_shape=jax.ShapeDtypeStruct((N, DO), jnp.float32),
        in_specs=[VMEM_SPEC] * 10,
        out_specs=VMEM_SPEC,
        compiler_params=pltpu.CompilerParams(vmem_limit_bytes=VMEM_LIMIT),
    )(P, _conv_weight(w, P.shape[1]),
      gamma.reshape(1, cout), beta.reshape(1, cout),
      w1p, b1p, w2p, b2p, w3p, b3p)
    return out[:, :fw3.shape[1]]


# ------------------------------ Parameters ----------------------------------

def init_params(key):
    """Deterministic synthetic parameters matching the module's shapes.

    Conv weights stored as (kh, kw, Cin, Cout); Linear weights as (in, out).
    Conv biases are kept (the reference uses them) but the Pallas path omits
    them -- training-mode BN cancels them exactly.
    """
    ks = jax.random.split(key, 16)

    def conv(k, kh, kw, cin, cout):
        scale = 1.0 / jnp.sqrt(kh * kw * cin)
        return jax.random.uniform(k, (kh, kw, cin, cout), jnp.float32, -scale, scale)

    def vec(k, n, lo=-0.1, hi=0.1):
        return jax.random.uniform(k, (n,), jnp.float32, lo, hi)

    def lin(k, fin, fout):
        scale = 1.0 / jnp.sqrt(fin)
        return jax.random.uniform(k, (fin, fout), jnp.float32, -scale, scale)

    p = {}
    # layer1: Conv2d(1, 6, 5, padding=2) + BN(6)
    p["w1"], p["cb1"] = conv(ks[0], 5, 5, 1, 6), vec(ks[1], 6)
    p["g1"], p["be1"] = 1.0 + vec(ks[2], 6), vec(ks[3], 6)
    # layer2: Conv2d(6, 16, 5) + BN(16)
    p["w2"], p["cb2"] = conv(ks[4], 5, 5, 6, 16), vec(ks[5], 16)
    p["g2"], p["be2"] = 1.0 + vec(ks[6], 16), vec(ks[7], 16)
    # layer3: Conv2d(16, 32, 3, padding=1) + BN(32)
    p["w3"], p["cb3"] = conv(ks[8], 3, 3, 16, 32), vec(ks[9], 32)
    p["g3"], p["be3"] = 1.0 + vec(ks[10], 32), vec(ks[11], 32)
    # layer4: Conv2d(32, 64, 3, padding=1) + BN(64)
    p["w4"], p["cb4"] = conv(ks[12], 3, 3, 32, 64), vec(ks[13], 64)
    p["g4"], p["be4"] = 1.0 + vec(ks[14], 64), vec(ks[15], 64)
    # layer5: Linear(64,120), Linear(120,84), Linear(84,10)
    k5 = jax.random.split(jax.random.fold_in(key, 99), 6)
    p["fw1"], p["fb1"] = lin(k5[0], 64, 120), vec(k5[1], 120)
    p["fw2"], p["fb2"] = lin(k5[2], 120, 84), vec(k5[3], 84)
    p["fw3"], p["fb3"] = lin(k5[4], 84, 10), vec(k5[5], 10)
    return p


# ------------------------------- Forward ------------------------------------

@jax.jit
def lenet_forward(x_nchw, p):
    # PyTorch-style NCHW in; NHWC + bf16 for the kernels (the im2col glue is
    # the dominant HBM traffic, so it is built at half width).
    x = jnp.transpose(x_nchw, (0, 2, 3, 1)).astype(jnp.bfloat16)   # (N,28,28,1)

    x = conv_bn_relu_pool(x, p["w1"], p["g1"], p["be1"], kh=5, kw=5, pad=2)  # (N,14,14,6)
    x = conv_bn_relu_pool(x, p["w2"], p["g2"], p["be2"], kh=5, kw=5, pad=0)  # (N,5,5,16)
    x = conv_bn_relu_pool(x, p["w3"], p["g3"], p["be3"], kh=3, kw=3, pad=1)  # (N,2,2,32)
    # layer4 conv + BN + ReLU + pool + Flatten + MLP head + LogSoftmax, fused.
    return conv4_and_head(x, p["w4"], p["g4"], p["be4"],
                          p["fw1"], p["fb1"], p["fw2"], p["fb2"],
                          p["fw3"], p["fb3"])                                # (N,10)


# --------------------- Pure-JAX reference (self-check) ----------------------

def _layer_ref(x, w, b, g, be, pad):
    y = jax.lax.conv_general_dilated(
        x, w, window_strides=(1, 1), padding=[(pad, pad), (pad, pad)],
        dimension_numbers=("NHWC", "HWIO", "NHWC")) + b
    m = jnp.mean(y, axis=(0, 1, 2))
    v = jnp.mean(jnp.square(y - m), axis=(0, 1, 2))
    y = jnp.maximum((y - m) * jax.lax.rsqrt(v + EPS) * g + be, 0.0)
    N, H, W, C = y.shape
    y = y[:, :H // 2 * 2, :W // 2 * 2, :].reshape(N, H // 2, 2, W // 2, 2, C)
    return jnp.max(y, axis=(2, 4))


@jax.jit
def _reference_forward(x_nchw, p):
    x = jnp.transpose(x_nchw, (0, 2, 3, 1)).astype(jnp.float32)
    x = _layer_ref(x, p["w1"], p["cb1"], p["g1"], p["be1"], 2)
    x = _layer_ref(x, p["w2"], p["cb2"], p["g2"], p["be2"], 0)
    x = _layer_ref(x, p["w3"], p["cb3"], p["g3"], p["be3"], 1)
    x = _layer_ref(x, p["w4"], p["cb4"], p["g4"], p["be4"], 1)
    h = x.reshape(x.shape[0], -1)
    h = jnp.maximum(h @ p["fw1"] + p["fb1"], 0.0)
    h = jnp.maximum(h @ p["fw2"] + p["fb2"], 0.0)
    return jax.nn.log_softmax(h @ p["fw3"] + p["fb3"], axis=1)


if __name__ == "__main__":
    key = jax.random.PRNGKey(0)
    kx, kp = jax.random.split(key)
    # FashionMNIST-shaped input (spatial must be 28 so layer5 sees 64*1*1).
    x = jax.random.normal(kx, (2, 1, 28, 28), dtype=jnp.float32)
    params = init_params(kp)

    out = lenet_forward(x, params)
    jax.block_until_ready(out)
    ref = _reference_forward(x, params)

    assert out.shape == (2, 10)
    # log-softmax rows should (approximately) exponentiate-sum to 1
    assert bool(jnp.allclose(jnp.sum(jnp.exp(out), axis=1), 1.0, atol=1e-3))
    # bf16 patches/activations with f32 accumulation: loose but meaningful tol
    assert bool(jnp.max(jnp.abs(out - ref)) < 0.25)
    print("KERNEL_OK")
</pallas_src>

<mosaic_0001>
module attributes {stable_mosaic.version = 11 : i64} {
  func.func @conv_bn_relu_pool_kernel(%arg0: memref<1568x32xbf16, #tpu.memory_space<vmem>>, %arg1: memref<32x6xbf16, #tpu.memory_space<vmem>>, %arg2: memref<1x6xf32, #tpu.memory_space<vmem>>, %arg3: memref<1x6xf32, #tpu.memory_space<vmem>>, %arg4: memref<392x6xbf16, #tpu.memory_space<vmem>>) attributes {dimension_semantics = [], scalar_prefetch = 0 : i64, scratch_operands = 0 : i64, tpu.core_type = #tpu.core_type<tc>} {
    %c0 = arith.constant 0 : index
    %c0_0 = arith.constant 0 : index
    %0 = vector.load %arg0[%c0, %c0_0] : memref<1568x32xbf16, #tpu.memory_space<vmem>>, vector<1568x32xbf16>
    %c0_1 = arith.constant 0 : index
    %c0_2 = arith.constant 0 : index
    %1 = vector.load %arg1[%c0_1, %c0_2] : memref<32x6xbf16, #tpu.memory_space<vmem>>, vector<32x6xbf16>
    %cst = arith.constant dense<0.000000e+00> : vector<1568x6xf32>
    %2 = tpu.matmul %0, %1, %cst {dimension_numbers = #tpu.dot_dimension_numbers<[1], [0], [0], [1], [0, 0, 1, 1], [], []>} : vector<1568x32xbf16>, vector<32x6xbf16>, vector<1568x6xf32> -> vector<1568x6xf32>
    %c0_3 = arith.constant 0 : index
    %c0_4 = arith.constant 0 : index
    %3 = vector.load %arg2[%c0_3, %c0_4] : memref<1x6xf32, #tpu.memory_space<vmem>>, vector<1x6xf32>
    %c0_5 = arith.constant 0 : index
    %c0_6 = arith.constant 0 : index
    %4 = vector.load %arg3[%c0_5, %c0_6] : memref<1x6xf32, #tpu.memory_space<vmem>>, vector<1x6xf32>
    %cst_7 = arith.constant dense<0.000000e+00> : vector<6xf32>
    %5 = vector.multi_reduction <add>, %2, %cst_7 [0] : vector<1568x6xf32> to vector<6xf32>
    %6 = vector.shape_cast %5 : vector<6xf32> to vector<1x6xf32>
    %7 = arith.mulf %2, %2 : vector<1568x6xf32>
    %cst_8 = arith.constant dense<0.000000e+00> : vector<6xf32>
    %8 = vector.multi_reduction <add>, %7, %cst_8 [0] : vector<1568x6xf32> to vector<6xf32>
    %9 = vector.shape_cast %8 : vector<6xf32> to vector<1x6xf32>
    %cst_9 = arith.constant 6.37755089E-4 : f32
    %10 = vector.broadcast %cst_9 : f32 to vector<1x6xf32>
    %11 = arith.mulf %6, %10 : vector<1x6xf32>
    %cst_10 = arith.constant 6.37755089E-4 : f32
    %12 = vector.broadcast %cst_10 : f32 to vector<1x6xf32>
    %13 = arith.mulf %9, %12 : vector<1x6xf32>
    %14 = arith.mulf %11, %11 : vector<1x6xf32>
    %15 = arith.subf %13, %14 : vector<1x6xf32>
    %cst_11 = arith.constant 0.000000e+00 : f32
    %16 = vector.broadcast %cst_11 : f32 to vector<1x6xf32>
    %17 = arith.maximumf %15, %16 : vector<1x6xf32>
    %cst_12 = arith.constant 9.99999974E-6 : f32
    %18 = vector.broadcast %cst_12 : f32 to vector<1x6xf32>
    %19 = arith.addf %17, %18 : vector<1x6xf32>
    %20 = math.rsqrt %19 : vector<1x6xf32>
    %21 = arith.mulf %3, %20 : vector<1x6xf32>
    %22 = arith.mulf %11, %21 : vector<1x6xf32>
    %23 = arith.subf %4, %22 : vector<1x6xf32>
    %24 = vector.extract_strided_slice %2 {offsets = [0, 0], sizes = [392, 6], strides = [1, 1]} : vector<1568x6xf32> to vector<392x6xf32>
    %25 = vector.extract_strided_slice %2 {offsets = [392, 0], sizes = [392, 6], strides = [1, 1]} : vector<1568x6xf32> to vector<392x6xf32>
    %26 = vector.extract_strided_slice %2 {offsets = [784, 0], sizes = [392, 6], strides = [1, 1]} : vector<1568x6xf32> to vector<392x6xf32>
    %27 = vector.extract_strided_slice %2 {offsets = [1176, 0], sizes = [392, 6], strides = [1, 1]} : vector<1568x6xf32> to vector<392x6xf32>
    %28 = arith.maximumf %24, %25 : vector<392x6xf32>
    %29 = arith.maximumf %26, %27 : vector<392x6xf32>
    %30 = arith.maximumf %28, %29 : vector<392x6xf32>
    %31 = arith.minimumf %24, %25 : vector<392x6xf32>
    %32 = arith.minimumf %26, %27 : vector<392x6xf32>
    %33 = arith.minimumf %31, %32 : vector<392x6xf32>
    %34 = vector.broadcast %21 : vector<1x6xf32> to vector<392x6xf32>
    %35 = arith.mulf %30, %34 : vector<392x6xf32>
    %36 = vector.broadcast %21 : vector<1x6xf32> to vector<392x6xf32>
    %37 = arith.mulf %33, %36 : vector<392x6xf32>
    %38 = arith.maximumf %35, %37 : vector<392x6xf32>
    %39 = vector.broadcast %23 : vector<1x6xf32> to vector<392x6xf32>
    %40 = arith.addf %38, %39 : vector<392x6xf32>
    %cst_13 = arith.constant 0.000000e+00 : f32
    %41 = vector.broadcast %cst_13 : f32 to vector<392x6xf32>
    %42 = arith.maximumf %40, %41 : vector<392x6xf32>
    %43 = arith.truncf %42 : vector<392x6xf32> to vector<392x6xbf16>
    %c0_14 = arith.constant 0 : index
    %c0_15 = arith.constant 0 : index
    %44 = vector.load %arg4[%c0_14, %c0_15] : memref<392x6xbf16, #tpu.memory_space<vmem>>, vector<392x6xbf16>
    tpu.vector_store %arg4[%c0_14, %c0_15], %43 {strides = array<i32>} : memref<392x6xbf16, #tpu.memory_space<vmem>>, vector<392x6xbf16>,
    return
  }
}

module attributes {stable_mosaic.version = 11 : i64} {
  func.func @conv_bn_relu_pool_kernel(%arg0: memref<224x160xbf16, #tpu.memory_space<vmem>>, %arg1: memref<160x16xbf16, #tpu.memory_space<vmem>>, %arg2: memref<1x16xf32, #tpu.memory_space<vmem>>, %arg3: memref<1x16xf32, #tpu.memory_space<vmem>>, %arg4: memref<50x16xbf16, #tpu.memory_space<vmem>>) attributes {dimension_semantics = [], scalar_prefetch = 0 : i64, scratch_operands = 0 : i64, tpu.core_type = #tpu.core_type<tc>} {
    %c0 = arith.constant 0 : index
    %c0_0 = arith.constant 0 : index
    %0 = vector.load %arg0[%c0, %c0_0] : memref<224x160xbf16, #tpu.memory_space<vmem>>, vector<224x160xbf16>
    %c0_1 = arith.constant 0 : index
    %c0_2 = arith.constant 0 : index
    %1 = vector.load %arg1[%c0_1, %c0_2] : memref<160x16xbf16, #tpu.memory_space<vmem>>, vector<160x16xbf16>
    %cst = arith.constant dense<0.000000e+00> : vector<224x16xf32>
    %2 = tpu.matmul %0, %1, %cst {dimension_numbers = #tpu.dot_dimension_numbers<[1], [0], [0], [1], [0, 0, 1, 1], [], []>} : vector<224x160xbf16>, vector<160x16xbf16>, vector<224x16xf32> -> vector<224x16xf32>
    %c0_3 = arith.constant 0 : index
    %c0_4 = arith.constant 0 : index
    %3 = vector.load %arg2[%c0_3, %c0_4] : memref<1x16xf32, #tpu.memory_space<vmem>>, vector<1x16xf32>
    %c0_5 = arith.constant 0 : index
    %c0_6 = arith.constant 0 : index
    %4 = vector.load %arg3[%c0_5, %c0_6] : memref<1x16xf32, #tpu.memory_space<vmem>>, vector<1x16xf32>
    %cst_7 = arith.constant dense<0.000000e+00> : vector<16xf32>
    %5 = vector.multi_reduction <add>, %2, %cst_7 [0] : vector<224x16xf32> to vector<16xf32>
    %6 = vector.shape_cast %5 : vector<16xf32> to vector<1x16xf32>
    %7 = arith.mulf %2, %2 : vector<224x16xf32>
    %cst_8 = arith.constant dense<0.000000e+00> : vector<16xf32>
    %8 = vector.multi_reduction <add>, %7, %cst_8 [0] : vector<224x16xf32> to vector<16xf32>
    %9 = vector.shape_cast %8 : vector<16xf32> to vector<1x16xf32>
    %cst_9 = arith.constant 5.000000e-03 : f32
    %10 = vector.broadcast %cst_9 : f32 to vector<1x16xf32>
    %11 = arith.mulf %6, %10 : vector<1x16xf32>
    %cst_10 = arith.constant 5.000000e-03 : f32
    %12 = vector.broadcast %cst_10 : f32 to vector<1x16xf32>
    %13 = arith.mulf %9, %12 : vector<1x16xf32>
    %14 = arith.mulf %11, %11 : vector<1x16xf32>
    %15 = arith.subf %13, %14 : vector<1x16xf32>
    %cst_11 = arith.constant 0.000000e+00 : f32
    %16 = vector.broadcast %cst_11 : f32 to vector<1x16xf32>
    %17 = arith.maximumf %15, %16 : vector<1x16xf32>
    %cst_12 = arith.constant 9.99999974E-6 : f32
    %18 = vector.broadcast %cst_12 : f32 to vector<1x16xf32>
    %19 = arith.addf %17, %18 : vector<1x16xf32>
    %20 = math.rsqrt %19 : vector<1x16xf32>
    %21 = arith.mulf %3, %20 : vector<1x16xf32>
    %22 = arith.mulf %11, %21 : vector<1x16xf32>
    %23 = arith.subf %4, %22 : vector<1x16xf32>
    %24 = vector.extract_strided_slice %2 {offsets = [0, 0], sizes = [50, 16], strides = [1, 1]} : vector<224x16xf32> to vector<50x16xf32>
    %25 = vector.extract_strided_slice %2 {offsets = [56, 0], sizes = [50, 16], strides = [1, 1]} : vector<224x16xf32> to vector<50x16xf32>
    %26 = vector.extract_strided_slice %2 {offsets = [112, 0], sizes = [50, 16], strides = [1, 1]} : vector<224x16xf32> to vector<50x16xf32>
    %27 = vector.extract_strided_slice %2 {offsets = [168, 0], sizes = [50, 16], strides = [1, 1]} : vector<224x16xf32> to vector<50x16xf32>
    %28 = arith.maximumf %24, %25 : vector<50x16xf32>
    %29 = arith.maximumf %26, %27 : vector<50x16xf32>
    %30 = arith.maximumf %28, %29 : vector<50x16xf32>
    %31 = arith.minimumf %24, %25 : vector<50x16xf32>
    %32 = arith.minimumf %26, %27 : vector<50x16xf32>
    %33 = arith.minimumf %31, %32 : vector<50x16xf32>
    %34 = vector.broadcast %21 : vector<1x16xf32> to vector<50x16xf32>
    %35 = arith.mulf %30, %34 : vector<50x16xf32>
    %36 = vector.broadcast %21 : vector<1x16xf32> to vector<50x16xf32>
    %37 = arith.mulf %33, %36 : vector<50x16xf32>
    %38 = arith.maximumf %35, %37 : vector<50x16xf32>
    %39 = vector.broadcast %23 : vector<1x16xf32> to vector<50x16xf32>
    %40 = arith.addf %38, %39 : vector<50x16xf32>
    %cst_13 = arith.constant 0.000000e+00 : f32
    %41 = vector.broadcast %cst_13 : f32 to vector<50x16xf32>
    %42 = arith.maximumf %40, %41 : vector<50x16xf32>
    %43 = arith.truncf %42 : vector<50x16xf32> to vector<50x16xbf16>
    %c0_14 = arith.constant 0 : index
    %c0_15 = arith.constant 0 : index
    %44 = vector.load %arg4[%c0_14, %c0_15] : memref<50x16xbf16, #tpu.memory_space<vmem>>, vector<50x16xbf16>
    tpu.vector_store %arg4[%c0_14, %c0_15], %43 {strides = array<i32>} : memref<50x16xbf16, #tpu.memory_space<vmem>>, vector<50x16xbf16>,
    return
  }
}

module attributes {stable_mosaic.version = 11 : i64} {
  func.func @conv_bn_relu_pool_kernel(%arg0: memref<56x144xbf16, #tpu.memory_space<vmem>>, %arg1: memref<144x32xbf16, #tpu.memory_space<vmem>>, %arg2: memref<1x32xf32, #tpu.memory_space<vmem>>, %arg3: memref<1x32xf32, #tpu.memory_space<vmem>>, %arg4: memref<8x32xbf16, #tpu.memory_space<vmem>>) attributes {dimension_semantics = [], scalar_prefetch = 0 : i64, scratch_operands = 0 : i64, tpu.core_type = #tpu.core_type<tc>} {
    %c0 = arith.constant 0 : index
    %c0_0 = arith.constant 0 : index
    %0 = vector.load %arg0[%c0, %c0_0] : memref<56x144xbf16, #tpu.memory_space<vmem>>, vector<56x144xbf16>
    %c0_1 = arith.constant 0 : index
    %c0_2 = arith.constant 0 : index
    %1 = vector.load %arg1[%c0_1, %c0_2] : memref<144x32xbf16, #tpu.memory_space<vmem>>, vector<144x32xbf16>
    %cst = arith.constant dense<0.000000e+00> : vector<56x32xf32>
    %2 = tpu.matmul %0, %1, %cst {dimension_numbers = #tpu.dot_dimension_numbers<[1], [0], [0], [1], [0, 0, 1, 1], [], []>} : vector<56x144xbf16>, vector<144x32xbf16>, vector<56x32xf32> -> vector<56x32xf32>
    %c0_3 = arith.constant 0 : index
    %c0_4 = arith.constant 0 : index
    %3 = vector.load %arg2[%c0_3, %c0_4] : memref<1x32xf32, #tpu.memory_space<vmem>>, vector<1x32xf32>
    %c0_5 = arith.constant 0 : index
    %c0_6 = arith.constant 0 : index
    %4 = vector.load %arg3[%c0_5, %c0_6] : memref<1x32xf32, #tpu.memory_space<vmem>>, vector<1x32xf32>
    %cst_7 = arith.constant dense<0.000000e+00> : vector<32xf32>
    %5 = vector.multi_reduction <add>, %2, %cst_7 [0] : vector<56x32xf32> to vector<32xf32>
    %6 = vector.shape_cast %5 : vector<32xf32> to vector<1x32xf32>
    %7 = arith.mulf %2, %2 : vector<56x32xf32>
    %cst_8 = arith.constant dense<0.000000e+00> : vector<32xf32>
    %8 = vector.multi_reduction <add>, %7, %cst_8 [0] : vector<56x32xf32> to vector<32xf32>
    %9 = vector.shape_cast %8 : vector<32xf32> to vector<1x32xf32>
    %cst_9 = arith.constant 2.000000e-02 : f32
    %10 = vector.broadcast %cst_9 : f32 to vector<1x32xf32>
    %11 = arith.mulf %6, %10 : vector<1x32xf32>
    %cst_10 = arith.constant 2.000000e-02 : f32
    %12 = vector.broadcast %cst_10 : f32 to vector<1x32xf32>
    %13 = arith.mulf %9, %12 : vector<1x32xf32>
    %14 = arith.mulf %11, %11 : vector<1x32xf32>
    %15 = arith.subf %13, %14 : vector<1x32xf32>
    %cst_11 = arith.constant 0.000000e+00 : f32
    %16 = vector.broadcast %cst_11 : f32 to vector<1x32xf32>
    %17 = arith.maximumf %15, %16 : vector<1x32xf32>
    %cst_12 = arith.constant 9.99999974E-6 : f32
    %18 = vector.broadcast %cst_12 : f32 to vector<1x32xf32>
    %19 = arith.addf %17, %18 : vector<1x32xf32>
    %20 = math.rsqrt %19 : vector<1x32xf32>
    %21 = arith.mulf %3, %20 : vector<1x32xf32>
    %22 = arith.mulf %11, %21 : vector<1x32xf32>
    %23 = arith.subf %4, %22 : vector<1x32xf32>
    %24 = vector.extract_strided_slice %2 {offsets = [0, 0], sizes = [8, 32], strides = [1, 1]} : vector<56x32xf32> to vector<8x32xf32>
    %25 = vector.extract_strided_slice %2 {offsets = [8, 0], sizes = [8, 32], strides = [1, 1]} : vector<56x32xf32> to vector<8x32xf32>
    %26 = vector.extract_strided_slice %2 {offsets = [16, 0], sizes = [8, 32], strides = [1, 1]} : vector<56x32xf32> to vector<8x32xf32>
    %27 = vector.extract_strided_slice %2 {offsets = [24, 0], sizes = [8, 32], strides = [1, 1]} : vector<56x32xf32> to vector<8x32xf32>
    %28 = arith.maximumf %24, %25 : vector<8x32xf32>
    %29 = arith.maximumf %26, %27 : vector<8x32xf32>
    %30 = arith.maximumf %28, %29 : vector<8x32xf32>
    %31 = arith.minimumf %24, %25 : vector<8x32xf32>
    %32 = arith.minimumf %26, %27 : vector<8x32xf32>
    %33 = arith.minimumf %31, %32 : vector<8x32xf32>
    %34 = vector.broadcast %21 : vector<1x32xf32> to vector<8x32xf32>
    %35 = arith.mulf %30, %34 : vector<8x32xf32>
    %36 = vector.broadcast %21 : vector<1x32xf32> to vector<8x32xf32>
    %37 = arith.mulf %33, %36 : vector<8x32xf32>
    %38 = arith.maximumf %35, %37 : vector<8x32xf32>
    %39 = vector.broadcast %23 : vector<1x32xf32> to vector<8x32xf32>
    %40 = arith.addf %38, %39 : vector<8x32xf32>
    %cst_13 = arith.constant 0.000000e+00 : f32
    %41 = vector.broadcast %cst_13 : f32 to vector<8x32xf32>
    %42 = arith.maximumf %40, %41 : vector<8x32xf32>
    %43 = arith.truncf %42 : vector<8x32xf32> to vector<8x32xbf16>
    %c0_14 = arith.constant 0 : index
    %c0_15 = arith.constant 0 : index
    %44 = vector.load %arg4[%c0_14, %c0_15] : memref<8x32xbf16, #tpu.memory_space<vmem>>, vector<8x32xbf16>
    tpu.vector_store %arg4[%c0_14, %c0_15], %43 {strides = array<i32>} : memref<8x32xbf16, #tpu.memory_space<vmem>>, vector<8x32xbf16>,
    return
  }
}

module attributes {stable_mosaic.version = 11 : i64} {
  func.func @conv4_head_kernel(%arg0: memref<32x288xbf16, #tpu.memory_space<vmem>>, %arg1: memref<288x64xbf16, #tpu.memory_space<vmem>>, %arg2: memref<1x64xf32, #tpu.memory_space<vmem>>, %arg3: memref<1x64xf32, #tpu.memory_space<vmem>>, %arg4: memref<64x128xbf16, #tpu.memory_space<vmem>>, %arg5: memref<1x128xf32, #tpu.memory_space<vmem>>, %arg6: memref<128x128xbf16, #tpu.memory_space<vmem>>, %arg7: memref<1x128xf32, #tpu.memory_space<vmem>>, %arg8: memref<128x128xbf16, #tpu.memory_space<vmem>>, %arg9: memref<1x128xf32, #tpu.memory_space<vmem>>, %arg10: memref<2x128xf32, #tpu.memory_space<vmem>>) attributes {dimension_semantics = [], scalar_prefetch = 0 : i64, scratch_operands = 0 : i64, tpu.core_type = #tpu.core_type<tc>} {
    %c0 = arith.constant 0 : index
    %c0_0 = arith.constant 0 : index
    %0 = vector.load %arg0[%c0, %c0_0] : memref<32x288xbf16, #tpu.memory_space<vmem>>, vector<32x288xbf16>
    %c0_1 = arith.constant 0 : index
    %c0_2 = arith.constant 0 : index
    %1 = vector.load %arg1[%c0_1, %c0_2] : memref<288x64xbf16, #tpu.memory_space<vmem>>, vector<288x64xbf16>
    %cst = arith.constant dense<0.000000e+00> : vector<32x64xf32>
    %2 = tpu.matmul %0, %1, %cst {dimension_numbers = #tpu.dot_dimension_numbers<[1], [0], [0], [1], [0, 0, 1, 1], [], []>} : vector<32x288xbf16>, vector<288x64xbf16>, vector<32x64xf32> -> vector<32x64xf32>
    %c0_3 = arith.constant 0 : index
    %c0_4 = arith.constant 0 : index
    %3 = vector.load %arg2[%c0_3, %c0_4] : memref<1x64xf32, #tpu.memory_space<vmem>>, vector<1x64xf32>
    %c0_5 = arith.constant 0 : index
    %c0_6 = arith.constant 0 : index
    %4 = vector.load %arg3[%c0_5, %c0_6] : memref<1x64xf32, #tpu.memory_space<vmem>>, vector<1x64xf32>
    %cst_7 = arith.constant dense<0.000000e+00> : vector<64xf32>
    %5 = vector.multi_reduction <add>, %2, %cst_7 [0] : vector<32x64xf32> to vector<64xf32>
    %6 = vector.shape_cast %5 : vector<64xf32> to vector<1x64xf32>
    %7 = arith.mulf %2, %2 : vector<32x64xf32>
    %cst_8 = arith.constant dense<0.000000e+00> : vector<64xf32>
    %8 = vector.multi_reduction <add>, %7, %cst_8 [0] : vector<32x64xf32> to vector<64xf32>
    %9 = vector.shape_cast %8 : vector<64xf32> to vector<1x64xf32>
    %cst_9 = arith.constant 1.250000e-01 : f32
    %10 = vector.broadcast %cst_9 : f32 to vector<1x64xf32>
    %11 = arith.mulf %6, %10 : vector<1x64xf32>
    %cst_10 = arith.constant 1.250000e-01 : f32
    %12 = vector.broadcast %cst_10 : f32 to vector<1x64xf32>
    %13 = arith.mulf %9, %12 : vector<1x64xf32>
    %14 = arith.mulf %11, %11 : vector<1x64xf32>
    %15 = arith.subf %13, %14 : vector<1x64xf32>
    %cst_11 = arith.constant 0.000000e+00 : f32
    %16 = vector.broadcast %cst_11 : f32 to vector<1x64xf32>
    %17 = arith.maximumf %15, %16 : vector<1x64xf32>
    %cst_12 = arith.constant 9.99999974E-6 : f32
    %18 = vector.broadcast %cst_12 : f32 to vector<1x64xf32>
    %19 = arith.addf %17, %18 : vector<1x64xf32>
    %20 = math.rsqrt %19 : vector<1x64xf32>
    %21 = arith.mulf %3, %20 : vector<1x64xf32>
    %22 = arith.mulf %11, %21 : vector<1x64xf32>
    %23 = arith.subf %4, %22 : vector<1x64xf32>
    %24 = vector.extract_strided_slice %2 {offsets = [0, 0], sizes = [2, 64], strides = [1, 1]} : vector<32x64xf32> to vector<2x64xf32>
    %25 = vector.extract_strided_slice %2 {offsets = [8, 0], sizes = [2, 64], strides = [1, 1]} : vector<32x64xf32> to vector<2x64xf32>
    %26 = vector.extract_strided_slice %2 {offsets = [16, 0], sizes = [2, 64], strides = [1, 1]} : vector<32x64xf32> to vector<2x64xf32>
    %27 = vector.extract_strided_slice %2 {offsets = [24, 0], sizes = [2, 64], strides = [1, 1]} : vector<32x64xf32> to vector<2x64xf32>
    %28 = arith.maximumf %24, %25 : vector<2x64xf32>
    %29 = arith.maximumf %26, %27 : vector<2x64xf32>
    %30 = arith.maximumf %28, %29 : vector<2x64xf32>
    %31 = arith.minimumf %24, %25 : vector<2x64xf32>
    %32 = arith.minimumf %26, %27 : vector<2x64xf32>
    %33 = arith.minimumf %31, %32 : vector<2x64xf32>
    %34 = vector.broadcast %21 : vector<1x64xf32> to vector<2x64xf32>
    %35 = arith.mulf %30, %34 : vector<2x64xf32>
    %36 = vector.broadcast %21 : vector<1x64xf32> to vector<2x64xf32>
    %37 = arith.mulf %33, %36 : vector<2x64xf32>
    %38 = arith.maximumf %35, %37 : vector<2x64xf32>
    %39 = vector.broadcast %23 : vector<1x64xf32> to vector<2x64xf32>
    %40 = arith.addf %38, %39 : vector<2x64xf32>
    %cst_13 = arith.constant 0.000000e+00 : f32
    %41 = vector.broadcast %cst_13 : f32 to vector<2x64xf32>
    %42 = arith.maximumf %40, %41 : vector<2x64xf32>
    %43 = arith.truncf %42 : vector<2x64xf32> to vector<2x64xbf16>
    %c0_14 = arith.constant 0 : index
    %c0_15 = arith.constant 0 : index
    %44 = vector.load %arg4[%c0_14, %c0_15] : memref<64x128xbf16, #tpu.memory_space<vmem>>, vector<64x128xbf16>
    %cst_16 = arith.constant dense<0.000000e+00> : vector<2x128xf32>
    %45 = tpu.matmul %43, %44, %cst_16 {dimension_numbers = #tpu.dot_dimension_numbers<[1], [0], [0], [1], [0, 0, 1, 1], [], []>} : vector<2x64xbf16>, vector<64x128xbf16>, vector<2x128xf32> -> vector<2x128xf32>
    %c0_17 = arith.constant 0 : index
    %c0_18 = arith.constant 0 : index
    %46 = vector.load %arg5[%c0_17, %c0_18] : memref<1x128xf32, #tpu.memory_space<vmem>>, vector<1x128xf32>
    %47 = vector.broadcast %46 : vector<1x128xf32> to vector<2x128xf32>
    %48 = arith.addf %45, %47 : vector<2x128xf32>
    %cst_19 = arith.constant 0.000000e+00 : f32
    %49 = vector.broadcast %cst_19 : f32 to vector<2x128xf32>
    %50 = arith.maximumf %48, %49 : vector<2x128xf32>
    %51 = arith.truncf %50 : vector<2x128xf32> to vector<2x128xbf16>
    %c0_20 = arith.constant 0 : index
    %c0_21 = arith.constant 0 : index
    %52 = vector.load %arg6[%c0_20, %c0_21] : memref<128x128xbf16, #tpu.memory_space<vmem>>, vector<128x128xbf16>
    %cst_22 = arith.constant dense<0.000000e+00> : vector<2x128xf32>
    %53 = tpu.matmul %51, %52, %cst_22 {dimension_numbers = #tpu.dot_dimension_numbers<[1], [0], [0], [1], [0, 0, 1, 1], [], []>} : vector<2x128xbf16>, vector<128x128xbf16>, vector<2x128xf32> -> vector<2x128xf32>
    %c0_23 = arith.constant 0 : index
    %c0_24 = arith.constant 0 : index
    %54 = vector.load %arg7[%c0_23, %c0_24] : memref<1x128xf32, #tpu.memory_space<vmem>>, vector<1x128xf32>
    %55 = vector.broadcast %54 : vector<1x128xf32> to vector<2x128xf32>
    %56 = arith.addf %53, %55 : vector<2x128xf32>
    %cst_25 = arith.constant 0.000000e+00 : f32
    %57 = vector.broadcast %cst_25 : f32 to vector<2x128xf32>
    %58 = arith.maximumf %56, %57 : vector<2x128xf32>
    %59 = arith.truncf %58 : vector<2x128xf32> to vector<2x128xbf16>
    %c0_26 = arith.constant 0 : index
    %c0_27 = arith.constant 0 : index
    %60 = vector.load %arg8[%c0_26, %c0_27] : memref<128x128xbf16, #tpu.memory_space<vmem>>, vector<128x128xbf16>
    %cst_28 = arith.constant dense<0.000000e+00> : vector<2x128xf32>
    %61 = tpu.matmul %59, %60, %cst_28 {dimension_numbers = #tpu.dot_dimension_numbers<[1], [0], [0], [1], [0, 0, 1, 1], [], []>} : vector<2x128xbf16>, vector<128x128xbf16>, vector<2x128xf32> -> vector<2x128xf32>
    %c0_29 = arith.constant 0 : index
    %c0_30 = arith.constant 0 : index
    %62 = vector.load %arg9[%c0_29, %c0_30] : memref<1x128xf32, #tpu.memory_space<vmem>>, vector<1x128xf32>
    %63 = vector.broadcast %62 : vector<1x128xf32> to vector<2x128xf32>
    %64 = arith.addf %61, %63 : vector<2x128xf32>
    %cst_31 = arith.constant dense<0xFF800000> : vector<2xf32>
    %65 = vector.multi_reduction <maximumf>, %64, %cst_31 [1] : vector<2x128xf32> to vector<2xf32>
    %66 = vector.shape_cast %65 : vector<2xf32> to vector<2x1xf32>
    %67 = vector.broadcast %66 : vector<2x1xf32> to vector<2x128xf32>
    %68 = arith.subf %64, %67 : vector<2x128xf32>
    %69 = math.exp %68 : vector<2x128xf32>
    %cst_32 = arith.constant dense<0.000000e+00> : vector<2xf32>
    %70 = vector.multi_reduction <add>, %69, %cst_32 [1] : vector<2x128xf32> to vector<2xf32>
    %71 = vector.shape_cast %70 : vector<2xf32> to vector<2x1xf32>
    %72 = math.log %71 : vector<2x1xf32>
    %73 = arith.addf %66, %72 : vector<2x1xf32>
    %74 = vector.broadcast %73 : vector<2x1xf32> to vector<2x128xf32>
    %75 = arith.subf %64, %74 : vector<2x128xf32>
    %c0_33 = arith.constant 0 : index
    %c0_34 = arith.constant 0 : index
    %76 = vector.load %arg10[%c0_33, %c0_34] : memref<2x128xf32, #tpu.memory_space<vmem>>, vector<2x128xf32>
    tpu.vector_store %arg10[%c0_33, %c0_34], %75 {strides = array<i32>} : memref<2x128xf32, #tpu.memory_space<vmem>>, vector<2x128xf32>,
    return
  }
}

</mosaic_0001>

<bundles_post_ra>
// kernel: lenet_forward.4
= control target key start
LH: loop header
LB: loop body
LE: loop exit
PB: predicated region body
PF: predicated region fallthrough
CT: control target
= control target key end

     0   :  { %9 = vsyncpa [#allocation3], 0  ;;  %s7568_s0 = inlined_call_operand.hbm [shape: bf16[1568,32], index: 0, kind: input, shape index: {}]   ;;  %s7569_s1 = inlined_call_operand.hbm [shape: bf16[32,6], index: 1, kind: input, shape index: {}]   ;;  %s7570_s2 = inlined_call_operand.hbm [shape: f32[1,6], index: 2, kind: input, shape index: {}]   ;;  %s7571_s3 = inlined_call_operand.hbm [shape: f32[1,6], index: 3, kind: input, shape index: {}]   ;;  %s7572_s4 = inlined_call_operand.hbm [shape: bf16[392,6], index: 4, kind: output, shape index: {}]  }
   0x1   :  { %10 = vsyncpa [#allocation6], 0 }
   0x2   :  { %11 = vsyncpa [#allocation9], 0 }
   0x3   :  { %12 = vsyncpa [#allocation4], 0  ;;  %s4531_s15 = smov [#allocation5]   ;;  %s4532_s17 = smov [#allocation2]  }
   0x4   :  { %s30_s16 = sshll.u32 %s4531_s15, 4  ;;  %s18_s18 = sshll.u32 %s4532_s17, 4  ;;  %s31_s16 = int_to_ptr.vmem [resolvable:$true] %s30_s16  ;;  %s4563_s18 = int_to_ptr.vmem [resolvable:$true] %s18_s18 }
   0x5   :  { %s4413_s21 = scalar_lea.hbm %s7569_s1, 256 }
   0x6   :  { %p4414_p0 = scmp.ne.s32.totalorder %s7569_s1, %s4413_s21  ;;  %p4417_p1 = scmp.lt.u32.totalorder %s4413_s21, %s7569_s1 }
   0x8   :  { %p4419_p2 = pnand %p4417_p1, %p4414_p0 }
   0xa   :  { %4422 = shalt.err (!%p4419_p2)
}
   0xb   :  { %s4423_s26 = scalar_lea.vmem %s31_s16, 256  ;;  %p4428_p4 = scmp.lt.s32.totalorder %s31_s16, %s31_s16 }
   0xc   :  { %p4424_p3 = scmp.ne.s32.totalorder %s31_s16, %s4423_s26  ;;  %p4429_p5 = scmp.lt.s32.totalorder %s4423_s26, %s4423_s26 }
   0xe   :  { %p4430_p6 = por %p4429_p5, %p4428_p4 }
  0x10   :  { %p4431_p7 = pnand %p4430_p6, %p4424_p3 }
  0x12   :  { %4434 = shalt.err (!%p4431_p7)
}
  0x13   :  { %s4533_s27 = smov 64   ;;  %s4534_s28 = smov 4  }
  0x14   :  { %36 = dma.hbm_to_vmem [thread:$0]  %s7569_s1, 256, %s31_s16, [#allocation6], %s4533_s27, %s4533_s27, %s4534_s28  }
  0x15   :  { %s4435_s7 = scalar_lea.hbm %s7568_s0, 12544 }
  0x16   :  { %p4436_p8 = scmp.ne.s32.totalorder %s7568_s0, %s4435_s7  ;;  %p4439_p9 = scmp.lt.u32.totalorder %s4435_s7, %s7568_s0 }
  0x18   :  { %p4441_p10 = pnand %p4439_p9, %p4436_p8 }
  0x1a   :  { %4444 = shalt.err (!%p4441_p10)
}
  0x1b   :  { %s4445_s12 = scalar_lea.vmem %s4563_s18, 12544  ;;  %p4450_p12 = scmp.lt.s32.totalorder %s4563_s18, %s4563_s18 }
  0x1c   :  { %p4446_p11 = scmp.ne.s32.totalorder %s4563_s18, %s4445_s12  ;;  %p4451_p13 = scmp.lt.s32.totalorder %s4445_s12, %s4445_s12 }
  0x1e   :  { %p4452_p0 = por %p4451_p13, %p4450_p12 }
  0x20   :  { %p4453_p1 = pnand %p4452_p0, %p4446_p11 }
  0x22   :  { %4456 = shalt.err (!%p4453_p1)
}
  0x23   :  { %24 = dma.hbm_to_vmem [thread:$0]  %s7568_s0, 12544, %s4563_s18, [#allocation3], %s4533_s27, %s4533_s27, %s4534_s28  }
  0x24   :  { %s4535_s14 = smov [#allocation7]   ;;  %s4536_s16 = smov [#allocation8]  }
  0x25   :  { %s43_s15 = sshll.u32 %s4535_s14, 4  ;;  %s53_s17 = sshll.u32 %s4536_s16, 4  ;;  %s44_s15 = int_to_ptr.vmem [resolvable:$true] %s43_s15  ;;  %s54_s17 = int_to_ptr.vmem [resolvable:$true] %s53_s17 }
  0x26   :  { %s4457_s21 = scalar_lea.hbm %s7570_s2, 16 }
  0x27   :  { %p4458_p2 = scmp.ne.s32.totalorder %s7570_s2, %s4457_s21  ;;  %p4461_p3 = scmp.lt.u32.totalorder %s4457_s21, %s7570_s2 }
  0x29   :  { %p4463_p4 = pnand %p4461_p3, %p4458_p2 }
  0x2b   :  { %4466 = shalt.err (!%p4463_p4)
}
  0x2c   :  { %s4467_s0 = scalar_lea.vmem %s44_s15, 16  ;;  %s4471_s18 = scalar_lea.vmem %s44_s15, 32 }
  0x2d   :  { %p4468_p5 = scmp.ne.s32.totalorder %s44_s15, %s4467_s0  ;;  %p4472_p6 = scmp.lt.s32.totalorder %s44_s15, %s44_s15 }
  0x2e   :  { %p4473_p7 = scmp.lt.s32.totalorder %s4471_s18, %s4467_s0 }
  0x30   :  { %p4474_p8 = por %p4473_p7, %p4472_p6 }
  0x32   :  { %p4475_p9 = pnand %p4474_p8, %p4468_p5 }
  0x34   :  { %4478 = shalt.err (!%p4475_p9)
}
  0x35   :  { %46 = dma.hbm_to_vmem [thread:$0]  %s7570_s2, 16, %s44_s15, [#allocation6]  }
  0x36   :  { %s4479_s6 = scalar_lea.hbm %s7571_s3, 16 }
  0x37   :  { %p4480_p10 = scmp.ne.s32.totalorder %s7571_s3, %s4479_s6  ;;  %p4483_p11 = scmp.lt.u32.totalorder %s4479_s6, %s7571_s3 }
  0x39   :  { %p4485_p12 = pnand %p4483_p11, %p4480_p10 }
  0x3b   :  { %4488 = shalt.err (!%p4485_p12)
}
  0x3c   :  { %s4489_s11 = scalar_lea.vmem %s54_s17, 16  ;;  %s4493_s12 = scalar_lea.vmem %s54_s17, 32 }
  0x3d   :  { %p4490_p13 = scmp.ne.s32.totalorder %s54_s17, %s4489_s11  ;;  %p4494_p0 = scmp.lt.s32.totalorder %s54_s17, %s54_s17 }
  0x3e   :  { %p4495_p1 = scmp.lt.s32.totalorder %s4493_s12, %s4489_s11 }
  0x40   :  { %p4496_p2 = por %p4495_p1, %p4494_p0 }
  0x42   :  { %p4497_p3 = pnand %p4496_p2, %p4490_p13 }
  0x44   :  { %4500 = shalt.err (!%p4497_p3)
}
  0x45   :  { %56 = dma.hbm_to_vmem [thread:$0]  %s7571_s3, 16, %s54_s17, [#allocation9]  }
  0x46   :  { %4523 = dma.done.wait [#allocation3], 12544  }
  0x47   :  { %4524 = vsyncadd [#allocation3], 4294954752 }
  0x48   :  { %4525 = dma.done.wait [#allocation6], 272  }
  0x49   :  { %4526 = vsyncadd [#allocation6], 4294967024 }
  0x4a   :  { %4527 = dma.done.wait [#allocation9], 16  }
  0x4b   :  { %4528 = vsyncadd [#allocation9], 4294967280  ;;  %v4311_v0 = vld [vmem:[#allocation5] sm:$0xff]   ;;  %v4312_v1 = vld [vmem:[#allocation5 + $0x8] sm:$0xff]   ;;  %vm772_vm0 = vcmask 261120   ;;  %vm1886_vm1 = vcmask 48128  }
  0x4c   :  { %4100 = vmatprep.subr.bf16.mxu0 %v4311_v0  ;;  %4300 = vmatprep.subr.bf16.mxu1 %v4311_v0  ;;  %v4313_v2 = vld [vmem:[#allocation2] sm:$0xff]   ;;  %v4314_v3 = vld [vmem:[#allocation2 + $0x190] sm:$0xff]   ;;  %v4315_v4 = vld [vmem:[#allocation2 + $0x8] sm:$0xff]   ;;  %vm3635_vm2 = vcmask 44032   ;;  %s4537_s3 = smov [#allocation10]  }
  0x4d   :  { %4101 = vmatpush3.bf16.msra.mxu0 %v4311_v0  ;;  %4302 = vmatpush3.bf16.msra.mxu1 %v4311_v0  ;;  %v4316_v5 = vld [vmem:[#allocation2 + $0x198] sm:$0xff]   ;;  %v4317_v6 = vld [vmem:[#allocation2 + $0x10] sm:$0xff]   ;;  %v4318_v7 = vld [vmem:[#allocation2 + $0x1a0] sm:$0xff]   ;;  %s3690_s13 = sshll.u32 %s4537_s3, 4  ;;  %s3691_s13 = int_to_ptr.vmem [resolvable:$true] %s3690_s13 }
  0x4e   :  { %4102 = vmatprep.subr.bf16.mxu0 %v4312_v1  ;;  %4301 = vmatprep.subr.bf16.mxu1 %v4312_v1  ;;  %v4319_v8 = vld [vmem:[#allocation2 + $0x18] sm:$0xff]   ;;  %v4320_v9 = vld [vmem:[#allocation2 + $0x1a8] sm:$0xff]   ;;  %v4321_v10 = vld [vmem:[#allocation2 + $0x20] sm:$0xff]   ;;  %s4501_s14 = scalar_lea.vmem %s3691_s13, 3136  ;;  %p4506_p5 = scmp.lt.s32.totalorder %s3691_s13, %s3691_s13 }
  0x4f   :  { %4104 = vmatprep.mubr.msk.bf16.mxu0 %vm772_vm0, %v4313_v2  ;;  %4204 = vmatprep.mubr.msk.bf16.mxu1 %vm772_vm0, %v4314_v3  ;;  %v4322_v11 = vld [vmem:[#allocation2 + $0x1b0] sm:$0xff]   ;;  %v4323_v12 = vld [vmem:[#allocation2 + $0x28] sm:$0xff]   ;;  %v4324_v13 = vld [vmem:[#allocation2 + $0x1b8] sm:$0xff]   ;;  %p4502_p4 = scmp.ne.s32.totalorder %s3691_s13, %s4501_s14  ;;  %p4507_p6 = scmp.lt.s32.totalorder %s4501_s14, %s4501_s14 }
  0x50   :  { %v4325_v14 = vld [vmem:[#allocation2 + $0x30] sm:$0xff]   ;;  %v4326_v15 = vld [vmem:[#allocation2 + $0x1c0] sm:$0xff]   ;;  %v4327_v16 = vld [vmem:[#allocation2 + $0x38] sm:$0xff]  }
  0x51   :  { %4103 = vmatpush3.bf16.msra.mxu0 %v4312_v1  ;;  %4303 = vmatpush3.bf16.msra.mxu1 %v4312_v1  ;;  %v4328_v17 = vld [vmem:[#allocation2 + $0x1c8] sm:$0xff]   ;;  %v4329_v18 = vld [vmem:[#allocation2 + $0x40] sm:$0xff]   ;;  %v4330_v19 = vld [vmem:[#allocation2 + $0x1d0] sm:$0xff]   ;;  %p4508_p7 = por %p4507_p6, %p4506_p5 }
  0x52   :  { %v4331_v20 = vld [vmem:[#allocation2 + $0x48] sm:$0xff]   ;;  %v4332_v21 = vld [vmem:[#allocation2 + $0x1d8] sm:$0xff]   ;;  %v4333_v22 = vld [vmem:[#allocation2 + $0x50] sm:$0xff]  }
  0x53   :  { %v4334_v23 = vld [vmem:[#allocation2 + $0x1e0] sm:$0xff]   ;;  %v4335_v24 = vld [vmem:[#allocation2 + $0x58] sm:$0xff]   ;;  %v4336_v25 = vld [vmem:[#allocation2 + $0x1e8] sm:$0xff]   ;;  %p4509_p8 = pnand %p4508_p7, %p4502_p4 }
  0x54   :  { %4105 = vmatmul.mubr.msk.bf16.vlgmr.msra.gmra.mrb[0].mxu0 %vm772_vm0, %v4315_v4  ;;  %4205 = vmatmul.mubr.msk.bf16.vlgmr.msra.gmra.mrb[0].mxu1 %vm772_vm0, %v4316_v5  ;;  %v4337_v26 = vld [vmem:[#allocation2 + $0x60] sm:$0xff]   ;;  %v4338_v27 = vld [vmem:[#allocation2 + $0x1f0] sm:$0xff]   ;;  %v4339_v28 = vld [vmem:[#allocation2 + $0x68] sm:$0xff]  }
  0x55   :  { %4108 = vmatprep.mubr.msk.bf16.mxu0 %vm772_vm0, %v4317_v6  ;;  %4208 = vmatprep.mubr.msk.bf16.mxu1 %vm772_vm0, %v4318_v7  ;;  %v4340_v29 = vld [vmem:[#allocation2 + $0x1f8] sm:$0xff]   ;;  %v4341_v30 = vld [vmem:[#allocation2 + $0x70] sm:$0xff]   ;;  %v4342_v31 = vld [vmem:[#allocation2 + $0x200] sm:$0xff]  }
  0x56   :  { %v4343_v32 = vld [vmem:[#allocation2 + $0x78] sm:$0xff]   ;;  %v4344_v33 = vld [vmem:[#allocation2 + $0x208] sm:$0xff]   ;;  %v4345_v34 = vld [vmem:[#allocation2 + $0x80] sm:$0xff]  }
  0x57   :  { %v4346_v35 = vld [vmem:[#allocation2 + $0x210] sm:$0xff]   ;;  %v4347_v36 = vld [vmem:[#allocation2 + $0x88] sm:$0xff]   ;;  %v4348_v37 = vld [vmem:[#allocation2 + $0x218] sm:$0xff]  }
  0x58   :  { %v4349_v38 = vld [vmem:[#allocation2 + $0x90] sm:$0xff]   ;;  %v4350_v39 = vld [vmem:[#allocation2 + $0x220] sm:$0xff]   ;;  %v4351_v40 = vld [vmem:[#allocation2 + $0x98] sm:$0xff]  }
  0x59   :  { %v4352_v41 = vld [vmem:[#allocation2 + $0x228] sm:$0xff]   ;;  %v4353_v42 = vld [vmem:[#allocation2 + $0xa0] sm:$0xff]   ;;  %v4354_v43 = vld [vmem:[#allocation2 + $0x230] sm:$0xff]  }
  0x5a   :  { %v4355_v44 = vld [vmem:[#allocation2 + $0xa8] sm:$0xff]   ;;  %v4356_v45 = vld [vmem:[#allocation2 + $0x238] sm:$0xff]   ;;  %v4357_v46 = vld [vmem:[#allocation2 + $0xb0] sm:$0xff]  }
  0x5b   :  { %v4358_v47 = vld [vmem:[#allocation2 + $0x240] sm:$0xff]   ;;  %v4359_v48 = vld [vmem:[#allocation2 + $0xb8] sm:$0xff]   ;;  %v4360_v49 = vld [vmem:[#allocation2 + $0x248] sm:$0xff]  }
  0x5c   :  { %4109 = vmatmul.mubr.msk.bf16.gmra.mrb[4].mxu0 %vm772_vm0, %v4319_v8  ;;  %4209 = vmatmul.mubr.msk.bf16.gmra.mrb[4].mxu1 %vm772_vm0, %v4320_v9  ;;  %v4361_v50 = vld [vmem:[#allocation2 + $0xc0] sm:$0xff]   ;;  %v4362_v51 = vld [vmem:[#allocation2 + $0x250] sm:$0xff]   ;;  %v4363_v52 = vld [vmem:[#allocation2 + $0xc8] sm:$0xff]  }
  0x5d   :  { %4112 = vmatprep.mubr.msk.bf16.mxu0 %vm772_vm0, %v4321_v10  ;;  %4212 = vmatprep.mubr.msk.bf16.mxu1 %vm772_vm0, %v4322_v11  ;;  %v4364_v53 = vld [vmem:[#allocation2 + $0x258] sm:$0xff]   ;;  %v4365_v54 = vld [vmem:[#allocation2 + $0xd0] sm:$0xff]   ;;  %v4366_v55 = vld [vmem:[#allocation2 + $0x260] sm:$0xff]  }
  0x5e   :  { %v4367_v56 = vld [vmem:[#allocation2 + $0xd8] sm:$0xff]   ;;  %v4368_v57 = vld [vmem:[#allocation2 + $0x268] sm:$0xff]   ;;  %v4369_v58 = vld [vmem:[#allocation2 + $0xe0] sm:$0xff]  }
  0x5f   :  { %v4370_v59 = vld [vmem:[#allocation2 + $0x270] sm:$0xff]   ;;  %v4371_v60 = vld [vmem:[#allocation2 + $0xe8] sm:$0xff]   ;;  %v4372_v61 = vld [vmem:[#allocation2 + $0x278] sm:$0xff]  }
  0x60   :  { %v4373_v62 = vld [vmem:[#allocation2 + $0xf0] sm:$0xff]   ;;  %v4374_v63 = vld [vmem:[#allocation2 + $0x280] sm:$0xff]   ;;  %v4375_v0 = vld [vmem:[#allocation2 + $0xf8] sm:$0xff]  }
  0x61   :  { %v4376_v1 = vld [vmem:[#allocation2 + $0x288] sm:$0xff]   ;;  %v4377_v2 = vld [vmem:[#allocation2 + $0x100] sm:$0xff]   ;;  %v4378_v3 = vld [vmem:[#allocation2 + $0x290] sm:$0xff]  }
  0x62   :  { %v4379_v4 = vld [vmem:[#allocation2 + $0x108] sm:$0xff]   ;;  %v4380_v5 = vld [vmem:[#allocation2 + $0x298] sm:$0xff]   ;;  %v4381_v6 = vld [vmem:[#allocation2 + $0x110] sm:$0xff]  }
  0x63   :  { %v4382_v7 = vld [vmem:[#allocation2 + $0x2a0] sm:$0xff]   ;;  %v4383_v8 = vld [vmem:[#allocation2 + $0x118] sm:$0xff]   ;;  %v4384_v9 = vld [vmem:[#allocation2 + $0x2a8] sm:$0xff]  }
  0x64   :  { %4113 = vmatmul.mubr.msk.bf16.gmra.mrb[8].mxu0 %vm772_vm0, %v4323_v12  ;;  %4213 = vmatmul.mubr.msk.bf16.gmra.mrb[8].mxu1 %vm772_vm0, %v4324_v13  ;;  %v4385_v10 = vld [vmem:[#allocation2 + $0x120] sm:$0xff]   ;;  %v4386_v11 = vld [vmem:[#allocation2 + $0x2b0] sm:$0xff]   ;;  %v4387_v12 = vld [vmem:[#allocation2 + $0x128] sm:$0xff]  }
  0x65   :  { %4116 = vmatprep.mubr.msk.bf16.mxu0 %vm772_vm0, %v4325_v14  ;;  %4216 = vmatprep.mubr.msk.bf16.mxu1 %vm772_vm0, %v4326_v15  ;;  %v4388_v13 = vld [vmem:[#allocation2 + $0x2b8] sm:$0xff]   ;;  %v4389_v14 = vld [vmem:[#allocation2 + $0x130] sm:$0xff]   ;;  %v4390_v15 = vld [vmem:[#allocation2 + $0x2c0] sm:$0xff]  }
  0x6c   :  { %4117 = vmatmul.mubr.msk.bf16.gmra.mrb[12].mxu0 %vm772_vm0, %v4327_v16  ;;  %4217 = vmatmul.mubr.msk.bf16.gmra.mrb[12].mxu1 %vm772_vm0, %v4328_v17  ;;  %v4391_v16 = vld [vmem:[#allocation2 + $0x138] sm:$0xff]   ;;  %v4392_v17 = vld [vmem:[#allocation2 + $0x2c8] sm:$0xff]  }
  0x6d   :  { %4120 = vmatprep.mubr.msk.bf16.mxu0 %vm772_vm0, %v4329_v18  ;;  %4220 = vmatprep.mubr.msk.bf16.mxu1 %vm772_vm0, %v4330_v19  ;;  %v4393_v18 = vld [vmem:[#allocation2 + $0x140] sm:$0xff]   ;;  %v4394_v19 = vld [vmem:[#allocation2 + $0x2d0] sm:$0xff]  }
  0x74   :  { %4121 = vmatmul.mubr.msk.bf16.gmra.mrb[16].mxu0 %vm772_vm0, %v4331_v20  ;;  %4221 = vmatmul.mubr.msk.bf16.gmra.mrb[16].mxu1 %vm772_vm0, %v4332_v21  ;;  %v4395_v20 = vld [vmem:[#allocation2 + $0x148] sm:$0xff]   ;;  %v4396_v21 = vld [vmem:[#allocation2 + $0x2d8] sm:$0xff]  }
  0x75   :  { %4124 = vmatprep.mubr.msk.bf16.mxu0 %vm772_vm0, %v4333_v22  ;;  %4224 = vmatprep.mubr.msk.bf16.mxu1 %vm772_vm0, %v4334_v23  ;;  %v4397_v22 = vld [vmem:[#allocation2 + $0x150] sm:$0xff]   ;;  %v4398_v23 = vld [vmem:[#allocation2 + $0x2e0] sm:$0xff]  }
  0x7c   :  { %4125 = vmatmul.mubr.msk.bf16.gmra.mrb[20].mxu0 %vm772_vm0, %v4335_v24  ;;  %4225 = vmatmul.mubr.msk.bf16.gmra.mrb[20].mxu1 %vm772_vm0, %v4336_v25  ;;  %v4399_v24 = vld [vmem:[#allocation2 + $0x158] sm:$0xff]   ;;  %v4400_v25 = vld [vmem:[#allocation2 + $0x2e8] sm:$0xff]  }
  0x7d   :  { %4128 = vmatprep.mubr.msk.bf16.mxu0 %vm772_vm0, %v4337_v26  ;;  %4228 = vmatprep.mubr.msk.bf16.mxu1 %vm772_vm0, %v4338_v27  ;;  %v4401_v26 = vld [vmem:[#allocation2 + $0x160] sm:$0xff]   ;;  %v4402_v27 = vld [vmem:[#allocation2 + $0x2f0] sm:$0xff]  }
  0x84   :  { %4129 = vmatmul.mubr.msk.bf16.gmra.mrb[24].mxu0 %vm772_vm0, %v4339_v28  ;;  %4229 = vmatmul.mubr.msk.bf16.gmra.mrb[24].mxu1 %vm772_vm0, %v4340_v29  ;;  %v4403_v28 = vld [vmem:[#allocation2 + $0x168] sm:$0xff]   ;;  %v4404_v29 = vld [vmem:[#allocation2 + $0x2f8] sm:$0xff]  }
  0x85   :  { %4132 = vmatprep.mubr.msk.bf16.mxu0 %vm772_vm0, %v4341_v30  ;;  %4232 = vmatprep.mubr.msk.bf16.mxu1 %vm772_vm0, %v4342_v31  ;;  %v4405_v30 = vld [vmem:[#allocation2 + $0x170] sm:$0xff]   ;;  %v4406_v31 = vld [vmem:[#allocation2 + $0x300] sm:$0xff]  }
  0x8c   :  { %4133 = vmatmul.mubr.msk.bf16.gmra.mrb[28].mxu0 %vm772_vm0, %v4343_v32  ;;  %4233 = vmatmul.mubr.msk.bf16.gmra.mrb[28].mxu1 %vm772_vm0, %v4344_v33  ;;  %v4407_v32 = vld [vmem:[#allocation2 + $0x178] sm:$0xff]   ;;  %v4408_v33 = vld [vmem:[#allocation2 + $0x308] sm:$0xff]  }
  0x8d   :  { %4136 = vmatprep.mubr.msk.bf16.mxu0 %vm772_vm0, %v4345_v34  ;;  %4236 = vmatprep.mubr.msk.bf16.mxu1 %vm772_vm0, %v4346_v35  ;;  %v4409_v34 = vld [vmem:[#allocation2 + $0x180] sm:$0xff]   ;;  %v4410_v35 = vld [vmem:[#allocation2 + $0x188] sm:$0xff]  }
  0x94   :  { %4137 = vmatmul.mubr.msk.bf16.gmra.mrb[32].mxu0 %vm772_vm0, %v4347_v36  ;;  %4237 = vmatmul.mubr.msk.bf16.gmra.mrb[32].mxu1 %vm772_vm0, %v4348_v37 }
  0x95   :  { %4140 = vmatprep.mubr.msk.bf16.mxu0 %vm772_vm0, %v4349_v38  ;;  %4240 = vmatprep.mubr.msk.bf16.mxu1 %vm772_vm0, %v4350_v39 }
  0x9c   :  { %4141 = vmatmul.mubr.msk.bf16.gmra.mrb[36].mxu0 %vm772_vm0, %v4351_v40  ;;  %4241 = vmatmul.mubr.msk.bf16.gmra.mrb[36].mxu1 %vm772_vm0, %v4352_v41 }
  0x9d   :  { %4144 = vmatprep.mubr.msk.bf16.mxu0 %vm772_vm0, %v4353_v42  ;;  %4244 = vmatprep.mubr.msk.bf16.mxu1 %vm772_vm0, %v4354_v43 }
  0xa4   :  { %4145 = vmatmul.mubr.msk.bf16.gmra.mrb[40].mxu0 %vm772_vm0, %v4355_v44  ;;  %4245 = vmatmul.mubr.msk.bf16.gmra.mrb[40].mxu1 %vm772_vm0, %v4356_v45 }
  0xa5   :  { %4148 = vmatprep.mubr.msk.bf16.mxu0 %vm772_vm0, %v4357_v46  ;;  %4248 = vmatprep.mubr.msk.bf16.mxu1 %vm772_vm0, %v4358_v47 }
  0xac   :  { %4149 = vmatmul.mubr.msk.bf16.gmra.mrb[44].mxu0 %vm772_vm0, %v4359_v48  ;;  %4249 = vmatmul.mubr.msk.bf16.gmra.mrb[44].mxu1 %vm772_vm0, %v4360_v49 }
  0xad   :  { %4152 = vmatprep.mubr.msk.bf16.mxu0 %vm772_vm0, %v4361_v50  ;;  %4252 = vmatprep.mubr.msk.bf16.mxu1 %vm772_vm0, %v4362_v51 }
  0xb4   :  { %4153 = vmatmul.mubr.msk.bf16.gmra.mrb[48].mxu0 %vm772_vm0, %v4363_v52  ;;  %4253 = vmatmul.mubr.msk.bf16.gmra.mrb[48].mxu1 %vm772_vm0, %v4364_v53 }
  0xb5   :  { %4156 = vmatprep.mubr.msk.bf16.mxu0 %vm772_vm0, %v4365_v54  ;;  %4256 = vmatprep.mubr.msk.bf16.mxu1 %vm772_vm0, %v4366_v55 }
  0xbc   :  { %4157 = vmatmul.mubr.msk.bf16.gmra.mrb[52].mxu0 %vm772_vm0, %v4367_v56  ;;  %4257 = vmatmul.mubr.msk.bf16.gmra.mrb[52].mxu1 %vm772_vm0, %v4368_v57 }
  0xbd   :  { %4160 = vmatprep.mubr.msk.bf16.mxu0 %vm772_vm0, %v4369_v58  ;;  %4260 = vmatprep.mubr.msk.bf16.mxu1 %vm772_vm0, %v4370_v59 }
  0xc4   :  { %4161 = vmatmul.mubr.msk.bf16.gmra.mrb[56].mxu0 %vm772_vm0, %v4371_v60  ;;  %4261 = vmatmul.mubr.msk.bf16.gmra.mrb[56].mxu1 %vm772_vm0, %v4372_v61 }
  0xc5   :  { %4164 = vmatprep.mubr.msk.bf16.mxu0 %vm772_vm0, %v4373_v62  ;;  %4264 = vmatprep.mubr.msk.bf16.mxu1 %vm772_vm0, %v4374_v63 }
  0xcc   :  { %4165 = vmatmul.mubr.msk.bf16.gmra.mrb[60].mxu0 %vm772_vm0, %v4375_v0  ;;  %4265 = vmatmul.mubr.msk.bf16.gmra.mrb[60].mxu1 %vm772_vm0, %v4376_v1 }
  0xcd   :  { %4168 = vmatprep.mubr.msk.bf16.mxu0 %vm772_vm0, %v4377_v2  ;;  %4268 = vmatprep.mubr.msk.bf16.mxu1 %vm772_vm0, %v4378_v3 }
  0xd4   :  { %4169 = vmatmul.mubr.msk.bf16.gmra.mrb[64].mxu0 %vm772_vm0, %v4379_v4  ;;  %4269 = vmatmul.mubr.msk.bf16.gmra.mrb[64].mxu1 %vm772_vm0, %v4380_v5 }
  0xd5   :  { %4172 = vmatprep.mubr.msk.bf16.mxu0 %vm772_vm0, %v4381_v6  ;;  %4272 = vmatprep.mubr.msk.bf16.mxu1 %vm772_vm0, %v4382_v7 }
  0xdc   :  { %4173 = vmatmul.mubr.msk.bf16.gmra.mrb[68].mxu0 %vm772_vm0, %v4383_v8  ;;  %4273 = vmatmul.mubr.msk.bf16.gmra.mrb[68].mxu1 %vm772_vm0, %v4384_v9 }
  0xdd   :  { %4176 = vmatprep.mubr.msk.bf16.mxu0 %vm772_vm0, %v4385_v10  ;;  %4276 = vmatprep.mubr.msk.bf16.mxu1 %vm772_vm0, %v4386_v11 }
  0xe4   :  { %4177 = vmatmul.mubr.msk.bf16.gmra.mrb[72].mxu0 %vm772_vm0, %v4387_v12  ;;  %4277 = vmatmul.mubr.msk.bf16.gmra.mrb[72].mxu1 %vm772_vm0, %v4388_v13 }
  0xe5   :  { %4180 = vmatprep.mubr.msk.bf16.mxu0 %vm772_vm0, %v4389_v14  ;;  %4280 = vmatprep.mubr.msk.bf16.mxu1 %vm772_vm0, %v4390_v15 }
  0xec   :  { %4181 = vmatmul.mubr.msk.bf16.gmra.mrb[76].mxu0 %vm772_vm0, %v4391_v16  ;;  %4281 = vmatmul.mubr.msk.bf16.gmra.mrb[76].mxu1 %vm772_vm0, %v4392_v17 }
  0xed   :  { %4184 = vmatprep.mubr.msk.bf16.mxu0 %vm772_vm0, %v4393_v18  ;;  %4284 = vmatprep.mubr.msk.bf16.mxu1 %vm772_vm0, %v4394_v19 }
  0xf4   :  { %4185 = vmatmul.mubr.msk.bf16.gmra.mrb[80].mxu0 %vm772_vm0, %v4395_v20  ;;  %4285 = vmatmul.mubr.msk.bf16.gmra.mrb[80].mxu1 %vm772_vm0, %v4396_v21 }
  0xf5   :  { %4188 = vmatprep.mubr.msk.bf16.mxu0 %vm772_vm0, %v4397_v22  ;;  %4288 = vmatprep.mubr.msk.bf16.mxu1 %vm772_vm0, %v4398_v23 }
  0xfc   :  { %4189 = vmatmul.mubr.msk.bf16.gmra.mrb[84].mxu0 %vm772_vm0, %v4399_v24  ;;  %4289 = vmatmul.mubr.msk.bf16.gmra.mrb[84].mxu1 %vm772_vm0, %v4400_v25 }
  0xfd   :  { %4192 = vmatprep.mubr.msk.bf16.mxu0 %vm772_vm0, %v4401_v26  ;;  %4292 = vmatprep.mubr.msk.bf16.mxu1 %vm772_vm0, %v4402_v27 }
 0x104   :  { %4193 = vmatmul.mubr.msk.bf16.gmra.mrb[88].mxu0 %vm772_vm0, %v4403_v28  ;;  %4293 = vmatmul.mubr.msk.bf16.gmra.mrb[88].mxu1 %vm772_vm0, %v4404_v29 }
 0x105   :  { %4196 = vmatprep.mubr.msk.bf16.mxu0 %vm772_vm0, %v4405_v30  ;;  %4296 = vmatprep.mubr.msk.bf16.mxu1 %vm772_vm0, %v4406_v31 }
 0x10c   :  { %4197 = vmatmul.mubr.msk.bf16.gmra.mrb[92].mxu0 %vm772_vm0, %v4407_v32  ;;  %4297 = vmatmul.mubr.msk.bf16.gmra.mrb[92].mxu1 %vm772_vm0, %v4408_v33 }
 0x10d   :  { %4200 = vmatprep.mubr.msk.bf16.mxu0 %vm772_vm0, %v4409_v34 }
 0x114   :  { %4201 = vmatmul.mubr.msk.bf16.gmra.mrb[96].mxu0 %vm772_vm0, %v4410_v35 }
 0x127   :  { %v4722_v36 = vpop.f32.mrb[0].mxu0  ;;  %v4724_v37 = vpop.f32.mrb[0].mxu1 }
 0x128   :  { %7796 = vst [vmem:[#allocation15_spill] sm:$0xff] %v4724_v37  ;;  %v4726_v38 = vpop.f32.mrb[1].mxu0  ;;  %v4728_v39 = vpop.f32.mrb[1].mxu1  ;;  %v2286_v45 = vmul.f32 %v4722_v36, %v4722_v36  ;;  %v1890_v50 = vsel %vm1886_vm1, %v4722_v36, 0.0 }
 0x129   :  { %7797 = vst [vmem:[#allocation16_spill] sm:$0xff] %v4726_v38  ;;  %7798 = vst [vmem:[#allocation17_spill] sm:$0xff] %v4728_v39  ;;  %v2284_v40 = vmul.f32 %v4726_v38, %v4726_v38  ;;  %v4732_v41 = vpop.f32.mrb[2].mxu0  ;;  %v4734_v42 = vpop.f32.mrb[2].mxu1  ;;  %v1887_v46 = vsel %vm1886_vm1, %v4726_v38, 0.0 }
 0x12a   :  { %7799 = vst [vmem:[#allocation18_spill] sm:$0xff] %v4734_v42  ;;  %v4736_v43 = vpop.f32.mrb[3].mxu0  ;;  %v4738_v44 = vpop.f32.mrb[3].mxu1  ;;  %v2287_v52 = vmul.f32 %v4732_v41, %v4732_v41  ;;  %v2483_v56 = vsel %vm1886_vm1, %v2286_v45, 0.0  ;;  %v1892_v57 = vsel %vm1886_vm1, %v4732_v41, 0.0 }
 0x12b   :  { %7800 = vst [vmem:[#allocation19_spill] sm:$0xff] %v4736_v43  ;;  %7801 = vst [vmem:[#allocation20_spill] sm:$0xff] %v4738_v44  ;;  %v1888_v47 = vsel %vm1886_vm1, %v4736_v43, 0.0  ;;  %v2285_v48 = vmul.f32 %v4736_v43, %v4736_v43  ;;  %v2480_v51 = vsel %vm1886_vm1, %v2284_v40, 0.0 }
 0x12c   :  { %v1889_v49 = vadd.f32 %v1888_v47, %v1887_v46  ;;  %v2485_v0 = vsel %vm1886_vm1, %v2287_v52, 0.0 }
 0x12d   :  { %v2481_v53 = vsel %vm1886_vm1, %v2285_v48, 0.0 }
 0x12e   :  { %v1891_v54 = vadd.f32 %v1890_v50, %v1889_v49  ;;  %v2482_v55 = vadd.f32 %v2481_v53, %v2480_v51 }
 0x12f   :  { %v4757_v58 = vpop.f32.mrb[4].mxu0  ;;  %v4759_v59 = vpop.f32.mrb[4].mxu1 }
 0x130   :  { %7802 = vst [vmem:[#allocation21_spill] sm:$0xff] %v4759_v59  ;;  %v1893_v60 = vadd.f32 %v1892_v57, %v1891_v54  ;;  %v2484_v61 = vadd.f32 %v2483_v56, %v2482_v55  ;;  %v4761_v62 = vpop.f32.mrb[5].mxu0  ;;  %v4763_v63 = vpop.f32.mrb[5].mxu1  ;;  %v2290_v9 = vmul.f32 %v4757_v58, %v4757_v58  ;;  %v1898_v15 = vsel %vm1886_vm1, %v4757_v58, 0.0 }
 0x131   :  { %7803 = vst [vmem:[#allocation22_spill] sm:$0xff] %v4763_v63  ;;  %v1894_v1 = vsel %vm1886_vm1, %v4761_v62, 0.0  ;;  %v2288_v2 = vmul.f32 %v4761_v62, %v4761_v62  ;;  %v4770_v3 = vpop.f32.mrb[6].mxu0  ;;  %v4772_v4 = vpop.f32.mrb[6].mxu1 }
 0x132   :  { %7804 = vst [vmem:[#allocation23_spill] sm:$0xff] %v4772_v4  ;;  %v2486_v5 = vadd.f32 %v2485_v0, %v2484_v61  ;;  %v1895_v6 = vadd.f32 %v1894_v1, %v1893_v60  ;;  %v4774_v7 = vpop.f32.mrb[7].mxu0  ;;  %v4776_v8 = vpop.f32.mrb[7].mxu1  ;;  %v2291_v16 = vmul.f32 %v4770_v3, %v4770_v3  ;;  %v2491_v20 = vsel %vm1886_vm1, %v2290_v9, 0.0 }
 0x133   :  { %7805 = vst [vmem:[#allocation24_spill] sm:$0xff] %v4776_v8  ;;  %v2487_v10 = vsel %vm1886_vm1, %v2288_v2, 0.0  ;;  %v1896_v11 = vsel %vm1886_vm1, %v4774_v7, 0.0  ;;  %v2289_v12 = vmul.f32 %v4774_v7, %v4774_v7  ;;  %v1900_v21 = vsel %vm1886_vm1, %v4770_v3, 0.0 }
 0x134   :  { %v2488_v13 = vadd.f32 %v2487_v10, %v2486_v5  ;;  %v1897_v14 = vadd.f32 %v1896_v11, %v1895_v6  ;;  %v2493_v28 = vsel %vm1886_vm1, %v2291_v16, 0.0 }
 0x135   :  { %v2489_v17 = vsel %vm1886_vm1, %v2289_v12, 0.0 }
 0x136   :  { %v1899_v18 = vadd.f32 %v1898_v15, %v1897_v14  ;;  %v2490_v19 = vadd.f32 %v2489_v17, %v2488_v13 }
 0x137   :  { %v4793_v22 = vpop.f32.mrb[8].mxu0  ;;  %v4795_v23 = vpop.f32.mrb[8].mxu1 }
 0x138   :  { %7806 = vst [vmem:[#allocation25_spill] sm:$0xff] %v4795_v23  ;;  %v1901_v24 = vadd.f32 %v1900_v21, %v1899_v18  ;;  %v2492_v25 = vadd.f32 %v2491_v20, %v2490_v19  ;;  %v4797_v26 = vpop.f32.mrb[9].mxu0  ;;  %v4799_v27 = vpop.f32.mrb[9].mxu1  ;;  %v2294_v45 = vmul.f32 %v4793_v22, %v4793_v22  ;;  %v1906_v51 = vsel %vm1886_vm1, %v4793_v22, 0.0 }
 0x139   :  { %7807 = vst [vmem:[#allocation26_spill] sm:$0xff] %v4799_v27  ;;  %v1902_v29 = vsel %vm1886_vm1, %v4797_v26, 0.0  ;;  %v2292_v30 = vmul.f32 %v4797_v26, %v4797_v26  ;;  %v4806_v31 = vpop.f32.mrb[10].mxu0  ;;  %v4808_v32 = vpop.f32.mrb[10].mxu1 }
 0x13a   :  { %7808 = vst [vmem:[#allocation27_spill] sm:$0xff] %v4808_v32  ;;  %v2494_v33 = vadd.f32 %v2493_v28, %v2492_v25  ;;  %v1903_v34 = vadd.f32 %v1902_v29, %v1901_v24  ;;  %v4810_v35 = vpop.f32.mrb[11].mxu0  ;;  %v4812_v40 = vpop.f32.mrb[11].mxu1  ;;  %v2295_v52 = vmul.f32 %v4806_v31, %v4806_v31  ;;  %v2499_v56 = vsel %vm1886_vm1, %v2294_v45, 0.0 }
 0x13b   :  { %7809 = vst [vmem:[#allocation28_spill] sm:$0xff] %v4812_v40  ;;  %v2495_v46 = vsel %vm1886_vm1, %v2292_v30, 0.0  ;;  %v1904_v47 = vsel %vm1886_vm1, %v4810_v35, 0.0  ;;  %v2293_v48 = vmul.f32 %v4810_v35, %v4810_v35  ;;  %v1908_v57 = vsel %vm1886_vm1, %v4806_v31, 0.0 }
 0x13c   :  { %v2496_v49 = vadd.f32 %v2495_v46, %v2494_v33  ;;  %v1905_v50 = vadd.f32 %v1904_v47, %v1903_v34  ;;  %v2501_v6 = vsel %vm1886_vm1, %v2295_v52, 0.0 }
 0x13d   :  { %v2497_v53 = vsel %vm1886_vm1, %v2293_v48, 0.0 }
 0x13e   :  { %v1907_v54 = vadd.f32 %v1906_v51, %v1905_v50  ;;  %v2498_v55 = vadd.f32 %v2497_v53, %v2496_v49 }
 0x13f   :  { %v4829_v60 = vpop.f32.mrb[12].mxu0  ;;  %v4831_v61 = vpop.f32.mrb[12].mxu1 }
 0x140   :  { %7810 = vst [vmem:[#allocation29_spill] sm:$0xff] %v4831_v61  ;;  %v1909_v0 = vadd.f32 %v1908_v57, %v1907_v54  ;;  %v2500_v1 = vadd.f32 %v2499_v56, %v2498_v55  ;;  %v4833_v2 = vpop.f32.mrb[13].mxu0  ;;  %v4835_v5 = vpop.f32.mrb[13].mxu1  ;;  %v2298_v17 = vmul.f32 %v4829_v60, %v4829_v60  ;;  %v1914_v25 = vsel %vm1886_vm1, %v4829_v60, 0.0 }
 0x141   :  { %7811 = vst [vmem:[#allocation30_spill] sm:$0xff] %v4835_v5  ;;  %v1910_v9 = vsel %vm1886_vm1, %v4833_v2, 0.0  ;;  %v2296_v10 = vmul.f32 %v4833_v2, %v4833_v2  ;;  %v4842_v11 = vpop.f32.mrb[14].mxu0  ;;  %v4844_v12 = vpop.f32.mrb[14].mxu1 }
 0x142   :  { %7812 = vst [vmem:[#allocation31_spill] sm:$0xff] %v4844_v12  ;;  %v2502_v13 = vadd.f32 %v2501_v6, %v2500_v1  ;;  %v1911_v14 = vadd.f32 %v1910_v9, %v1909_v0  ;;  %v4846_v15 = vpop.f32.mrb[15].mxu0  ;;  %v4848_v16 = vpop.f32.mrb[15].mxu1  ;;  %v2299_v28 = vmul.f32 %v4842_v11, %v4842_v11  ;;  %v2507_v34 = vsel %vm1886_vm1, %v2298_v17, 0.0 }
 0x143   :  { %7813 = vst [vmem:[#allocation32_spill] sm:$0xff] %v4848_v16  ;;  %v2503_v18 = vsel %vm1886_vm1, %v2296_v10, 0.0  ;;  %v1912_v19 = vsel %vm1886_vm1, %v4846_v15, 0.0  ;;  %v2297_v20 = vmul.f32 %v4846_v15, %v4846_v15  ;;  %v1916_v45 = vsel %vm1886_vm1, %v4842_v11, 0.0 }
 0x144   :  { %v2504_v21 = vadd.f32 %v2503_v18, %v2502_v13  ;;  %v1913_v24 = vadd.f32 %v1912_v19, %v1911_v14  ;;  %v2509_v52 = vsel %vm1886_vm1, %v2299_v28, 0.0 }
 0x145   :  { %v2505_v29 = vsel %vm1886_vm1, %v2297_v20, 0.0 }
 0x146   :  { %v1915_v30 = vadd.f32 %v1914_v25, %v1913_v24  ;;  %v2506_v33 = vadd.f32 %v2505_v29, %v2504_v21 }
 0x147   :  { %v4865_v46 = vpop.f32.mrb[16].mxu0  ;;  %v4867_v47 = vpop.f32.mrb[16].mxu1 }
 0x148   :  { %7814 = vst [vmem:[#allocation33_spill] sm:$0xff] %v4867_v47  ;;  %v1917_v48 = vadd.f32 %v1916_v45, %v1915_v30  ;;  %v2508_v49 = vadd.f32 %v2507_v34, %v2506_v33  ;;  %v4869_v50 = vpop.f32.mrb[17].mxu0  ;;  %v4871_v51 = vpop.f32.mrb[17].mxu1  ;;  %v2302_v9 = vmul.f32 %v4865_v46, %v4865_v46  ;;  %v1922_v19 = vsel %vm1886_vm1, %v4865_v46, 0.0 }
 0x149   :  { %7815 = vst [vmem:[#allocation34_spill] sm:$0xff] %v4869_v50  ;;  %7816 = vst [vmem:[#allocation35_spill] sm:$0xff] %v4871_v51  ;;  %v1918_v53 = vsel %vm1886_vm1, %v4869_v50, 0.0  ;;  %v2300_v54 = vmul.f32 %v4869_v50, %v4869_v50  ;;  %v4878_v55 = vpop.f32.mrb[18].mxu0  ;;  %v4880_v56 = vpop.f32.mrb[18].mxu1 }
 0x14a   :  { %7817 = vst [vmem:[#allocation36_spill] sm:$0xff] %v4878_v55  ;;  %7818 = vst [vmem:[#allocation37_spill] sm:$0xff] %v4880_v56  ;;  %v2510_v57 = vadd.f32 %v2509_v52, %v2508_v49  ;;  %v1919_v0 = vadd.f32 %v1918_v53, %v1917_v48  ;;  %v4882_v1 = vpop.f32.mrb[19].mxu0  ;;  %v4884_v6 = vpop.f32.mrb[19].mxu1  ;;  %v2303_v20 = vmul.f32 %v4878_v55, %v4878_v55  ;;  %v2515_v28 = vsel %vm1886_vm1, %v2302_v9, 0.0 }
 0x14b   :  { %7819 = vst [vmem:[#allocation38_spill] sm:$0xff] %v4884_v6  ;;  %v2511_v10 = vsel %vm1886_vm1, %v2300_v54, 0.0  ;;  %v1920_v13 = vsel %vm1886_vm1, %v4882_v1, 0.0  ;;  %v2301_v14 = vmul.f32 %v4882_v1, %v4882_v1  ;;  %v1924_v29 = vsel %vm1886_vm1, %v4878_v55, 0.0 }
 0x14c   :  { %v2512_v17 = vadd.f32 %v2511_v10, %v2510_v57  ;;  %v1921_v18 = vadd.f32 %v1920_v13, %v1919_v0  ;;  %v2517_v52 = vsel %vm1886_vm1, %v2303_v20, 0.0 }
 0x14d   :  { %v2513_v21 = vsel %vm1886_vm1, %v2301_v14, 0.0 }
 0x14e   :  { %v1923_v24 = vadd.f32 %v1922_v19, %v1921_v18  ;;  %v2514_v25 = vadd.f32 %v2513_v21, %v2512_v17 }
 0x14f   :  { %v4901_v30 = vpop.f32.mrb[20].mxu0  ;;  %v4903_v33 = vpop.f32.mrb[20].mxu1 }
 0x150   :  { %7820 = vst [vmem:[#allocation39_spill] sm:$0xff] %v4901_v30  ;;  %7821 = vst [vmem:[#allocation40_spill] sm:$0xff] %v4903_v33  ;;  %v1925_v34 = vadd.f32 %v1924_v29, %v1923_v24  ;;  %v2516_v45 = vadd.f32 %v2515_v28, %v2514_v25  ;;  %v4905_v48 = vpop.f32.mrb[21].mxu0  ;;  %v4907_v49 = vpop.f32.mrb[21].mxu1  ;;  %v2306_v17 = vmul.f32 %v4901_v30, %v4901_v30  ;;  %v1930_v25 = vsel %vm1886_vm1, %v4901_v30, 0.0 }
 0x151   :  { %7822 = vst [vmem:[#allocation41_spill] sm:$0xff] %v4905_v48  ;;  %7823 = vst [vmem:[#allocation42_spill] sm:$0xff] %v4907_v49  ;;  %v1926_v53 = vsel %vm1886_vm1, %v4905_v48, 0.0  ;;  %v2304_v54 = vmul.f32 %v4905_v48, %v4905_v48  ;;  %v4914_v57 = vpop.f32.mrb[22].mxu0  ;;  %v4916_v0 = vpop.f32.mrb[22].mxu1 }
 0x152   :  { %7824 = vst [vmem:[#allocation43_spill] sm:$0xff] %v4914_v57  ;;  %7825 = vst [vmem:[#allocation44_spill] sm:$0xff] %v4916_v0  ;;  %v2518_v9 = vadd.f32 %v2517_v52, %v2516_v45  ;;  %v1927_v10 = vadd.f32 %v1926_v53, %v1925_v34  ;;  %v4918_v13 = vpop.f32.mrb[23].mxu0  ;;  %v4920_v14 = vpop.f32.mrb[23].mxu1  ;;  %v2307_v28 = vmul.f32 %v4914_v57, %v4914_v57  ;;  %v2523_v52 = vsel %vm1886_vm1, %v2306_v17, 0.0 }
 0x153   :  { %7826 = vst [vmem:[#allocation45_spill] sm:$0xff] %v4918_v13  ;;  %7827 = vst [vmem:[#allocation46_spill] sm:$0xff] %v4920_v14  ;;  %v2519_v18 = vsel %vm1886_vm1, %v2304_v54, 0.0  ;;  %v1928_v19 = vsel %vm1886_vm1, %v4918_v13, 0.0  ;;  %v2305_v20 = vmul.f32 %v4918_v13, %v4918_v13  ;;  %v1932_v53 = vsel %vm1886_vm1, %v4914_v57, 0.0 }
 0x154   :  { %v2520_v21 = vadd.f32 %v2519_v18, %v2518_v9  ;;  %v1929_v24 = vadd.f32 %v1928_v19, %v1927_v10  ;;  %v2525_v49 = vsel %vm1886_vm1, %v2307_v28, 0.0 }
 0x155   :  { %v2521_v29 = vsel %vm1886_vm1, %v2305_v20, 0.0 }
 0x156   :  { %v1931_v34 = vadd.f32 %v1930_v25, %v1929_v24  ;;  %v2522_v45 = vadd.f32 %v2521_v29, %v2520_v21 }
 0x157   :  { %v4937_v54 = vpop.f32.mrb[24].mxu0  ;;  %v4939_v0 = vpop.f32.mrb[24].mxu1 }
 0x158   :  { %7828 = vst [vmem:[#allocation47_spill] sm:$0xff] %v4937_v54  ;;  %7829 = vst [vmem:[#allocation48_spill] sm:$0xff] %v4939_v0  ;;  %v1933_v9 = vadd.f32 %v1932_v53, %v1931_v34  ;;  %v2524_v10 = vadd.f32 %v2523_v52, %v2522_v45  ;;  %v4941_v18 = vpop.f32.mrb[25].mxu0  ;;  %v4943_v19 = vpop.f32.mrb[25].mxu1  ;;  %v2310_v52 = vmul.f32 %v4937_v54, %v4937_v54 }
 0x159   :  { %7830 = vst [vmem:[#allocation49_spill] sm:$0xff] %v4941_v18  ;;  %7831 = vst [vmem:[#allocation50_spill] sm:$0xff] %v4943_v19  ;;  %v1934_v20 = vsel %vm1886_vm1, %v4941_v18, 0.0  ;;  %v2308_v17 = vmul.f32 %v4941_v18, %v4941_v18  ;;  %v4950_v21 = vpop.f32.mrb[26].mxu0  ;;  %v4952_v24 = vpop.f32.mrb[26].mxu1 }
 0x15a   :  { %7832 = vst [vmem:[#allocation51_spill] sm:$0xff] %v4950_v21  ;;  %7833 = vst [vmem:[#allocation52_spill] sm:$0xff] %v4952_v24  ;;  %v2526_v25 = vadd.f32 %v2525_v49, %v2524_v10  ;;  %v1935_v29 = vadd.f32 %v1934_v20, %v1933_v9  ;;  %v4954_v34 = vpop.f32.mrb[27].mxu0  ;;  %v4956_v45 = vpop.f32.mrb[27].mxu1  ;;  %v1938_v49 = vsel %vm1886_vm1, %v4937_v54, 0.0  ;;  %v2311_v9 = vmul.f32 %v4950_v21, %v4950_v21 }
 0x15b   :  { %7834 = vst [vmem:[#allocation53_spill] sm:$0xff] %v4954_v34  ;;  %7835 = vst [vmem:[#allocation54_spill] sm:$0xff] %v4956_v45  ;;  %v2527_v28 = vsel %vm1886_vm1, %v2308_v17, 0.0  ;;  %v1936_v53 = vsel %vm1886_vm1, %v4954_v34, 0.0  ;;  %v2309_v19 = vmul.f32 %v4954_v34, %v4954_v34  ;;  %v2531_v17 = vsel %vm1886_vm1, %v2310_v52, 0.0 }
 0x15c   :  { %v2528_v18 = vadd.f32 %v2527_v28, %v2526_v25  ;;  %v1937_v0 = vadd.f32 %v1936_v53, %v1935_v29  ;;  %v1940_v57 = vsel %vm1886_vm1, %v4950_v21, 0.0  ;;  %v2533_v54 = vsel %vm1886_vm1, %v2311_v9, 0.0 }
 0x15d   :  { %v2529_v10 = vsel %vm1886_vm1, %v2309_v19, 0.0 }
 0x15e   :  { %v1939_v20 = vadd.f32 %v1938_v49, %v1937_v0  ;;  %v2530_v24 = vadd.f32 %v2529_v10, %v2528_v18 }
 0x15f   :  { %v4973_v45 = vpop.f32.mrb[28].mxu0  ;;  %v4975_v34 = vpop.f32.mrb[28].mxu1 }
 0x160   :  { %7836 = vst [vmem:[#allocation55_spill] sm:$0xff] %v4973_v45  ;;  %7837 = vst [vmem:[#allocation56_spill] sm:$0xff] %v4975_v34  ;;  %v1941_v25 = vadd.f32 %v1940_v57, %v1939_v20  ;;  %v2532_v29 = vadd.f32 %v2531_v17, %v2530_v24  ;;  %v4977_v28 = vpop.f32.mrb[29].mxu0  ;;  %v4979_v53 = vpop.f32.mrb[29].mxu1  ;;  %v2314_v20 = vmul.f32 %v4973_v45, %v4973_v45 }
 0x161   :  { %7838 = vst [vmem:[#allocation57_spill] sm:$0xff] %v4977_v28  ;;  %7839 = vst [vmem:[#allocation58_spill] sm:$0xff] %v4979_v53  ;;  %v1942_v0 = vsel %vm1886_vm1, %v4977_v28, 0.0  ;;  %v2312_v18 = vmul.f32 %v4977_v28, %v4977_v28  ;;  %v4986_v19 = vpop.f32.mrb[30].mxu0  ;;  %v4988_v52 = vpop.f32.mrb[30].mxu1 }
 0x162   :  { %7840 = vst [vmem:[#allocation59_spill] sm:$0xff] %v4986_v19  ;;  %7841 = vst [vmem:[#allocation60_spill] sm:$0xff] %v4988_v52  ;;  %v2534_v49 = vadd.f32 %v2533_v54, %v2532_v29  ;;  %v1943_v10 = vadd.f32 %v1942_v0, %v1941_v25  ;;  %v4990_v57 = vpop.f32.mrb[31].mxu0  ;;  %v4992_v24 = vpop.f32.mrb[31].mxu1  ;;  %v1946_v54 = vsel %vm1886_vm1, %v4973_v45, 0.0  ;;  %v2315_v25 = vmul.f32 %v4986_v19, %v4986_v19 }
 0x163   :  { %7842 = vst [vmem:[#allocation61_spill] sm:$0xff] %v4990_v57  ;;  %7843 = vst [vmem:[#allocation62_spill] sm:$0xff] %v4992_v24  ;;  %v2535_v9 = vsel %vm1886_vm1, %v2312_v18, 0.0  ;;  %v1944_v17 = vsel %vm1886_vm1, %v4990_v57, 0.0  ;;  %v2313_v53 = vmul.f32 %v4990_v57, %v4990_v57  ;;  %v2539_v18 = vsel %vm1886_vm1, %v2314_v20, 0.0 }
 0x164   :  { %v2536_v28 = vadd.f32 %v2535_v9, %v2534_v49  ;;  %v1945_v34 = vadd.f32 %v1944_v17, %v1943_v10  ;;  %v1948_v21 = vsel %vm1886_vm1, %v4986_v19, 0.0  ;;  %v2541_v45 = vsel %vm1886_vm1, %v2315_v25, 0.0 }
 0x165   :  { %v2537_v29 = vsel %vm1886_vm1, %v2313_v53, 0.0 }
 0x166   :  { %v1947_v0 = vadd.f32 %v1946_v54, %v1945_v34  ;;  %v2538_v52 = vadd.f32 %v2537_v29, %v2536_v28 }
 0x167   :  { %v5009_v24 = vpop.f32.mrb[32].mxu0  ;;  %v5011_v57 = vpop.f32.mrb[32].mxu1 }
 0x168   :  { %7844 = vst [vmem:[#allocation63_spill] sm:$0xff] %v5009_v24  ;;  %7845 = vst [vmem:[#allocation64_spill] sm:$0xff] %v5011_v57  ;;  %v1949_v49 = vadd.f32 %v1948_v21, %v1947_v0  ;;  %v2540_v10 = vadd.f32 %v2539_v18, %v2538_v52  ;;  %v5013_v9 = vpop.f32.mrb[33].mxu0  ;;  %v5015_v17 = vpop.f32.mrb[33].mxu1  ;;  %v2318_v0 = vmul.f32 %v5009_v24, %v5009_v24 }
 0x169   :  { %7846 = vst [vmem:[#allocation65_spill] sm:$0xff] %v5013_v9  ;;  %7847 = vst [vmem:[#allocation66_spill] sm:$0xff] %v5015_v17  ;;  %v1950_v34 = vsel %vm1886_vm1, %v5013_v9, 0.0  ;;  %v2316_v28 = vmul.f32 %v5013_v9, %v5013_v9  ;;  %v5022_v53 = vpop.f32.mrb[34].mxu0  ;;  %v5024_v20 = vpop.f32.mrb[34].mxu1 }
 0x16a   :  { %7848 = vst [vmem:[#allocation67_spill] sm:$0xff] %v5022_v53  ;;  %7849 = vst [vmem:[#allocation68_spill] sm:$0xff] %v5024_v20  ;;  %v2542_v54 = vadd.f32 %v2541_v45, %v2540_v10  ;;  %v1951_v29 = vadd.f32 %v1950_v34, %v1949_v49  ;;  %v5026_v21 = vpop.f32.mrb[35].mxu0  ;;  %v5028_v52 = vpop.f32.mrb[35].mxu1  ;;  %v1954_v45 = vsel %vm1886_vm1, %v5009_v24, 0.0  ;;  %v2319_v49 = vmul.f32 %v5022_v53, %v5022_v53 }
 0x16b   :  { %7850 = vst [vmem:[#allocation69_spill] sm:$0xff] %v5026_v21  ;;  %7851 = vst [vmem:[#allocation70_spill] sm:$0xff] %v5028_v52  ;;  %v2543_v25 = vsel %vm1886_vm1, %v2316_v28, 0.0  ;;  %v1952_v18 = vsel %vm1886_vm1, %v5026_v21, 0.0  ;;  %v2317_v17 = vmul.f32 %v5026_v21, %v5026_v21  ;;  %v2547_v28 = vsel %vm1886_vm1, %v2318_v0, 0.0 }
 0x16c   :  { %v2544_v9 = vadd.f32 %v2543_v25, %v2542_v54  ;;  %v1953_v57 = vadd.f32 %v1952_v18, %v1951_v29  ;;  %v1956_v19 = vsel %vm1886_vm1, %v5022_v53, 0.0  ;;  %v2549_v24 = vsel %vm1886_vm1, %v2319_v49, 0.0 }
 0x16d   :  { %v2545_v10 = vsel %vm1886_vm1, %v2317_v17, 0.0 }
 0x16e   :  { %v1955_v34 = vadd.f32 %v1954_v45, %v1953_v57  ;;  %v2546_v20 = vadd.f32 %v2545_v10, %v2544_v9 }
 0x16f   :  { %v5045_v52 = vpop.f32.mrb[36].mxu0  ;;  %v5047_v21 = vpop.f32.mrb[36].mxu1 }
 0x170   :  { %7852 = vst [vmem:[#allocation71_spill] sm:$0xff] %v5045_v52  ;;  %7853 = vst [vmem:[#allocation72_spill] sm:$0xff] %v5047_v21  ;;  %v1957_v54 = vadd.f32 %v1956_v19, %v1955_v34  ;;  %v2548_v29 = vadd.f32 %v2547_v28, %v2546_v20  ;;  %v5049_v25 = vpop.f32.mrb[37].mxu0  ;;  %v5051_v18 = vpop.f32.mrb[37].mxu1  ;;  %v2322_v34 = vmul.f32 %v5045_v52, %v5045_v52 }
 0x171   :  { %7854 = vst [vmem:[#allocation73_spill] sm:$0xff] %v5049_v25  ;;  %7855 = vst [vmem:[#allocation74_spill] sm:$0xff] %v5051_v18  ;;  %v1958_v57 = vsel %vm1886_vm1, %v5049_v25, 0.0  ;;  %v2320_v9 = vmul.f32 %v5049_v25, %v5049_v25  ;;  %v5058_v17 = vpop.f32.mrb[38].mxu0  ;;  %v5060_v0 = vpop.f32.mrb[38].mxu1 }
 0x172   :  { %7856 = vst [vmem:[#allocation75_spill] sm:$0xff] %v5058_v17  ;;  %7857 = vst [vmem:[#allocation76_spill] sm:$0xff] %v5060_v0  ;;  %v2550_v45 = vadd.f32 %v2549_v24, %v2548_v29  ;;  %v1959_v10 = vadd.f32 %v1958_v57, %v1957_v54  ;;  %v5062_v19 = vpop.f32.mrb[39].mxu0  ;;  %v5064_v20 = vpop.f32.mrb[39].mxu1  ;;  %v1962_v24 = vsel %vm1886_vm1, %v5045_v52, 0.0  ;;  %v2323_v54 = vmul.f32 %v5058_v17, %v5058_v17 }
 0x173   :  { %7858 = vst [vmem:[#allocation77_spill] sm:$0xff] %v5062_v19  ;;  %7859 = vst [vmem:[#allocation78_spill] sm:$0xff] %v5064_v20  ;;  %v2551_v49 = vsel %vm1886_vm1, %v2320_v9, 0.0  ;;  %v1960_v28 = vsel %vm1886_vm1, %v5062_v19, 0.0  ;;  %v2321_v18 = vmul.f32 %v5062_v19, %v5062_v19  ;;  %v2555_v9 = vsel %vm1886_vm1, %v2322_v34, 0.0 }
 0x174   :  { %v2552_v25 = vadd.f32 %v2551_v49, %v2550_v45  ;;  %v1961_v21 = vadd.f32 %v1960_v28, %v1959_v10  ;;  %v1964_v53 = vsel %vm1886_vm1, %v5058_v17, 0.0  ;;  %v2557_v52 = vsel %vm1886_vm1, %v2323_v54, 0.0 }
 0x175   :  { %v2553_v29 = vsel %vm1886_vm1, %v2321_v18, 0.0 }
 0x176   :  { %v1963_v57 = vadd.f32 %v1962_v24, %v1961_v21  ;;  %v2554_v0 = vadd.f32 %v2553_v29, %v2552_v25 }
 0x177   :  { %v5081_v20 = vpop.f32.mrb[40].mxu0  ;;  %v5083_v19 = vpop.f32.mrb[40].mxu1 }
 0x178   :  { %7860 = vst [vmem:[#allocation79_spill] sm:$0xff] %v5081_v20  ;;  %7861 = vst [vmem:[#allocation80_spill] sm:$0xff] %v5083_v19  ;;  %v2556_v45 = vadd.f32 %v2555_v9, %v2554_v0  ;;  %v5085_v10 = vpop.f32.mrb[41].mxu0  ;;  %v1965_v49 = vadd.f32 %v1964_v53, %v1963_v57  ;;  %v5087_v28 = vpop.f32.mrb[41].mxu1  ;;  %v2326_v53 = vmul.f32 %v5081_v20, %v5081_v20 }
 0x179   :  { %7862 = vst [vmem:[#allocation81_spill] sm:$0xff] %v5085_v10  ;;  %7863 = vst [vmem:[#allocation82_spill] sm:$0xff] %v5087_v28  ;;  %v1966_v21 = vsel %vm1886_vm1, %v5085_v10, 0.0  ;;  %v2324_v25 = vmul.f32 %v5085_v10, %v5085_v10  ;;  %v5094_v18 = vpop.f32.mrb[42].mxu0  ;;  %v5096_v34 = vpop.f32.mrb[42].mxu1 }
 0x17a   :  { %7864 = vst [vmem:[#allocation83_spill] sm:$0xff] %v5094_v18  ;;  %7865 = vst [vmem:[#allocation84_spill] sm:$0xff] %v5096_v34  ;;  %v1967_v24 = vadd.f32 %v1966_v21, %v1965_v49  ;;  %v2558_v29 = vadd.f32 %v2557_v52, %v2556_v45  ;;  %v5098_v0 = vpop.f32.mrb[43].mxu0  ;;  %v5100_v9 = vpop.f32.mrb[43].mxu1  ;;  %v1970_v52 = vsel %vm1886_vm1, %v5081_v20, 0.0  ;;  %v2327_v45 = vmul.f32 %v5094_v18, %v5094_v18 }
 0x17b   :  { %7866 = vst [vmem:[#allocation85_spill] sm:$0xff] %v5098_v0  ;;  %7867 = vst [vmem:[#allocation86_spill] sm:$0xff] %v5100_v9  ;;  %v2559_v54 = vsel %vm1886_vm1, %v2324_v25, 0.0  ;;  %v1968_v57 = vsel %vm1886_vm1, %v5098_v0, 0.0  ;;  %v2325_v28 = vmul.f32 %v5098_v0, %v5098_v0  ;;  %v2563_v25 = vsel %vm1886_vm1, %v2326_v53, 0.0 }
 0x17c   :  { %v2560_v10 = vadd.f32 %v2559_v54, %v2558_v29  ;;  %v1969_v19 = vadd.f32 %v1968_v57, %v1967_v24  ;;  %v1972_v17 = vsel %vm1886_vm1, %v5094_v18, 0.0  ;;  %v2565_v20 = vsel %vm1886_vm1, %v2327_v45, 0.0 }
 0x17d   :  { %v2561_v49 = vsel %vm1886_vm1, %v2325_v28, 0.0 }
 0x17e   :  { %v1971_v21 = vadd.f32 %v1970_v52, %v1969_v19  ;;  %v2562_v34 = vadd.f32 %v2561_v49, %v2560_v10 }
 0x17f   :  { %v5117_v9 = vpop.f32.mrb[44].mxu0  ;;  %v5119_v0 = vpop.f32.mrb[44].mxu1 }
 0x180   :  { %7868 = vst [vmem:[#allocation87_spill] sm:$0xff] %v5117_v9  ;;  %7869 = vst [vmem:[#allocation88_spill] sm:$0xff] %v5119_v0  ;;  %v2564_v24 = vadd.f32 %v2563_v25, %v2562_v34  ;;  %v5121_v29 = vpop.f32.mrb[45].mxu0  ;;  %v1973_v54 = vadd.f32 %v1972_v17, %v1971_v21  ;;  %v5123_v57 = vpop.f32.mrb[45].mxu1  ;;  %v2330_v17 = vmul.f32 %v5117_v9, %v5117_v9 }
 0x181   :  { %7870 = vst [vmem:[#allocation89_spill] sm:$0xff] %v5121_v29  ;;  %7871 = vst [vmem:[#allocation90_spill] sm:$0xff] %v5123_v57  ;;  %v1974_v19 = vsel %vm1886_vm1, %v5121_v29, 0.0  ;;  %v2328_v10 = vmul.f32 %v5121_v29, %v5121_v29  ;;  %v5130_v28 = vpop.f32.mrb[46].mxu0  ;;  %v5132_v53 = vpop.f32.mrb[46].mxu1 }
 0x182   :  { %7872 = vst [vmem:[#allocation91_spill] sm:$0xff] %v5130_v28  ;;  %7873 = vst [vmem:[#allocation92_spill] sm:$0xff] %v5132_v53  ;;  %v1975_v52 = vadd.f32 %v1974_v19, %v1973_v54  ;;  %v2566_v49 = vadd.f32 %v2565_v20, %v2564_v24  ;;  %v5134_v34 = vpop.f32.mrb[47].mxu0  ;;  %v5136_v25 = vpop.f32.mrb[47].mxu1  ;;  %v1978_v20 = vsel %vm1886_vm1, %v5117_v9, 0.0  ;;  %v2331_v54 = vmul.f32 %v5130_v28, %v5130_v28 }
 0x183   :  { %7874 = vst [vmem:[#allocation93_spill] sm:$0xff] %v5134_v34  ;;  %7875 = vst [vmem:[#allocation94_spill] sm:$0xff] %v5136_v25  ;;  %v2567_v45 = vsel %vm1886_vm1, %v2328_v10, 0.0  ;;  %v1976_v21 = vsel %vm1886_vm1, %v5134_v34, 0.0  ;;  %v2329_v57 = vmul.f32 %v5134_v34, %v5134_v34  ;;  %v2571_v10 = vsel %vm1886_vm1, %v2330_v17, 0.0 }
 0x184   :  { %v2568_v29 = vadd.f32 %v2567_v45, %v2566_v49  ;;  %v1977_v0 = vadd.f32 %v1976_v21, %v1975_v52  ;;  %v2573_v17 = vsel %vm1886_vm1, %v2331_v54, 0.0 }
 0x185   :  { %v2569_v24 = vsel %vm1886_vm1, %v2329_v57, 0.0 }
 0x186   :  { %v1979_v19 = vadd.f32 %v1978_v20, %v1977_v0  ;;  %v2570_v53 = vadd.f32 %v2569_v24, %v2568_v29  ;;  %v1980_v29 = vsel %vm1886_vm1, %v5130_v28, 0.0 }
 0x187   :  { %v5151_v18 = vpop.f32.mrb[48].mxu0  ;;  %v5153_v25 = vpop.f32.mrb[48].mxu1 }
 0x188   :  { %7876 = vst [vmem:[#allocation95_spill] sm:$0xff] %v5151_v18  ;;  %7877 = vst [vmem:[#allocation96_spill] sm:$0xff] %v5153_v25  ;;  %v2572_v48 = vadd.f32 %v2571_v10, %v2570_v53  ;;  %v5157_v49 = vpop.f32.mrb[49].mxu0  ;;  %v5159_v45 = vpop.f32.mrb[49].mxu1  ;;  %v2939_v53 = vmax.f32 %v4738_v44, %v5153_v25  ;;  %v1981_v52 = vadd.f32 %v1980_v29, %v1979_v19  ;;  %v1986_v56 = vsel %vm1886_vm1, %v5151_v18, 0.0 }
 0x189   :  { %7878 = vst [vmem:[#allocation97_spill] sm:$0xff] %v5157_v49  ;;  %7879 = vst [vmem:[#allocation98_spill] sm:$0xff] %v5159_v45  ;;  %v4155_v21 = vpop.f32.mrb[50].mxu0  ;;  %v5163_v0 = vpop.f32.mrb[50].mxu1  ;;  %v1982_v57 = vsel %vm1886_vm1, %v5157_v49, 0.0  ;;  %v2332_v43 = vmul.f32 %v5157_v49, %v5157_v49  ;;  %v2334_v33 = vmul.f32 %v5151_v18, %v5151_v18 }
 0x18a   :  { %7880 = vst [vmem:[#allocation99_spill] sm:$0xff] %v5163_v0  ;;  %v5172_v24 = vpop.f32.mrb[51].mxu0  ;;  %v5174_v10 = vpop.f32.mrb[51].mxu1  ;;  %v2574_v45 = vadd.f32 %v2573_v17, %v2572_v48  ;;  %v1983_v28 = vadd.f32 %v1982_v57, %v1981_v52  ;;  %v2889_v9 = vmax.f32 %v4722_v36, %v4155_v21  ;;  %v3036_v20 = vmin.f32 %v4722_v36, %v4155_v21 }
 0x18b   :  { %7881 = vst [vmem:[#allocation100_spill] sm:$0xff] %v5172_v24  ;;  %7882 = vst [vmem:[#allocation101_spill] sm:$0xff] %v5174_v10  ;;  %v2575_v54 = vsel %vm1886_vm1, %v2332_v43, 0.0  ;;  %v1984_v43 = vsel %vm1886_vm1, %v5172_v24, 0.0  ;;  %v2333_v52 = vmul.f32 %v5172_v24, %v5172_v24  ;;  %v2938_v36 = vmax.f32 %v4728_v39, %v5174_v10 }
 0x18c   :  { %v2576_v34 = vadd.f32 %v2575_v54, %v2574_v45  ;;  %v2335_v54 = vmul.f32 %v4155_v21, %v4155_v21  ;;  %v1985_v29 = vadd.f32 %v1984_v43, %v1983_v28  ;;  %v3085_v45 = vmin.f32 %v4728_v39, %v5174_v10 }
 0x18d   :  { %v2577_v55 = vsel %vm1886_vm1, %v2333_v52, 0.0  ;;  %v2579_v28 = vsel %vm1886_vm1, %v2334_v33, 0.0  ;;  %v5217_v13 = vmax.f32 %v2889_v9, %v2938_v36  ;;  %v1988_v50 = vsel %vm1886_vm1, %v4155_v21, 0.0 }
 0x18e   :  { %v1987_v43 = vadd.f32 %v1986_v56, %v1985_v29  ;;  %v2578_v14 = vadd.f32 %v2577_v55, %v2576_v34  ;;  %v5219_v51 = vmin.f32 %v3036_v20, %v3085_v45  ;;  %v2581_v10 = vsel %vm1886_vm1, %v2335_v54, 0.0 }
 0x18f   :  { %v5189_v30 = vpop.f32.mrb[52].mxu0  ;;  %v5191_v48 = vpop.f32.mrb[52].mxu1  ;;  %7887 = vst [vmem:[#allocation106_spill] sm:$0xff] %v5217_v13 }
 0x190   :  { %7883 = vst [vmem:[#allocation102_spill] sm:$0xff] %v5191_v48  ;;  %v1309_v57 = vpop.f32.mrb[53].mxu0  ;;  %v5201_v17 = vpop.f32.mrb[53].mxu1  ;;  %7888 = vst [vmem:[#allocation107_spill] sm:$0xff] %v5219_v51  ;;  %v2892_v52 = vmax.f32 %v4774_v7, %v5189_v30  ;;  %v3039_v18 = vmin.f32 %v4774_v7, %v5189_v30  ;;  %v2580_v39 = vadd.f32 %v2579_v28, %v2578_v14 }
 0x191   :  { %7884 = vst [vmem:[#allocation103_spill] sm:$0xff] %v5201_v17  ;;  %v5203_v19 = vpop.f32.mrb[54].mxu0  ;;  %v5205_v49 = vpop.f32.mrb[54].mxu1  ;;  %v1989_v56 = vadd.f32 %v1988_v50, %v1987_v43  ;;  %v1990_v9 = vsel %vm1886_vm1, %v1309_v57, 0.0  ;;  %v2336_v34 = vmul.f32 %v1309_v57, %v1309_v57  ;;  %v2890_v29 = vmax.f32 %v4732_v41, %v1309_v57 }
 0x192   :  { %7885 = vst [vmem:[#allocation104_spill] sm:$0xff] %v5205_v49  ;;  %v1312_v24 = vpop.f32.mrb[55].mxu0  ;;  %v5214_v38 = vpop.f32.mrb[55].mxu1  ;;  %v2582_v20 = vadd.f32 %v2581_v10, %v2580_v39  ;;  %v3037_v14 = vmin.f32 %v4732_v41, %v1309_v57  ;;  %v2941_v39 = vmax.f32 %v4734_v42, %v5201_v17  ;;  %v3088_v10 = vmin.f32 %v4734_v42, %v5201_v17 }
 0x193   :  { %7886 = vst [vmem:[#allocation105_spill] sm:$0xff] %v5214_v38  ;;  %v1991_v21 = vadd.f32 %v1990_v9, %v1989_v56  ;;  %v2583_v28 = vsel %vm1886_vm1, %v2336_v34, 0.0  ;;  %v5243_v50 = vmax.f32 %v2890_v29, %v2939_v53  ;;  %v7893_v41 = vmin.f32 %v4738_v44, %v5153_v25 }
 0x194   :  { %v2584_v56 = vadd.f32 %v2583_v28, %v2582_v20  ;;  %v5262_v34 = vmax.f32 %v2892_v52, %v2941_v39  ;;  %v5264_v29 = vmin.f32 %v3039_v18, %v3088_v10  ;;  %v2893_v33 = vmax.f32 %v4757_v58, %v5203_v19 }
 0x195   :  { %7891 = vst [vmem:[#allocation110_spill] sm:$0xff] %v5243_v50  ;;  %v5256_v57 = vmin.f32 %v3037_v14, %v7893_v41  ;;  %v3040_v51 = vmin.f32 %v4757_v58, %v5203_v19  ;;  %v2338_v14 = vmul.f32 %v5189_v30, %v5189_v30  ;;  %v1992_v52 = vsel %vm1886_vm1, %v1312_v24, 0.0 }
 0x196   :  { %7896 = vst [vmem:[#allocation114_spill] sm:$0xff] %v5262_v34  ;;  %7897 = vst [vmem:[#allocation115_spill] sm:$0xff] %v5264_v29  ;;  %v2337_v39 = vmul.f32 %v1312_v24, %v1312_v24  ;;  %v1993_v18 = vadd.f32 %v1992_v52, %v1991_v21  ;;  %v2891_v10 = vmax.f32 %v4761_v62, %v1312_v24  ;;  %v1994_v58 = vsel %vm1886_vm1, %v5189_v30, 0.0 }
 0x197   :  { %v5233_v36 = vpop.f32.mrb[56].mxu0  ;;  %v5235_v7 = vpop.f32.mrb[56].mxu1  ;;  %7894 = vst [vmem:[#allocation112_spill] sm:$0xff] %v5256_v57  ;;  %v3038_v41 = vmin.f32 %v4761_v62, %v1312_v24  ;;  %v2339_v20 = vmul.f32 %v5203_v19, %v5203_v19  ;;  %v2942_v57 = vmax.f32 %v4763_v63, %v5214_v38  ;;  %v7899_v62 = vmax.f32 %v4724_v37, %v5163_v0 }
 0x198   :  { %7889 = vst [vmem:[#allocation108_spill] sm:$0xff] %v5235_v7  ;;  %v5238_v45 = vpop.f32.mrb[57].mxu0  ;;  %v5240_v54 = vpop.f32.mrb[57].mxu1  ;;  %v2585_v29 = vsel %vm1886_vm1, %v2337_v39, 0.0  ;;  %v1995_v21 = vadd.f32 %v1994_v58, %v1993_v18  ;;  %v7901_v30 = vmin.f32 %v4724_v37, %v5163_v0  ;;  %v2587_v17 = vsel %vm1886_vm1, %v2338_v14, 0.0 }
 0x199   :  { %7890 = vst [vmem:[#allocation109_spill] sm:$0xff] %v5240_v54  ;;  %v5249_v43 = vpop.f32.mrb[58].mxu0  ;;  %v5251_v55 = vpop.f32.mrb[58].mxu1  ;;  %v2586_v52 = vadd.f32 %v2585_v29, %v2584_v56  ;;  %v5293_v24 = vmax.f32 %v2891_v10, %v7899_v62  ;;  %v5305_v25 = vmax.f32 %v2893_v33, %v2942_v57  ;;  %v3089_v56 = vmin.f32 %v4763_v63, %v5214_v38 }
 0x19a   :  { %7892 = vst [vmem:[#allocation111_spill] sm:$0xff] %v5251_v55  ;;  %v5258_v9 = vpop.f32.mrb[59].mxu0  ;;  %v5260_v53 = vpop.f32.mrb[59].mxu1  ;;  %v5298_v50 = vmin.f32 %v3038_v41, %v7901_v30  ;;  %v2896_v41 = vmax.f32 %v4810_v35, %v5233_v36  ;;  %v3043_v58 = vmin.f32 %v4810_v35, %v5233_v36  ;;  %v1996_v33 = vsel %vm1886_vm1, %v5203_v19, 0.0 }
 0x19b   :  { %7895 = vst [vmem:[#allocation113_spill] sm:$0xff] %v5260_v53  ;;  %7900 = vst [vmem:[#allocation117_spill] sm:$0xff] %v5293_v24  ;;  %v2588_v10 = vadd.f32 %v2587_v17, %v2586_v52  ;;  %v5323_v57 = vmin.f32 %v3040_v51, %v3089_v56  ;;  %v2589_v17 = vsel %vm1886_vm1, %v2339_v20, 0.0  ;;  %v1998_v35 = vsel %vm1886_vm1, %v5238_v45, 0.0 }
 0x19c   :  { %7902 = vst [vmem:[#allocation118_spill] sm:$0xff] %v5298_v50  ;;  %7904 = vst [vmem:[#allocation120_spill] sm:$0xff] %v5305_v25  ;;  %v1997_v50 = vadd.f32 %v1996_v33, %v1995_v21  ;;  %v2340_v25 = vmul.f32 %v5238_v45, %v5238_v45  ;;  %v2894_v51 = vmax.f32 %v4770_v3, %v5238_v45 }
 0x19d   :  { %7907 = vst [vmem:[#allocation123_spill] sm:$0xff] %v5323_v57  ;;  %v2590_v24 = vadd.f32 %v2589_v17, %v2588_v10  ;;  %v3041_v56 = vmin.f32 %v4770_v3, %v5238_v45  ;;  %v7908_v52 = vmax.f32 %v4776_v8, %v5191_v48  ;;  %v2945_v33 = vmax.f32 %v4772_v4, %v5240_v54 }
 0x19e   :  { %v1999_v19 = vadd.f32 %v1998_v35, %v1997_v50  ;;  %v2591_v20 = vsel %vm1886_vm1, %v2340_v25, 0.0  ;;  %v3092_v10 = vmin.f32 %v4772_v4, %v5240_v54  ;;  %v7911_v3 = vmin.f32 %v4776_v8, %v5191_v48 }
 0x19f   :  { %v5286_v28 = vpop.f32.mrb[60].mxu0  ;;  %v5288_v34 = vpop.f32.mrb[60].mxu1  ;;  %v5342_v21 = vmax.f32 %v2894_v51, %v7908_v52  ;;  %v2592_v50 = vadd.f32 %v2591_v20, %v2590_v24  ;;  %v5361_v35 = vmax.f32 %v2896_v41, %v2945_v33  ;;  %v2897_v57 = vmax.f32 %v4793_v22, %v5249_v43 }
 0x1a0   :  { %7898 = vst [vmem:[#allocation116_spill] sm:$0xff] %v5288_v34  ;;  %v5300_v39 = vpop.f32.mrb[61].mxu0  ;;  %v5302_v13 = vpop.f32.mrb[61].mxu1  ;;  %v5355_v25 = vmin.f32 %v3041_v56, %v7911_v3  ;;  %v5363_v51 = vmin.f32 %v3043_v58, %v3092_v10  ;;  %v3044_v24 = vmin.f32 %v4793_v22, %v5249_v43  ;;  %v2342_v41 = vmul.f32 %v5233_v36, %v5233_v36 }
 0x1a1   :  { %7903 = vst [vmem:[#allocation119_spill] sm:$0xff] %v5302_v13  ;;  %v5309_v29 = vpop.f32.mrb[62].mxu0  ;;  %v5311_v18 = vpop.f32.mrb[62].mxu1  ;;  %7909 = vst [vmem:[#allocation124_spill] sm:$0xff] %v5342_v21  ;;  %v2000_v33 = vsel %vm1886_vm1, %v5258_v9, 0.0  ;;  %v2341_v10 = vmul.f32 %v5258_v9, %v5258_v9  ;;  %v2895_v56 = vmax.f32 %v4797_v26, %v5258_v9  ;;  %v2946_v48 = vmax.f32 %v4799_v27, %v5260_v53 }
 0x1a2   :  { %7905 = vst [vmem:[#allocation121_spill] sm:$0xff] %v5311_v18  ;;  %v5317_v62 = vpop.f32.mrb[63].mxu0  ;;  %v5319_v30 = vpop.f32.mrb[63].mxu1  ;;  %7912 = vst [vmem:[#allocation126_spill] sm:$0xff] %v5355_v25  ;;  %v2001_v22 = vadd.f32 %v2000_v33, %v1999_v19  ;;  %v2002_v25 = vsel %vm1886_vm1, %v5233_v36, 0.0  ;;  %v7918_v19 = vmax.f32 %v4759_v59, %v5205_v49  ;;  %v2595_v36 = vsel %vm1886_vm1, %v2342_v41, 0.0 }
 0x1a3   :  { %7906 = vst [vmem:[#allocation122_spill] sm:$0xff] %v5319_v30  ;;  %7914 = vst [vmem:[#allocation128_spill] sm:$0xff] %v5361_v35  ;;  %v2343_v35 = vmul.f32 %v5249_v43, %v5249_v43  ;;  %v2593_v58 = vsel %vm1886_vm1, %v2341_v10, 0.0  ;;  %v5409_v4 = vmax.f32 %v2897_v57, %v2946_v48  ;;  %v3093_v10 = vmin.f32 %v4799_v27, %v5260_v53 }
 0x1a4   :  { %7915 = vst [vmem:[#allocation129_spill] sm:$0xff] %v5363_v51  ;;  %v3042_v51 = vmin.f32 %v4797_v26, %v5258_v9  ;;  %v2003_v38 = vadd.f32 %v2002_v25, %v2001_v22  ;;  %v2594_v0 = vadd.f32 %v2593_v58, %v2592_v50  ;;  %v5401_v33 = vmax.f32 %v2895_v56, %v7918_v19 }
 0x1a5   :  { %v7920_v26 = vmin.f32 %v4759_v59, %v5205_v49  ;;  %7922 = vst [vmem:[#allocation134_spill] sm:$0xff] %v5409_v4  ;;  %v2900_v56 = vmax.f32 %v4846_v15, %v5286_v28  ;;  %v3047_v58 = vmin.f32 %v4846_v15, %v5286_v28  ;;  %v2004_v48 = vsel %vm1886_vm1, %v5249_v43, 0.0 }
 0x1a6   :  { %7919 = vst [vmem:[#allocation132_spill] sm:$0xff] %v5401_v33  ;;  %v2596_v25 = vadd.f32 %v2595_v36, %v2594_v0  ;;  %v5427_v57 = vmin.f32 %v3044_v24, %v3093_v10  ;;  %v2005_v36 = vadd.f32 %v2004_v48, %v2003_v38  ;;  %v2344_v24 = vmul.f32 %v5300_v39, %v5300_v39 }
 0x1a7   :  { %v5348_v17 = vpop.f32.mrb[64].mxu0  ;;  %v5350_v14 = vpop.f32.mrb[64].mxu1  ;;  %v5406_v9 = vmin.f32 %v3042_v51, %v7920_v26  ;;  %v2597_v26 = vsel %vm1886_vm1, %v2343_v35, 0.0  ;;  %v2898_v41 = vmax.f32 %v4806_v31, %v5300_v39  ;;  %v3045_v35 = vmin.f32 %v4806_v31, %v5300_v39 }
 0x1a8   :  { %7910 = vst [vmem:[#allocation125_spill] sm:$0xff] %v5350_v14  ;;  %v5357_v45 = vpop.f32.mrb[65].mxu0  ;;  %v5359_v52 = vpop.f32.mrb[65].mxu1  ;;  %7925 = vst [vmem:[#allocation137_spill] sm:$0xff] %v5427_v57  ;;  %v2598_v10 = vadd.f32 %v2597_v26, %v2596_v25  ;;  %v2599_v38 = vsel %vm1886_vm1, %v2344_v24, 0.0  ;;  %v7928_v48 = vmax.f32 %v4812_v40, %v5235_v7  ;;  %v2949_v33 = vmax.f32 %v4808_v32, %v5302_v13 }
 0x1a9   :  { %7913 = vst [vmem:[#allocation127_spill] sm:$0xff] %v5359_v52  ;;  %v5367_v21 = vpop.f32.mrb[66].mxu0  ;;  %v5369_v54 = vpop.f32.mrb[66].mxu1  ;;  %7921 = vst [vmem:[#allocation133_spill] sm:$0xff] %v5406_v9  ;;  %v2006_v9 = vsel %vm1886_vm1, %v5300_v39, 0.0  ;;  %v3096_v25 = vmin.f32 %v4808_v32, %v5302_v13  ;;  %v2010_v13 = vsel %vm1886_vm1, %v5286_v28, 0.0  ;;  %v7939_v32 = vmin.f32 %v4795_v23, %v5251_v55 }
 0x1aa   :  { %7916 = vst [vmem:[#allocation130_spill] sm:$0xff] %v5369_v54  ;;  %v5375_v20 = vpop.f32.mrb[67].mxu0  ;;  %v5377_v3 = vpop.f32.mrb[67].mxu1  ;;  %v2007_v57 = vadd.f32 %v2006_v9, %v2005_v36  ;;  %v5454_v15 = vmax.f32 %v2898_v41, %v7928_v48  ;;  %v2600_v26 = vadd.f32 %v2599_v38, %v2598_v10  ;;  %v7930_v9 = vmin.f32 %v4812_v40, %v5235_v7 }
 0x1ab   :  { %7917 = vst [vmem:[#allocation131_spill] sm:$0xff] %v5377_v3  ;;  %v5465_v31 = vmax.f32 %v2900_v56, %v2949_v33  ;;  %v5467_v39 = vmin.f32 %v3047_v58, %v3096_v25  ;;  %v2901_v41 = vmax.f32 %v4829_v60, %v5309_v29  ;;  %v2346_v33 = vmul.f32 %v5286_v28, %v5286_v28 }
 0x1ac   :  { %7929 = vst [vmem:[#allocation140_spill] sm:$0xff] %v5454_v15  ;;  %v5463_v36 = vmin.f32 %v3045_v35, %v7930_v9  ;;  %v3048_v15 = vmin.f32 %v4829_v60, %v5309_v29  ;;  %v2008_v58 = vsel %vm1886_vm1, %v5317_v62, 0.0  ;;  %v2345_v25 = vmul.f32 %v5317_v62, %v5317_v62 }
 0x1ad   :  { %7932 = vst [vmem:[#allocation142_spill] sm:$0xff] %v5465_v31  ;;  %7933 = vst [vmem:[#allocation143_spill] sm:$0xff] %v5467_v39  ;;  %v2009_v10 = vadd.f32 %v2008_v58, %v2007_v57  ;;  %v2899_v39 = vmax.f32 %v4833_v2, %v5317_v62  ;;  %v2347_v7 = vmul.f32 %v5309_v29, %v5309_v29  ;;  %v2603_v28 = vsel %vm1886_vm1, %v2346_v33, 0.0 }
 0x1ae   :  { %7931 = vst [vmem:[#allocation141_spill] sm:$0xff] %v5463_v36  ;;  %v3046_v36 = vmin.f32 %v4833_v2, %v5317_v62  ;;  %v2601_v53 = vsel %vm1886_vm1, %v2345_v25, 0.0  ;;  %v2950_v57 = vmax.f32 %v4835_v5, %v5319_v30  ;;  %v7937_v2 = vmax.f32 %v4795_v23, %v5251_v55 }
 0x1af   :  { %v5413_v8 = vpop.f32.mrb[68].mxu0  ;;  %v5415_v50 = vpop.f32.mrb[68].mxu1  ;;  %v2011_v58 = vadd.f32 %v2010_v13, %v2009_v10  ;;  %v2602_v49 = vadd.f32 %v2601_v53, %v2600_v26  ;;  %v3097_v25 = vmin.f32 %v4835_v5, %v5319_v30  ;;  %v2904_v13 = vmax.f32 %v4882_v1, %v5348_v17 }
 0x1b0   :  { %7923 = vst [vmem:[#allocation135_spill] sm:$0xff] %v5415_v50  ;;  %v5421_v51 = vpop.f32.mrb[69].mxu0  ;;  %v5423_v22 = vpop.f32.mrb[69].mxu1  ;;  %v5513_v62 = vmax.f32 %v2899_v39, %v7937_v2  ;;  %v5518_v40 = vmin.f32 %v3046_v36, %v7939_v32  ;;  %v5521_v27 = vmax.f32 %v2901_v41, %v2950_v57  ;;  %v3051_v53 = vmin.f32 %v4882_v1, %v5348_v17 }
 0x1b1   :  { %7924 = vst [vmem:[#allocation136_spill] sm:$0xff] %v5423_v22  ;;  %v5431_v19 = vpop.f32.mrb[70].mxu0  ;;  %v5433_v0 = vpop.f32.mrb[70].mxu1  ;;  %v2604_v59 = vadd.f32 %v2603_v28, %v2602_v49  ;;  %v2012_v26 = vsel %vm1886_vm1, %v5309_v29, 0.0  ;;  %v5531_v39 = vmin.f32 %v3048_v15, %v3097_v25  ;;  %v2605_v49 = vsel %vm1886_vm1, %v2347_v7, 0.0 }
 0x1b2   :  { %7926 = vst [vmem:[#allocation138_spill] sm:$0xff] %v5433_v0  ;;  %v5440_v4 = vpop.f32.mrb[71].mxu0  ;;  %v5442_v43 = vpop.f32.mrb[71].mxu1  ;;  %7938 = vst [vmem:[#allocation147_spill] sm:$0xff] %v5513_v62  ;;  %v2013_v33 = vadd.f32 %v2012_v26, %v2011_v58  ;;  %v2014_v1 = vsel %vm1886_vm1, %v5357_v45, 0.0  ;;  %v2348_v15 = vmul.f32 %v5357_v45, %v5357_v45  ;;  %v2902_v28 = vmax.f32 %v4842_v11, %v5357_v45 }
 0x1b3   :  { %7927 = vst [vmem:[#allocation139_spill] sm:$0xff] %v5442_v43  ;;  %7940 = vst [vmem:[#allocation148_spill] sm:$0xff] %v5518_v40  ;;  %v2606_v2 = vadd.f32 %v2605_v49, %v2604_v59  ;;  %v3049_v58 = vmin.f32 %v4842_v11, %v5357_v45  ;;  %v7946_v59 = vmax.f32 %v4848_v16, %v5288_v34 }
 0x1b4   :  { %7941 = vst [vmem:[#allocation149_spill] sm:$0xff] %v5521_v27  ;;  %7942 = vst [vmem:[#allocation150_spill] sm:$0xff] %v5531_v39  ;;  %v2015_v10 = vadd.f32 %v2014_v1, %v2013_v33  ;;  %v2607_v39 = vsel %vm1886_vm1, %v2348_v15, 0.0  ;;  %v2953_v40 = vmax.f32 %v4844_v12, %v5359_v52  ;;  %v3100_v33 = vmin.f32 %v4844_v12, %v5359_v52 }
 0x1b5   :  { %v5566_v49 = vmax.f32 %v2902_v28, %v7946_v59  ;;  %v2608_v1 = vadd.f32 %v2607_v39, %v2606_v2  ;;  %v7948_v11 = vmin.f32 %v4848_v16, %v5288_v34  ;;  %v2905_v28 = vmax.f32 %v4865_v46, %v5367_v21 }
 0x1b6   :  { %v5577_v27 = vmax.f32 %v2904_v13, %v2953_v40  ;;  %v5579_v15 = vmin.f32 %v3051_v53, %v3100_v33  ;;  %v3052_v59 = vmin.f32 %v4865_v46, %v5367_v21  ;;  %v2350_v39 = vmul.f32 %v5348_v17, %v5348_v17  ;;  %v7952_v33 = vld [vmem:[#allocation34_spill] sm:$0xff] }
 0x1b7   :  { %v5471_v24 = vpop.f32.mrb[72].mxu0  ;;  %v5473_v48 = vpop.f32.mrb[72].mxu1  ;;  %7947 = vst [vmem:[#allocation154_spill] sm:$0xff] %v5566_v49  ;;  %v5575_v45 = vmin.f32 %v3049_v58, %v7948_v11  ;;  %v2016_v40 = vsel %vm1886_vm1, %v5375_v20, 0.0  ;;  %v2349_v13 = vmul.f32 %v5375_v20, %v5375_v20  ;;  %v2903_v11 = vmax.f32 %v7952_v33, %v5375_v20 }
 0x1b8   :  { %7934 = vst [vmem:[#allocation144_spill] sm:$0xff] %v5473_v48  ;;  %v5479_v38 = vpop.f32.mrb[73].mxu0  ;;  %v5481_v35 = vpop.f32.mrb[73].mxu1  ;;  %7950 = vst [vmem:[#allocation156_spill] sm:$0xff] %v5577_v27  ;;  %v2017_v46 = vadd.f32 %v2016_v40, %v2015_v10  ;;  %v3050_v49 = vmin.f32 %v7952_v33, %v5375_v20  ;;  %v2351_v27 = vmul.f32 %v5367_v21, %v5367_v21  ;;  %v7953_v10 = vld [vmem:[#allocation35_spill] sm:$0xff]  ;;  %v2611_v5 = vsel %vm1886_vm1, %v2350_v39, 0.0 }
 0x1b9   :  { %7935 = vst [vmem:[#allocation145_spill] sm:$0xff] %v5481_v35  ;;  %v5491_v60 = vpop.f32.mrb[74].mxu0  ;;  %v5493_v9 = vpop.f32.mrb[74].mxu1  ;;  %7949 = vst [vmem:[#allocation155_spill] sm:$0xff] %v5575_v45  ;;  %v2018_v45 = vsel %vm1886_vm1, %v5348_v17, 0.0  ;;  %v2609_v62 = vsel %vm1886_vm1, %v2349_v13, 0.0  ;;  %v2954_v40 = vmax.f32 %v7953_v10, %v5377_v3  ;;  %v7955_v30 = vmax.f32 %v4831_v61, %v5311_v18 }
 0x1ba   :  { %v5499_v31 = vpop.f32.mrb[75].mxu0  ;;  %v5501_v56 = vpop.f32.mrb[75].mxu1  ;;  %7951 = vst [vmem:[#allocation157_spill] sm:$0xff] %v5579_v15  ;;  %v2019_v20 = vadd.f32 %v2018_v45, %v2017_v46  ;;  %v2610_v33 = vadd.f32 %v2609_v62, %v2608_v1  ;;  %v7957_v17 = vmin.f32 %v4831_v61, %v5311_v18  ;;  %v3101_v62 = vmin.f32 %v7953_v10, %v5377_v3 }
 0x1bb   :  { %7936 = vst [vmem:[#allocation146_spill] sm:$0xff] %v5501_v56  ;;  %v5621_v55 = vmax.f32 %v2903_v11, %v7955_v30  ;;  %v5633_v23 = vmax.f32 %v2905_v28, %v2954_v40  ;;  %v7960_v30 = vld [vmem:[#allocation45_spill] sm:$0xff]  ;;  %v2613_v28 = vsel %vm1886_vm1, %v2351_v27, 0.0  ;;  %v7967_v3 = vmin.f32 %v4884_v6, %v5350_v14 }
 0x1bc   :  { %v5626_v12 = vmin.f32 %v3050_v49, %v7957_v17  ;;  %v2612_v1 = vadd.f32 %v2611_v5, %v2610_v33  ;;  %v2908_v45 = vmax.f32 %v7960_v30, %v5413_v8  ;;  %v3055_v46 = vmin.f32 %v7960_v30, %v5413_v8  ;;  %v7962_v17 = vld [vmem:[#allocation46_spill] sm:$0xff] }
 0x1bd   :  { %7956 = vst [vmem:[#allocation158_spill] sm:$0xff] %v5621_v55  ;;  %7959 = vst [vmem:[#allocation160_spill] sm:$0xff] %v5633_v23  ;;  %v2020_v49 = vsel %vm1886_vm1, %v5367_v21, 0.0  ;;  %v5643_v11 = vmin.f32 %v3052_v59, %v3101_v62  ;;  %v2022_v33 = vsel %vm1886_vm1, %v5421_v51, 0.0  ;;  %v2352_v30 = vmul.f32 %v5421_v51, %v5421_v51  ;;  %v7963_v21 = vld [vmem:[#allocation36_spill] sm:$0xff]  ;;  %v7966_v23 = vld [vmem:[#allocation37_spill] sm:$0xff] }
 0x1be   :  { %7958 = vst [vmem:[#allocation159_spill] sm:$0xff] %v5626_v12  ;;  %v2021_v5 = vadd.f32 %v2020_v49, %v2019_v20  ;;  %v2614_v12 = vadd.f32 %v2613_v28, %v2612_v1  ;;  %v2906_v59 = vmax.f32 %v7963_v21, %v5421_v51  ;;  %v3053_v27 = vmin.f32 %v7963_v21, %v5421_v51 }
 0x1bf   :  { %v5535_v36 = vpop.f32.mrb[76].mxu0  ;;  %v5537_v41 = vpop.f32.mrb[76].mxu1  ;;  %7961 = vst [vmem:[#allocation45_spill] sm:$0xff] %v5643_v11  ;;  %v2615_v49 = vsel %vm1886_vm1, %v2352_v30, 0.0  ;;  %v7964_v1 = vmax.f32 %v4884_v6, %v5350_v14  ;;  %v2957_v55 = vmax.f32 %v7966_v23, %v5423_v22 }
 0x1c0   :  { %7943 = vst [vmem:[#allocation151_spill] sm:$0xff] %v5537_v41  ;;  %v5544_v57 = vpop.f32.mrb[77].mxu0  ;;  %v5546_v29 = vpop.f32.mrb[77].mxu1  ;;  %v2023_v39 = vadd.f32 %v2022_v33, %v2021_v5  ;;  %v3104_v5 = vmin.f32 %v7966_v23, %v5423_v22  ;;  %v2616_v21 = vadd.f32 %v2615_v49, %v2614_v12  ;;  %v5683_v30 = vmin.f32 %v3053_v27, %v7967_v3  ;;  %v7971_v22 = vld [vmem:[#allocation39_spill] sm:$0xff]  ;;  %v7972_v12 = vld [vmem:[#allocation40_spill] sm:$0xff] }
 0x1c1   :  { %7944 = vst [vmem:[#allocation152_spill] sm:$0xff] %v5546_v29  ;;  %v5552_v25 = vpop.f32.mrb[78].mxu0  ;;  %v5554_v7 = vpop.f32.mrb[78].mxu1  ;;  %v5670_v28 = vmax.f32 %v2906_v59, %v7964_v1  ;;  %v5689_v1 = vmax.f32 %v2908_v45, %v2957_v55  ;;  %v2909_v23 = vmax.f32 %v7971_v22, %v5431_v19  ;;  %v3056_v10 = vmin.f32 %v7971_v22, %v5431_v19 }
 0x1c2   :  { %7945 = vst [vmem:[#allocation153_spill] sm:$0xff] %v5554_v7  ;;  %v5558_v26 = vpop.f32.mrb[79].mxu0  ;;  %v5560_v32 = vpop.f32.mrb[79].mxu1  ;;  %7968 = vst [vmem:[#allocation161_spill] sm:$0xff] %v5683_v30  ;;  %v2354_v3 = vmul.f32 %v5413_v8, %v5413_v8  ;;  %v2024_v55 = vsel %vm1886_vm1, %v5440_v4, 0.0  ;;  %v2353_v45 = vmul.f32 %v5440_v4, %v5440_v4  ;;  %v2026_v49 = vsel %vm1886_vm1, %v5413_v8, 0.0 }
 0x1c3   :  { %7965 = vst [vmem:[#allocation36_spill] sm:$0xff] %v5670_v28  ;;  %7969 = vst [vmem:[#allocation162_spill] sm:$0xff] %v5689_v1  ;;  %v5691_v28 = vmin.f32 %v3055_v46, %v3104_v5  ;;  %v2025_v46 = vadd.f32 %v2024_v55, %v2023_v39  ;;  %v7973_v5 = vld [vmem:[#allocation41_spill] sm:$0xff]  ;;  %v2355_v30 = vmul.f32 %v5431_v19, %v5431_v19  ;;  %v7974_v1 = vld [vmem:[#allocation42_spill] sm:$0xff] }
 0x1c4   :  { %v3054_v22 = vmin.f32 %v7973_v5, %v5440_v4  ;;  %v2617_v27 = vsel %vm1886_vm1, %v2353_v45, 0.0  ;;  %v2958_v14 = vmax.f32 %v7974_v1, %v5442_v43  ;;  %v7978_v8 = vmin.f32 %v4867_v47, %v5369_v54 }
 0x1c5   :  { %7970 = vst [vmem:[#allocation163_spill] sm:$0xff] %v5691_v28  ;;  %v2907_v28 = vmax.f32 %v7973_v5, %v5440_v4  ;;  %v2027_v55 = vadd.f32 %v2026_v49, %v2025_v46  ;;  %v2618_v61 = vadd.f32 %v2617_v27, %v2616_v21  ;;  %v7976_v4 = vmax.f32 %v4867_v47, %v5369_v54  ;;  %v7982_v46 = vld [vmem:[#allocation53_spill] sm:$0xff] }
 0x1c6   :  { %v5730_v63 = vmin.f32 %v3054_v22, %v7978_v8  ;;  %v2619_v37 = vsel %vm1886_vm1, %v2354_v3, 0.0  ;;  %v5737_v44 = vmax.f32 %v2909_v23, %v2958_v14  ;;  %v3105_v21 = vmin.f32 %v7974_v1, %v5442_v43  ;;  %v7985_v3 = vld [vmem:[#allocation54_spill] sm:$0xff] }
 0x1c7   :  { %v5595_v53 = vpop.f32.mrb[80].mxu0  ;;  %v5597_v58 = vpop.f32.mrb[80].mxu1  ;;  %v5725_v5 = vmax.f32 %v2907_v28, %v7976_v4  ;;  %v2620_v27 = vadd.f32 %v2619_v37, %v2618_v61  ;;  %v2912_v22 = vmax.f32 %v7982_v46, %v5471_v24  ;;  %v3059_v4 = vmin.f32 %v7982_v46, %v5471_v24 }
 0x1c8   :  { %v5603_v15 = vpop.f32.mrb[81].mxu0  ;;  %v5605_v2 = vpop.f32.mrb[81].mxu1  ;;  %7979 = vst [vmem:[#allocation41_spill] sm:$0xff] %v5730_v63  ;;  %7980 = vst [vmem:[#allocation164_spill] sm:$0xff] %v5737_v44  ;;  %v2028_v23 = vsel %vm1886_vm1, %v5431_v19, 0.0  ;;  %v5755_v14 = vmin.f32 %v3056_v10, %v3105_v21  ;;  %v2621_v37 = vsel %vm1886_vm1, %v2355_v30, 0.0  ;;  %v2356_v43 = vmul.f32 %v5479_v38, %v5479_v38 }
 0x1c9   :  { %v5614_v52 = vpop.f32.mrb[82].mxu0  ;;  %v5616_v34 = vpop.f32.mrb[82].mxu1  ;;  %7977 = vst [vmem:[#allocation40_spill] sm:$0xff] %v5725_v5  ;;  %v2029_v5 = vadd.f32 %v2028_v23, %v2027_v55  ;;  %v2030_v46 = vsel %vm1886_vm1, %v5479_v38, 0.0  ;;  %v2622_v54 = vadd.f32 %v2621_v37, %v2620_v27  ;;  %v7986_v19 = vld [vmem:[#allocation43_spill] sm:$0xff]  ;;  %v7987_v61 = vmax.f32 %v7962_v17, %v5415_v50  ;;  %v7989_v23 = vld [vmem:[#allocation44_spill] sm:$0xff] }
 0x1ca   :  { %7954 = vst [vmem:[#allocation34_spill] sm:$0xff] %v5616_v34  ;;  %v5628_v13 = vpop.f32.mrb[83].mxu0  ;;  %v5630_v16 = vpop.f32.mrb[83].mxu1  ;;  %7984 = vst [vmem:[#allocation166_spill] sm:$0xff] %v5755_v14  ;;  %v2910_v10 = vmax.f32 %v7986_v19, %v5479_v38  ;;  %v3057_v44 = vmin.f32 %v7986_v19, %v5479_v38  ;;  %v2623_v30 = vsel %vm1886_vm1, %v2356_v43, 0.0  ;;  %v2961_v14 = vmax.f32 %v7989_v23, %v5481_v35 }
 0x1cb   :  { %v2031_v21 = vadd.f32 %v2030_v46, %v2029_v5  ;;  %v3108_v27 = vmin.f32 %v7989_v23, %v5481_v35  ;;  %v2624_v5 = vadd.f32 %v2623_v30, %v2622_v54  ;;  %v7991_v38 = vmin.f32 %v7962_v17, %v5415_v50 }
 0x1cc   :  { %v5774_v55 = vmax.f32 %v2910_v10, %v7987_v61  ;;  %v5793_v19 = vmax.f32 %v2912_v22, %v2961_v14  ;;  %v2358_v22 = vmul.f32 %v5471_v24, %v5471_v24  ;;  %v2032_v14 = vsel %vm1886_vm1, %v5499_v31, 0.0 }
 0x1cd   :  { %v5787_v43 = vmin.f32 %v3057_v44, %v7991_v38  ;;  %v5795_v10 = vmin.f32 %v3059_v4, %v3108_v27  ;;  %v8000_v44 = vld [vmem:[#allocation48_spill] sm:$0xff]  ;;  %v2357_v27 = vmul.f32 %v5499_v31, %v5499_v31  ;;  %v2034_v50 = vsel %vm1886_vm1, %v5471_v24, 0.0 }
 0x1ce   :  { %7988 = vst [vmem:[#allocation54_spill] sm:$0xff] %v5774_v55  ;;  %7995 = vst [vmem:[#allocation170_spill] sm:$0xff] %v5793_v19  ;;  %v7997_v55 = vld [vmem:[#allocation47_spill] sm:$0xff]  ;;  %v3111_v4 = vmin.f32 %v8000_v44, %v5493_v9  ;;  %v2359_v17 = vmul.f32 %v5491_v60, %v5491_v60  ;;  %v2627_v24 = vsel %vm1886_vm1, %v2358_v22, 0.0 }
 0x1cf   :  { %v5656_v62 = vpop.f32.mrb[84].mxu0  ;;  %v5658_v11 = vpop.f32.mrb[84].mxu1  ;;  %7992 = vst [vmem:[#allocation167_spill] sm:$0xff] %v5787_v43  ;;  %7996 = vst [vmem:[#allocation171_spill] sm:$0xff] %v5795_v10  ;;  %v2913_v35 = vmax.f32 %v7997_v55, %v5491_v60  ;;  %v3060_v54 = vmin.f32 %v7997_v55, %v5491_v60  ;;  %v2033_v55 = vadd.f32 %v2032_v14, %v2031_v21  ;;  %v8003_v10 = vld [vmem:[#allocation49_spill] sm:$0xff] }
 0x1d0   :  { %v5662_v40 = vpop.f32.mrb[85].mxu0  ;;  %v5664_v20 = vpop.f32.mrb[85].mxu1  ;;  %v2911_v30 = vmax.f32 %v8003_v10, %v5499_v31  ;;  %v3058_v19 = vmin.f32 %v8003_v10, %v5499_v31  ;;  %v8005_v21 = vmax.f32 %v7972_v12, %v5433_v0  ;;  %v8007_v31 = vmin.f32 %v7972_v12, %v5433_v0 }
 0x1d1   :  { %v5676_v33 = vpop.f32.mrb[86].mxu0  ;;  %v5678_v51 = vpop.f32.mrb[86].mxu1 }
 0x1d2   :  { %v5685_v18 = vpop.f32.mrb[87].mxu0  ;;  %v5687_v59 = vpop.f32.mrb[87].mxu1  ;;  %v5833_v14 = vmax.f32 %v2911_v30, %v8005_v21  ;;  %v5838_v10 = vmin.f32 %v3058_v19, %v8007_v31  ;;  %v2036_v19 = vsel %vm1886_vm1, %v5491_v60, 0.0  ;;  %v2360_v60 = vmul.f32 %v5544_v57, %v5544_v57 }
 0x1d4   :  { %8006 = vst [vmem:[#allocation49_spill] sm:$0xff] %v5833_v14  ;;  %v2631_v14 = vsel %vm1886_vm1, %v2360_v60, 0.0 }
 0x1d7   :  { %v5718_v6 = vpop.f32.mrb[88].mxu0  ;;  %v5720_v39 = vpop.f32.mrb[88].mxu1 }
 0x1d8   :  { %7975 = vst [vmem:[#allocation39_spill] sm:$0xff] %v5720_v39  ;;  %v5732_v45 = vpop.f32.mrb[89].mxu0  ;;  %v5734_v42 = vpop.f32.mrb[89].mxu1 }
 0x1d9   :  { %v5741_v49 = vpop.f32.mrb[90].mxu0  ;;  %v5743_v28 = vpop.f32.mrb[90].mxu1 }
 0x1da   :  { %7981 = vst [vmem:[#allocation165_spill] sm:$0xff] %v5743_v28  ;;  %v5749_v8 = vpop.f32.mrb[91].mxu0  ;;  %v5751_v63 = vpop.f32.mrb[91].mxu1 }
 0x1db   :  { %7983 = vst [vmem:[#allocation53_spill] sm:$0xff] %v5751_v63 }
 0x1df   :  { %v5780_v37 = vpop.f32.mrb[92].mxu0  ;;  %v5782_v1 = vpop.f32.mrb[92].mxu1 }
 0x1e0   :  { %7990 = vst [vmem:[#allocation43_spill] sm:$0xff] %v5782_v1  ;;  %v5789_v46 = vpop.f32.mrb[93].mxu0  ;;  %v5791_v61 = vpop.f32.mrb[93].mxu1 }
 0x1e1   :  { %7993 = vst [vmem:[#allocation168_spill] sm:$0xff] %v5789_v46  ;;  %7994 = vst [vmem:[#allocation169_spill] sm:$0xff] %v5791_v61  ;;  %v5799_v23 = vpop.f32.mrb[94].mxu0  ;;  %v5801_v47 = vpop.f32.mrb[94].mxu1 }
 0x1e2   :  { %7998 = vst [vmem:[#allocation47_spill] sm:$0xff] %v5799_v23  ;;  %7999 = vst [vmem:[#allocation172_spill] sm:$0xff] %v5801_v47  ;;  %v5807_v38 = vpop.f32.mrb[95].mxu0  ;;  %v5809_v43 = vpop.f32.mrb[95].mxu1  ;;  %v2035_v23 = vadd.f32 %v2034_v50, %v2033_v55 }
 0x1e3   :  { %8001 = vst [vmem:[#allocation48_spill] sm:$0xff] %v5807_v38  ;;  %8002 = vst [vmem:[#allocation173_spill] sm:$0xff] %v5809_v43  ;;  %v2625_v43 = vsel %vm1886_vm1, %v2357_v27, 0.0  ;;  %v8004_v38 = vld [vmem:[#allocation50_spill] sm:$0xff] }
 0x1e4   :  { %v2962_v47 = vmax.f32 %v8004_v38, %v5501_v56  ;;  %v2626_v61 = vadd.f32 %v2625_v43, %v2624_v5  ;;  %8008 = vst [vmem:[#allocation50_spill] sm:$0xff] %v5838_v10  ;;  %v3109_v27 = vmin.f32 %v8004_v38, %v5501_v56  ;;  %v8010_v5 = vld [vmem:[#allocation61_spill] sm:$0xff] }
 0x1e5   :  { %v2916_v43 = vmax.f32 %v8010_v5, %v5535_v36  ;;  %v3063_v30 = vmin.f32 %v8010_v5, %v5535_v36  ;;  %v2038_v5 = vsel %vm1886_vm1, %v5544_v57, 0.0 }
 0x1e6   :  { %v5841_v46 = vmax.f32 %v2913_v35, %v2962_v47  ;;  %v2628_v50 = vadd.f32 %v2627_v24, %v2626_v61  ;;  %v5855_v22 = vmin.f32 %v3060_v54, %v3109_v27  ;;  %v8012_v47 = vld [vmem:[#allocation62_spill] sm:$0xff]  ;;  %v2629_v61 = vsel %vm1886_vm1, %v2359_v17, 0.0  ;;  %v8013_v27 = vld [vmem:[#allocation51_spill] sm:$0xff] }
 0x1e7   :  { %v5845_v1 = vpop.f32.mrb[96].mxu0  ;;  %v2967_v35 = vmax.f32 %v8012_v47, %v5537_v41  ;;  %v3114_v31 = vmin.f32 %v8012_v47, %v5537_v41  ;;  %v2037_v24 = vadd.f32 %v2036_v19, %v2035_v23  ;;  %v3061_v17 = vmin.f32 %v8013_v27, %v5544_v57  ;;  %v8016_v41 = vld [vmem:[#allocation52_spill] sm:$0xff]  ;;  %v8029_v47 = vld [vmem:[#allocation69_spill] sm:$0xff] }
 0x1e8   :  { %8009 = vst [vmem:[#allocation174_spill] sm:$0xff] %v5841_v46  ;;  %v5851_v55 = vpop.f32.mrb[97].mxu0  ;;  %8011 = vst [vmem:[#allocation61_spill] sm:$0xff] %v5855_v22  ;;  %v2630_v54 = vadd.f32 %v2629_v61, %v2628_v50  ;;  %v2914_v22 = vmax.f32 %v8013_v27, %v5544_v57  ;;  %v8014_v23 = vmax.f32 %v7985_v3, %v5473_v48  ;;  %v8021_v27 = vld [vmem:[#allocation55_spill] sm:$0xff] }
 0x1e9   :  { %v5859_v21 = vpop.f32.mrb[98].mxu0  ;;  %v2039_v46 = vadd.f32 %v2038_v5, %v2037_v24  ;;  %v2965_v56 = vmax.f32 %v8016_v41, %v5546_v29  ;;  %v3112_v50 = vmin.f32 %v8016_v41, %v5546_v29  ;;  %v8017_v24 = vmin.f32 %v7985_v3, %v5473_v48 }
 0x1ea   :  { %v5866_v10 = vpop.f32.mrb[99].mxu0  ;;  %v5878_v19 = vmax.f32 %v2914_v22, %v8014_v23  ;;  %v2632_v61 = vadd.f32 %v2631_v14, %v2630_v54  ;;  %v2917_v22 = vmax.f32 %v8021_v27, %v5552_v25  ;;  %v3064_v23 = vmin.f32 %v8021_v27, %v5552_v25 }
 0x1eb   :  { %v5887_v5 = vmin.f32 %v3061_v17, %v8017_v24  ;;  %v5889_v57 = vmax.f32 %v2916_v43, %v2965_v56  ;;  %v5891_v60 = vmin.f32 %v3063_v30, %v3112_v50  ;;  %v2362_v14 = vmul.f32 %v5535_v36, %v5535_v36  ;;  %v8023_v17 = vld [vmem:[#allocation57_spill] sm:$0xff] }
 0x1ec   :  { %8015 = vst [vmem:[#allocation51_spill] sm:$0xff] %v5878_v19  ;;  %v8022_v19 = vld [vmem:[#allocation56_spill] sm:$0xff]  ;;  %v2040_v56 = vsel %vm1886_vm1, %v5558_v26, 0.0  ;;  %v2361_v43 = vmul.f32 %v5558_v26, %v5558_v26  ;;  %v2915_v50 = vmax.f32 %v8023_v17, %v5558_v26  ;;  %v3062_v24 = vmin.f32 %v8023_v17, %v5558_v26 }
 0x1ed   :  { %8018 = vst [vmem:[#allocation175_spill] sm:$0xff] %v5887_v5  ;;  %8019 = vst [vmem:[#allocation176_spill] sm:$0xff] %v5889_v57  ;;  %v2968_v0 = vmax.f32 %v8022_v19, %v5554_v7  ;;  %v3115_v54 = vmin.f32 %v8022_v19, %v5554_v7  ;;  %v2041_v30 = vadd.f32 %v2040_v56, %v2039_v46  ;;  %v2042_v27 = vsel %vm1886_vm1, %v5535_v36, 0.0  ;;  %v8024_v57 = vld [vmem:[#allocation58_spill] sm:$0xff] }
 0x1ee   :  { %8020 = vst [vmem:[#allocation177_spill] sm:$0xff] %v5891_v60  ;;  %v2363_v60 = vmul.f32 %v5552_v25, %v5552_v25  ;;  %v2633_v5 = vsel %vm1886_vm1, %v2361_v43, 0.0  ;;  %v2966_v7 = vmax.f32 %v8024_v57, %v5560_v32  ;;  %v8025_v46 = vmax.f32 %v8000_v44, %v5493_v9 }
 0x1ef   :  { %v2043_v29 = vadd.f32 %v2042_v27, %v2041_v30  ;;  %v2634_v48 = vadd.f32 %v2633_v5, %v2632_v61  ;;  %v5923_v19 = vmin.f32 %v3062_v24, %v3111_v4  ;;  %v2635_v26 = vsel %vm1886_vm1, %v2362_v14, 0.0  ;;  %v8031_v4 = vld [vmem:[#allocation70_spill] sm:$0xff] }
 0x1f0   :  { %v5921_v56 = vmax.f32 %v2915_v50, %v8025_v46  ;;  %v5926_v36 = vmax.f32 %v2917_v22, %v2966_v7  ;;  %v3113_v17 = vmin.f32 %v8024_v57, %v5560_v32  ;;  %v2920_v41 = vmax.f32 %v8029_v47, %v5595_v53 }
 0x1f1   :  { %8027 = vst [vmem:[#allocation57_spill] sm:$0xff] %v5923_v19  ;;  %v2636_v43 = vadd.f32 %v2635_v26, %v2634_v48  ;;  %v3067_v61 = vmin.f32 %v8029_v47, %v5595_v53  ;;  %v2044_v5 = vsel %vm1886_vm1, %v5552_v25, 0.0  ;;  %v2971_v14 = vmax.f32 %v8031_v4, %v5597_v58  ;;  %v8032_v25 = vld [vmem:[#allocation59_spill] sm:$0xff] }
 0x1f2   :  { %8026 = vst [vmem:[#allocation55_spill] sm:$0xff] %v5921_v56  ;;  %8028 = vst [vmem:[#allocation58_spill] sm:$0xff] %v5926_v36  ;;  %v5936_v30 = vmin.f32 %v3064_v23, %v3113_v17  ;;  %v2637_v7 = vsel %vm1886_vm1, %v2363_v60, 0.0  ;;  %v3118_v22 = vmin.f32 %v8031_v4, %v5597_v58  ;;  %v2045_v48 = vadd.f32 %v2044_v5, %v2043_v29  ;;  %v8034_v29 = vld [vmem:[#allocation60_spill] sm:$0xff]  ;;  %v8045_v56 = vld [vmem:[#allocation77_spill] sm:$0xff] }
 0x1f3   :  { %v2046_v50 = vsel %vm1886_vm1, %v5603_v15, 0.0  ;;  %v2364_v47 = vmul.f32 %v5603_v15, %v5603_v15  ;;  %v2638_v24 = vadd.f32 %v2637_v7, %v2636_v43  ;;  %v2918_v23 = vmax.f32 %v8032_v25, %v5603_v15 }
 0x1f4   :  { %8030 = vst [vmem:[#allocation69_spill] sm:$0xff] %v5936_v30  ;;  %v2047_v27 = vadd.f32 %v2046_v50, %v2045_v48  ;;  %v3065_v46 = vmin.f32 %v8032_v25, %v5603_v15  ;;  %v2969_v17 = vmax.f32 %v8034_v29, %v5605_v2  ;;  %v3116_v5 = vmin.f32 %v8034_v29, %v5605_v2  ;;  %v8038_v48 = vld [vmem:[#allocation63_spill] sm:$0xff]  ;;  %v8039_v50 = vld [vmem:[#allocation64_spill] sm:$0xff] }
 0x1f5   :  { %v2639_v60 = vsel %vm1886_vm1, %v2364_v47, 0.0  ;;  %v5952_v26 = vmax.f32 %v2918_v23, %v2967_v35  ;;  %v2921_v15 = vmax.f32 %v8038_v48, %v5614_v52  ;;  %v3068_v35 = vmin.f32 %v8038_v48, %v5614_v52  ;;  %v8040_v23 = vld [vmem:[#allocation65_spill] sm:$0xff] }
 0x1f6   :  { %v2640_v30 = vadd.f32 %v2639_v60, %v2638_v24  ;;  %v5958_v19 = vmin.f32 %v3065_v46, %v3114_v31  ;;  %v5960_v43 = vmax.f32 %v2920_v41, %v2969_v17  ;;  %v5962_v7 = vmin.f32 %v3067_v61, %v3116_v5 }
 0x1f7   :  { %8033 = vst [vmem:[#allocation70_spill] sm:$0xff] %v5952_v26  ;;  %v2972_v47 = vmax.f32 %v8039_v50, %v5616_v34  ;;  %v2366_v25 = vmul.f32 %v5595_v53, %v5595_v53  ;;  %v3119_v31 = vmin.f32 %v8039_v50, %v5616_v34  ;;  %v2048_v41 = vsel %vm1886_vm1, %v5628_v13, 0.0 }
 0x1f8   :  { %8035 = vst [vmem:[#allocation59_spill] sm:$0xff] %v5958_v19  ;;  %8036 = vst [vmem:[#allocation60_spill] sm:$0xff] %v5960_v43  ;;  %v2365_v61 = vmul.f32 %v5628_v13, %v5628_v13  ;;  %v2049_v24 = vadd.f32 %v2048_v41, %v2047_v27  ;;  %v2919_v46 = vmax.f32 %v8040_v23, %v5628_v13  ;;  %v2050_v17 = vsel %vm1886_vm1, %v5595_v53, 0.0 }
 0x1f9   :  { %8037 = vst [vmem:[#allocation178_spill] sm:$0xff] %v5962_v7  ;;  %v3066_v60 = vmin.f32 %v8040_v23, %v5628_v13  ;;  %v2367_v5 = vmul.f32 %v5614_v52, %v5614_v52  ;;  %v8041_v7 = vld [vmem:[#allocation66_spill] sm:$0xff]  ;;  %v2643_v36 = vsel %vm1886_vm1, %v2366_v25, 0.0  ;;  %v3071_v34 = vmin.f32 %v8045_v56, %v5656_v62 }
 0x1fa   :  { %v2641_v48 = vsel %vm1886_vm1, %v2365_v61, 0.0  ;;  %v2970_v19 = vmax.f32 %v8041_v7, %v5630_v16  ;;  %v2051_v43 = vadd.f32 %v2050_v17, %v2049_v24  ;;  %v5989_v27 = vmax.f32 %v2919_v46, %v2968_v0 }
 0x1fb   :  { %v2642_v26 = vadd.f32 %v2641_v48, %v2640_v30  ;;  %v5991_v41 = vmin.f32 %v3066_v60, %v3115_v54  ;;  %v3117_v53 = vmin.f32 %v8041_v7, %v5630_v16  ;;  %v2924_v61 = vmax.f32 %v8045_v56, %v5656_v62  ;;  %v8047_v54 = vld [vmem:[#allocation78_spill] sm:$0xff] }
 0x1fc   :  { %8042 = vst [vmem:[#allocation63_spill] sm:$0xff] %v5989_v27  ;;  %v5994_v13 = vmax.f32 %v2921_v15, %v2970_v19  ;;  %v2052_v0 = vsel %vm1886_vm1, %v5614_v52, 0.0  ;;  %v2975_v25 = vmax.f32 %v8047_v54, %v5658_v11  ;;  %v2645_v19 = vsel %vm1886_vm1, %v2367_v5, 0.0  ;;  %v8048_v52 = vld [vmem:[#allocation67_spill] sm:$0xff] }
 0x1fd   :  { %8043 = vst [vmem:[#allocation64_spill] sm:$0xff] %v5991_v41  ;;  %v2644_v23 = vadd.f32 %v2643_v36, %v2642_v26  ;;  %v6004_v30 = vmin.f32 %v3068_v35, %v3117_v53  ;;  %v3122_v15 = vmin.f32 %v8047_v54, %v5658_v11  ;;  %v2053_v36 = vadd.f32 %v2052_v0, %v2051_v43  ;;  %v8050_v43 = vld [vmem:[#allocation68_spill] sm:$0xff] }
 0x1fe   :  { %8044 = vst [vmem:[#allocation65_spill] sm:$0xff] %v5994_v13  ;;  %v2054_v26 = vsel %vm1886_vm1, %v5662_v40, 0.0  ;;  %v2368_v56 = vmul.f32 %v5662_v40, %v5662_v40  ;;  %v2922_v35 = vmax.f32 %v8048_v52, %v5662_v40  ;;  %v3069_v60 = vmin.f32 %v8048_v52, %v5662_v40  ;;  %v8061_v13 = vld [vmem:[#allocation85_spill] sm:$0xff] }
 0x1ff   :  { %8046 = vst [vmem:[#allocation66_spill] sm:$0xff] %v6004_v30  ;;  %v2646_v24 = vadd.f32 %v2645_v19, %v2644_v23  ;;  %v2055_v46 = vadd.f32 %v2054_v26, %v2053_v36  ;;  %v2973_v48 = vmax.f32 %v8050_v43, %v5664_v20  ;;  %v3120_v53 = vmin.f32 %v8050_v43, %v5664_v20  ;;  %v8054_v36 = vld [vmem:[#allocation71_spill] sm:$0xff]  ;;  %v8055_v26 = vld [vmem:[#allocation72_spill] sm:$0xff] }
 0x200   :  { %v2647_v17 = vsel %vm1886_vm1, %v2368_v56, 0.0  ;;  %v6020_v5 = vmax.f32 %v2922_v35, %v2971_v14  ;;  %v6026_v30 = vmin.f32 %v3069_v60, %v3118_v22  ;;  %v2925_v40 = vmax.f32 %v8054_v36, %v5676_v33  ;;  %v8056_v35 = vld [vmem:[#allocation73_spill] sm:$0xff] }
 0x201   :  { %v2648_v0 = vadd.f32 %v2647_v17, %v2646_v24  ;;  %v6028_v23 = vmax.f32 %v2924_v61, %v2973_v48  ;;  %v6030_v19 = vmin.f32 %v3071_v34, %v3120_v53  ;;  %v3072_v14 = vmin.f32 %v8054_v36, %v5676_v33 }
 0x202   :  { %8049 = vst [vmem:[#allocation77_spill] sm:$0xff] %v6020_v5  ;;  %8051 = vst [vmem:[#allocation78_spill] sm:$0xff] %v6026_v30  ;;  %v2976_v56 = vmax.f32 %v8055_v26, %v5678_v51  ;;  %v2370_v52 = vmul.f32 %v5656_v62, %v5656_v62  ;;  %v3123_v22 = vmin.f32 %v8055_v26, %v5678_v51  ;;  %v2056_v61 = vsel %vm1886_vm1, %v5685_v18, 0.0 }
 0x203   :  { %8052 = vst [vmem:[#allocation67_spill] sm:$0xff] %v6028_v23  ;;  %8053 = vst [vmem:[#allocation68_spill] sm:$0xff] %v6030_v19  ;;  %v2369_v34 = vmul.f32 %v5685_v18, %v5685_v18  ;;  %v2057_v24 = vadd.f32 %v2056_v61, %v2055_v46  ;;  %v2923_v60 = vmax.f32 %v8056_v35, %v5685_v18  ;;  %v2058_v48 = vsel %vm1886_vm1, %v5656_v62, 0.0  ;;  %v8057_v19 = vld [vmem:[#allocation74_spill] sm:$0xff] }
 0x204   :  { %v3070_v17 = vmin.f32 %v8056_v35, %v5685_v18  ;;  %v2371_v53 = vmul.f32 %v5676_v33, %v5676_v33  ;;  %v2974_v30 = vmax.f32 %v8057_v19, %v5687_v59  ;;  %v2651_v5 = vsel %vm1886_vm1, %v2370_v52, 0.0 }
 0x205   :  { %v2649_v36 = vsel %vm1886_vm1, %v2369_v34, 0.0  ;;  %v2059_v41 = vadd.f32 %v2058_v48, %v2057_v24  ;;  %v6057_v46 = vmax.f32 %v2923_v60, %v2972_v47  ;;  %v3121_v62 = vmin.f32 %v8057_v19, %v5687_v59 }
 0x206   :  { %v2650_v23 = vadd.f32 %v2649_v36, %v2648_v0  ;;  %v6059_v61 = vmin.f32 %v3070_v17, %v3119_v31  ;;  %v6062_v18 = vmax.f32 %v2925_v40, %v2974_v30  ;;  %v2928_v34 = vmax.f32 %v8061_v13, %v5718_v6  ;;  %v8063_v31 = vld [vmem:[#allocation86_spill] sm:$0xff] }
 0x207   :  { %8058 = vst [vmem:[#allocation71_spill] sm:$0xff] %v6057_v46  ;;  %v3075_v27 = vmin.f32 %v8061_v13, %v5718_v6  ;;  %v2060_v47 = vsel %vm1886_vm1, %v5676_v33, 0.0  ;;  %v6072_v0 = vmin.f32 %v3072_v14, %v3121_v62  ;;  %v2979_v52 = vmax.f32 %v8063_v31, %v5720_v39  ;;  %v8064_v33 = vld [vmem:[#allocation75_spill] sm:$0xff] }
 0x208   :  { %8059 = vst [vmem:[#allocation72_spill] sm:$0xff] %v6059_v61  ;;  %8060 = vst [vmem:[#allocation73_spill] sm:$0xff] %v6062_v18  ;;  %v2652_v35 = vadd.f32 %v2651_v5, %v2650_v23  ;;  %v2653_v30 = vsel %vm1886_vm1, %v2371_v53, 0.0  ;;  %v3126_v40 = vmin.f32 %v8063_v31, %v5720_v39  ;;  %v2061_v5 = vadd.f32 %v2060_v47, %v2059_v41  ;;  %v8066_v41 = vld [vmem:[#allocation76_spill] sm:$0xff]  ;;  %v8077_v18 = vld [vmem:[#allocation93_spill] sm:$0xff] }
 0x209   :  { %8062 = vst [vmem:[#allocation74_spill] sm:$0xff] %v6072_v0  ;;  %v2062_v23 = vsel %vm1886_vm1, %v5732_v45, 0.0  ;;  %v2372_v13 = vmul.f32 %v5732_v45, %v5732_v45  ;;  %v2926_v14 = vmax.f32 %v8064_v33, %v5732_v45  ;;  %v3073_v17 = vmin.f32 %v8064_v33, %v5732_v45 }
 0x20a   :  { %v2654_v24 = vadd.f32 %v2653_v30, %v2652_v35  ;;  %v2063_v60 = vadd.f32 %v2062_v23, %v2061_v5  ;;  %v2977_v36 = vmax.f32 %v8066_v41, %v5734_v42  ;;  %v3124_v62 = vmin.f32 %v8066_v41, %v5734_v42  ;;  %v8070_v5 = vld [vmem:[#allocation79_spill] sm:$0xff]  ;;  %v8071_v23 = vld [vmem:[#allocation80_spill] sm:$0xff] }
 0x20b   :  { %v2655_v48 = vsel %vm1886_vm1, %v2372_v13, 0.0  ;;  %v6088_v53 = vmax.f32 %v2926_v14, %v2975_v25  ;;  %v6094_v0 = vmin.f32 %v3073_v17, %v3122_v15  ;;  %v2929_v45 = vmax.f32 %v8070_v5, %v5741_v49  ;;  %v8072_v14 = vld [vmem:[#allocation81_spill] sm:$0xff] }
 0x20c   :  { %v2656_v47 = vadd.f32 %v2655_v48, %v2654_v24  ;;  %v6096_v35 = vmax.f32 %v2928_v34, %v2977_v36  ;;  %v6098_v30 = vmin.f32 %v3075_v27, %v3124_v62  ;;  %v3076_v25 = vmin.f32 %v8070_v5, %v5741_v49 }
 0x20d   :  { %8065 = vst [vmem:[#allocation85_spill] sm:$0xff] %v6088_v53  ;;  %8067 = vst [vmem:[#allocation86_spill] sm:$0xff] %v6094_v0  ;;  %v2980_v13 = vmax.f32 %v8071_v23, %v5743_v28  ;;  %v2374_v33 = vmul.f32 %v5718_v6, %v5718_v6  ;;  %v3127_v15 = vmin.f32 %v8071_v23, %v5743_v28  ;;  %v2064_v34 = vsel %vm1886_vm1, %v5749_v8, 0.0 }
 0x20e   :  { %8068 = vst [vmem:[#allocation75_spill] sm:$0xff] %v6096_v35  ;;  %8069 = vst [vmem:[#allocation76_spill] sm:$0xff] %v6098_v30  ;;  %v2373_v27 = vmul.f32 %v5749_v8, %v5749_v8  ;;  %v2065_v24 = vadd.f32 %v2064_v34, %v2063_v60  ;;  %v2927_v17 = vmax.f32 %v8072_v14, %v5749_v8  ;;  %v2066_v36 = vsel %vm1886_vm1, %v5718_v6, 0.0  ;;  %v8073_v30 = vld [vmem:[#allocation82_spill] sm:$0xff] }
 0x20f   :  { %v3074_v48 = vmin.f32 %v8072_v14, %v5749_v8  ;;  %v2375_v62 = vmul.f32 %v5741_v49, %v5741_v49  ;;  %v2978_v0 = vmax.f32 %v8073_v30, %v5751_v63  ;;  %v2659_v53 = vsel %vm1886_vm1, %v2374_v33, 0.0 }
 0x210   :  { %v2657_v5 = vsel %vm1886_vm1, %v2373_v27, 0.0  ;;  %v2067_v61 = vadd.f32 %v2066_v36, %v2065_v24  ;;  %v6125_v60 = vmax.f32 %v2927_v17, %v2976_v56  ;;  %v3125_v6 = vmin.f32 %v8073_v30, %v5751_v63  ;;  %v8080_v24 = vld [vmem:[#allocation94_spill] sm:$0xff] }
 0x211   :  { %v2658_v35 = vadd.f32 %v2657_v5, %v2656_v47  ;;  %v6127_v34 = vmin.f32 %v3074_v48, %v3123_v22  ;;  %v6130_v8 = vmax.f32 %v2929_v45, %v2978_v0  ;;  %v2932_v27 = vmax.f32 %v8077_v18, %v5780_v37  ;;  %v8079_v22 = vld [vmem:[#allocation43_spill] sm:$0xff] }
 0x212   :  { %8074 = vst [vmem:[#allocation79_spill] sm:$0xff] %v6125_v60  ;;  %v3079_v46 = vmin.f32 %v8077_v18, %v5780_v37  ;;  %v2068_v56 = vsel %vm1886_vm1, %v5741_v49, 0.0  ;;  %v6140_v47 = vmin.f32 %v3076_v25, %v3125_v6  ;;  %v2983_v33 = vmax.f32 %v8080_v24, %v8079_v22  ;;  %v8082_v49 = vld [vmem:[#allocation83_spill] sm:$0xff] }
 0x213   :  { %8075 = vst [vmem:[#allocation80_spill] sm:$0xff] %v6127_v34  ;;  %8076 = vst [vmem:[#allocation81_spill] sm:$0xff] %v6130_v8  ;;  %v2660_v14 = vadd.f32 %v2659_v53, %v2658_v35  ;;  %v2661_v0 = vsel %vm1886_vm1, %v2375_v62, 0.0  ;;  %v3130_v45 = vmin.f32 %v8080_v24, %v8079_v22  ;;  %v2069_v53 = vadd.f32 %v2068_v56, %v2067_v61  ;;  %v8081_v35 = vld [vmem:[#allocation168_spill] sm:$0xff] }
 0x214   :  { %8078 = vst [vmem:[#allocation82_spill] sm:$0xff] %v6140_v47  ;;  %v2070_v17 = vsel %vm1886_vm1, %v8081_v35, 0.0  ;;  %v2376_v18 = vmul.f32 %v8081_v35, %v8081_v35  ;;  %v2930_v25 = vmax.f32 %v8082_v49, %v8081_v35  ;;  %v3077_v5 = vmin.f32 %v8082_v49, %v8081_v35  ;;  %v8084_v47 = vld [vmem:[#allocation169_spill] sm:$0xff]  ;;  %v8085_v61 = vld [vmem:[#allocation84_spill] sm:$0xff] }
 0x215   :  { %v2662_v48 = vadd.f32 %v2661_v0, %v2660_v14  ;;  %v2071_v36 = vadd.f32 %v2070_v17, %v2069_v53  ;;  %v2981_v56 = vmax.f32 %v8085_v61, %v8084_v47  ;;  %v3128_v34 = vmin.f32 %v8085_v61, %v8084_v47  ;;  %v8089_v53 = vld [vmem:[#allocation47_spill] sm:$0xff]  ;;  %v8092_v49 = vld [vmem:[#allocation88_spill] sm:$0xff] }
 0x216   :  { %v2663_v62 = vsel %vm1886_vm1, %v2376_v18, 0.0  ;;  %v6156_v6 = vmax.f32 %v2930_v25, %v2979_v52  ;;  %v6162_v60 = vmin.f32 %v3077_v5, %v3126_v40  ;;  %v8090_v17 = vld [vmem:[#allocation87_spill] sm:$0xff]  ;;  %v8091_v18 = vld [vmem:[#allocation172_spill] sm:$0xff]  ;;  %v8094_v5 = vld [vmem:[#allocation89_spill] sm:$0xff] }
 0x217   :  { %v2664_v8 = vadd.f32 %v2663_v62, %v2662_v48  ;;  %v6164_v14 = vmax.f32 %v2932_v27, %v2981_v56  ;;  %v6166_v0 = vmin.f32 %v3079_v46, %v3128_v34  ;;  %v2933_v35 = vmax.f32 %v8090_v17, %v8089_v53  ;;  %v8093_v48 = vld [vmem:[#allocation48_spill] sm:$0xff] }
 0x218   :  { %8083 = vst [vmem:[#allocation93_spill] sm:$0xff] %v6156_v6  ;;  %8086 = vst [vmem:[#allocation94_spill] sm:$0xff] %v6162_v60  ;;  %v3080_v52 = vmin.f32 %v8090_v17, %v8089_v53  ;;  %v2984_v25 = vmax.f32 %v8092_v49, %v8091_v18  ;;  %v2378_v6 = vmul.f32 %v5780_v37, %v5780_v37  ;;  %v2072_v27 = vsel %vm1886_vm1, %v8093_v48, 0.0  ;;  %v8095_v60 = vld [vmem:[#allocation173_spill] sm:$0xff] }
 0x219   :  { %8087 = vst [vmem:[#allocation168_spill] sm:$0xff] %v6164_v14  ;;  %8088 = vst [vmem:[#allocation83_spill] sm:$0xff] %v6166_v0  ;;  %v3131_v40 = vmin.f32 %v8092_v49, %v8091_v18  ;;  %v2377_v46 = vmul.f32 %v8093_v48, %v8093_v48  ;;  %v2073_v34 = vadd.f32 %v2072_v27, %v2071_v36  ;;  %v2074_v17 = vsel %vm1886_vm1, %v5780_v37, 0.0  ;;  %v8096_v14 = vld [vmem:[#allocation90_spill] sm:$0xff] }
 0x21a   :  { %v2931_v62 = vmax.f32 %v8094_v5, %v8093_v48  ;;  %v3078_v56 = vmin.f32 %v8094_v5, %v8093_v48  ;;  %v2982_v18 = vmax.f32 %v8096_v14, %v8095_v60  ;;  %v2667_v36 = vsel %vm1886_vm1, %v2378_v6, 0.0  ;;  %v8099_v5 = vld [vmem:[#allocation92_spill] sm:$0xff]  ;;  %v8101_v6 = vld [vmem:[#allocation91_spill] sm:$0xff] }
 0x21b   :  { %v2665_v0 = vsel %vm1886_vm1, %v2377_v46, 0.0  ;;  %v2075_v22 = vadd.f32 %v2074_v17, %v2073_v34  ;;  %v2379_v27 = vmul.f32 %v8089_v53, %v8089_v53  ;;  %v3129_v37 = vmin.f32 %v8096_v14, %v8095_v60  ;;  %v8103_v34 = vld [vmem:[#allocation100_spill] sm:$0xff] }
 0x21c   :  { %v2666_v47 = vadd.f32 %v2665_v0, %v2664_v8  ;;  %v6191_v28 = vmax.f32 %v2931_v62, %v2980_v13  ;;  %v6193_v39 = vmin.f32 %v3078_v56, %v3127_v15  ;;  %v6198_v48 = vmax.f32 %v2933_v35, %v2982_v18  ;;  %v8102_v18 = vld [vmem:[#allocation16_spill] sm:$0xff] }
 0x21d   :  { %v2936_v63 = vmax.f32 %v5845_v1, %v8099_v5  ;;  %v3083_v13 = vmin.f32 %v5845_v1, %v8099_v5  ;;  %v6206_v8 = vmin.f32 %v3080_v52, %v3129_v37  ;;  %v2380_v15 = vmul.f32 %v5851_v55, %v5851_v55 }
 0x21e   :  { %8097 = vst [vmem:[#allocation84_spill] sm:$0xff] %v6193_v39  ;;  %8098 = vst [vmem:[#allocation47_spill] sm:$0xff] %v6198_v48  ;;  %v2668_v46 = vadd.f32 %v2667_v36, %v2666_v47  ;;  %v2934_v0 = vmax.f32 %v8101_v6, %v5851_v55  ;;  %v2076_v35 = vsel %vm1886_vm1, %v8089_v53, 0.0  ;;  %v8104_v47 = vmax.f32 %v8102_v18, %v8103_v34 }
 0x21f   :  { %8100 = vst [vmem:[#allocation87_spill] sm:$0xff] %v6206_v8  ;;  %v8105_v56 = vmin.f32 %v8102_v18, %v8103_v34  ;;  %v3081_v52 = vmin.f32 %v8101_v6, %v5851_v55  ;;  %v2669_v36 = vsel %vm1886_vm1, %v2379_v27, 0.0  ;;  %v2078_v37 = vsel %vm1886_vm1, %v5851_v55, 0.0 }
 0x220   :  { %v6217_v62 = vmax.f32 %v8104_v47, %v2936_v63  ;;  %v2671_v53 = vsel %vm1886_vm1, %v2380_v15, 0.0  ;;  %v6230_v8 = vmax.f32 %v2934_v0, %v2983_v33  ;;  %v8109_v63 = vld [vmem:[#allocation98_spill] sm:$0xff]  ;;  %v2077_v18 = vadd.f32 %v2076_v35, %v2075_v22  ;;  %v8110_v15 = vld [vmem:[#allocation19_spill] sm:$0xff]  ;;  %v8114_v35 = vld [vmem:[#allocation97_spill] sm:$0xff] }
 0x221   :  { %v6222_v17 = vmin.f32 %v8105_v56, %v3083_v13  ;;  %v6232_v39 = vmin.f32 %v3081_v52, %v3130_v45  ;;  %v2937_v47 = vmax.f32 %v5859_v21, %v8109_v63  ;;  %v3084_v13 = vmin.f32 %v5859_v21, %v8109_v63  ;;  %v8111_v45 = vld [vmem:[#allocation95_spill] sm:$0xff] }
 0x222   :  { %8107 = vst [vmem:[#allocation48_spill] sm:$0xff] %v6230_v8  ;;  %v2382_v6 = vmul.f32 %v5845_v1, %v5845_v1  ;;  %v2080_v27 = vsel %vm1886_vm1, %v5866_v10, 0.0  ;;  %v2381_v55 = vmul.f32 %v5866_v10, %v5866_v10  ;;  %v2670_v33 = vadd.f32 %v2669_v36, %v2668_v46  ;;  %v8115_v36 = vld [vmem:[#allocation17_spill] sm:$0xff] }
 0x223   :  { %8106 = vst [vmem:[#allocation88_spill] sm:$0xff] %v6222_v17  ;;  %8108 = vst [vmem:[#allocation89_spill] sm:$0xff] %v6232_v39  ;;  %v8112_v0 = vmax.f32 %v8110_v15, %v8111_v45  ;;  %v8113_v56 = vmin.f32 %v8110_v15, %v8111_v45  ;;  %v2079_v22 = vadd.f32 %v2078_v37, %v2077_v18  ;;  %v2082_v37 = vsel %vm1886_vm1, %v5845_v1, 0.0 }
 0x224   :  { %v2935_v39 = vmax.f32 %v8114_v35, %v5866_v10  ;;  %v2672_v17 = vadd.f32 %v2671_v53, %v2670_v33  ;;  %v2673_v8 = vsel %vm1886_vm1, %v2381_v55, 0.0  ;;  %v3082_v46 = vmin.f32 %v8114_v35, %v5866_v10 }
 0x225   :  { %v6247_v34 = vmax.f32 %v8112_v0, %v2937_v47  ;;  %v6252_v52 = vmin.f32 %v8113_v56, %v3084_v13  ;;  %v2384_v48 = vmul.f32 %v8115_v36, %v8115_v36  ;;  %v2383_v47 = vmul.f32 %v5859_v21, %v5859_v21 }
 0x226   :  { %v2081_v0 = vadd.f32 %v2080_v27, %v2079_v22  ;;  %v6263_v15 = vmax.f32 %v2935_v39, %v2984_v25  ;;  %v2674_v13 = vadd.f32 %v2673_v8, %v2672_v17  ;;  %v6267_v18 = vmin.f32 %v3082_v46, %v3131_v40  ;;  %v8116_v39 = vld [vmem:[#allocation20_spill] sm:$0xff]  ;;  %v8117_v17 = vld [vmem:[#allocation15_spill] sm:$0xff]  ;;  %v8118_v46 = vld [vmem:[#allocation18_spill] sm:$0xff] }
 0x227   :  { %v2675_v53 = vsel %vm1886_vm1, %v2382_v6, 0.0  ;;  %v2086_v10 = vsel %vm1886_vm1, %v8115_v36, 0.0  ;;  %v2084_v33 = vsel %vm1886_vm1, %v5859_v21, 0.0  ;;  %v2679_v27 = vsel %vm1886_vm1, %v2384_v48, 0.0  ;;  %v8119_v36 = vld [vmem:[#allocation22_spill] sm:$0xff] }
 0x228   :  { %v2083_v55 = vadd.f32 %v2082_v37, %v2081_v0  ;;  %v2676_v45 = vadd.f32 %v2675_v53, %v2674_v13  ;;  %v2385_v25 = vmul.f32 %v8116_v39, %v8116_v39  ;;  %v2677_v1 = vsel %vm1886_vm1, %v2383_v47, 0.0 }
 0x229   :  { %v2386_v6 = vmul.f32 %v8117_v17, %v8117_v17  ;;  %v2088_v22 = vsel %vm1886_vm1, %v8116_v39, 0.0  ;;  %v2387_v21 = vmul.f32 %v8118_v46, %v8118_v46  ;;  %v2388_v0 = vmul.f32 %v8119_v36, %v8119_v36 }
 0x22a   :  { %v2085_v8 = vadd.f32 %v2084_v33, %v2083_v55  ;;  %v2678_v40 = vadd.f32 %v2677_v1, %v2676_v45  ;;  %v2681_v48 = vsel %vm1886_vm1, %v2385_v25, 0.0  ;;  %v2090_v47 = vsel %vm1886_vm1, %v8117_v17, 0.0  ;;  %v8120_v25 = vld [vmem:[#allocation24_spill] sm:$0xff]  ;;  %v8121_v17 = vld [vmem:[#allocation21_spill] sm:$0xff] }
 0x22b   :  { %v2683_v53 = vsel %vm1886_vm1, %v2386_v6, 0.0  ;;  %v2094_v33 = vsel %vm1886_vm1, %v8119_v36, 0.0  ;;  %v2687_v39 = vsel %vm1886_vm1, %v2388_v0, 0.0  ;;  %v2389_v1 = vmul.f32 %v8120_v25, %v8120_v25  ;;  %v8123_v36 = vld [vmem:[#allocation26_spill] sm:$0xff] }
 0x22c   :  { %v2087_v56 = vadd.f32 %v2086_v10, %v2085_v8  ;;  %v2680_v35 = vadd.f32 %v2679_v27, %v2678_v40  ;;  %v2092_v10 = vsel %vm1886_vm1, %v8118_v46, 0.0  ;;  %v2685_v27 = vsel %vm1886_vm1, %v2387_v21, 0.0  ;;  %v8122_v46 = vld [vmem:[#allocation23_spill] sm:$0xff] }
 0x22d   :  { %v2390_v6 = vmul.f32 %v8121_v17, %v8121_v17  ;;  %v2689_v21 = vsel %vm1886_vm1, %v2389_v1, 0.0  ;;  %v2392_v0 = vmul.f32 %v8123_v36, %v8123_v36 }
 0x22e   :  { %v2089_v37 = vadd.f32 %v2088_v22, %v2087_v56  ;;  %v2682_v13 = vadd.f32 %v2681_v48, %v2680_v35  ;;  %v2096_v22 = vsel %vm1886_vm1, %v8120_v25, 0.0  ;;  %v2391_v48 = vmul.f32 %v8122_v46, %v8122_v46  ;;  %v8124_v25 = vld [vmem:[#allocation28_spill] sm:$0xff] }
 0x22f   :  { %v2393_v1 = vmul.f32 %v8124_v25, %v8124_v25 }
 0x230   :  { %v2091_v55 = vadd.f32 %v2090_v47, %v2089_v37  ;;  %v2684_v45 = vadd.f32 %v2683_v53, %v2682_v13  ;;  %v2098_v47 = vsel %vm1886_vm1, %v8121_v17, 0.0  ;;  %v2691_v53 = vsel %vm1886_vm1, %v2390_v6, 0.0  ;;  %v8125_v17 = vld [vmem:[#allocation25_spill] sm:$0xff] }
 0x231   :  { %v2394_v6 = vmul.f32 %v8125_v17, %v8125_v17 }
 0x232   :  { %v2093_v8 = vadd.f32 %v2092_v10, %v2091_v55  ;;  %v2686_v40 = vadd.f32 %v2685_v27, %v2684_v45  ;;  %v2100_v10 = vsel %vm1886_vm1, %v8122_v46, 0.0  ;;  %v2693_v27 = vsel %vm1886_vm1, %v2391_v48, 0.0  ;;  %v8126_v46 = vld [vmem:[#allocation27_spill] sm:$0xff] }
 0x233   :  { %v2697_v48 = vsel %vm1886_vm1, %v2393_v1, 0.0 }
 0x234   :  { %v2095_v56 = vadd.f32 %v2094_v33, %v2093_v8  ;;  %v2688_v35 = vadd.f32 %v2687_v39, %v2686_v40  ;;  %v2102_v33 = vsel %vm1886_vm1, %v8123_v36, 0.0  ;;  %v2695_v39 = vsel %vm1886_vm1, %v2392_v0, 0.0  ;;  %v8127_v36 = vld [vmem:[#allocation30_spill] sm:$0xff] }
 0x235   :  { %v2396_v0 = vmul.f32 %v8127_v36, %v8127_v36 }
 0x236   :  { %v2097_v37 = vadd.f32 %v2096_v22, %v2095_v56  ;;  %v2690_v13 = vadd.f32 %v2689_v21, %v2688_v35  ;;  %v2104_v22 = vsel %vm1886_vm1, %v8124_v25, 0.0  ;;  %v2395_v21 = vmul.f32 %v8126_v46, %v8126_v46  ;;  %v8128_v25 = vld [vmem:[#allocation32_spill] sm:$0xff] }
 0x237   :  { %v2397_v1 = vmul.f32 %v8128_v25, %v8128_v25 }
 0x238   :  { %v2099_v55 = vadd.f32 %v2098_v47, %v2097_v37  ;;  %v2692_v45 = vadd.f32 %v2691_v53, %v2690_v13  ;;  %v2106_v47 = vsel %vm1886_vm1, %v8125_v17, 0.0  ;;  %v2699_v53 = vsel %vm1886_vm1, %v2394_v6, 0.0  ;;  %v8129_v17 = vld [vmem:[#allocation29_spill] sm:$0xff] }
 0x239   :  { %v2398_v6 = vmul.f32 %v8129_v17, %v8129_v17 }
 0x23a   :  { %v2101_v8 = vadd.f32 %v2100_v10, %v2099_v55  ;;  %v2694_v40 = vadd.f32 %v2693_v27, %v2692_v45  ;;  %v2108_v10 = vsel %vm1886_vm1, %v8126_v46, 0.0  ;;  %v2701_v27 = vsel %vm1886_vm1, %v2395_v21, 0.0  ;;  %v8130_v46 = vld [vmem:[#allocation31_spill] sm:$0xff] }
 0x23b   :  { %v2705_v21 = vsel %vm1886_vm1, %v2397_v1, 0.0 }
 0x23c   :  { %v2103_v56 = vadd.f32 %v2102_v33, %v2101_v8  ;;  %v2696_v35 = vadd.f32 %v2695_v39, %v2694_v40  ;;  %v2110_v33 = vsel %vm1886_vm1, %v8127_v36, 0.0  ;;  %v2703_v39 = vsel %vm1886_vm1, %v2396_v0, 0.0  ;;  %v8131_v36 = vld [vmem:[#allocation35_spill] sm:$0xff] }
 0x23d   :  { %v2400_v0 = vmul.f32 %v8131_v36, %v8131_v36 }
 0x23e   :  { %v2105_v37 = vadd.f32 %v2104_v22, %v2103_v56  ;;  %v2698_v13 = vadd.f32 %v2697_v48, %v2696_v35  ;;  %v2112_v22 = vsel %vm1886_vm1, %v8128_v25, 0.0  ;;  %v2399_v48 = vmul.f32 %v8130_v46, %v8130_v46  ;;  %v8132_v25 = vld [vmem:[#allocation38_spill] sm:$0xff] }
 0x23f   :  { %v2401_v1 = vmul.f32 %v8132_v25, %v8132_v25 }
 0x240   :  { %v2107_v55 = vadd.f32 %v2106_v47, %v2105_v37  ;;  %v2700_v45 = vadd.f32 %v2699_v53, %v2698_v13  ;;  %v2114_v47 = vsel %vm1886_vm1, %v8129_v17, 0.0  ;;  %v2707_v53 = vsel %vm1886_vm1, %v2398_v6, 0.0  ;;  %v8133_v17 = vld [vmem:[#allocation33_spill] sm:$0xff] }
 0x241   :  { %v2402_v6 = vmul.f32 %v8133_v17, %v8133_v17 }
 0x242   :  { %v2109_v8 = vadd.f32 %v2108_v10, %v2107_v55  ;;  %v2702_v40 = vadd.f32 %v2701_v27, %v2700_v45  ;;  %v2116_v10 = vsel %vm1886_vm1, %v8130_v46, 0.0  ;;  %v2709_v27 = vsel %vm1886_vm1, %v2399_v48, 0.0  ;;  %v8134_v46 = vld [vmem:[#allocation37_spill] sm:$0xff] }
 0x243   :  { %v2713_v48 = vsel %vm1886_vm1, %v2401_v1, 0.0 }
 0x244   :  { %v2111_v56 = vadd.f32 %v2110_v33, %v2109_v8  ;;  %v2704_v35 = vadd.f32 %v2703_v39, %v2702_v40  ;;  %v2118_v33 = vsel %vm1886_vm1, %v8131_v36, 0.0  ;;  %v2711_v39 = vsel %vm1886_vm1, %v2400_v0, 0.0  ;;  %v8135_v36 = vld [vmem:[#allocation42_spill] sm:$0xff] }
 0x245   :  { %v2404_v0 = vmul.f32 %v8135_v36, %v8135_v36 }
 0x246   :  { %v2113_v37 = vadd.f32 %v2112_v22, %v2111_v56  ;;  %v2706_v13 = vadd.f32 %v2705_v21, %v2704_v35  ;;  %v2120_v22 = vsel %vm1886_vm1, %v8132_v25, 0.0  ;;  %v2403_v21 = vmul.f32 %v8134_v46, %v8134_v46  ;;  %v8136_v25 = vld [vmem:[#allocation46_spill] sm:$0xff] }
 0x247   :  { %v2405_v1 = vmul.f32 %v8136_v25, %v8136_v25 }
 0x248   :  { %v2115_v55 = vadd.f32 %v2114_v47, %v2113_v37  ;;  %v2708_v45 = vadd.f32 %v2707_v53, %v2706_v13  ;;  %v2122_v47 = vsel %vm1886_vm1, %v8133_v17, 0.0  ;;  %v2715_v53 = vsel %vm1886_vm1, %v2402_v6, 0.0 }
 0x249   :  { %v2406_v17 = vmul.f32 %v7972_v12, %v7972_v12 }
 0x24a   :  { %v2117_v8 = vadd.f32 %v2116_v10, %v2115_v55  ;;  %v2710_v40 = vadd.f32 %v2709_v27, %v2708_v45  ;;  %v2124_v10 = vsel %vm1886_vm1, %v8134_v46, 0.0  ;;  %v2717_v27 = vsel %vm1886_vm1, %v2403_v21, 0.0 }
 0x24b   :  { %v2721_v21 = vsel %vm1886_vm1, %v2405_v1, 0.0 }
 0x24c   :  { %v2119_v56 = vadd.f32 %v2118_v33, %v2117_v8  ;;  %v2712_v35 = vadd.f32 %v2711_v39, %v2710_v40  ;;  %v2126_v33 = vsel %vm1886_vm1, %v8135_v36, 0.0  ;;  %v2719_v39 = vsel %vm1886_vm1, %v2404_v0, 0.0 }
 0x24d   :  { %v2130_v0 = vsel %vm1886_vm1, %v7972_v12, 0.0 }
 0x24e   :  { %v2121_v37 = vadd.f32 %v2120_v22, %v2119_v56  ;;  %v2714_v13 = vadd.f32 %v2713_v48, %v2712_v35  ;;  %v2128_v56 = vsel %vm1886_vm1, %v8136_v25, 0.0  ;;  %v8137_v35 = vld [vmem:[#allocation44_spill] sm:$0xff]  ;;  %v2408_v48 = vmul.f32 %v8004_v38, %v8004_v38 }
 0x24f   :  { %v2407_v46 = vmul.f32 %v8137_v35, %v8137_v35  ;;  %v2410_v25 = vmul.f32 %v8000_v44, %v8000_v44 }
 0x250   :  { %v2123_v55 = vadd.f32 %v2122_v47, %v2121_v37  ;;  %v2716_v45 = vadd.f32 %v2715_v53, %v2714_v13  ;;  %v2723_v47 = vsel %vm1886_vm1, %v2406_v17, 0.0  ;;  %v2132_v53 = vsel %vm1886_vm1, %v8137_v35, 0.0  ;;  %v8138_v17 = vld [vmem:[#allocation52_spill] sm:$0xff] }
 0x251   :  { %v2138_v35 = vsel %vm1886_vm1, %v8000_v44, 0.0 }
 0x252   :  { %v2125_v8 = vadd.f32 %v2124_v10, %v2123_v55  ;;  %v2718_v40 = vadd.f32 %v2717_v27, %v2716_v45  ;;  %v2134_v55 = vsel %vm1886_vm1, %v8004_v38, 0.0  ;;  %v2727_v45 = vsel %vm1886_vm1, %v2408_v48, 0.0 }
 0x253   :  { %v2409_v27 = vmul.f32 %v7985_v3, %v7985_v3  ;;  %v2411_v38 = vmul.f32 %v8138_v17, %v8138_v17 }
 0x254   :  { %v2127_v6 = vadd.f32 %v2126_v33, %v2125_v8  ;;  %v2720_v22 = vadd.f32 %v2719_v39, %v2718_v40  ;;  %v2725_v33 = vsel %vm1886_vm1, %v2407_v46, 0.0  ;;  %v2136_v8 = vsel %vm1886_vm1, %v7985_v3, 0.0 }
 0x255   :  { %v2140_v3 = vsel %vm1886_vm1, %v8138_v17, 0.0 }
 0x256   :  { %v2129_v36 = vadd.f32 %v2128_v56, %v2127_v6  ;;  %v2722_v37 = vadd.f32 %v2721_v21, %v2720_v22  ;;  %v2729_v6 = vsel %vm1886_vm1, %v2409_v27, 0.0  ;;  %v2412_v56 = vmul.f32 %v8024_v57, %v8024_v57 }
 0x257   :  { %v2731_v21 = vsel %vm1886_vm1, %v2410_v25, 0.0  ;;  %v2416_v25 = vmul.f32 %v8041_v7, %v8041_v7 }
 0x258   :  { %v2131_v13 = vadd.f32 %v2130_v0, %v2129_v36  ;;  %v2724_v10 = vadd.f32 %v2723_v47, %v2722_v37  ;;  %v2142_v36 = vsel %vm1886_vm1, %v8024_v57, 0.0  ;;  %v2733_v37 = vsel %vm1886_vm1, %v2411_v38, 0.0 }
 0x259   :  { %v2735_v47 = vsel %vm1886_vm1, %v2412_v56, 0.0  ;;  %v2415_v57 = vmul.f32 %v8034_v29, %v8034_v29  ;;  %v2150_v56 = vsel %vm1886_vm1, %v8041_v7, 0.0  ;;  %v2419_v7 = vmul.f32 %v8050_v43, %v8050_v43 }
 0x25a   :  { %v2133_v39 = vadd.f32 %v2132_v53, %v2131_v13  ;;  %v2726_v12 = vadd.f32 %v2725_v33, %v2724_v10  ;;  %v8139_v13 = vld [vmem:[#allocation62_spill] sm:$0xff]  ;;  %v8140_v10 = vld [vmem:[#allocation56_spill] sm:$0xff] }
 0x25b   :  { %v2413_v53 = vmul.f32 %v8139_v13, %v8139_v13  ;;  %v2414_v33 = vmul.f32 %v8140_v10, %v8140_v10  ;;  %v2144_v27 = vsel %vm1886_vm1, %v8139_v13, 0.0  ;;  %v2420_v13 = vmul.f32 %v8057_v19, %v8057_v19 }
 0x25c   :  { %v2135_v1 = vadd.f32 %v2134_v55, %v2133_v39  ;;  %v2728_v40 = vadd.f32 %v2727_v45, %v2726_v12 }
 0x25d   :  { %v2737_v12 = vsel %vm1886_vm1, %v2413_v53, 0.0  ;;  %v2739_v17 = vsel %vm1886_vm1, %v2414_v33, 0.0 }
 0x25e   :  { %v2137_v22 = vadd.f32 %v2136_v8, %v2135_v1  ;;  %v2730_v46 = vadd.f32 %v2729_v6, %v2728_v40  ;;  %v2146_v8 = vsel %vm1886_vm1, %v8140_v10, 0.0  ;;  %v2148_v6 = vsel %vm1886_vm1, %v8034_v29, 0.0 }
 0x25f   :  { %v2152_v29 = vsel %vm1886_vm1, %v8031_v4, 0.0 }
 0x260   :  { %v2139_v48 = vadd.f32 %v2138_v35, %v2137_v22  ;;  %v2732_v0 = vadd.f32 %v2731_v21, %v2730_v46  ;;  %v2741_v35 = vsel %vm1886_vm1, %v2415_v57, 0.0  ;;  %v2743_v46 = vsel %vm1886_vm1, %v2416_v25, 0.0 }
 0x261   :  { %v2417_v21 = vmul.f32 %v8031_v4, %v8031_v4  ;;  %v2156_v4 = vsel %vm1886_vm1, %v8050_v43, 0.0  ;;  %v2751_v57 = vsel %vm1886_vm1, %v2420_v13, 0.0  ;;  %v2160_v43 = vsel %vm1886_vm1, %v8047_v54, 0.0 }
 0x262   :  { %v2141_v55 = vadd.f32 %v2140_v3, %v2139_v48  ;;  %v2734_v44 = vadd.f32 %v2733_v37, %v2732_v0 }
 0x264   :  { %v2143_v45 = vadd.f32 %v2142_v36, %v2141_v55  ;;  %v2736_v39 = vadd.f32 %v2735_v47, %v2734_v44  ;;  %v2418_v36 = vmul.f32 %v8039_v50, %v8039_v50  ;;  %v2745_v47 = vsel %vm1886_vm1, %v2417_v21, 0.0 }
 0x265   :  { %v2154_v55 = vsel %vm1886_vm1, %v8039_v50, 0.0  ;;  %v2166_v21 = vsel %vm1886_vm1, %v8073_v30, 0.0 }
 0x266   :  { %v2145_v1 = vadd.f32 %v2144_v27, %v2143_v45  ;;  %v2738_v40 = vadd.f32 %v2737_v12, %v2736_v39  ;;  %v2747_v10 = vsel %vm1886_vm1, %v2418_v36, 0.0  ;;  %v2158_v45 = vsel %vm1886_vm1, %v8057_v19, 0.0 }
 0x267   :  { %v2749_v39 = vsel %vm1886_vm1, %v2419_v7, 0.0  ;;  %v2421_v12 = vmul.f32 %v8047_v54, %v8047_v54  ;;  %v2423_v19 = vmul.f32 %v8066_v41, %v8066_v41  ;;  %v2164_v54 = vsel %vm1886_vm1, %v8066_v41, 0.0 }
 0x268   :  { %v2147_v38 = vadd.f32 %v2146_v8, %v2145_v1  ;;  %v2740_v22 = vadd.f32 %v2739_v17, %v2738_v40  ;;  %v2422_v1 = vmul.f32 %v8055_v26, %v8055_v26  ;;  %v2168_v41 = vsel %vm1886_vm1, %v8063_v31, 0.0 }
 0x269   :  { %v2753_v17 = vsel %vm1886_vm1, %v2421_v12, 0.0  ;;  %v2429_v12 = vmul.f32 %v8080_v24, %v8080_v24 }
 0x26a   :  { %v2149_v48 = vadd.f32 %v2148_v6, %v2147_v38  ;;  %v2742_v3 = vadd.f32 %v2741_v35, %v2740_v22  ;;  %v2424_v38 = vmul.f32 %v8073_v30, %v8073_v30  ;;  %v2755_v35 = vsel %vm1886_vm1, %v2422_v1, 0.0 }
 0x26b   :  { %v2427_v30 = vmul.f32 %v8085_v61, %v8085_v61 }
 0x26c   :  { %v2151_v0 = vadd.f32 %v2150_v56, %v2149_v48  ;;  %v2744_v37 = vadd.f32 %v2743_v46, %v2742_v3  ;;  %v2162_v56 = vsel %vm1886_vm1, %v8055_v26, 0.0  ;;  %v2757_v3 = vsel %vm1886_vm1, %v2423_v19, 0.0 }
 0x26d   :  { %v2759_v36 = vsel %vm1886_vm1, %v2424_v38, 0.0 }
 0x26e   :  { %v2153_v53 = vadd.f32 %v2152_v29, %v2151_v0  ;;  %v2746_v44 = vadd.f32 %v2745_v47, %v2744_v37  ;;  %v2425_v0 = vmul.f32 %v8063_v31, %v8063_v31  ;;  %v2426_v37 = vmul.f32 %v8071_v23, %v8071_v23 }
 0x26f   :  { %v2172_v31 = vsel %vm1886_vm1, %v8085_v61, 0.0  ;;  %v2176_v61 = vsel %vm1886_vm1, %v8080_v24, 0.0  ;;  %v2180_v24 = vsel %vm1886_vm1, %v8099_v5, 0.0 }
 0x270   :  { %v2155_v33 = vadd.f32 %v2154_v55, %v2153_v53  ;;  %v2748_v27 = vadd.f32 %v2747_v10, %v2746_v44  ;;  %v2761_v13 = vsel %vm1886_vm1, %v2425_v0, 0.0  ;;  %v2428_v53 = vmul.f32 %v8096_v14, %v8096_v14 }
 0x271   :  { %v2170_v44 = vsel %vm1886_vm1, %v8071_v23, 0.0 }
 0x272   :  { %v2157_v25 = vadd.f32 %v2156_v4, %v2155_v33  ;;  %v2750_v50 = vadd.f32 %v2749_v39, %v2748_v27  ;;  %v2763_v33 = vsel %vm1886_vm1, %v2426_v37, 0.0  ;;  %v2765_v39 = vsel %vm1886_vm1, %v2427_v30, 0.0  ;;  %v8143_v37 = vld [vmem:[#allocation99_spill] sm:$0xff] }
 0x274   :  { %v2159_v8 = vadd.f32 %v2158_v45, %v2157_v25  ;;  %v2752_v40 = vadd.f32 %v2751_v57, %v2750_v50  ;;  %v2174_v45 = vsel %vm1886_vm1, %v8096_v14, 0.0  ;;  %v2767_v57 = vsel %vm1886_vm1, %v2428_v53, 0.0 }
 0x275   :  { %v2430_v50 = vmul.f32 %v8092_v49, %v8092_v49  ;;  %v2431_v14 = vmul.f32 %v8099_v5, %v8099_v5 }
 0x276   :  { %v2161_v6 = vadd.f32 %v2160_v43, %v2159_v8  ;;  %v2754_v22 = vadd.f32 %v2753_v17, %v2752_v40  ;;  %v2769_v43 = vsel %vm1886_vm1, %v2429_v12, 0.0  ;;  %v2432_v40 = vmul.f32 %v8109_v63, %v8109_v63 }
 0x277   :  { %v2178_v17 = vsel %vm1886_vm1, %v8092_v49, 0.0 }
 0x278   :  { %v2163_v46 = vadd.f32 %v2162_v56, %v2161_v6  ;;  %v2756_v48 = vadd.f32 %v2755_v35, %v2754_v22  ;;  %v2771_v6 = vsel %vm1886_vm1, %v2430_v50, 0.0  ;;  %v2182_v22 = vsel %vm1886_vm1, %v8109_v63, 0.0 }
 0x279   :  { %v2435_v63 = vmul.f32 %v8143_v37, %v8143_v37 }
 0x27a   :  { %v2165_v29 = vadd.f32 %v2164_v54, %v2163_v46  ;;  %v2758_v26 = vadd.f32 %v2757_v3, %v2756_v48  ;;  %v2773_v46 = vsel %vm1886_vm1, %v2431_v14, 0.0  ;;  %v2775_v54 = vsel %vm1886_vm1, %v2432_v40, 0.0  ;;  %v8148_v40 = vld [vmem:[#allocation109_spill] sm:$0xff] }
 0x27c   :  { %v2167_v7 = vadd.f32 %v2166_v21, %v2165_v29  ;;  %v2760_v47 = vadd.f32 %v2759_v36, %v2758_v26  ;;  %v8141_v21 = vld [vmem:[#allocation101_spill] sm:$0xff]  ;;  %v8142_v36 = vld [vmem:[#allocation96_spill] sm:$0xff] }
 0x27d   :  { %v2433_v48 = vmul.f32 %v8141_v21, %v8141_v21  ;;  %v2434_v0 = vmul.f32 %v8142_v36, %v8142_v36  ;;  %v2184_v5 = vsel %vm1886_vm1, %v8141_v21, 0.0 }
 0x27e   :  { %v2169_v55 = vadd.f32 %v2168_v41, %v2167_v7  ;;  %v2762_v10 = vadd.f32 %v2761_v13, %v2760_v47  ;;  %v8144_v41 = vld [vmem:[#allocation103_spill] sm:$0xff]  ;;  %v2186_v13 = vsel %vm1886_vm1, %v8142_v36, 0.0 }
 0x27f   :  { %v2777_v7 = vsel %vm1886_vm1, %v2433_v48, 0.0  ;;  %v2436_v47 = vmul.f32 %v8144_v41, %v8144_v41  ;;  %v8149_v48 = vld [vmem:[#allocation113_spill] sm:$0xff] }
 0x280   :  { %v2171_v4 = vadd.f32 %v2170_v44, %v2169_v55  ;;  %v2764_v27 = vadd.f32 %v2763_v33, %v2762_v10  ;;  %v2779_v55 = vsel %vm1886_vm1, %v2434_v0, 0.0  ;;  %v2188_v10 = vsel %vm1886_vm1, %v8143_v37, 0.0  ;;  %v8150_v0 = vld [vmem:[#allocation108_spill] sm:$0xff] }
 0x281   :  { %v2190_v33 = vsel %vm1886_vm1, %v8144_v41, 0.0 }
 0x282   :  { %v2173_v25 = vadd.f32 %v2172_v31, %v2171_v4  ;;  %v2766_v23 = vadd.f32 %v2765_v39, %v2764_v27  ;;  %v2781_v31 = vsel %vm1886_vm1, %v2435_v63, 0.0  ;;  %v8145_v27 = vld [vmem:[#allocation105_spill] sm:$0xff]  ;;  %v8151_v63 = vld [vmem:[#allocation111_spill] sm:$0xff] }
 0x283   :  { %v2437_v39 = vmul.f32 %v8145_v27, %v8145_v27 }
 0x284   :  { %v2175_v1 = vadd.f32 %v2174_v45, %v2173_v25  ;;  %v2768_v8 = vadd.f32 %v2767_v57, %v2766_v23  ;;  %v2783_v45 = vsel %vm1886_vm1, %v2436_v47, 0.0  ;;  %v8146_v25 = vld [vmem:[#allocation102_spill] sm:$0xff]  ;;  %v8152_v47 = vld [vmem:[#allocation119_spill] sm:$0xff] }
 0x285   :  { %v2438_v23 = vmul.f32 %v8146_v25, %v8146_v25 }
 0x286   :  { %v2177_v19 = vadd.f32 %v2176_v61, %v2175_v1  ;;  %v2770_v38 = vadd.f32 %v2769_v43, %v2768_v8  ;;  %v2192_v1 = vsel %vm1886_vm1, %v8145_v27, 0.0  ;;  %v8147_v8 = vld [vmem:[#allocation104_spill] sm:$0xff]  ;;  %v2785_v43 = vsel %vm1886_vm1, %v2437_v39, 0.0  ;;  %v8153_v39 = vld [vmem:[#allocation122_spill] sm:$0xff] }
 0x287   :  { %v2439_v14 = vmul.f32 %v8147_v8, %v8147_v8 }
 0x288   :  { %v2179_v56 = vadd.f32 %v2178_v17, %v2177_v19  ;;  %v2772_v35 = vadd.f32 %v2771_v6, %v2770_v38  ;;  %v2440_v19 = vmul.f32 %v8148_v40, %v8148_v40  ;;  %v2194_v38 = vsel %vm1886_vm1, %v8146_v25, 0.0 }
 0x28a   :  { %v2181_v3 = vadd.f32 %v2180_v24, %v2179_v56  ;;  %v2774_v49 = vadd.f32 %v2773_v46, %v2772_v35  ;;  %v2787_v56 = vsel %vm1886_vm1, %v2438_v23, 0.0  ;;  %v2198_v35 = vsel %vm1886_vm1, %v8148_v40, 0.0  ;;  %v8154_v23 = vld [vmem:[#allocation116_spill] sm:$0xff] }
 0x28b   :  { %v2791_v21 = vsel %vm1886_vm1, %v2440_v19, 0.0  ;;  %v8156_v19 = vld [vmem:[#allocation127_spill] sm:$0xff] }
 0x28c   :  { %v2183_v29 = vadd.f32 %v2182_v22, %v2181_v3  ;;  %v2776_v26 = vadd.f32 %v2775_v54, %v2774_v49  ;;  %v2196_v22 = vsel %vm1886_vm1, %v8147_v8, 0.0  ;;  %v2789_v54 = vsel %vm1886_vm1, %v2439_v14, 0.0  ;;  %v8155_v14 = vld [vmem:[#allocation121_spill] sm:$0xff] }
 0x28d   :  { %v2441_v3 = vmul.f32 %v8149_v48, %v8149_v48 }
 0x28e   :  { %v2185_v30 = vadd.f32 %v2184_v5, %v2183_v29  ;;  %v2778_v53 = vadd.f32 %v2777_v7, %v2776_v26  ;;  %v2442_v29 = vmul.f32 %v8150_v0, %v8150_v0  ;;  %v2200_v26 = vsel %vm1886_vm1, %v8149_v48, 0.0 }
 0x28f   :  { %v2443_v7 = vmul.f32 %v8151_v63, %v8151_v63  ;;  %v2793_v41 = vsel %vm1886_vm1, %v2441_v3, 0.0  ;;  %v8157_v3 = vld [vmem:[#allocation131_spill] sm:$0xff] }
 0x290   :  { %v2187_v44 = vadd.f32 %v2186_v13, %v2185_v30  ;;  %v2780_v4 = vadd.f32 %v2779_v55, %v2778_v53  ;;  %v2444_v30 = vmul.f32 %v8152_v47, %v8152_v47  ;;  %v2202_v53 = vsel %vm1886_vm1, %v8150_v0, 0.0 }
 0x292   :  { %v2189_v57 = vadd.f32 %v2188_v10, %v2187_v44  ;;  %v2782_v12 = vadd.f32 %v2781_v31, %v2780_v4  ;;  %v2795_v44 = vsel %vm1886_vm1, %v2442_v29, 0.0  ;;  %v2206_v4 = vsel %vm1886_vm1, %v8152_v47, 0.0  ;;  %v8158_v29 = vld [vmem:[#allocation125_spill] sm:$0xff] }
 0x293   :  { %v2799_v27 = vsel %vm1886_vm1, %v2444_v30, 0.0  ;;  %v8160_v30 = vld [vmem:[#allocation136_spill] sm:$0xff] }
 0x294   :  { %v2191_v50 = vadd.f32 %v2190_v33, %v2189_v57  ;;  %v2784_v61 = vadd.f32 %v2783_v45, %v2782_v12  ;;  %v2204_v33 = vsel %vm1886_vm1, %v8151_v63, 0.0  ;;  %v2797_v45 = vsel %vm1886_vm1, %v2443_v7, 0.0  ;;  %v8159_v7 = vld [vmem:[#allocation130_spill] sm:$0xff] }
 0x295   :  { %v2445_v57 = vmul.f32 %v8153_v39, %v8153_v39 }
 0x296   :  { %v2193_v17 = vadd.f32 %v2192_v1, %v2191_v50  ;;  %v2786_v6 = vadd.f32 %v2785_v43, %v2784_v61  ;;  %v2446_v50 = vmul.f32 %v8154_v23, %v8154_v23  ;;  %v2208_v61 = vsel %vm1886_vm1, %v8153_v39, 0.0 }
 0x297   :  { %v2447_v43 = vmul.f32 %v8155_v14, %v8155_v14  ;;  %v2801_v40 = vsel %vm1886_vm1, %v2445_v57, 0.0  ;;  %v8161_v57 = vld [vmem:[#allocation139_spill] sm:$0xff] }
 0x298   :  { %v2195_v24 = vadd.f32 %v2194_v38, %v2193_v17  ;;  %v2788_v46 = vadd.f32 %v2787_v56, %v2786_v6  ;;  %v2448_v17 = vmul.f32 %v8156_v19, %v8156_v19  ;;  %v2210_v6 = vsel %vm1886_vm1, %v8154_v23, 0.0 }
 0x29a   :  { %v2197_v49 = vadd.f32 %v2196_v22, %v2195_v24  ;;  %v2790_v36 = vadd.f32 %v2789_v54, %v2788_v46  ;;  %v2803_v24 = vsel %vm1886_vm1, %v2446_v50, 0.0  ;;  %v2214_v46 = vsel %vm1886_vm1, %v8156_v19, 0.0  ;;  %v8162_v50 = vld [vmem:[#allocation135_spill] sm:$0xff] }
 0x29b   :  { %v2807_v48 = vsel %vm1886_vm1, %v2448_v17, 0.0  ;;  %v8164_v17 = vld [vmem:[#allocation145_spill] sm:$0xff] }
 0x29c   :  { %v2199_v5 = vadd.f32 %v2198_v35, %v2197_v49  ;;  %v2792_v37 = vadd.f32 %v2791_v21, %v2790_v36  ;;  %v2212_v35 = vsel %vm1886_vm1, %v8155_v14, 0.0  ;;  %v2805_v21 = vsel %vm1886_vm1, %v2447_v43, 0.0  ;;  %v8163_v43 = vld [vmem:[#allocation138_spill] sm:$0xff] }
 0x29d   :  { %v2449_v49 = vmul.f32 %v8157_v3, %v8157_v3 }
 0x29e   :  { %v2201_v13 = vadd.f32 %v2200_v26, %v2199_v5  ;;  %v2794_v55 = vadd.f32 %v2793_v41, %v2792_v37  ;;  %v2450_v5 = vmul.f32 %v8158_v29, %v8158_v29  ;;  %v2216_v37 = vsel %vm1886_vm1, %v8157_v3, 0.0 }
 0x29f   :  { %v2451_v41 = vmul.f32 %v8159_v7, %v8159_v7  ;;  %v2809_v47 = vsel %vm1886_vm1, %v2449_v49, 0.0  ;;  %v8165_v49 = vld [vmem:[#allocation146_spill] sm:$0xff] }
 0x2a0   :  { %v2203_v10 = vadd.f32 %v2202_v53, %v2201_v13  ;;  %v2796_v31 = vadd.f32 %v2795_v44, %v2794_v55  ;;  %v2452_v13 = vmul.f32 %v8160_v30, %v8160_v30  ;;  %v2218_v55 = vsel %vm1886_vm1, %v8158_v29, 0.0 }
 0x2a2   :  { %v2205_v12 = vadd.f32 %v2204_v33, %v2203_v10  ;;  %v2798_v25 = vadd.f32 %v2797_v45, %v2796_v31  ;;  %v2811_v10 = vsel %vm1886_vm1, %v2450_v5, 0.0  ;;  %v2222_v31 = vsel %vm1886_vm1, %v8160_v30, 0.0  ;;  %v8166_v5 = vld [vmem:[#allocation144_spill] sm:$0xff] }
 0x2a3   :  { %v2815_v39 = vsel %vm1886_vm1, %v2452_v13, 0.0  ;;  %v8167_v30 = vld [vmem:[#allocation152_spill] sm:$0xff] }
 0x2a4   :  { %v2207_v1 = vadd.f32 %v2206_v4, %v2205_v12  ;;  %v2800_v8 = vadd.f32 %v2799_v27, %v2798_v25  ;;  %v2220_v4 = vsel %vm1886_vm1, %v8159_v7, 0.0  ;;  %v2813_v27 = vsel %vm1886_vm1, %v2451_v41, 0.0 }
 0x2a5   :  { %v2453_v12 = vmul.f32 %v8161_v57, %v8161_v57  ;;  %v2459_v41 = vmul.f32 %v5493_v9, %v5493_v9  ;;  %v2460_v13 = vmul.f32 %v8167_v30, %v8167_v30 }
 0x2a6   :  { %v2209_v38 = vadd.f32 %v2208_v61, %v2207_v1  ;;  %v2802_v56 = vadd.f32 %v2801_v40, %v2800_v8  ;;  %v2454_v1 = vmul.f32 %v8162_v50, %v8162_v50  ;;  %v2224_v8 = vsel %vm1886_vm1, %v8161_v57, 0.0 }
 0x2a7   :  { %v2455_v40 = vmul.f32 %v8163_v43, %v8163_v43  ;;  %v2817_v19 = vsel %vm1886_vm1, %v2453_v12, 0.0  ;;  %v2461_v57 = vmul.f32 %v5560_v32, %v5560_v32 }
 0x2a8   :  { %v2211_v22 = vadd.f32 %v2210_v6, %v2209_v38  ;;  %v2804_v54 = vadd.f32 %v2803_v24, %v2802_v56  ;;  %v2456_v38 = vmul.f32 %v8164_v17, %v8164_v17  ;;  %v2226_v56 = vsel %vm1886_vm1, %v8162_v50, 0.0 }
 0x2aa   :  { %v2213_v36 = vadd.f32 %v2212_v35, %v2211_v22  ;;  %v2806_v0 = vadd.f32 %v2805_v21, %v2804_v54  ;;  %v2819_v22 = vsel %vm1886_vm1, %v2454_v1, 0.0  ;;  %v2230_v54 = vsel %vm1886_vm1, %v8164_v17, 0.0 }
 0x2ab   :  { %v2823_v3 = vsel %vm1886_vm1, %v2456_v38, 0.0 }
 0x2ac   :  { %v2215_v26 = vadd.f32 %v2214_v46, %v2213_v36  ;;  %v2808_v63 = vadd.f32 %v2807_v48, %v2806_v0  ;;  %v2228_v46 = vsel %vm1886_vm1, %v8163_v43, 0.0  ;;  %v2821_v48 = vsel %vm1886_vm1, %v2455_v40, 0.0 }
 0x2ad   :  { %v2457_v36 = vmul.f32 %v8165_v49, %v8165_v49  ;;  %v2833_v43 = vsel %vm1886_vm1, %v2461_v57, 0.0  ;;  %v2464_v40 = vmul.f32 %v5605_v2, %v5605_v2 }
 0x2ae   :  { %v2217_v53 = vadd.f32 %v2216_v37, %v2215_v26  ;;  %v2810_v44 = vadd.f32 %v2809_v47, %v2808_v63  ;;  %v2458_v26 = vmul.f32 %v8166_v5, %v8166_v5  ;;  %v2232_v63 = vsel %vm1886_vm1, %v8165_v49, 0.0 }
 0x2af   :  { %v2825_v47 = vsel %vm1886_vm1, %v2457_v36, 0.0  ;;  %v2248_v36 = vsel %vm1886_vm1, %v5630_v16, 0.0 }
 0x2b0   :  { %v2219_v33 = vadd.f32 %v2218_v55, %v2217_v53  ;;  %v2812_v45 = vadd.f32 %v2811_v10, %v2810_v44  ;;  %v2234_v55 = vsel %vm1886_vm1, %v8166_v5, 0.0  ;;  %v2827_v10 = vsel %vm1886_vm1, %v2458_v26, 0.0 }
 0x2b1   :  { %v2468_v26 = vmul.f32 %v5664_v20, %v5664_v20 }
 0x2b2   :  { %v2221_v25 = vadd.f32 %v2220_v4, %v2219_v33  ;;  %v2814_v23 = vadd.f32 %v2813_v27, %v2812_v45  ;;  %v2236_v4 = vsel %vm1886_vm1, %v5493_v9, 0.0  ;;  %v2829_v27 = vsel %vm1886_vm1, %v2459_v41, 0.0 }
 0x2b3   :  { %v2240_v9 = vsel %vm1886_vm1, %v5560_v32, 0.0 }
 0x2b4   :  { %v2223_v61 = vadd.f32 %v2222_v31, %v2221_v25  ;;  %v2816_v14 = vadd.f32 %v2815_v39, %v2814_v23  ;;  %v2238_v31 = vsel %vm1886_vm1, %v8167_v30, 0.0  ;;  %v2831_v39 = vsel %vm1886_vm1, %v2460_v13, 0.0  ;;  %v8168_v23 = vld [vmem:[#allocation151_spill] sm:$0xff] }
 0x2b5   :  { %v2462_v50 = vmul.f32 %v8168_v23, %v8168_v23  ;;  %v2242_v17 = vsel %vm1886_vm1, %v8168_v23, 0.0  ;;  %v2254_v30 = vsel %vm1886_vm1, %v5664_v20, 0.0  ;;  %v2471_v20 = vmul.f32 %v5678_v51, %v5678_v51 }
 0x2b6   :  { %v2225_v6 = vadd.f32 %v2224_v8, %v2223_v61  ;;  %v2818_v24 = vadd.f32 %v2817_v19, %v2816_v14  ;;  %v8169_v8 = vld [vmem:[#allocation153_spill] sm:$0xff] }
 0x2b7   :  { %v2463_v14 = vmul.f32 %v8169_v8, %v8169_v8  ;;  %v2244_v32 = vsel %vm1886_vm1, %v8169_v8, 0.0 }
 0x2b8   :  { %v2227_v35 = vadd.f32 %v2226_v56, %v2225_v6  ;;  %v2820_v21 = vadd.f32 %v2819_v22, %v2818_v24  ;;  %v2835_v6 = vsel %vm1886_vm1, %v2462_v50, 0.0  ;;  %v2246_v24 = vsel %vm1886_vm1, %v5605_v2, 0.0 }
 0x2ba   :  { %v2229_v0 = vadd.f32 %v2228_v46, %v2227_v35  ;;  %v2822_v29 = vadd.f32 %v2821_v48, %v2820_v21  ;;  %v2837_v35 = vsel %vm1886_vm1, %v2463_v14, 0.0  ;;  %v2839_v46 = vsel %vm1886_vm1, %v2464_v40, 0.0  ;;  %v8171_v14 = vld [vmem:[#allocation53_spill] sm:$0xff] }
 0x2bc   :  { %v2231_v37 = vadd.f32 %v2230_v54, %v2229_v0  ;;  %v2824_v7 = vadd.f32 %v2823_v3, %v2822_v29  ;;  %v2465_v54 = vmul.f32 %v5630_v16, %v5630_v16  ;;  %v2466_v3 = vmul.f32 %v5597_v58, %v5597_v58  ;;  %v8170_v29 = vld [vmem:[#allocation34_spill] sm:$0xff] }
 0x2bd   :  { %v2467_v2 = vmul.f32 %v8170_v29, %v8170_v29  ;;  %v2252_v16 = vsel %vm1886_vm1, %v8170_v29, 0.0 }
 0x2be   :  { %v2233_v53 = vadd.f32 %v2232_v63, %v2231_v37  ;;  %v2826_v44 = vadd.f32 %v2825_v47, %v2824_v7  ;;  %v2841_v5 = vsel %vm1886_vm1, %v2465_v54, 0.0  ;;  %v2250_v63 = vsel %vm1886_vm1, %v5597_v58, 0.0 }
 0x2bf   :  { %v2843_v41 = vsel %vm1886_vm1, %v2466_v3, 0.0 }
 0x2c0   :  { %v2235_v33 = vadd.f32 %v2234_v55, %v2233_v53  ;;  %v2828_v45 = vadd.f32 %v2827_v10, %v2826_v44  ;;  %v2845_v53 = vsel %vm1886_vm1, %v2467_v2, 0.0  ;;  %v2847_v55 = vsel %vm1886_vm1, %v2468_v26, 0.0 }
 0x2c1   :  { %v2469_v44 = vmul.f32 %v5687_v59, %v5687_v59  ;;  %v2477_v2 = vmul.f32 %v8095_v60, %v8095_v60 }
 0x2c2   :  { %v2237_v12 = vadd.f32 %v2236_v4, %v2235_v33  ;;  %v2830_v25 = vadd.f32 %v2829_v27, %v2828_v45  ;;  %v2470_v33 = vmul.f32 %v5658_v11, %v5658_v11 }
 0x2c3   :  { %v2849_v27 = vsel %vm1886_vm1, %v2469_v44, 0.0 }
 0x2c4   :  { %v2239_v1 = vadd.f32 %v2238_v31, %v2237_v12  ;;  %v2832_v61 = vadd.f32 %v2831_v39, %v2830_v25  ;;  %v2256_v31 = vsel %vm1886_vm1, %v5687_v59, 0.0  ;;  %v2472_v39 = vmul.f32 %v5734_v42, %v5734_v42 }
 0x2c5   :  { %v2258_v12 = vsel %vm1886_vm1, %v5658_v11, 0.0  ;;  %v2851_v23 = vsel %vm1886_vm1, %v2470_v33, 0.0  ;;  %v2260_v59 = vsel %vm1886_vm1, %v5678_v51, 0.0  ;;  %v2264_v51 = vsel %vm1886_vm1, %v8171_v14, 0.0 }
 0x2c6   :  { %v2241_v19 = vadd.f32 %v2240_v9, %v2239_v1  ;;  %v2834_v38 = vadd.f32 %v2833_v43, %v2832_v61  ;;  %v2262_v1 = vsel %vm1886_vm1, %v5734_v42, 0.0  ;;  %v2853_v61 = vsel %vm1886_vm1, %v2471_v20, 0.0 }
 0x2c7   :  { %v2855_v8 = vsel %vm1886_vm1, %v2472_v39, 0.0  ;;  %v2473_v43 = vmul.f32 %v8171_v14, %v8171_v14 }
 0x2c8   :  { %v2243_v56 = vadd.f32 %v2242_v17, %v2241_v19  ;;  %v2836_v22 = vadd.f32 %v2835_v6, %v2834_v38  ;;  %v8172_v19 = vld [vmem:[#allocation39_spill] sm:$0xff] }
 0x2c9   :  { %v2474_v17 = vmul.f32 %v8172_v19, %v8172_v19 }
 0x2ca   :  { %v2245_v21 = vadd.f32 %v2244_v32, %v2243_v56  ;;  %v2838_v48 = vadd.f32 %v2837_v35, %v2836_v22  ;;  %v8173_v56 = vld [vmem:[#allocation165_spill] sm:$0xff]  ;;  %v2857_v32 = vsel %vm1886_vm1, %v2473_v43, 0.0 }
 0x2cb   :  { %v2475_v42 = vmul.f32 %v8173_v56, %v8173_v56  ;;  %v2268_v3 = vsel %vm1886_vm1, %v8173_v56, 0.0 }
 0x2cc   :  { %v2247_v49 = vadd.f32 %v2246_v24, %v2245_v21  ;;  %v2840_v0 = vadd.f32 %v2839_v46, %v2838_v48  ;;  %v8174_v24 = vld [vmem:[#allocation169_spill] sm:$0xff]  ;;  %v2266_v46 = vsel %vm1886_vm1, %v8172_v19, 0.0  ;;  %v2859_v21 = vsel %vm1886_vm1, %v2474_v17, 0.0 }
 0x2cd   :  { %v2476_v22 = vmul.f32 %v8174_v24, %v8174_v24  ;;  %v3182_v17 = vlaneseq }
 0x2ce   :  { %v2249_v37 = vadd.f32 %v2248_v36, %v2247_v49  ;;  %v2842_v7 = vadd.f32 %v2841_v5, %v2840_v0  ;;  %v2270_v49 = vsel %vm1886_vm1, %v8174_v24, 0.0  ;;  %v2861_v0 = vsel %vm1886_vm1, %v2475_v42, 0.0 }
 0x2cf   :  { %v2863_v29 = vsel %vm1886_vm1, %v2476_v22, 0.0 }
 0x2d0   :  { %v2251_v47 = vadd.f32 %v2250_v63, %v2249_v37  ;;  %v2844_v13 = vadd.f32 %v2843_v41, %v2842_v7  ;;  %v8175_v37 = vld [vmem:[#allocation43_spill] sm:$0xff]  ;;  %v2272_v41 = vsel %vm1886_vm1, %v8095_v60, 0.0 }
 0x2d1   :  { %v2478_v63 = vmul.f32 %v8175_v37, %v8175_v37 }
 0x2d2   :  { %v2253_v10 = vadd.f32 %v2252_v16, %v2251_v47  ;;  %v2846_v58 = vadd.f32 %v2845_v53, %v2844_v13  ;;  %v8176_v16 = vld [vmem:[#allocation172_spill] sm:$0xff]  ;;  %v2865_v13 = vsel %vm1886_vm1, %v2477_v2, 0.0 }
 0x2d3   :  { %v2276_v33 = vsel %vm1886_vm1, %v8176_v16, 0.0 }
 0x2d4   :  { %v2255_v4 = vadd.f32 %v2254_v30, %v2253_v10  ;;  %v2848_v45 = vadd.f32 %v2847_v55, %v2846_v58  ;;  %v2479_v30 = vmul.f32 %v8176_v16, %v8176_v16  ;;  %v2274_v55 = vsel %vm1886_vm1, %v8175_v37, 0.0  ;;  %v8183_v37 = vld [vmem:[#allocation124_spill] sm:$0xff] }
 0x2d5   :  { %v2867_v10 = vsel %vm1886_vm1, %v2478_v63, 0.0 }
 0x2d6   :  { %v2257_v57 = vadd.f32 %v2256_v31, %v2255_v4  ;;  %v2850_v25 = vadd.f32 %v2849_v27, %v2848_v45  ;;  %v2869_v60 = vsel %vm1886_vm1, %v2479_v30, 0.0  ;;  %v8186_v30 = vld [vmem:[#allocation134_spill] sm:$0xff] }
 0x2d8   :  { %v2259_v50 = vadd.f32 %v2258_v12, %v2257_v57  ;;  %v2852_v9 = vadd.f32 %v2851_v23, %v2850_v25 }
 0x2da   :  { %v2261_v40 = vadd.f32 %v2260_v59, %v2259_v50  ;;  %v2854_v11 = vadd.f32 %v2853_v61, %v2852_v9 }
 0x2dc   :  { %v2263_v38 = vadd.f32 %v2262_v1, %v2261_v40  ;;  %v2856_v6 = vadd.f32 %v2855_v8, %v2854_v11 }
 0x2de   :  { %v2265_v35 = vadd.f32 %v2264_v51, %v2263_v38  ;;  %v2858_v54 = vadd.f32 %v2857_v32, %v2856_v6  ;;  %v3183_v38 = vshrl.u32 %v3182_v17, 7  ;;  %v1884_v51 = vld [vmem:[#allocation7] sm:$0x1]  ;;  %v1885_v32 = vld [vmem:[#allocation8] sm:$0x1]  ;;  %v8200_v17 = vld [vmem:[#allocation49_spill] sm:$0xff] }
 0x2e0   :  { %v2267_v48 = vadd.f32 %v2266_v46, %v2265_v35  ;;  %v2860_v36 = vadd.f32 %v2859_v21, %v2858_v54  ;;  %v3184_v6 = vsub.s32 0, %v3183_v38 }
 0x2e2   :  { %v2269_v5 = vadd.f32 %v2268_v3, %v2267_v48  ;;  %v2862_v26 = vadd.f32 %v2861_v0, %v2860_v36  ;;  %v8177_v3 = vld [vmem:[#allocation106_spill] sm:$0xff] }
 0x2e3   :  { %v8178_v36 = vld [vmem:[#allocation110_spill] sm:$0xff] }
 0x2e4   :  { %v2271_v7 = vadd.f32 %v2270_v49, %v2269_v5  ;;  %v2864_v47 = vadd.f32 %v2863_v29, %v2862_v26 }
 0x2e6   :  { %v2273_v53 = vadd.f32 %v2272_v41, %v2271_v7  ;;  %v2866_v44 = vadd.f32 %v2865_v13, %v2864_v47  ;;  %v8184_v7 = vld [vmem:[#allocation132_spill] sm:$0xff] }
 0x2e7   :  { %v8185_v47 = vld [vmem:[#allocation128_spill] sm:$0xff] }
 0x2e8   :  { %v2275_v58 = vadd.f32 %v2274_v55, %v2273_v53  ;;  %v2868_v4 = vadd.f32 %v2867_v10, %v2866_v44  ;;  %v8187_v55 = vld [vmem:[#allocation140_spill] sm:$0xff]  ;;  %v8188_v10 = vld [vmem:[#allocation147_spill] sm:$0xff] }
 0x2ea   :  { %v2277_v31 = vadd.f32 %v2276_v33, %v2275_v58  ;;  %v2870_v45 = vadd.f32 %v2869_v60, %v2868_v4  ;;  %v8189_v33 = vld [vmem:[#allocation142_spill] sm:$0xff]  ;;  %v8190_v60 = vld [vmem:[#allocation149_spill] sm:$0xff] }
 0x2ec   :  { %v2278_v20 = vrot.slane %v2277_v31, 4  ;;  %v2871_v27 = vrot.slane %v2870_v45, 4 }
 0x2ee   :  { %v2279_v39 = vadd.f32 %v2278_v20, %v2277_v31  ;;  %v2872_v57 = vadd.f32 %v2871_v27, %v2870_v45  ;;  %v8191_v45 = vld [vmem:[#allocation154_spill] sm:$0xff] }
 0x2ef   :  { %v8192_v27 = vld [vmem:[#allocation158_spill] sm:$0xff] }
 0x2f0   :  { %v2280_v12 = vrot.slane %v2279_v39, 2  ;;  %v2873_v25 = vrot.slane %v2872_v57, 2 }
 0x2f2   :  { %v2281_v23 = vadd.f32 %v2280_v12, %v2279_v39  ;;  %v2874_v50 = vadd.f32 %v2873_v25, %v2872_v57  ;;  %v8193_v57 = vld [vmem:[#allocation156_spill] sm:$0xff] }
 0x2f4   :  { %v2282_v59 = vrot.slane %v2281_v23, 1  ;;  %v2875_v1 = vrot.slane %v2874_v50, 1 }
 0x2f6   :  { %v2283_v9 = vadd.f32 %v2282_v59, %v2281_v23  ;;  %v2876_v61 = vadd.f32 %v2875_v1, %v2874_v50  ;;  %v8194_v23 = vld [vmem:[#allocation160_spill] sm:$0xff] }
 0x2f7   :  { %v8195_v59 = vld [vmem:[#allocation36_spill] sm:$0xff] }
 0x2f8   :  { %v2877_v8 = vmul.f32 0.0006377551, %v2283_v9  ;;  %v2878_v14 = vmul.f32 0.0006377551, %v2876_v61  ;;  %v8196_v9 = vld [vmem:[#allocation40_spill] sm:$0xff] }
 0x2fa   :  { %v2879_v43 = vmul.f32 %v2877_v8, %v2877_v8 }
 0x2fc   :  { %v2880_v40 = vsub.f32 %v2878_v14, %v2879_v43  ;;  %v8198_v43 = vld [vmem:[#allocation164_spill] sm:$0xff] }
 0x2fe   :  { %v2881_v11 = vmax.f32 %v2880_v40, 0.0 }
 0x300   :  { %v2882_v19 = vadd.f32 1e-05, %v2881_v11  ;;  %v8199_v11 = vld [vmem:[#allocation54_spill] sm:$0xff] }
 0x302   :  { %4411 = vrsqrt.f32 %v2882_v19 }
 0x30c   :  { %v4412_v56 = vpop.eup %4411 }
 0x30d   :  { %v2884_v42 = vmul.f32 %v4412_v56, %v1884_v51 }
 0x30f   :  { %v2885_v24 = vmul.f32 %v2884_v42, %v2877_v8  ;;  %v6751_v22 = vrot.slane %v2884_v42, %v3184_v6  ;;  %v8197_v8 = vld [vmem:[#allocation162_spill] sm:$0xff] }
 0x310   :  { %v8202_v42 = vld [vmem:[#allocation174_spill] sm:$0xff] }
 0x311   :  { %v2886_v35 = vsub.f32 %v1885_v32, %v2885_v24  ;;  %v3235_v46 = vmul.f32 %v6751_v22, %v6263_v15  ;;  %v3284_v54 = vmul.f32 %v6751_v22, %v6267_v18  ;;  %v6759_v21 = vmul.f32 %v6751_v22, %v6217_v62  ;;  %v8179_v15 = vld [vmem:[#allocation117_spill] sm:$0xff]  ;;  %v8181_v62 = vld [vmem:[#allocation114_spill] sm:$0xff]  ;;  %v8204_v24 = vld [vmem:[#allocation51_spill] sm:$0xff] }
 0x312   :  { %v6763_v48 = vmul.f32 %v6751_v22, %v6247_v34  ;;  %v6767_v49 = vmul.f32 %v6751_v22, %v8177_v3  ;;  %v6771_v0 = vmul.f32 %v6751_v22, %v8178_v36  ;;  %v6775_v29 = vmul.f32 %v6751_v22, %v8179_v15  ;;  %v8182_v34 = vld [vmem:[#allocation120_spill] sm:$0xff]  ;;  %v8210_v15 = vld [vmem:[#allocation58_spill] sm:$0xff] }
 0x313   :  { %v3333_v18 = vmax.f32 %v3235_v46, %v3284_v54  ;;  %v6777_v2 = vrot.slane %v2886_v35, %v3184_v6  ;;  %v6781_v5 = vmul.f32 %v6751_v22, %v8181_v62  ;;  %v6785_v26 = vmul.f32 %v6751_v22, %v8182_v34  ;;  %v8201_v6 = vld [vmem:[#allocation170_spill] sm:$0xff]  ;;  %v8206_v46 = vld [vmem:[#allocation55_spill] sm:$0xff]  ;;  %v8208_v3 = vld [vmem:[#allocation176_spill] sm:$0xff] }
 0x314   :  { %v6789_v63 = vmul.f32 %v6751_v22, %v8183_v37  ;;  %v6793_v41 = vmul.f32 %v6751_v22, %v8184_v7  ;;  %v6797_v16 = vmul.f32 %v6751_v22, %v8185_v47  ;;  %v6801_v13 = vmul.f32 %v6751_v22, %v8186_v30  ;;  %v8212_v62 = vld [vmem:[#allocation70_spill] sm:$0xff]  ;;  %v8214_v37 = vld [vmem:[#allocation63_spill] sm:$0xff]  ;;  %v8216_v47 = vld [vmem:[#allocation60_spill] sm:$0xff] }
 0x315   :  { %8180 = vst [vmem:[#allocation173_spill] sm:$0xff] %v6777_v2  ;;  %v3388_v53 = vadd.f32 %v6777_v2, %v3333_v18  ;;  %v6806_v44 = vmul.f32 %v6751_v22, %v8187_v55  ;;  %v6810_v58 = vmul.f32 %v6751_v22, %v8188_v10  ;;  %v6814_v4 = vmul.f32 %v6751_v22, %v8189_v33  ;;  %v8220_v10 = vld [vmem:[#allocation77_spill] sm:$0xff] }
 0x316   :  { %v6818_v31 = vmul.f32 %v6751_v22, %v8190_v60  ;;  %v6822_v20 = vmul.f32 %v6751_v22, %v8191_v45  ;;  %v6826_v39 = vmul.f32 %v6751_v22, %v8192_v27  ;;  %v6830_v12 = vmul.f32 %v6751_v22, %v8193_v57  ;;  %v8222_v60 = vld [vmem:[#allocation71_spill] sm:$0xff]  ;;  %v8253_v2 = vld [vmem:[#allocation129_spill] sm:$0xff] }
 0x317   :  { %v3437_v25 = vmax.f32 %v3388_v53, 0.0  ;;  %v6834_v50 = vmul.f32 %v6751_v22, %v8194_v23  ;;  %v6838_v1 = vmul.f32 %v6751_v22, %v8195_v59  ;;  %v6842_v61 = vmul.f32 %v6751_v22, %v8196_v9  ;;  %v8218_v53 = vld [vmem:[#allocation65_spill] sm:$0xff]  ;;  %v8224_v27 = vld [vmem:[#allocation67_spill] sm:$0xff] }
 0x318   :  { %v6846_v14 = vmul.f32 %v6751_v22, %v8197_v8  ;;  %v6850_v40 = vmul.f32 %v6751_v22, %v8198_v43  ;;  %v6854_v19 = vmul.f32 %v6751_v22, %v8199_v11  ;;  %v6858_v38 = vmul.f32 %v6751_v22, %v8200_v17  ;;  %v8228_v59 = vld [vmem:[#allocation85_spill] sm:$0xff]  ;;  %v8230_v8 = vld [vmem:[#allocation79_spill] sm:$0xff] }
 0x319   :  { %v3999_v51 = vpack.c.bf16 %v3437_v25, %v3437_v25  ;;  %v6862_v56 = vmul.f32 %v6751_v22, %v8201_v6  ;;  %v6866_v32 = vmul.f32 %v6751_v22, %v8202_v42  ;;  %v6870_v35 = vmul.f32 %v6751_v22, %v8204_v24  ;;  %v8226_v25 = vld [vmem:[#allocation73_spill] sm:$0xff]  ;;  %v8232_v11 = vld [vmem:[#allocation75_spill] sm:$0xff] }
 0x31a   :  { %v6874_v54 = vmul.f32 %v6751_v22, %v8206_v46  ;;  %v6878_v36 = vmul.f32 %v6751_v22, %v8208_v3  ;;  %v6882_v18 = vmul.f32 %v6751_v22, %v8210_v15  ;;  %v6886_v34 = vmul.f32 %v6751_v22, %v8212_v62  ;;  %v8236_v42 = vld [vmem:[#allocation93_spill] sm:$0xff]  ;;  %v8239_v3 = vld [vmem:[#allocation168_spill] sm:$0xff]  ;;  %v8241_v62 = vld [vmem:[#allocation47_spill] sm:$0xff] }
 0x31b   :  { %8203 = vst [vmem:[#allocation90_spill] sm:$0xff] %v6866_v32  ;;  %8205 = vst [vmem:[#allocation92_spill] sm:$0xff] %v6870_v35  ;;  %v6891_v7 = vmul.f32 %v6751_v22, %v8214_v37  ;;  %v6895_v30 = vmul.f32 %v6751_v22, %v8216_v47  ;;  %v6899_v55 = vmul.f32 %v6751_v22, %v8218_v53  ;;  %v8243_v47 = vld [vmem:[#allocation48_spill] sm:$0xff]  ;;  %v8278_v35 = vld [vmem:[#allocation69_spill] sm:$0xff] }
 0x31c   :  { %8207 = vst [vmem:[#allocation91_spill] sm:$0xff] %v6874_v54  ;;  %8209 = vst [vmem:[#allocation16_spill] sm:$0xff] %v6878_v36  ;;  %v6903_v33 = vmul.f32 %v6751_v22, %v8220_v10  ;;  %v6907_v45 = vmul.f32 %v6751_v22, %v8222_v60  ;;  %v6911_v57 = vmul.f32 %v6751_v22, %v8224_v27  ;;  %v8245_v10 = vld [vmem:[#allocation88_spill] sm:$0xff]  ;;  %v8246_v27 = vld [vmem:[#allocation107_spill] sm:$0xff] }
 0x31d   :  { %8211 = vst [vmem:[#allocation100_spill] sm:$0xff] %v6882_v18  ;;  %8213 = vst [vmem:[#allocation98_spill] sm:$0xff] %v6886_v34  ;;  %v6915_v23 = vmul.f32 %v6751_v22, %v8226_v25  ;;  %v6919_v9 = vmul.f32 %v6751_v22, %v8228_v59  ;;  %v6923_v43 = vmul.f32 %v6751_v22, %v8230_v8  ;;  %v8247_v59 = vld [vmem:[#allocation112_spill] sm:$0xff]  ;;  %v8270_v34 = vld [vmem:[#allocation61_spill] sm:$0xff] }
 0x31e   :  { %3684 = vst.msk [vmem:[#allocation10 + $0xc0] sm:$0xf] %vm3635_vm2, %v3999_v51  ;;  %8215 = vst [vmem:[#allocation19_spill] sm:$0xff] %v6891_v7  ;;  %v6927_v17 = vmul.f32 %v6751_v22, %v8232_v11  ;;  %v8234_v51 = vld [vmem:[#allocation81_spill] sm:$0xff]  ;;  %v6935_v24 = vmul.f32 %v6751_v22, %v8236_v42  ;;  %v6939_v46 = vmul.f32 %v6751_v22, %v6191_v28  ;;  %v8248_v11 = vld [vmem:[#allocation118_spill] sm:$0xff] }
 0x31f   :  { %8217 = vst [vmem:[#allocation95_spill] sm:$0xff] %v6895_v30  ;;  %8219 = vst [vmem:[#allocation97_spill] sm:$0xff] %v6899_v55  ;;  %v6931_v6 = vmul.f32 %v6751_v22, %v8234_v51  ;;  %v6943_v15 = vmul.f32 %v6751_v22, %v8239_v3  ;;  %v6947_v37 = vmul.f32 %v6751_v22, %v8241_v62  ;;  %v8249_v42 = vld [vmem:[#allocation115_spill] sm:$0xff]  ;;  %v8268_v30 = vld [vmem:[#allocation50_spill] sm:$0xff] }
 0x320   :  { %8221 = vst [vmem:[#allocation17_spill] sm:$0xff] %v6903_v33  ;;  %8223 = vst [vmem:[#allocation20_spill] sm:$0xff] %v6907_v45  ;;  %v6951_v53 = vmul.f32 %v6751_v22, %v8243_v47  ;;  %v6955_v60 = vmul.f32 %v6751_v22, %v8245_v10  ;;  %v6959_v28 = vmul.f32 %v6751_v22, %v6252_v52  ;;  %v8250_v62 = vld [vmem:[#allocation123_spill] sm:$0xff]  ;;  %v8251_v47 = vld [vmem:[#allocation126_spill] sm:$0xff] }
 0x321   :  { %8225 = vst [vmem:[#allocation15_spill] sm:$0xff] %v6911_v57  ;;  %8227 = vst [vmem:[#allocation18_spill] sm:$0xff] %v6915_v23  ;;  %v6963_v25 = vmul.f32 %v6751_v22, %v8246_v27  ;;  %v6967_v8 = vmul.f32 %v6751_v22, %v8247_v59  ;;  %v6971_v51 = vmul.f32 %v6751_v22, %v8248_v11  ;;  %v8252_v27 = vld [vmem:[#allocation133_spill] sm:$0xff]  ;;  %v8265_v45 = vld [vmem:[#allocation163_spill] sm:$0xff] }
 0x322   :  { %8229 = vst [vmem:[#allocation22_spill] sm:$0xff] %v6919_v9  ;;  %8231 = vst [vmem:[#allocation24_spill] sm:$0xff] %v6923_v43  ;;  %v6975_v3 = vmul.f32 %v6751_v22, %v8249_v42  ;;  %v6979_v52 = vmul.f32 %v6751_v22, %v8250_v62  ;;  %v6983_v10 = vmul.f32 %v6751_v22, %v8251_v47  ;;  %v8261_v43 = vld [vmem:[#allocation157_spill] sm:$0xff]  ;;  %v8266_v33 = vld [vmem:[#allocation166_spill] sm:$0xff] }
 0x323   :  { %8233 = vst [vmem:[#allocation21_spill] sm:$0xff] %v6927_v17  ;;  %8235 = vst [vmem:[#allocation23_spill] sm:$0xff] %v6931_v6  ;;  %v6987_v59 = vmul.f32 %v6751_v22, %v8252_v27  ;;  %v6991_v11 = vmul.f32 %v6751_v22, %v8253_v2  ;;  %v8259_v6 = vld [vmem:[#allocation155_spill] sm:$0xff]  ;;  %v8262_v9 = vld [vmem:[#allocation45_spill] sm:$0xff] }
 0x324   :  { %8237 = vst [vmem:[#allocation26_spill] sm:$0xff] %v6935_v24  ;;  %8238 = vst [vmem:[#allocation28_spill] sm:$0xff] %v6939_v46  ;;  %v8257_v46 = vld [vmem:[#allocation143_spill] sm:$0xff]  ;;  %v8258_v24 = vld [vmem:[#allocation150_spill] sm:$0xff] }
 0x325   :  { %8240 = vst [vmem:[#allocation25_spill] sm:$0xff] %v6943_v15  ;;  %8242 = vst [vmem:[#allocation27_spill] sm:$0xff] %v6947_v37  ;;  %v8255_v37 = vld [vmem:[#allocation141_spill] sm:$0xff]  ;;  %v8256_v15 = vld [vmem:[#allocation148_spill] sm:$0xff]  ;;  %v7007_v27 = vmul.f32 %v6751_v22, %v8257_v46  ;;  %v7011_v2 = vmul.f32 %v6751_v22, %v8258_v24  ;;  %v7027_v46 = vmul.f32 %v6751_v22, %v8262_v9 }
 0x326   :  { %8244 = vst [vmem:[#allocation30_spill] sm:$0xff] %v6951_v53  ;;  %v8254_v53 = vld [vmem:[#allocation137_spill] sm:$0xff]  ;;  %v6999_v62 = vmul.f32 %v6751_v22, %v8255_v37  ;;  %v7003_v47 = vmul.f32 %v6751_v22, %v8256_v15  ;;  %v8260_v17 = vld [vmem:[#allocation159_spill] sm:$0xff]  ;;  %v7023_v15 = vmul.f32 %v6751_v22, %v8261_v43  ;;  %v7043_v43 = vmul.f32 %v6751_v22, %v8266_v33 }
 0x327   :  { %v6995_v42 = vmul.f32 %v6751_v22, %v8254_v53  ;;  %v7015_v53 = vmul.f32 %v6751_v22, %v8259_v6  ;;  %v7019_v37 = vmul.f32 %v6751_v22, %v8260_v17  ;;  %v8263_v23 = vld [vmem:[#allocation161_spill] sm:$0xff]  ;;  %v7039_v17 = vmul.f32 %v6751_v22, %v8265_v45  ;;  %v8267_v55 = vld [vmem:[#allocation167_spill] sm:$0xff] }
 0x328   :  { %v7031_v24 = vmul.f32 %v6751_v22, %v8263_v23  ;;  %v8264_v57 = vld [vmem:[#allocation41_spill] sm:$0xff]  ;;  %v7047_v9 = vmul.f32 %v6751_v22, %v8267_v55  ;;  %v7051_v23 = vmul.f32 %v6751_v22, %v8268_v30  ;;  %v8269_v7 = vld [vmem:[#allocation171_spill] sm:$0xff]  ;;  %v7059_v45 = vmul.f32 %v6751_v22, %v8270_v34 }
 0x329   :  { %v7035_v6 = vmul.f32 %v6751_v22, %v8264_v57  ;;  %v7055_v57 = vmul.f32 %v6751_v22, %v8269_v7  ;;  %v8272_v18 = vld [vmem:[#allocation175_spill] sm:$0xff]  ;;  %v8274_v36 = vld [vmem:[#allocation57_spill] sm:$0xff]  ;;  %v7075_v7 = vmul.f32 %v6751_v22, %v8278_v35 }
 0x32a   :  { %8271 = vst [vmem:[#allocation32_spill] sm:$0xff] %v7059_v45  ;;  %v7063_v33 = vmul.f32 %v6751_v22, %v8272_v18  ;;  %v7067_v55 = vmul.f32 %v6751_v22, %v8274_v36  ;;  %v8276_v54 = vld [vmem:[#allocation177_spill] sm:$0xff]  ;;  %v8280_v32 = vld [vmem:[#allocation59_spill] sm:$0xff]  ;;  %v8282_v45 = vld [vmem:[#allocation64_spill] sm:$0xff] }
 0x32b   :  { %v7071_v30 = vmul.f32 %v6751_v22, %v8276_v54  ;;  %8279 = vst [vmem:[#allocation38_spill] sm:$0xff] %v7075_v7  ;;  %v7079_v34 = vmul.f32 %v6751_v22, %v8280_v32  ;;  %v7083_v18 = vmul.f32 %v6751_v22, %v8282_v45  ;;  %v8290_v7 = vld [vmem:[#allocation72_spill] sm:$0xff] }
 0x32c   :  { %8273 = vst [vmem:[#allocation29_spill] sm:$0xff] %v7063_v33  ;;  %8275 = vst [vmem:[#allocation31_spill] sm:$0xff] %v7067_v55  ;;  %v8284_v33 = vld [vmem:[#allocation178_spill] sm:$0xff]  ;;  %v7099_v32 = vmul.f32 %v6751_v22, %v8290_v7 }
 0x32d   :  { %8277 = vst [vmem:[#allocation35_spill] sm:$0xff] %v7071_v30  ;;  %8281 = vst [vmem:[#allocation33_spill] sm:$0xff] %v7079_v34  ;;  %v7087_v36 = vmul.f32 %v6751_v22, %v8284_v33  ;;  %v8286_v55 = vld [vmem:[#allocation66_spill] sm:$0xff]  ;;  %v8292_v34 = vld [vmem:[#allocation68_spill] sm:$0xff] }
 0x32e   :  { %8283 = vst [vmem:[#allocation37_spill] sm:$0xff] %v7083_v18  ;;  %v7091_v54 = vmul.f32 %v6751_v22, %v8286_v55  ;;  %v8288_v30 = vld [vmem:[#allocation78_spill] sm:$0xff]  ;;  %8291 = vst [vmem:[#allocation52_spill] sm:$0xff] %v7099_v32  ;;  %v7103_v45 = vmul.f32 %v6751_v22, %v8292_v34 }
 0x32f   :  { %8285 = vst [vmem:[#allocation42_spill] sm:$0xff] %v7087_v36  ;;  %v7095_v35 = vmul.f32 %v6751_v22, %v8288_v30  ;;  %v8294_v18 = vld [vmem:[#allocation74_spill] sm:$0xff] }
 0x330   :  { %8287 = vst [vmem:[#allocation46_spill] sm:$0xff] %v7091_v54  ;;  %8293 = vst [vmem:[#allocation62_spill] sm:$0xff] %v7103_v45  ;;  %v7107_v33 = vmul.f32 %v6751_v22, %v8294_v18  ;;  %v8296_v36 = vld [vmem:[#allocation86_spill] sm:$0xff]  ;;  %v8298_v54 = vld [vmem:[#allocation80_spill] sm:$0xff] }
 0x331   :  { %8289 = vst [vmem:[#allocation44_spill] sm:$0xff] %v7095_v35  ;;  %v7111_v55 = vmul.f32 %v6751_v22, %v8296_v36  ;;  %v7115_v30 = vmul.f32 %v6751_v22, %v8298_v54  ;;  %v8300_v35 = vld [vmem:[#allocation76_spill] sm:$0xff]  ;;  %v8302_v32 = vld [vmem:[#allocation82_spill] sm:$0xff] }
 0x332   :  { %8295 = vst [vmem:[#allocation56_spill] sm:$0xff] %v7107_v33  ;;  %v7119_v7 = vmul.f32 %v6751_v22, %v8300_v35  ;;  %v7123_v34 = vmul.f32 %v6751_v22, %v8302_v32  ;;  %v8303_v45 = vld [vmem:[#allocation94_spill] sm:$0xff]  ;;  %v8305_v33 = vld [vmem:[#allocation84_spill] sm:$0xff] }
 0x333   :  { %8297 = vst [vmem:[#allocation101_spill] sm:$0xff] %v7111_v55  ;;  %8299 = vst [vmem:[#allocation96_spill] sm:$0xff] %v7115_v30  ;;  %v7127_v18 = vmul.f32 %v6751_v22, %v8303_v45  ;;  %v7131_v36 = vmul.f32 %v6751_v22, %v8305_v33  ;;  %v8306_v55 = vld [vmem:[#allocation83_spill] sm:$0xff]  ;;  %v3285_v45 = vmax.f32 %v6759_v21, %v6955_v60  ;;  %v8310_v60 = vld [vmem:[#allocation32_spill] sm:$0xff] }
 0x334   :  { %8301 = vst [vmem:[#allocation99_spill] sm:$0xff] %v7119_v7  ;;  %v7135_v54 = vmul.f32 %v6751_v22, %v8306_v55  ;;  %v8307_v30 = vld [vmem:[#allocation87_spill] sm:$0xff]  ;;  %v8309_v7 = vld [vmem:[#allocation89_spill] sm:$0xff]  ;;  %v3287_v33 = vmax.f32 %v6767_v49, %v6963_v25  ;;  %v3288_v55 = vmax.f32 %v6771_v0, %v6967_v8  ;;  %v3292_v21 = vmax.f32 %v6789_v63, %v6983_v10 }
 0x335   :  { %8304 = vst [vmem:[#allocation103_spill] sm:$0xff] %v7127_v18  ;;  %v7139_v35 = vmul.f32 %v6751_v22, %v8307_v30  ;;  %v7143_v32 = vmul.f32 %v6751_v22, %v8309_v7  ;;  %v3286_v18 = vmax.f32 %v6763_v48, %v6959_v28  ;;  %v3289_v30 = vmax.f32 %v6775_v29, %v6971_v51  ;;  %v8312_v25 = vld [vmem:[#allocation29_spill] sm:$0xff]  ;;  %v8314_v51 = vld [vmem:[#allocation31_spill] sm:$0xff] }
 0x336   :  { %v3291_v22 = vmax.f32 %v6785_v26, %v6979_v52  ;;  %v3293_v48 = vmax.f32 %v6793_v41, %v6987_v59  ;;  %v3294_v49 = vmax.f32 %v6797_v16, %v6991_v11  ;;  %v3295_v0 = vmax.f32 %v6801_v13, %v6995_v42  ;;  %v8316_v52 = vld [vmem:[#allocation35_spill] sm:$0xff]  ;;  %v8318_v59 = vld [vmem:[#allocation38_spill] sm:$0xff]  ;;  %v8320_v42 = vld [vmem:[#allocation33_spill] sm:$0xff] }
 0x337   :  { %8308 = vst [vmem:[#allocation105_spill] sm:$0xff] %v7139_v35  ;;  %v3290_v35 = vmax.f32 %v6781_v5, %v6975_v3  ;;  %v3296_v29 = vmax.f32 %v6806_v44, %v6999_v62  ;;  %v3297_v5 = vmax.f32 %v6810_v58, %v7003_v47  ;;  %v3298_v26 = vmax.f32 %v6814_v4, %v7007_v27  ;;  %v8322_v47 = vld [vmem:[#allocation37_spill] sm:$0xff]  ;;  %v8332_v7 = vld [vmem:[#allocation62_spill] sm:$0xff] }
 0x338   :  { %v3299_v63 = vmax.f32 %v6818_v31, %v7011_v2  ;;  %v3300_v41 = vmax.f32 %v6822_v20, %v7015_v53  ;;  %v3301_v16 = vmax.f32 %v6826_v39, %v7019_v37  ;;  %v3302_v13 = vmax.f32 %v6830_v12, %v7023_v15  ;;  %v8324_v2 = vld [vmem:[#allocation42_spill] sm:$0xff]  ;;  %v8325_v53 = vld [vmem:[#allocation95_spill] sm:$0xff] }
 0x339   :  { %v3303_v44 = vmax.f32 %v6834_v50, %v7027_v46  ;;  %v3304_v58 = vmax.f32 %v6838_v1, %v7031_v24  ;;  %v3305_v4 = vmax.f32 %v6842_v61, %v7035_v6  ;;  %v3306_v31 = vmax.f32 %v6846_v14, %v7039_v17  ;;  %v8311_v1 = vld [vmem:[#allocation90_spill] sm:$0xff]  ;;  %v8313_v61 = vld [vmem:[#allocation92_spill] sm:$0xff]  ;;  %v8315_v14 = vld [vmem:[#allocation91_spill] sm:$0xff] }
 0x33a   :  { %v3307_v20 = vmax.f32 %v6850_v40, %v7043_v43  ;;  %v3308_v39 = vmax.f32 %v6854_v19, %v7047_v9  ;;  %v3309_v12 = vmax.f32 %v6858_v38, %v7051_v23  ;;  %v3310_v50 = vmax.f32 %v6862_v56, %v7055_v57  ;;  %v8317_v40 = vld [vmem:[#allocation16_spill] sm:$0xff]  ;;  %v8321_v38 = vld [vmem:[#allocation98_spill] sm:$0xff]  ;;  %v8323_v56 = vld [vmem:[#allocation19_spill] sm:$0xff] }
 0x33b   :  { %v3311_v28 = vmax.f32 %v8311_v1, %v8310_v60  ;;  %v3312_v8 = vmax.f32 %v8313_v61, %v8312_v25  ;;  %v3313_v3 = vmax.f32 %v8315_v14, %v8314_v51  ;;  %v3314_v10 = vmax.f32 %v8317_v40, %v8316_v52  ;;  %v8319_v19 = vld [vmem:[#allocation100_spill] sm:$0xff]  ;;  %v8326_v15 = vld [vmem:[#allocation46_spill] sm:$0xff]  ;;  %v8327_v46 = vld [vmem:[#allocation97_spill] sm:$0xff] }
 0x33c   :  { %v3315_v11 = vmax.f32 %v8319_v19, %v8318_v59  ;;  %v3316_v62 = vmax.f32 %v8321_v38, %v8320_v42  ;;  %v3317_v27 = vmax.f32 %v8323_v56, %v8322_v47  ;;  %v3318_v37 = vmax.f32 %v8325_v53, %v8324_v2  ;;  %v8328_v6 = vld [vmem:[#allocation44_spill] sm:$0xff]  ;;  %v8329_v17 = vld [vmem:[#allocation17_spill] sm:$0xff]  ;;  %v8333_v60 = vld [vmem:[#allocation15_spill] sm:$0xff] }
 0x33d   :  { %v3319_v24 = vmax.f32 %v8327_v46, %v8326_v15  ;;  %v3320_v43 = vmax.f32 %v8329_v17, %v8328_v6  ;;  %v8330_v9 = vld [vmem:[#allocation52_spill] sm:$0xff]  ;;  %v3322_v1 = vmax.f32 %v8333_v60, %v8332_v7  ;;  %v8335_v61 = vld [vmem:[#allocation18_spill] sm:$0xff]  ;;  %v8336_v14 = vld [vmem:[#allocation101_spill] sm:$0xff] }
 0x33e   :  { %v8331_v23 = vld [vmem:[#allocation20_spill] sm:$0xff]  ;;  %v8337_v52 = vld [vmem:[#allocation22_spill] sm:$0xff]  ;;  %v8340_v38 = vld [vmem:[#allocation99_spill] sm:$0xff] }
 0x33f   :  { %v3321_v57 = vmax.f32 %v8331_v23, %v8330_v9  ;;  %v8334_v25 = vld [vmem:[#allocation56_spill] sm:$0xff]  ;;  %v3324_v40 = vmax.f32 %v8337_v52, %v8336_v14  ;;  %v8341_v47 = vld [vmem:[#allocation21_spill] sm:$0xff]  ;;  %v8342_v2 = vld [vmem:[#allocation23_spill] sm:$0xff] }
 0x340   :  { %v3323_v51 = vmax.f32 %v8335_v61, %v8334_v25  ;;  %v8338_v59 = vld [vmem:[#allocation96_spill] sm:$0xff]  ;;  %v3326_v56 = vmax.f32 %v8341_v47, %v8340_v38  ;;  %v3327_v53 = vmax.f32 %v8342_v2, %v7123_v34  ;;  %v8343_v15 = vld [vmem:[#allocation103_spill] sm:$0xff]  ;;  %v8344_v46 = vld [vmem:[#allocation26_spill] sm:$0xff] }
 0x341   :  { %v8339_v19 = vld [vmem:[#allocation24_spill] sm:$0xff]  ;;  %v3328_v6 = vmax.f32 %v8344_v46, %v8343_v15  ;;  %v8346_v23 = vld [vmem:[#allocation25_spill] sm:$0xff]  ;;  %v8348_v25 = vld [vmem:[#allocation27_spill] sm:$0xff] }
 0x342   :  { %v3325_v42 = vmax.f32 %v8339_v19, %v8338_v59  ;;  %v8345_v17 = vld [vmem:[#allocation28_spill] sm:$0xff]  ;;  %v3330_v7 = vmax.f32 %v8346_v23, %v7135_v54  ;;  %v8347_v60 = vld [vmem:[#allocation105_spill] sm:$0xff]  ;;  %v8349_v14 = vld [vmem:[#allocation30_spill] sm:$0xff] }
 0x343   :  { %v3329_v9 = vmax.f32 %v8345_v17, %v7131_v36  ;;  %v3331_v61 = vmax.f32 %v8348_v25, %v8347_v60  ;;  %v3332_v52 = vmax.f32 %v8349_v14, %v7143_v32  ;;  %v8350_v59 = vld [vmem:[#allocation173_spill] sm:$0xff] }
 0x344   :  { %v7242_v19 = vadd.f32 %v8350_v59, %v3285_v45  ;;  %v7245_v34 = vadd.f32 %v8350_v59, %v3286_v18  ;;  %v7248_v38 = vadd.f32 %v8350_v59, %v3287_v33  ;;  %v7251_v36 = vadd.f32 %v8350_v59, %v3288_v55 }
 0x345   :  { %v7254_v54 = vadd.f32 %v8350_v59, %v3289_v30  ;;  %v7257_v47 = vadd.f32 %v8350_v59, %v3290_v35  ;;  %v7260_v32 = vadd.f32 %v8350_v59, %v3291_v22  ;;  %v7263_v45 = vadd.f32 %v8350_v59, %v3292_v21 }
 0x346   :  { %v7266_v18 = vadd.f32 %v8350_v59, %v3293_v48  ;;  %v7269_v33 = vadd.f32 %v8350_v59, %v3294_v49  ;;  %v7272_v55 = vadd.f32 %v8350_v59, %v3295_v0  ;;  %v7275_v30 = vadd.f32 %v8350_v59, %v3296_v29 }
 0x347   :  { %v7278_v35 = vadd.f32 %v8350_v59, %v3297_v5  ;;  %v7281_v22 = vadd.f32 %v8350_v59, %v3298_v26  ;;  %v7284_v21 = vadd.f32 %v8350_v59, %v3299_v63  ;;  %v7287_v48 = vadd.f32 %v8350_v59, %v3300_v41 }
 0x348   :  { %v7290_v49 = vadd.f32 %v8350_v59, %v3301_v16  ;;  %v7293_v0 = vadd.f32 %v8350_v59, %v3302_v13  ;;  %v7296_v29 = vadd.f32 %v8350_v59, %v3303_v44  ;;  %v7299_v5 = vadd.f32 %v8350_v59, %v3304_v58 }
 0x349   :  { %v7302_v26 = vadd.f32 %v8350_v59, %v3305_v4  ;;  %v7305_v63 = vadd.f32 %v8350_v59, %v3306_v31  ;;  %v7308_v41 = vadd.f32 %v8350_v59, %v3307_v20  ;;  %v7311_v16 = vadd.f32 %v8350_v59, %v3308_v39 }
 0x34a   :  { %v7314_v13 = vadd.f32 %v8350_v59, %v3309_v12  ;;  %v7317_v44 = vadd.f32 %v8350_v59, %v3310_v50  ;;  %v7320_v58 = vadd.f32 %v8350_v59, %v3311_v28  ;;  %v7323_v4 = vadd.f32 %v8350_v59, %v3312_v8 }
 0x34b   :  { %v7326_v31 = vadd.f32 %v8350_v59, %v3313_v3  ;;  %v7329_v20 = vadd.f32 %v8350_v59, %v3314_v10  ;;  %v7332_v39 = vadd.f32 %v8350_v59, %v3315_v11  ;;  %v7335_v12 = vadd.f32 %v8350_v59, %v3316_v62 }
 0x34c   :  { %v7338_v50 = vadd.f32 %v8350_v59, %v3317_v27  ;;  %v7341_v28 = vadd.f32 %v8350_v59, %v3318_v37  ;;  %v7344_v8 = vadd.f32 %v8350_v59, %v3319_v24  ;;  %v7347_v3 = vadd.f32 %v8350_v59, %v3320_v43 }
 0x34d   :  { %v7350_v10 = vadd.f32 %v8350_v59, %v3321_v57  ;;  %v7353_v11 = vadd.f32 %v8350_v59, %v3322_v1  ;;  %v7356_v62 = vadd.f32 %v8350_v59, %v3323_v51  ;;  %v7359_v27 = vadd.f32 %v8350_v59, %v3324_v40 }
 0x34e   :  { %v7362_v37 = vadd.f32 %v8350_v59, %v3325_v42  ;;  %v7365_v24 = vadd.f32 %v8350_v59, %v3326_v56  ;;  %v7368_v43 = vadd.f32 %v8350_v59, %v3327_v53  ;;  %v7371_v57 = vadd.f32 %v8350_v59, %v3328_v6 }
 0x34f   :  { %v7374_v1 = vadd.f32 %v8350_v59, %v3329_v9  ;;  %v7377_v51 = vadd.f32 %v8350_v59, %v3330_v7  ;;  %v7380_v40 = vadd.f32 %v8350_v59, %v3331_v61  ;;  %v7383_v42 = vadd.f32 %v8350_v59, %v3332_v52 }
 0x350   :  { %v3389_v56 = vmax.f32 %v7242_v19, 0.0  ;;  %v3390_v2 = vmax.f32 %v7245_v34, 0.0  ;;  %v3391_v53 = vmax.f32 %v7248_v38, 0.0  ;;  %v3392_v15 = vmax.f32 %v7251_v36, 0.0 }
 0x351   :  { %v3393_v46 = vmax.f32 %v7254_v54, 0.0  ;;  %v3394_v6 = vmax.f32 %v7257_v47, 0.0  ;;  %v3395_v17 = vmax.f32 %v7260_v32, 0.0  ;;  %v3396_v9 = vmax.f32 %v7263_v45, 0.0 }
 0x352   :  { %v3397_v23 = vmax.f32 %v7266_v18, 0.0  ;;  %v3398_v7 = vmax.f32 %v7269_v33, 0.0  ;;  %v3399_v60 = vmax.f32 %v7272_v55, 0.0  ;;  %v3400_v25 = vmax.f32 %v7275_v30, 0.0 }
 0x353   :  { %v3401_v61 = vmax.f32 %v7278_v35, 0.0  ;;  %v3402_v14 = vmax.f32 %v7281_v22, 0.0  ;;  %v3403_v52 = vmax.f32 %v7284_v21, 0.0  ;;  %v3404_v59 = vmax.f32 %v7287_v48, 0.0 }
 0x354   :  { %v3405_v19 = vmax.f32 %v7290_v49, 0.0  ;;  %v3406_v34 = vmax.f32 %v7293_v0, 0.0  ;;  %v3407_v38 = vmax.f32 %v7296_v29, 0.0  ;;  %v3408_v36 = vmax.f32 %v7299_v5, 0.0 }
 0x355   :  { %v3409_v54 = vmax.f32 %v7302_v26, 0.0  ;;  %v3410_v47 = vmax.f32 %v7305_v63, 0.0  ;;  %v3411_v32 = vmax.f32 %v7308_v41, 0.0  ;;  %v3412_v45 = vmax.f32 %v7311_v16, 0.0 }
 0x356   :  { %v3433_v29 = vmax.f32 %v7374_v1, 0.0  ;;  %v3434_v5 = vmax.f32 %v7377_v51, 0.0  ;;  %v3435_v26 = vmax.f32 %v7380_v40, 0.0  ;;  %v3436_v63 = vmax.f32 %v7383_v42, 0.0 }
 0x357   :  { %v3951_v22 = vpack.c.bf16 %v3389_v56, %v3389_v56  ;;  %v3952_v41 = vpack.c.bf16 %v3390_v2, %v3390_v2  ;;  %v3953_v35 = vpack.c.bf16 %v3391_v53, %v3391_v53  ;;  %v3954_v16 = vpack.c.bf16 %v3392_v15, %v3392_v15 }
 0x358   :  { %v3955_v30 = vpack.c.bf16 %v3393_v46, %v3393_v46  ;;  %v3956_v21 = vpack.c.bf16 %v3394_v6, %v3394_v6  ;;  %v3957_v55 = vpack.c.bf16 %v3395_v17, %v3395_v17  ;;  %v3958_v48 = vpack.c.bf16 %v3396_v9, %v3396_v9 }
 0x359   :  { %v3959_v33 = vpack.c.bf16 %v3397_v23, %v3397_v23  ;;  %v3960_v49 = vpack.c.bf16 %v3398_v7, %v3398_v7  ;;  %v3961_v18 = vpack.c.bf16 %v3399_v60, %v3399_v60  ;;  %v3962_v0 = vpack.c.bf16 %v3400_v25, %v3400_v25  ;;  %3636 = vst.msk [vmem:[#allocation10] sm:$0xf] %vm3635_vm2, %v3951_v22 }
 0x35a   :  { %3637 = vst.msk [vmem:[#allocation10 + $0x4] sm:$0xf] %vm3635_vm2, %v3952_v41  ;;  %3638 = vst.msk [vmem:[#allocation10 + $0x8] sm:$0xf] %vm3635_vm2, %v3953_v35  ;;  %v3963_v56 = vpack.c.bf16 %v3401_v61, %v3401_v61  ;;  %v3964_v2 = vpack.c.bf16 %v3402_v14, %v3402_v14  ;;  %v3965_v53 = vpack.c.bf16 %v3403_v52, %v3403_v52  ;;  %v8351_v61 = vmax.f32 %v7314_v13, 0.0 }
 0x35b   :  { %3639 = vst.msk [vmem:[#allocation10 + $0xc] sm:$0xf] %vm3635_vm2, %v3954_v16  ;;  %v3966_v15 = vpack.c.bf16 %v3404_v59, %v3404_v59  ;;  %3640 = vst.msk [vmem:[#allocation10 + $0x10] sm:$0xf] %vm3635_vm2, %v3955_v30  ;;  %v3967_v46 = vpack.c.bf16 %v3405_v19, %v3405_v19  ;;  %v3968_v6 = vpack.c.bf16 %v3406_v34, %v3406_v34  ;;  %v8352_v52 = vmax.f32 %v7317_v44, 0.0 }
 0x35c   :  { %3641 = vst.msk [vmem:[#allocation10 + $0x14] sm:$0xf] %vm3635_vm2, %v3956_v21  ;;  %3642 = vst.msk [vmem:[#allocation10 + $0x18] sm:$0xf] %vm3635_vm2, %v3957_v55  ;;  %v3969_v17 = vpack.c.bf16 %v3407_v38, %v3407_v38  ;;  %v3970_v9 = vpack.c.bf16 %v3408_v36, %v3408_v36  ;;  %v3971_v23 = vpack.c.bf16 %v3409_v54, %v3409_v54  ;;  %v8353_v19 = vmax.f32 %v7320_v58, 0.0 }
 0x35d   :  { %3643 = vst.msk [vmem:[#allocation10 + $0x1c] sm:$0xf] %vm3635_vm2, %v3958_v48  ;;  %3644 = vst.msk [vmem:[#allocation10 + $0x20] sm:$0xf] %vm3635_vm2, %v3959_v33  ;;  %v3972_v7 = vpack.c.bf16 %v3410_v47, %v3410_v47  ;;  %v3973_v60 = vpack.c.bf16 %v3411_v32, %v3411_v32  ;;  %v3974_v25 = vpack.c.bf16 %v3412_v45, %v3412_v45  ;;  %v8354_v38 = vmax.f32 %v7323_v4, 0.0 }
 0x35e   :  { %3645 = vst.msk [vmem:[#allocation10 + $0x24] sm:$0xf] %vm3635_vm2, %v3960_v49  ;;  %3646 = vst.msk [vmem:[#allocation10 + $0x28] sm:$0xf] %vm3635_vm2, %v3961_v18  ;;  %v3975_v14 = vpack.c.bf16 %v8351_v61, %v8351_v61  ;;  %v3976_v59 = vpack.c.bf16 %v8352_v52, %v8352_v52  ;;  %v3977_v34 = vpack.c.bf16 %v8353_v19, %v8353_v19  ;;  %v8355_v13 = vmax.f32 %v7326_v31, 0.0 }
 0x35f   :  { %3647 = vst.msk [vmem:[#allocation10 + $0x2c] sm:$0xf] %vm3635_vm2, %v3962_v0  ;;  %3648 = vst.msk [vmem:[#allocation10 + $0x30] sm:$0xf] %vm3635_vm2, %v3963_v56  ;;  %v3978_v36 = vpack.c.bf16 %v8354_v38, %v8354_v38  ;;  %v8356_v58 = vmax.f32 %v7329_v20, 0.0  ;;  %v8357_v4 = vmax.f32 %v7332_v39, 0.0 }
 0x360   :  { %3649 = vst.msk [vmem:[#allocation10 + $0x34] sm:$0xf] %vm3635_vm2, %v3964_v2  ;;  %3650 = vst.msk [vmem:[#allocation10 + $0x38] sm:$0xf] %vm3635_vm2, %v3965_v53  ;;  %v3979_v44 = vpack.c.bf16 %v8355_v13, %v8355_v13  ;;  %v8358_v32 = vmax.f32 %v7335_v12, 0.0  ;;  %v8359_v31 = vmax.f32 %v7338_v50, 0.0 }
 0x361   :  { %3651 = vst.msk [vmem:[#allocation10 + $0x3c] sm:$0xf] %vm3635_vm2, %v3966_v15  ;;  %3652 = vst.msk [vmem:[#allocation10 + $0x40] sm:$0xf] %vm3635_vm2, %v3967_v46  ;;  %v3980_v54 = vpack.c.bf16 %v8356_v58, %v8356_v58  ;;  %v3981_v47 = vpack.c.bf16 %v8357_v4, %v8357_v4  ;;  %v8360_v39 = vmax.f32 %v7341_v28, 0.0  ;;  %v8361_v12 = vmax.f32 %v7344_v8, 0.0 }
 0x362   :  { %3653 = vst.msk [vmem:[#allocation10 + $0x44] sm:$0xf] %vm3635_vm2, %v3968_v6  ;;  %3654 = vst.msk [vmem:[#allocation10 + $0x48] sm:$0xf] %vm3635_vm2, %v3969_v17  ;;  %v3982_v45 = vpack.c.bf16 %v8358_v32, %v8358_v32  ;;  %v3983_v20 = vpack.c.bf16 %v8359_v31, %v8359_v31  ;;  %v8362_v55 = vmax.f32 %v7347_v3, 0.0  ;;  %v8363_v50 = vmax.f32 %v7350_v10, 0.0 }
 0x363   :  { %3655 = vst.msk [vmem:[#allocation10 + $0x4c] sm:$0xf] %vm3635_vm2, %v3970_v9  ;;  %3656 = vst.msk [vmem:[#allocation10 + $0x50] sm:$0xf] %vm3635_vm2, %v3971_v23  ;;  %v3984_v18 = vpack.c.bf16 %v8360_v39, %v8360_v39  ;;  %v3985_v33 = vpack.c.bf16 %v8361_v12, %v8361_v12  ;;  %v8364_v8 = vmax.f32 %v7353_v11, 0.0  ;;  %v8365_v35 = vmax.f32 %v7356_v62, 0.0 }
 0x364   :  { %3657 = vst.msk [vmem:[#allocation10 + $0x54] sm:$0xf] %vm3635_vm2, %v3972_v7  ;;  %3658 = vst.msk [vmem:[#allocation10 + $0x58] sm:$0xf] %vm3635_vm2, %v3973_v60  ;;  %v3986_v30 = vpack.c.bf16 %v8362_v55, %v8362_v55  ;;  %v3987_v28 = vpack.c.bf16 %v8363_v50, %v8363_v50  ;;  %v8366_v21 = vmax.f32 %v7359_v27, 0.0  ;;  %v8367_v10 = vmax.f32 %v7362_v37, 0.0 }
 0x365   :  { %3659 = vst.msk [vmem:[#allocation10 + $0x5c] sm:$0xf] %vm3635_vm2, %v3974_v25  ;;  %3660 = vst.msk [vmem:[#allocation10 + $0x60] sm:$0xf] %vm3635_vm2, %v3975_v14  ;;  %v3988_v3 = vpack.c.bf16 %v8364_v8, %v8364_v8  ;;  %v3989_v22 = vpack.c.bf16 %v8365_v35, %v8365_v35  ;;  %v8368_v62 = vmax.f32 %v7365_v24, 0.0  ;;  %v8369_v27 = vmax.f32 %v7368_v43, 0.0 }
 0x366   :  { %3661 = vst.msk [vmem:[#allocation10 + $0x64] sm:$0xf] %vm3635_vm2, %v3976_v59  ;;  %3662 = vst.msk [vmem:[#allocation10 + $0x68] sm:$0xf] %vm3635_vm2, %v3977_v34  ;;  %v3990_v48 = vpack.c.bf16 %v8366_v21, %v8366_v21  ;;  %v3991_v11 = vpack.c.bf16 %v8367_v10, %v8367_v10  ;;  %v8370_v41 = vmax.f32 %v7371_v57, 0.0  ;;  %v3995_v37 = vpack.c.bf16 %v3433_v29, %v3433_v29 }
 0x367   :  { %3663 = vst.msk [vmem:[#allocation10 + $0x6c] sm:$0xf] %vm3635_vm2, %v3978_v36  ;;  %3664 = vst.msk [vmem:[#allocation10 + $0x70] sm:$0xf] %vm3635_vm2, %v3979_v44  ;;  %v3992_v49 = vpack.c.bf16 %v8368_v62, %v8368_v62  ;;  %v3993_v0 = vpack.c.bf16 %v8369_v27, %v8369_v27  ;;  %v3996_v24 = vpack.c.bf16 %v3434_v5, %v3434_v5 }
 0x368   :  { %3665 = vst.msk [vmem:[#allocation10 + $0x74] sm:$0xf] %vm3635_vm2, %v3980_v54  ;;  %3666 = vst.msk [vmem:[#allocation10 + $0x78] sm:$0xf] %vm3635_vm2, %v3981_v47  ;;  %v3994_v16 = vpack.c.bf16 %v8370_v41, %v8370_v41  ;;  %v3997_v43 = vpack.c.bf16 %v3435_v26, %v3435_v26  ;;  %v3998_v57 = vpack.c.bf16 %v3436_v63, %v3436_v63 }
 0x369   :  { %3667 = vst.msk [vmem:[#allocation10 + $0x7c] sm:$0xf] %vm3635_vm2, %v3982_v45  ;;  %3668 = vst.msk [vmem:[#allocation10 + $0x80] sm:$0xf] %vm3635_vm2, %v3983_v20 }
 0x36a   :  { %3669 = vst.msk [vmem:[#allocation10 + $0x84] sm:$0xf] %vm3635_vm2, %v3984_v18  ;;  %3670 = vst.msk [vmem:[#allocation10 + $0x88] sm:$0xf] %vm3635_vm2, %v3985_v33 }
 0x36b   :  { %3671 = vst.msk [vmem:[#allocation10 + $0x8c] sm:$0xf] %vm3635_vm2, %v3986_v30  ;;  %3672 = vst.msk [vmem:[#allocation10 + $0x90] sm:$0xf] %vm3635_vm2, %v3987_v28 }
 0x36c   :  { %3673 = vst.msk [vmem:[#allocation10 + $0x94] sm:$0xf] %vm3635_vm2, %v3988_v3  ;;  %3674 = vst.msk [vmem:[#allocation10 + $0x98] sm:$0xf] %vm3635_vm2, %v3989_v22 }
 0x36d   :  { %3675 = vst.msk [vmem:[#allocation10 + $0x9c] sm:$0xf] %vm3635_vm2, %v3990_v48  ;;  %3676 = vst.msk [vmem:[#allocation10 + $0xa0] sm:$0xf] %vm3635_vm2, %v3991_v11 }
 0x36e   :  { %3677 = vst.msk [vmem:[#allocation10 + $0xa4] sm:$0xf] %vm3635_vm2, %v3992_v49  ;;  %3678 = vst.msk [vmem:[#allocation10 + $0xa8] sm:$0xf] %vm3635_vm2, %v3993_v0 }
 0x36f   :  { %3679 = vst.msk [vmem:[#allocation10 + $0xac] sm:$0xf] %vm3635_vm2, %v3994_v16  ;;  %3680 = vst.msk [vmem:[#allocation10 + $0xb0] sm:$0xf] %vm3635_vm2, %v3995_v37 }
 0x370   :  { %3681 = vst.msk [vmem:[#allocation10 + $0xb4] sm:$0xf] %vm3635_vm2, %v3996_v24  ;;  %3682 = vst.msk [vmem:[#allocation10 + $0xb8] sm:$0xf] %vm3635_vm2, %v3997_v43 }
 0x371   :  { %3683 = vst.msk [vmem:[#allocation10 + $0xbc] sm:$0xf] %vm3635_vm2, %v3998_v57 }
 0x372   :  { %4512 = shalt.err (!%p4509_p8)
}
 0x373   :  { %s4513_s17 = scalar_lea.hbm %s7572_s4, 3136 }
 0x374   :  { %p4514_p9 = scmp.ne.s32.totalorder %s7572_s4, %s4513_s17  ;;  %p4517_p10 = scmp.lt.u32.totalorder %s4513_s17, %s7572_s4 }
 0x376   :  { %p4519_p11 = pnand %p4517_p10, %p4514_p9 }
 0x378   :  { %4522 = shalt.err (!%p4519_p11)
}
 0x379   :  { %3696 = dma.vmem_to_hbm [thread:$0]  %s3691_s13, 3136, %s7572_s4, [#allocation4], %s4533_s27, %s4533_s27, %s4534_s28  }
 0x37a   :  { %4529 = dma.done.wait [#allocation4], 3136  }
 0x37b   :  { %4530 = vsyncadd [#allocation4], 4294964160 }
 0x37c   :  { %3700 = vsyncpa [#allocation3], 1 }
 0x37d   :  { %3701 = vsyncpa [#allocation6], 1 }
 0x37e   :  { %3702 = vsyncpa [#allocation9], 1 }
 0x37f   :  { %3703 = vsyncpa [#allocation4], 1 }

// kernel: lenet_forward.5
= control target key start
LH: loop header
LB: loop body
LE: loop exit
PB: predicated region body
PF: predicated region fallthrough
CT: control target
= control target key end

     0   :  { %9 = vsyncpa [#allocation3], 0  ;;  %s1436_s0 = inlined_call_operand.hbm [shape: bf16[224,160], index: 0, kind: input, shape index: {}]   ;;  %s1437_s1 = inlined_call_operand.hbm [shape: bf16[160,16], index: 1, kind: input, shape index: {}]   ;;  %s1438_s2 = inlined_call_operand.hbm [shape: f32[1,16], index: 2, kind: input, shape index: {}]   ;;  %s1439_s3 = inlined_call_operand.hbm [shape: f32[1,16], index: 3, kind: input, shape index: {}]   ;;  %s1440_s4 = inlined_call_operand.hbm [shape: bf16[50,16], index: 4, kind: output, shape index: {}]  }
   0x1   :  { %10 = vsyncpa [#allocation6], 0 }
   0x2   :  { %11 = vsyncpa [#allocation9], 0 }
   0x3   :  { %12 = vsyncpa [#allocation4], 0  ;;  %s1069_s15 = smov [#allocation5]   ;;  %s951_s19 = scalar_lea.hbm %s1437_s1, 1280 }
   0x4   :  { %s30_s16 = sshll.u32 %s1069_s15, 4  ;;  %p952_p0 = scmp.ne.s32.totalorder %s1437_s1, %s951_s19  ;;  %s31_s16 = int_to_ptr.vmem [resolvable:$true] %s30_s16 }
   0x5   :  { %p955_p1 = scmp.lt.u32.totalorder %s951_s19, %s1437_s1 }
   0x7   :  { %p957_p2 = pnand %p955_p1, %p952_p0 }
   0x9   :  { %960 = shalt.err (!%p957_p2)
}
   0xa   :  { %s961_s24 = scalar_lea.vmem %s31_s16, 1280  ;;  %p966_p4 = scmp.lt.s32.totalorder %s31_s16, %s31_s16 }
   0xb   :  { %p962_p3 = scmp.ne.s32.totalorder %s31_s16, %s961_s24  ;;  %p967_p5 = scmp.lt.s32.totalorder %s961_s24, %s961_s24 }
   0xd   :  { %p968_p6 = por %p967_p5, %p966_p4 }
   0xf   :  { %p969_p7 = pnand %p968_p6, %p962_p3 }
  0x11   :  { %972 = shalt.err (!%p969_p7)
}
  0x12   :  { %s1070_s25 = smov 64   ;;  %s1071_s26 = smov 4  }
  0x13   :  { %36 = dma.hbm_to_vmem [thread:$0]  %s1437_s1, 1280, %s31_s16, [#allocation6], %s1070_s25, %s1070_s25, %s1071_s26  }
  0x14   :  { %s1072_s29 = smov [#allocation2]   ;;  %s973_s7 = scalar_lea.hbm %s1436_s0, 3584 }
  0x15   :  { %s18_s30 = sshll.u32 %s1072_s29, 4  ;;  %p974_p8 = scmp.ne.s32.totalorder %s1436_s0, %s973_s7  ;;  %s19_s30 = int_to_ptr.vmem [resolvable:$true] %s18_s30 }
  0x16   :  { %p977_p9 = scmp.lt.u32.totalorder %s973_s7, %s1436_s0 }
  0x18   :  { %p979_p10 = pnand %p977_p9, %p974_p8 }
  0x1a   :  { %982 = shalt.err (!%p979_p10)
}
  0x1b   :  { %s983_s12 = scalar_lea.vmem %s19_s30, 3584  ;;  %p988_p12 = scmp.lt.s32.totalorder %s19_s30, %s19_s30 }
  0x1c   :  { %p984_p11 = scmp.ne.s32.totalorder %s19_s30, %s983_s12  ;;  %p989_p13 = scmp.lt.s32.totalorder %s983_s12, %s983_s12 }
  0x1e   :  { %p990_p0 = por %p989_p13, %p988_p12 }
  0x20   :  { %p991_p1 = pnand %p990_p0, %p984_p11 }
  0x22   :  { %994 = shalt.err (!%p991_p1)
}
  0x23   :  { %s1073_s1 = smov 128   ;;  %s1074_s13 = smov 8  }
  0x24   :  { %24 = dma.hbm_to_vmem [thread:$0]  %s1436_s0, 3584, %s19_s30, [#allocation3], %s1073_s1, %s1073_s1, %s1074_s13  }
  0x25   :  { %s1075_s16 = smov [#allocation7]   ;;  %s1076_s18 = smov [#allocation8]  }
  0x26   :  { %s43_s17 = sshll.u32 %s1075_s16, 4  ;;  %s53_s19 = sshll.u32 %s1076_s18, 4  ;;  %s44_s17 = int_to_ptr.vmem [resolvable:$true] %s43_s17  ;;  %s54_s19 = int_to_ptr.vmem [resolvable:$true] %s53_s19 }
  0x27   :  { %s995_s22 = scalar_lea.hbm %s1438_s2, 16 }
  0x28   :  { %p996_p2 = scmp.ne.s32.totalorder %s1438_s2, %s995_s22  ;;  %p999_p3 = scmp.lt.u32.totalorder %s995_s22, %s1438_s2 }
  0x2a   :  { %p1001_p4 = pnand %p999_p3, %p996_p2 }
  0x2c   :  { %1004 = shalt.err (!%p1001_p4)
}
  0x2d   :  { %s1005_s0 = scalar_lea.vmem %s44_s17, 16  ;;  %s1009_s29 = scalar_lea.vmem %s44_s17, 32 }
  0x2e   :  { %p1006_p5 = scmp.ne.s32.totalorder %s44_s17, %s1005_s0  ;;  %p1010_p6 = scmp.lt.s32.totalorder %s44_s17, %s44_s17 }
  0x2f   :  { %p1011_p7 = scmp.lt.s32.totalorder %s1009_s29, %s1005_s0 }
  0x31   :  { %p1012_p8 = por %p1011_p7, %p1010_p6 }
  0x33   :  { %p1013_p9 = pnand %p1012_p8, %p1006_p5 }
  0x35   :  { %1016 = shalt.err (!%p1013_p9)
}
  0x36   :  { %46 = dma.hbm_to_vmem [thread:$0]  %s1438_s2, 16, %s44_s17, [#allocation6]  }
  0x37   :  { %s1017_s8 = scalar_lea.hbm %s1439_s3, 16 }
  0x38   :  { %p1018_p10 = scmp.ne.s32.totalorder %s1439_s3, %s1017_s8  ;;  %p1021_p11 = scmp.lt.u32.totalorder %s1017_s8, %s1439_s3 }
  0x3a   :  { %p1023_p12 = pnand %p1021_p11, %p1018_p10 }
  0x3c   :  { %1026 = shalt.err (!%p1023_p12)
}
  0x3d   :  { %s1027_s1 = scalar_lea.vmem %s54_s19, 16  ;;  %s1031_s13 = scalar_lea.vmem %s54_s19, 32 }
  0x3e   :  { %p1028_p13 = scmp.ne.s32.totalorder %s54_s19, %s1027_s1  ;;  %p1032_p0 = scmp.lt.s32.totalorder %s54_s19, %s54_s19 }
  0x3f   :  { %p1033_p1 = scmp.lt.s32.totalorder %s1031_s13, %s1027_s1 }
  0x41   :  { %p1034_p2 = por %p1033_p1, %p1032_p0 }
  0x43   :  { %p1035_p3 = pnand %p1034_p2, %p1028_p13 }
  0x45   :  { %1038 = shalt.err (!%p1035_p3)
}
  0x46   :  { %56 = dma.hbm_to_vmem [thread:$0]  %s1439_s3, 16, %s54_s19, [#allocation9]  }
  0x47   :  { %1061 = dma.done.wait [#allocation3], 3584  }
  0x48   :  { %1062 = vsyncadd [#allocation3], 4294963712 }
  0x49   :  { %1063 = dma.done.wait [#allocation6], 1296  }
  0x4a   :  { %1064 = vsyncadd [#allocation6], 4294966000 }
  0x4b   :  { %1065 = dma.done.wait [#allocation9], 16  }
  0x4c   :  { %1066 = vsyncadd [#allocation9], 4294967280  ;;  %v1077_v0 = vmov 0   ;;  %v897_v1 = vld [vmem:[#allocation5] sm:$0xff]   ;;  %v898_v2 = vld [vmem:[#allocation5 + $0x8] sm:$0xff]   ;;  %vm304_vm0 = vcmask 261120  }
  0x4d   :  { %347 = vmatprep.subr.bf16.mxu0 %v1077_v0  ;;  %867 = vmatprep.subr.bf16.mxu1 %v1077_v0  ;;  %v899_v3 = vld [vmem:[#allocation5 + $0x10] sm:$0xff]   ;;  %v900_v4 = vld [vmem:[#allocation5 + $0x18] sm:$0xff]   ;;  %v909_v5 = vld [vmem:[#allocation2 + $0x4] ss:$8 sps:$4 sm:$0xff]   ;;  %vm494_vm1 = vcmask 130048   ;;  %vm780_vm2 = vcmask 122880  }
  0x4e   :  { %348 = vmatpush1.bf16.msra.mxu0 %v897_v1  ;;  %877 = vmatpush1.bf16.msra.mxu1 %v897_v1  ;;  %v912_v6 = vld [vmem:[#allocation2 + $0x74] ss:$8 sps:$4 sm:$0xff]   ;;  %v901_v7 = vld [vmem:[#allocation5 + $0x20] sm:$0xff]   ;;  %v902_v8 = vld [vmem:[#allocation5 + $0x28] sm:$0xff]   ;;  %vm773_vm3 = vcmask 125952   ;;  %s1078_s3 = smov [#allocation10]  }
  0x4f   :  { %349 = vmatprep.subr.bf16.mxu0 %v1077_v0  ;;  %868 = vmatprep.subr.bf16.mxu1 %v1077_v0  ;;  %v903_v9 = vld [vmem:[#allocation5 + $0x30] sm:$0xff]   ;;  %v904_v10 = vld [vmem:[#allocation5 + $0x38] sm:$0xff]   ;;  %v905_v11 = vld [vmem:[#allocation5 + $0x40] sm:$0xff]   ;;  %s787_s15 = sshll.u32 %s1078_s3, 4  ;;  %s788_s15 = int_to_ptr.vmem [resolvable:$true] %s787_s15 }
  0x50   :  { %839 = vmatprep.mubr.msk.bf16.mxu0 %vm304_vm0, %v909_v5  ;;  %846 = vmatprep.mubr.msk.bf16.mxu1 %vm304_vm0, %v912_v6  ;;  %v906_v12 = vld [vmem:[#allocation5 + $0x48] sm:$0xff]   ;;  %v910_v14 = vld [vmem:[#allocation2 + $0x70] ss:$8 sps:$4 sm:$0xff]   ;;  %v913_v15 = vld [vmem:[#allocation2 + $0x14] ss:$8 sps:$4 sm:$0xff]   ;;  %s1039_s16 = scalar_lea.vmem %s788_s15, 448  ;;  %p1044_p5 = scmp.lt.s32.totalorder %s788_s15, %s788_s15 }
  0x51   :  { %v907_v13 = vld [vmem:[#allocation2] ss:$8 sps:$4 sm:$0xff]   ;;  %v915_v16 = vld [vmem:[#allocation2 + $0x84] ss:$8 sps:$4 sm:$0xff]   ;;  %v917_v17 = vld [vmem:[#allocation2 + $0x10] ss:$8 sps:$4 sm:$0xff]   ;;  %p1040_p4 = scmp.ne.s32.totalorder %s788_s15, %s1039_s16  ;;  %p1045_p6 = scmp.lt.s32.totalorder %s1039_s16, %s1039_s16 }
  0x52   :  { %350 = vmatpush1.bf16.msra.mxu0 %v898_v2  ;;  %878 = vmatpush1.bf16.msra.mxu1 %v898_v2  ;;  %v918_v18 = vld [vmem:[#allocation2 + $0x80] ss:$8 sps:$4 sm:$0xff]   ;;  %v919_v19 = vld [vmem:[#allocation2 + $0x24] ss:$8 sps:$4 sm:$0xff]   ;;  %v921_v20 = vld [vmem:[#allocation2 + $0x94] ss:$8 sps:$4 sm:$0xff]  }
  0x53   :  { %351 = vmatprep.subr.bf16.mxu0 %v1077_v0  ;;  %869 = vmatprep.subr.bf16.mxu1 %v1077_v0  ;;  %v923_v21 = vld [vmem:[#allocation2 + $0x20] ss:$8 sps:$4 sm:$0xff]   ;;  %v924_v22 = vld [vmem:[#allocation2 + $0x90] ss:$8 sps:$4 sm:$0xff]   ;;  %v925_v23 = vld [vmem:[#allocation2 + $0x34] ss:$8 sps:$4 sm:$0xff]   ;;  %p1046_p7 = por %p1045_p6, %p1044_p5 }
  0x54   :  { %v927_v24 = vld [vmem:[#allocation2 + $0xa4] ss:$8 sps:$4 sm:$0xff]   ;;  %v929_v25 = vld [vmem:[#allocation2 + $0x30] ss:$8 sps:$4 sm:$0xff]   ;;  %v930_v26 = vld [vmem:[#allocation2 + $0xa0] ss:$8 sps:$4 sm:$0xff]  }
  0x55   :  { %v931_v27 = vld [vmem:[#allocation2 + $0x44] ss:$8 sps:$4 sm:$0xff]   ;;  %v933_v28 = vld [vmem:[#allocation2 + $0xb4] ss:$8 sps:$4 sm:$0xff]   ;;  %v935_v29 = vld [vmem:[#allocation2 + $0x40] ss:$8 sps:$4 sm:$0xff]   ;;  %p1047_p8 = pnand %p1046_p7, %p1040_p4 }
  0x56   :  { %352 = vmatpush1.bf16.msra.mxu0 %v899_v3  ;;  %879 = vmatpush1.bf16.msra.mxu1 %v899_v3  ;;  %v936_v30 = vld [vmem:[#allocation2 + $0xb0] ss:$8 sps:$4 sm:$0xff]   ;;  %v937_v31 = vld [vmem:[#allocation2 + $0x54] ss:$8 sps:$4 sm:$0xff]   ;;  %v939_v32 = vld [vmem:[#allocation2 + $0xc4] ss:$8 sps:$4 sm:$0xff]  }
  0x57   :  { %353 = vmatprep.subr.bf16.mxu0 %v1077_v0  ;;  %870 = vmatprep.subr.bf16.mxu1 %v1077_v0  ;;  %v941_v33 = vld [vmem:[#allocation2 + $0x50] ss:$8 sps:$4 sm:$0xff]   ;;  %v942_v34 = vld [vmem:[#allocation2 + $0xc0] ss:$8 sps:$4 sm:$0xff]   ;;  %v943_v35 = vld [vmem:[#allocation2 + $0x64] ss:$8 sps:$4 sm:$0xff]  }
  0x58   :  { %v945_v36 = vld [vmem:[#allocation2 + $0xd4] ss:$8 sps:$4 sm:$0xff]   ;;  %v947_v37 = vld [vmem:[#allocation2 + $0x60] ss:$8 sps:$4 sm:$0xff]   ;;  %v948_v38 = vld [vmem:[#allocation2 + $0xd0] ss:$8 sps:$4 sm:$0xff]  }
  0x5a   :  { %354 = vmatpush1.bf16.msra.mxu0 %v900_v4  ;;  %880 = vmatpush1.bf16.msra.mxu1 %v900_v4 }
  0x5b   :  { %355 = vmatprep.subr.bf16.mxu0 %v1077_v0  ;;  %871 = vmatprep.subr.bf16.mxu1 %v1077_v0 }
  0x5e   :  { %356 = vmatpush1.bf16.msra.mxu0 %v901_v7  ;;  %881 = vmatpush1.bf16.msra.mxu1 %v901_v7 }
  0x5f   :  { %357 = vmatprep.subr.bf16.mxu0 %v1077_v0  ;;  %872 = vmatprep.subr.bf16.mxu1 %v1077_v0 }
  0x62   :  { %358 = vmatpush1.bf16.msra.mxu0 %v902_v8  ;;  %882 = vmatpush1.bf16.msra.mxu1 %v902_v8 }
  0x63   :  { %359 = vmatprep.subr.bf16.mxu0 %v1077_v0  ;;  %873 = vmatprep.subr.bf16.mxu1 %v1077_v0 }
  0x66   :  { %360 = vmatpush1.bf16.msra.mxu0 %v903_v9  ;;  %883 = vmatpush1.bf16.msra.mxu1 %v903_v9 }
  0x67   :  { %361 = vmatprep.subr.bf16.mxu0 %v1077_v0  ;;  %874 = vmatprep.subr.bf16.mxu1 %v1077_v0 }
  0x6a   :  { %362 = vmatpush1.bf16.msra.mxu0 %v904_v10  ;;  %884 = vmatpush1.bf16.msra.mxu1 %v904_v10 }
  0x6b   :  { %363 = vmatprep.subr.bf16.mxu0 %v1077_v0  ;;  %875 = vmatprep.subr.bf16.mxu1 %v1077_v0 }
  0x6e   :  { %364 = vmatpush1.bf16.msra.mxu0 %v905_v11  ;;  %885 = vmatpush1.bf16.msra.mxu1 %v905_v11 }
  0x6f   :  { %365 = vmatprep.subr.bf16.mxu0 %v1077_v0  ;;  %876 = vmatprep.subr.bf16.mxu1 %v1077_v0 }
  0x72   :  { %366 = vmatpush1.bf16.msra.mxu0 %v906_v12  ;;  %886 = vmatpush1.bf16.msra.mxu1 %v906_v12 }
  0x75   :  { %380 = vmatmul.mubr.bf16.vlgmr.msra.gmra.mrb[0].mxu0 %v907_v13  ;;  %436 = vmatmul.mubr.bf16.vlgmr.msra.gmra.mrb[0].mxu1 %v910_v14 }
  0x76   :  { %840 = vmatprep.mubr.msk.bf16.mxu0 %vm304_vm0, %v913_v15  ;;  %847 = vmatprep.mubr.msk.bf16.mxu1 %vm304_vm0, %v915_v16 }
  0x7d   :  { %388 = vmatmul.mubr.bf16.gmra.mrb[4].mxu0 %v917_v17  ;;  %444 = vmatmul.mubr.bf16.gmra.mrb[4].mxu1 %v918_v18 }
  0x7e   :  { %841 = vmatprep.mubr.msk.bf16.mxu0 %vm304_vm0, %v919_v19  ;;  %848 = vmatprep.mubr.msk.bf16.mxu1 %vm304_vm0, %v921_v20 }
  0x85   :  { %396 = vmatmul.mubr.bf16.gmra.mrb[8].mxu0 %v923_v21  ;;  %452 = vmatmul.mubr.bf16.gmra.mrb[8].mxu1 %v924_v22 }
  0x86   :  { %842 = vmatprep.mubr.msk.bf16.mxu0 %vm304_vm0, %v925_v23  ;;  %849 = vmatprep.mubr.msk.bf16.mxu1 %vm304_vm0, %v927_v24 }
  0x8d   :  { %404 = vmatmul.mubr.bf16.gmra.mrb[12].mxu0 %v929_v25  ;;  %460 = vmatmul.mubr.bf16.gmra.mrb[12].mxu1 %v930_v26 }
  0x8e   :  { %843 = vmatprep.mubr.msk.bf16.mxu0 %vm304_vm0, %v931_v27  ;;  %850 = vmatprep.mubr.msk.bf16.mxu1 %vm304_vm0, %v933_v28 }
  0x95   :  { %412 = vmatmul.mubr.bf16.gmra.mrb[16].mxu0 %v935_v29  ;;  %468 = vmatmul.mubr.bf16.gmra.mrb[16].mxu1 %v936_v30 }
  0x96   :  { %844 = vmatprep.mubr.msk.bf16.mxu0 %vm304_vm0, %v937_v31  ;;  %851 = vmatprep.mubr.msk.bf16.mxu1 %vm304_vm0, %v939_v32 }
  0x9d   :  { %420 = vmatmul.mubr.bf16.gmra.mrb[20].mxu0 %v941_v33  ;;  %476 = vmatmul.mubr.bf16.gmra.mrb[20].mxu1 %v942_v34 }
  0x9e   :  { %845 = vmatprep.mubr.msk.bf16.mxu0 %vm304_vm0, %v943_v35  ;;  %852 = vmatprep.mubr.msk.bf16.mxu1 %vm304_vm0, %v945_v36 }
  0xa5   :  { %428 = vmatmul.mubr.bf16.gmra.mrb[24].mxu0 %v947_v37  ;;  %484 = vmatmul.mubr.bf16.gmra.mrb[24].mxu1 %v948_v38 }
 0x148   :  { %v1169_v39 = vpop.f32.mrb[0].mxu0  ;;  %v1171_v40 = vpop.f32.mrb[0].mxu1 }
 0x149   :  { %v556_v41 = vmul.f32 %v1169_v39, %v1169_v39  ;;  %v383_v42 = vpop.f32.mrb[1].mxu0  ;;  %v439_v43 = vpop.f32.mrb[1].mxu1  ;;  %v495_v46 = vsel %vm494_vm1, %v1169_v39, 0.0 }
 0x14a   :  { %v1175_v44 = vpop.f32.mrb[2].mxu0  ;;  %v1177_v45 = vpop.f32.mrb[2].mxu1 }
 0x14b   :  { %v496_v47 = vsel %vm494_vm1, %v1175_v44, 0.0  ;;  %v557_v48 = vmul.f32 %v1175_v44, %v1175_v44  ;;  %v386_v49 = vpop.f32.mrb[3].mxu0  ;;  %v442_v50 = vpop.f32.mrb[3].mxu1  ;;  %v584_v52 = vsel %vm494_vm1, %v556_v41, 0.0 }
 0x14c   :  { %v497_v51 = vadd.f32 %v496_v47, %v495_v46 }
 0x14d   :  { %v585_v53 = vsel %vm494_vm1, %v557_v48, 0.0 }
 0x14e   :  { %v586_v54 = vadd.f32 %v585_v53, %v584_v52 }
 0x150   :  { %v1187_v55 = vpop.f32.mrb[4].mxu0  ;;  %v1189_v56 = vpop.f32.mrb[4].mxu1 }
 0x151   :  { %v498_v57 = vsel %vm494_vm1, %v1187_v55, 0.0  ;;  %v558_v58 = vmul.f32 %v1187_v55, %v1187_v55  ;;  %v391_v59 = vpop.f32.mrb[5].mxu0  ;;  %v447_v60 = vpop.f32.mrb[5].mxu1 }
 0x152   :  { %v499_v61 = vadd.f32 %v498_v57, %v497_v51  ;;  %v1195_v62 = vpop.f32.mrb[6].mxu0  ;;  %v1197_v63 = vpop.f32.mrb[6].mxu1 }
 0x153   :  { %v587_v0 = vsel %vm494_vm1, %v558_v58, 0.0  ;;  %v500_v1 = vsel %vm494_vm1, %v1195_v62, 0.0  ;;  %v559_v2 = vmul.f32 %v1195_v62, %v1195_v62  ;;  %v394_v3 = vpop.f32.mrb[7].mxu0  ;;  %v450_v4 = vpop.f32.mrb[7].mxu1 }
 0x154   :  { %v588_v5 = vadd.f32 %v587_v0, %v586_v54  ;;  %v501_v6 = vadd.f32 %v500_v1, %v499_v61 }
 0x155   :  { %v589_v7 = vsel %vm494_vm1, %v559_v2, 0.0 }
 0x156   :  { %v590_v8 = vadd.f32 %v589_v7, %v588_v5 }
 0x158   :  { %v1205_v9 = vpop.f32.mrb[8].mxu0  ;;  %v1207_v10 = vpop.f32.mrb[8].mxu1 }
 0x159   :  { %v502_v11 = vsel %vm494_vm1, %v1205_v9, 0.0  ;;  %v560_v12 = vmul.f32 %v1205_v9, %v1205_v9  ;;  %v399_v13 = vpop.f32.mrb[9].mxu0  ;;  %v455_v14 = vpop.f32.mrb[9].mxu1 }
 0x15a   :  { %v503_v15 = vadd.f32 %v502_v11, %v501_v6  ;;  %v1213_v16 = vpop.f32.mrb[10].mxu0  ;;  %v1215_v17 = vpop.f32.mrb[10].mxu1 }
 0x15b   :  { %v591_v18 = vsel %vm494_vm1, %v560_v12, 0.0  ;;  %v504_v19 = vsel %vm494_vm1, %v1213_v16, 0.0  ;;  %v561_v20 = vmul.f32 %v1213_v16, %v1213_v16  ;;  %v402_v21 = vpop.f32.mrb[11].mxu0  ;;  %v458_v22 = vpop.f32.mrb[11].mxu1 }
 0x15c   :  { %v592_v23 = vadd.f32 %v591_v18, %v590_v8  ;;  %v505_v24 = vadd.f32 %v504_v19, %v503_v15 }
 0x15d   :  { %v593_v25 = vsel %vm494_vm1, %v561_v20, 0.0 }
 0x15e   :  { %v594_v26 = vadd.f32 %v593_v25, %v592_v23 }
 0x160   :  { %v1223_v27 = vpop.f32.mrb[12].mxu0  ;;  %v1225_v28 = vpop.f32.mrb[12].mxu1 }
 0x161   :  { %v506_v29 = vsel %vm494_vm1, %v1223_v27, 0.0  ;;  %v562_v30 = vmul.f32 %v1223_v27, %v1223_v27  ;;  %v407_v31 = vpop.f32.mrb[13].mxu0  ;;  %v463_v32 = vpop.f32.mrb[13].mxu1 }
 0x162   :  { %v507_v33 = vadd.f32 %v506_v29, %v505_v24  ;;  %v408_v34 = vpop.f32.mrb[14].mxu0  ;;  %v1231_v35 = vpop.f32.mrb[14].mxu1 }
 0x163   :  { %v595_v36 = vsel %vm494_vm1, %v562_v30, 0.0  ;;  %v508_v37 = vsel %vm494_vm1, %v408_v34, 0.0  ;;  %v563_v38 = vmul.f32 %v408_v34, %v408_v34  ;;  %v410_v41 = vpop.f32.mrb[15].mxu0  ;;  %v466_v42 = vpop.f32.mrb[15].mxu1  ;;  %v655_v47 = vmax.f32 %v1169_v39, %v408_v34 }
 0x164   :  { %v596_v43 = vadd.f32 %v595_v36, %v594_v26  ;;  %v509_v46 = vadd.f32 %v508_v37, %v507_v33  ;;  %v676_v48 = vmin.f32 %v1169_v39, %v408_v34  ;;  %v662_v50 = vmax.f32 %v1171_v40, %v1231_v35 }
 0x165   :  { %v597_v49 = vsel %vm494_vm1, %v563_v38, 0.0  ;;  %v683_v52 = vmin.f32 %v1171_v40, %v1231_v35 }
 0x166   :  { %v598_v51 = vadd.f32 %v597_v49, %v596_v43  ;;  %v1242_v53 = vmax.f32 %v655_v47, %v662_v50 }
 0x167   :  { %v1244_v54 = vmin.f32 %v676_v48, %v683_v52 }
 0x168   :  { %v413_v57 = vpop.f32.mrb[16].mxu0  ;;  %v1246_v58 = vpop.f32.mrb[16].mxu1 }
 0x169   :  { %v510_v59 = vsel %vm494_vm1, %v413_v57, 0.0  ;;  %v564_v60 = vmul.f32 %v413_v57, %v413_v57  ;;  %v656_v39 = vmax.f32 %v1175_v44, %v413_v57  ;;  %v677_v61 = vmin.f32 %v1175_v44, %v413_v57  ;;  %v415_v0 = vpop.f32.mrb[17].mxu0  ;;  %v471_v1 = vpop.f32.mrb[17].mxu1 }
 0x16a   :  { %v511_v2 = vadd.f32 %v510_v59, %v509_v46  ;;  %v663_v3 = vmax.f32 %v1177_v45, %v1246_v58  ;;  %v416_v4 = vpop.f32.mrb[18].mxu0  ;;  %v1253_v5 = vpop.f32.mrb[18].mxu1  ;;  %v684_v7 = vmin.f32 %v1177_v45, %v1246_v58 }
 0x16b   :  { %v599_v6 = vsel %vm494_vm1, %v564_v60, 0.0  ;;  %v512_v8 = vsel %vm494_vm1, %v416_v4, 0.0  ;;  %v565_v11 = vmul.f32 %v416_v4, %v416_v4  ;;  %v418_v12 = vpop.f32.mrb[19].mxu0  ;;  %v474_v13 = vpop.f32.mrb[19].mxu1  ;;  %v657_v20 = vmax.f32 %v1187_v55, %v416_v4 }
 0x16c   :  { %v600_v44 = vadd.f32 %v599_v6, %v598_v51  ;;  %v1259_v14 = vmax.f32 %v656_v39, %v663_v3  ;;  %v513_v15 = vadd.f32 %v512_v8, %v511_v2  ;;  %v1261_v18 = vmin.f32 %v677_v61, %v684_v7 }
 0x16d   :  { %v601_v19 = vsel %vm494_vm1, %v565_v11, 0.0  ;;  %v678_v21 = vmin.f32 %v1187_v55, %v416_v4  ;;  %v664_v23 = vmax.f32 %v1189_v56, %v1253_v5  ;;  %v685_v24 = vmin.f32 %v1189_v56, %v1253_v5 }
 0x16e   :  { %v602_v22 = vadd.f32 %v601_v19, %v600_v44  ;;  %v522_v13 = vsel %vm494_vm1, %v1171_v40, 0.0 }
 0x16f   :  { %v1270_v25 = vmax.f32 %v657_v20, %v664_v23  ;;  %v1274_v30 = vmin.f32 %v678_v21, %v685_v24 }
 0x170   :  { %v421_v26 = vpop.f32.mrb[20].mxu0  ;;  %v1272_v29 = vpop.f32.mrb[20].mxu1 }
 0x171   :  { %v514_v31 = vsel %vm494_vm1, %v421_v26, 0.0  ;;  %v566_v32 = vmul.f32 %v421_v26, %v421_v26  ;;  %v658_v33 = vmax.f32 %v1195_v62, %v421_v26  ;;  %v423_v55 = vpop.f32.mrb[21].mxu0  ;;  %v479_v34 = vpop.f32.mrb[21].mxu1  ;;  %v679_v37 = vmin.f32 %v1195_v62, %v421_v26 }
 0x172   :  { %v515_v36 = vadd.f32 %v514_v31, %v513_v15  ;;  %v424_v38 = vpop.f32.mrb[22].mxu0  ;;  %v1279_v41 = vpop.f32.mrb[22].mxu1  ;;  %v665_v43 = vmax.f32 %v1197_v63, %v1272_v29  ;;  %v686_v46 = vmin.f32 %v1197_v63, %v1272_v29 }
 0x173   :  { %v603_v42 = vsel %vm494_vm1, %v566_v32, 0.0  ;;  %v516_v47 = vsel %vm494_vm1, %v424_v38, 0.0  ;;  %v426_v48 = vpop.f32.mrb[23].mxu0  ;;  %v482_v49 = vpop.f32.mrb[23].mxu1  ;;  %v567_v52 = vmul.f32 %v424_v38, %v424_v38  ;;  %v659_v59 = vmax.f32 %v1205_v9, %v424_v38 }
 0x174   :  { %v604_v50 = vadd.f32 %v603_v42, %v602_v22  ;;  %v517_v51 = vadd.f32 %v516_v47, %v515_v36  ;;  %v1287_v57 = vmax.f32 %v658_v33, %v665_v43  ;;  %v1289_v62 = vmin.f32 %v679_v37, %v686_v46 }
 0x175   :  { %v680_v60 = vmin.f32 %v1205_v9, %v424_v38  ;;  %v605_v39 = vsel %vm494_vm1, %v567_v52, 0.0  ;;  %v666_v61 = vmax.f32 %v1207_v10, %v1279_v41  ;;  %v687_v1 = vmin.f32 %v1207_v10, %v1279_v41 }
 0x176   :  { %v606_v0 = vadd.f32 %v605_v39, %v604_v50  ;;  %v570_v32 = vmul.f32 %v1171_v40, %v1171_v40  ;;  %v571_v42 = vmul.f32 %v1177_v45, %v1177_v45  ;;  %v524_v40 = vsel %vm494_vm1, %v1177_v45, 0.0 }
 0x177   :  { %v1298_v2 = vmax.f32 %v659_v59, %v666_v61  ;;  %v1302_v6 = vmin.f32 %v680_v60, %v687_v1  ;;  %v526_v52 = vsel %vm494_vm1, %v1189_v56, 0.0  ;;  %v573_v61 = vmul.f32 %v1197_v63, %v1197_v63 }
 0x178   :  { %v429_v3 = vpop.f32.mrb[24].mxu0  ;;  %v1300_v4 = vpop.f32.mrb[24].mxu1  ;;  %v611_v50 = vsel %vm494_vm1, %v570_v32, 0.0  ;;  %v613_v39 = vsel %vm494_vm1, %v571_v42, 0.0  ;;  %v528_v1 = vsel %vm494_vm1, %v1197_v63, 0.0  ;;  %v532_v63 = vsel %vm494_vm1, %v1215_v17, 0.0 }
 0x179   :  { %v518_v7 = vsel %vm494_vm1, %v429_v3, 0.0  ;;  %v568_v8 = vmul.f32 %v429_v3, %v429_v3  ;;  %v660_v9 = vmax.f32 %v1213_v16, %v429_v3  ;;  %v431_v11 = vpop.f32.mrb[25].mxu0  ;;  %v487_v12 = vpop.f32.mrb[25].mxu1  ;;  %v681_v15 = vmin.f32 %v1213_v16, %v429_v3 }
 0x17a   :  { %v519_v44 = vadd.f32 %v518_v7, %v517_v51  ;;  %v432_v19 = vpop.f32.mrb[26].mxu0  ;;  %v1309_v20 = vpop.f32.mrb[26].mxu1  ;;  %v667_v22 = vmax.f32 %v1215_v17, %v1300_v4  ;;  %v688_v23 = vmin.f32 %v1215_v17, %v1300_v4  ;;  %v617_v12 = vsel %vm494_vm1, %v573_v61, 0.0 }
 0x17b   :  { %v607_v21 = vsel %vm494_vm1, %v568_v8, 0.0  ;;  %v520_v24 = vsel %vm494_vm1, %v432_v19, 0.0  ;;  %v434_v26 = vpop.f32.mrb[27].mxu0  ;;  %v490_v31 = vpop.f32.mrb[27].mxu1  ;;  %v569_v55 = vmul.f32 %v432_v19, %v432_v19  ;;  %v661_v37 = vmax.f32 %v1223_v27, %v432_v19 }
 0x17c   :  { %v608_v33 = vadd.f32 %v607_v21, %v606_v0  ;;  %v521_v16 = vadd.f32 %v520_v24, %v519_v44  ;;  %v1319_v34 = vmax.f32 %v660_v9, %v667_v22  ;;  %v1321_v36 = vmin.f32 %v681_v15, %v688_v23 }
 0x17d   :  { %v682_v38 = vmin.f32 %v1223_v27, %v432_v19  ;;  %v609_v46 = vsel %vm494_vm1, %v569_v55, 0.0  ;;  %v668_v48 = vmax.f32 %v1225_v28, %v1309_v20  ;;  %v689_v49 = vmin.f32 %v1225_v28, %v1309_v20 }
 0x17e   :  { %v523_v43 = vadd.f32 %v522_v13, %v521_v16  ;;  %v610_v47 = vadd.f32 %v609_v46, %v608_v33  ;;  %v572_v27 = vmul.f32 %v1189_v56, %v1189_v56  ;;  %v574_v56 = vmul.f32 %v1207_v10, %v1207_v10 }
 0x17f   :  { %v1339_v60 = vmax.f32 %v661_v37, %v668_v48  ;;  %v1341_v45 = vmin.f32 %v682_v38, %v689_v49  ;;  %v530_v9 = vsel %vm494_vm1, %v1207_v10, 0.0  ;;  %v575_v13 = vmul.f32 %v1215_v17, %v1215_v17 }
 0x180   :  { %v525_v51 = vadd.f32 %v524_v40, %v523_v43  ;;  %v612_v59 = vadd.f32 %v611_v50, %v610_v47  ;;  %v615_v7 = vsel %vm494_vm1, %v572_v27, 0.0  ;;  %v619_v19 = vsel %vm494_vm1, %v574_v56, 0.0 }
 0x181   :  { %v576_v21 = vmul.f32 %v1225_v28, %v1225_v28  ;;  %v534_v10 = vsel %vm494_vm1, %v1225_v28, 0.0  ;;  %v621_v24 = vsel %vm494_vm1, %v575_v13, 0.0  ;;  %v577_v26 = vmul.f32 %v1231_v35, %v1231_v35 }
 0x182   :  { %v527_v0 = vadd.f32 %v526_v52, %v525_v51  ;;  %v614_v3 = vadd.f32 %v613_v39, %v612_v59  ;;  %v536_v17 = vsel %vm494_vm1, %v1231_v35, 0.0  ;;  %v578_v16 = vmul.f32 %v1246_v58, %v1246_v58 }
 0x183   :  { %v623_v33 = vsel %vm494_vm1, %v576_v21, 0.0  ;;  %v538_v28 = vsel %vm494_vm1, %v1246_v58, 0.0  ;;  %v625_v38 = vsel %vm494_vm1, %v577_v26, 0.0  ;;  %v579_v42 = vmul.f32 %v1253_v5, %v1253_v5 }
 0x184   :  { %v529_v8 = vadd.f32 %v528_v1, %v527_v0  ;;  %v616_v11 = vadd.f32 %v615_v7, %v614_v3  ;;  %v540_v35 = vsel %vm494_vm1, %v1253_v5, 0.0  ;;  %v627_v40 = vsel %vm494_vm1, %v578_v16, 0.0 }
 0x185   :  { %v580_v47 = vmul.f32 %v1272_v29, %v1272_v29  ;;  %v542_v58 = vsel %vm494_vm1, %v1272_v29, 0.0  ;;  %v629_v50 = vsel %vm494_vm1, %v579_v42, 0.0  ;;  %v581_v27 = vmul.f32 %v1279_v41, %v1279_v41 }
 0x186   :  { %v531_v44 = vadd.f32 %v530_v9, %v529_v8  ;;  %v618_v15 = vadd.f32 %v617_v12, %v616_v11  ;;  %v582_v51 = vmul.f32 %v1300_v4, %v1300_v4  ;;  %v544_v52 = vsel %vm494_vm1, %v1279_v41, 0.0 }
 0x187   :  { %v546_v59 = vsel %vm494_vm1, %v1300_v4, 0.0  ;;  %v631_v61 = vsel %vm494_vm1, %v580_v47, 0.0  ;;  %v633_v1 = vsel %vm494_vm1, %v581_v27, 0.0  ;;  %v583_v56 = vmul.f32 %v1309_v20, %v1309_v20 }
 0x188   :  { %v533_v22 = vadd.f32 %v532_v63, %v531_v44  ;;  %v620_v23 = vadd.f32 %v619_v19, %v618_v15  ;;  %v635_v3 = vsel %vm494_vm1, %v582_v51, 0.0  ;;  %v548_v8 = vsel %vm494_vm1, %v1309_v20, 0.0 }
 0x189   :  { %v637_v12 = vsel %vm494_vm1, %v583_v56, 0.0 }
 0x18a   :  { %v535_v31 = vadd.f32 %v534_v10, %v533_v22  ;;  %v622_v32 = vadd.f32 %v621_v24, %v620_v23 }
 0x18c   :  { %v537_v55 = vadd.f32 %v536_v17, %v535_v31  ;;  %v624_v37 = vadd.f32 %v623_v33, %v622_v32 }
 0x18e   :  { %v539_v43 = vadd.f32 %v538_v28, %v537_v55  ;;  %v626_v46 = vadd.f32 %v625_v38, %v624_v37  ;;  %v698_v28 = vlaneseq  ;;  %v492_v38 = vld [vmem:[#allocation7] sm:$0x1] }
 0x190   :  { %v541_v48 = vadd.f32 %v540_v35, %v539_v43  ;;  %v628_v49 = vadd.f32 %v627_v40, %v626_v46  ;;  %v699_v37 = vshrl.u32 %v698_v28, 7  ;;  %v493_v46 = vld [vmem:[#allocation8] sm:$0x1] }
 0x192   :  { %v543_v5 = vadd.f32 %v542_v58, %v541_v48  ;;  %v630_v39 = vadd.f32 %v629_v50, %v628_v49  ;;  %v700_v42 = vsub.s32 0, %v699_v37 }
 0x194   :  { %v545_v29 = vadd.f32 %v544_v52, %v543_v5  ;;  %v632_v0 = vadd.f32 %v631_v61, %v630_v39 }
 0x196   :  { %v547_v7 = vadd.f32 %v546_v59, %v545_v29  ;;  %v634_v41 = vadd.f32 %v633_v1, %v632_v0 }
 0x198   :  { %v549_v9 = vadd.f32 %v548_v8, %v547_v7  ;;  %v636_v11 = vadd.f32 %v635_v3, %v634_v41 }
 0x19a   :  { %v550_v4 = vrot.slane %v549_v9, 4  ;;  %v638_v13 = vadd.f32 %v637_v12, %v636_v11 }
 0x19c   :  { %v551_v44 = vadd.f32 %v550_v4, %v549_v9  ;;  %v639_v63 = vrot.slane %v638_v13, 4 }
 0x19e   :  { %v552_v15 = vrot.slane %v551_v44, 2  ;;  %v640_v19 = vadd.f32 %v639_v63, %v638_v13 }
 0x1a0   :  { %v553_v21 = vadd.f32 %v552_v15, %v551_v44  ;;  %v641_v22 = vrot.slane %v640_v19, 2 }
 0x1a2   :  { %v554_v10 = vrot.slane %v553_v21, 1  ;;  %v642_v23 = vadd.f32 %v641_v22, %v640_v19 }
 0x1a4   :  { %v555_v24 = vadd.f32 %v554_v10, %v553_v21  ;;  %v643_v26 = vrot.slane %v642_v23, 1 }
 0x1a6   :  { %v645_v31 = vmul.f32 0.005, %v555_v24  ;;  %v644_v17 = vadd.f32 %v643_v26, %v642_v23 }
 0x1a8   :  { %v647_v20 = vmul.f32 %v645_v31, %v645_v31  ;;  %v646_v32 = vmul.f32 0.005, %v644_v17 }
 0x1aa   :  { %v648_v33 = vsub.f32 %v646_v32, %v647_v20 }
 0x1ac   :  { %v649_v16 = vmax.f32 %v648_v33, 0.0 }
 0x1ae   :  { %v650_v55 = vadd.f32 1e-05, %v649_v16 }
 0x1b0   :  { %949 = vrsqrt.f32 %v650_v55 }
 0x1ba   :  { %v950_v43 = vpop.eup %949 }
 0x1bb   :  { %v652_v35 = vmul.f32 %v950_v43, %v492_v38 }
 0x1bd   :  { %v653_v40 = vmul.f32 %v652_v35, %v645_v31  ;;  %v701_v47 = vrot.slane %v652_v35, %v700_v42 }
 0x1bf   :  { %v654_v48 = vsub.f32 %v493_v46, %v653_v40  ;;  %v709_v58 = vmul.f32 %v701_v47, %v1339_v60  ;;  %v716_v49 = vmul.f32 %v701_v47, %v1341_v45  ;;  %v703_v50 = vmul.f32 %v701_v47, %v1242_v53 }
 0x1c0   :  { %v704_v27 = vmul.f32 %v701_v47, %v1259_v14  ;;  %v705_v51 = vmul.f32 %v701_v47, %v1270_v25  ;;  %v706_v5 = vmul.f32 %v701_v47, %v1287_v57  ;;  %v707_v52 = vmul.f32 %v701_v47, %v1298_v2 }
 0x1c1   :  { %v723_v59 = vmax.f32 %v709_v58, %v716_v49  ;;  %v728_v39 = vrot.slane %v654_v48, %v700_v42  ;;  %v708_v61 = vmul.f32 %v701_v47, %v1319_v34  ;;  %v710_v29 = vmul.f32 %v701_v47, %v1244_v54 }
 0x1c2   :  { %v711_v60 = vmul.f32 %v701_v47, %v1261_v18  ;;  %v712_v45 = vmul.f32 %v701_v47, %v1274_v30  ;;  %v713_v53 = vmul.f32 %v701_v47, %v1289_v62  ;;  %v714_v14 = vmul.f32 %v701_v47, %v1302_v6 }
 0x1c3   :  { %v736_v0 = vadd.f32 %v728_v39, %v723_v59  ;;  %v715_v25 = vmul.f32 %v701_v47, %v1321_v36  ;;  %v717_v57 = vmax.f32 %v703_v50, %v710_v29 }
 0x1c4   :  { %v718_v1 = vmax.f32 %v704_v27, %v711_v60  ;;  %v719_v2 = vmax.f32 %v705_v51, %v712_v45  ;;  %v720_v3 = vmax.f32 %v706_v5, %v713_v53  ;;  %v721_v7 = vmax.f32 %v707_v52, %v714_v14 }
 0x1c5   :  { %v743_v56 = vmax.f32 %v736_v0, 0.0  ;;  %v722_v34 = vmax.f32 %v708_v61, %v715_v25  ;;  %v730_v54 = vadd.f32 %v728_v39, %v717_v57 }
 0x1c6   :  { %v731_v8 = vadd.f32 %v728_v39, %v718_v1  ;;  %v732_v18 = vadd.f32 %v728_v39, %v719_v2  ;;  %v733_v41 = vadd.f32 %v728_v39, %v720_v3  ;;  %v734_v30 = vadd.f32 %v728_v39, %v721_v7 }
 0x1c7   :  { %v866_v9 = vpack.c.bf16 %v743_v56, %v743_v56  ;;  %v735_v62 = vadd.f32 %v728_v39, %v722_v34  ;;  %v737_v11 = vmax.f32 %v730_v54, 0.0 }
 0x1c8   :  { %v738_v6 = vmax.f32 %v731_v8, 0.0  ;;  %v739_v4 = vmax.f32 %v732_v18, 0.0  ;;  %v740_v36 = vmax.f32 %v733_v41, 0.0  ;;  %v741_v12 = vmax.f32 %v734_v30, 0.0 }
 0x1c9   :  { %781 = vst.msk [vmem:[#allocation10 + $0x18] sm:$0x1] %vm780_vm2, %v866_v9  ;;  %v742_v13 = vmax.f32 %v735_v62, 0.0  ;;  %v860_v44 = vpack.c.bf16 %v737_v11, %v737_v11 }
 0x1ca   :  { %v861_v63 = vpack.c.bf16 %v738_v6, %v738_v6  ;;  %v862_v15 = vpack.c.bf16 %v739_v4, %v739_v4  ;;  %v863_v19 = vpack.c.bf16 %v740_v36, %v740_v36  ;;  %v864_v21 = vpack.c.bf16 %v741_v12, %v741_v12 }
 0x1cb   :  { %v865_v22 = vpack.c.bf16 %v742_v13, %v742_v13  ;;  %774 = vst.msk [vmem:[#allocation10] sm:$0xf] %vm773_vm3, %v860_v44 }
 0x1cc   :  { %775 = vst.msk [vmem:[#allocation10 + $0x4] sm:$0xf] %vm773_vm3, %v861_v63  ;;  %776 = vst.msk [vmem:[#allocation10 + $0x8] sm:$0xf] %vm773_vm3, %v862_v15 }
 0x1cd   :  { %777 = vst.msk [vmem:[#allocation10 + $0xc] sm:$0xf] %vm773_vm3, %v863_v19  ;;  %778 = vst.msk [vmem:[#allocation10 + $0x10] sm:$0xf] %vm773_vm3, %v864_v21 }
 0x1ce   :  { %779 = vst.msk [vmem:[#allocation10 + $0x14] sm:$0xf] %vm773_vm3, %v865_v22 }
 0x1cf   :  { %1050 = shalt.err (!%p1047_p8)
}
 0x1d0   :  { %s1051_s19 = scalar_lea.hbm %s1440_s4, 448 }
 0x1d1   :  { %p1052_p9 = scmp.ne.s32.totalorder %s1440_s4, %s1051_s19  ;;  %p1055_p10 = scmp.lt.u32.totalorder %s1051_s19, %s1440_s4 }
 0x1d3   :  { %p1057_p11 = pnand %p1055_p10, %p1052_p9 }
 0x1d5   :  { %1060 = shalt.err (!%p1057_p11)
}
 0x1d6   :  { %793 = dma.vmem_to_hbm [thread:$0]  %s788_s15, 448, %s1440_s4, [#allocation4], %s1070_s25, %s1070_s25, %s1071_s26  }
 0x1d7   :  { %1067 = dma.done.wait [#allocation4], 448  }
 0x1d8   :  { %1068 = vsyncadd [#allocation4], 4294966848 }
 0x1d9   :  { %797 = vsyncpa [#allocation3], 1 }
 0x1da   :  { %798 = vsyncpa [#allocation6], 1 }
 0x1db   :  { %799 = vsyncpa [#allocation9], 1 }
 0x1dc   :  { %800 = vsyncpa [#allocation4], 1 }

// kernel: lenet_forward.6
= control target key start
LH: loop header
LB: loop body
LE: loop exit
PB: predicated region body
PF: predicated region fallthrough
CT: control target
= control target key end

     0   :  { %9 = vsyncpa [#allocation3], 0  ;;  %s662_s0 = inlined_call_operand.hbm [shape: bf16[56,144], index: 0, kind: input, shape index: {}]   ;;  %s663_s1 = inlined_call_operand.hbm [shape: bf16[144,32], index: 1, kind: input, shape index: {}]   ;;  %s664_s2 = inlined_call_operand.hbm [shape: f32[1,32], index: 2, kind: input, shape index: {}]   ;;  %s665_s3 = inlined_call_operand.hbm [shape: f32[1,32], index: 3, kind: input, shape index: {}]   ;;  %s666_s4 = inlined_call_operand.hbm [shape: bf16[8,32], index: 4, kind: output, shape index: {}]  }
   0x1   :  { %10 = vsyncpa [#allocation6], 0 }
   0x2   :  { %11 = vsyncpa [#allocation9], 0 }
   0x3   :  { %12 = vsyncpa [#allocation4], 0  ;;  %s549_s15 = smov [#allocation5]   ;;  %s431_s19 = scalar_lea.hbm %s663_s1, 1152 }
   0x4   :  { %s30_s16 = sshll.u32 %s549_s15, 4  ;;  %p432_p0 = scmp.ne.s32.totalorder %s663_s1, %s431_s19  ;;  %s31_s16 = int_to_ptr.vmem [resolvable:$true] %s30_s16 }
   0x5   :  { %p435_p1 = scmp.lt.u32.totalorder %s431_s19, %s663_s1 }
   0x7   :  { %p437_p2 = pnand %p435_p1, %p432_p0 }
   0x9   :  { %440 = shalt.err (!%p437_p2)
}
   0xa   :  { %s441_s24 = scalar_lea.vmem %s31_s16, 1152  ;;  %p446_p4 = scmp.lt.s32.totalorder %s31_s16, %s31_s16 }
   0xb   :  { %p442_p3 = scmp.ne.s32.totalorder %s31_s16, %s441_s24  ;;  %p447_p5 = scmp.lt.s32.totalorder %s441_s24, %s441_s24 }
   0xd   :  { %p448_p6 = por %p447_p5, %p446_p4 }
   0xf   :  { %p449_p7 = pnand %p448_p6, %p442_p3 }
  0x11   :  { %452 = shalt.err (!%p449_p7)
}
  0x12   :  { %s550_s25 = smov 64   ;;  %s551_s26 = smov 4  }
  0x13   :  { %36 = dma.hbm_to_vmem [thread:$0]  %s663_s1, 1152, %s31_s16, [#allocation6], %s550_s25, %s550_s25, %s551_s26  }
  0x14   :  { %s552_s29 = smov [#allocation2]   ;;  %s453_s7 = scalar_lea.hbm %s662_s0, 896 }
  0x15   :  { %s18_s30 = sshll.u32 %s552_s29, 4  ;;  %p454_p8 = scmp.ne.s32.totalorder %s662_s0, %s453_s7  ;;  %s19_s30 = int_to_ptr.vmem [resolvable:$true] %s18_s30 }
  0x16   :  { %p457_p9 = scmp.lt.u32.totalorder %s453_s7, %s662_s0 }
  0x18   :  { %p459_p10 = pnand %p457_p9, %p454_p8 }
  0x1a   :  { %462 = shalt.err (!%p459_p10)
}
  0x1b   :  { %s463_s12 = scalar_lea.vmem %s19_s30, 896  ;;  %p468_p12 = scmp.lt.s32.totalorder %s19_s30, %s19_s30 }
  0x1c   :  { %p464_p11 = scmp.ne.s32.totalorder %s19_s30, %s463_s12  ;;  %p469_p13 = scmp.lt.s32.totalorder %s463_s12, %s463_s12 }
  0x1e   :  { %p470_p0 = por %p469_p13, %p468_p12 }
  0x20   :  { %p471_p1 = pnand %p470_p0, %p464_p11 }
  0x22   :  { %474 = shalt.err (!%p471_p1)
}
  0x23   :  { %s553_s1 = smov 128   ;;  %s554_s13 = smov 8  }
  0x24   :  { %24 = dma.hbm_to_vmem [thread:$0]  %s662_s0, 896, %s19_s30, [#allocation3], %s553_s1, %s553_s1, %s554_s13  }
  0x25   :  { %s555_s16 = smov [#allocation7]   ;;  %s556_s18 = smov [#allocation8]  }
  0x26   :  { %s43_s17 = sshll.u32 %s555_s16, 4  ;;  %s53_s19 = sshll.u32 %s556_s18, 4  ;;  %s44_s17 = int_to_ptr.vmem [resolvable:$true] %s43_s17  ;;  %s54_s19 = int_to_ptr.vmem [resolvable:$true] %s53_s19 }
  0x27   :  { %s475_s22 = scalar_lea.hbm %s664_s2, 16 }
  0x28   :  { %p476_p2 = scmp.ne.s32.totalorder %s664_s2, %s475_s22  ;;  %p479_p3 = scmp.lt.u32.totalorder %s475_s22, %s664_s2 }
  0x2a   :  { %p481_p4 = pnand %p479_p3, %p476_p2 }
  0x2c   :  { %484 = shalt.err (!%p481_p4)
}
  0x2d   :  { %s485_s0 = scalar_lea.vmem %s44_s17, 16  ;;  %s489_s27 = scalar_lea.vmem %s44_s17, 32 }
  0x2e   :  { %p486_p5 = scmp.ne.s32.totalorder %s44_s17, %s485_s0  ;;  %p490_p6 = scmp.lt.s32.totalorder %s44_s17, %s44_s17 }
  0x2f   :  { %p491_p7 = scmp.lt.s32.totalorder %s489_s27, %s485_s0 }
  0x31   :  { %p492_p8 = por %p491_p7, %p490_p6 }
  0x33   :  { %p493_p9 = pnand %p492_p8, %p486_p5 }
  0x35   :  { %496 = shalt.err (!%p493_p9)
}
  0x36   :  { %46 = dma.hbm_to_vmem [thread:$0]  %s664_s2, 16, %s44_s17, [#allocation6]  }
  0x37   :  { %s497_s6 = scalar_lea.hbm %s665_s3, 16 }
  0x38   :  { %p498_p10 = scmp.ne.s32.totalorder %s665_s3, %s497_s6  ;;  %p501_p11 = scmp.lt.u32.totalorder %s497_s6, %s665_s3 }
  0x3a   :  { %p503_p12 = pnand %p501_p11, %p498_p10 }
  0x3c   :  { %506 = shalt.err (!%p503_p12)
}
  0x3d   :  { %s507_s11 = scalar_lea.vmem %s54_s19, 16  ;;  %s511_s12 = scalar_lea.vmem %s54_s19, 32 }
  0x3e   :  { %p508_p13 = scmp.ne.s32.totalorder %s54_s19, %s507_s11  ;;  %p512_p0 = scmp.lt.s32.totalorder %s54_s19, %s54_s19 }
  0x3f   :  { %p513_p1 = scmp.lt.s32.totalorder %s511_s12, %s507_s11 }
  0x41   :  { %p514_p2 = por %p513_p1, %p512_p0 }
  0x43   :  { %p515_p3 = pnand %p514_p2, %p508_p13 }
  0x45   :  { %518 = shalt.err (!%p515_p3)
}
  0x46   :  { %56 = dma.hbm_to_vmem [thread:$0]  %s665_s3, 16, %s54_s19, [#allocation9]  }
  0x47   :  { %541 = dma.done.wait [#allocation3], 896  }
  0x48   :  { %542 = vsyncadd [#allocation3], 4294966400 }
  0x49   :  { %543 = dma.done.wait [#allocation6], 1168  }
  0x4a   :  { %544 = vsyncadd [#allocation6], 4294966128 }
  0x4b   :  { %545 = dma.done.wait [#allocation9], 16  }
  0x4c   :  { %546 = vsyncadd [#allocation9], 4294967280  ;;  %v557_v0 = vmov 0   ;;  %v409_v1 = vld [vmem:[#allocation5] sm:$0xff]   ;;  %v410_v2 = vld [vmem:[#allocation5 + $0x8] sm:$0xff]   ;;  %vm182_vm0 = vcmask 130048  }
  0x4d   :  { %195 = vmatprep.subr.bf16.mxu0 %v557_v0  ;;  %381 = vmatprep.subr.bf16.mxu1 %v557_v0  ;;  %v411_v3 = vld [vmem:[#allocation5 + $0x10] sm:$0xff]   ;;  %v412_v4 = vld [vmem:[#allocation5 + $0x18] sm:$0xff]   ;;  %v413_v7 = vld [vmem:[#allocation5 + $0x20] sm:$0xff]   ;;  %vm261_vm1 = vcmask 261120   ;;  %s558_s3 = smov [#allocation10]   ;;  %vm341_vm2 = vcmask 257024  }
  0x4e   :  { %196 = vmatpush1.bf16.msra.mxu0 %v409_v1  ;;  %390 = vmatpush1.bf16.msra.mxu1 %v409_v1  ;;  %v420_v5 = vld [vmem:[#allocation2 + $0x4] ss:$8 sps:$4 sm:$0xff]   ;;  %v416_v10 = vld [vmem:[#allocation5 + $0x38] sm:$0xff]   ;;  %v417_v11 = vld [vmem:[#allocation5 + $0x40] sm:$0xff]   ;;  %s349_s13 = sshll.u32 %s558_s3, 4  ;;  %s350_s13 = int_to_ptr.vmem [resolvable:$true] %s349_s13 }
  0x4f   :  { %197 = vmatprep.subr.bf16.mxu0 %v557_v0  ;;  %382 = vmatprep.subr.bf16.mxu1 %v557_v0  ;;  %v423_v6 = vld [vmem:[#allocation2 + $0x24] ss:$8 sps:$4 sm:$0xff]   ;;  %v76_v12 = vld [vmem:[#allocation2 + $0x30] sm:$0xff]  ;;  %v418_v13 = vld [vmem:[#allocation2] ss:$8 sps:$4 sm:$0xff]   ;;  %s519_s14 = scalar_lea.vmem %s350_s13, 64  ;;  %p524_p5 = scmp.lt.s32.totalorder %s350_s13, %s350_s13 }
  0x50   :  { %377 = vmatprep.mubr.msk.bf16.mxu0 %vm182_vm0, %v420_v5  ;;  %379 = vmatprep.mubr.msk.bf16.mxu1 %vm182_vm0, %v423_v6  ;;  %v414_v8 = vld [vmem:[#allocation5 + $0x28] sm:$0xff]   ;;  %v415_v9 = vld [vmem:[#allocation5 + $0x30] sm:$0xff]   ;;  %v424_v15 = vld [vmem:[#allocation2 + $0x14] ss:$8 sps:$4 sm:$0xff]   ;;  %v367_v16 = vcombine.high %v76_v12, %v76_v12  ;;  %v366_v18 = vcombine.low %v76_v12, %v76_v12  ;;  %p520_p4 = scmp.ne.s32.totalorder %s350_s13, %s519_s14  ;;  %p525_p6 = scmp.lt.s32.totalorder %s519_s14, %s519_s14 }
  0x51   :  { %v421_v14 = vld [vmem:[#allocation2 + $0x20] ss:$8 sps:$4 sm:$0xff]   ;;  %v426_v17 = vld [vmem:[#allocation2 + $0x10] ss:$8 sps:$4 sm:$0xff]  }
  0x52   :  { %198 = vmatpush1.bf16.msra.mxu0 %v410_v2  ;;  %391 = vmatpush1.bf16.msra.mxu1 %v410_v2  ;;  %p526_p7 = por %p525_p6, %p524_p5 }
  0x53   :  { %199 = vmatprep.subr.bf16.mxu0 %v557_v0  ;;  %383 = vmatprep.subr.bf16.mxu1 %v557_v0 }
  0x54   :  { %p527_p8 = pnand %p526_p7, %p520_p4 }
  0x56   :  { %200 = vmatpush1.bf16.msra.mxu0 %v411_v3  ;;  %392 = vmatpush1.bf16.msra.mxu1 %v411_v3 }
  0x57   :  { %201 = vmatprep.subr.bf16.mxu0 %v557_v0  ;;  %384 = vmatprep.subr.bf16.mxu1 %v557_v0 }
  0x5a   :  { %202 = vmatpush1.bf16.msra.mxu0 %v412_v4  ;;  %393 = vmatpush1.bf16.msra.mxu1 %v412_v4 }
  0x5b   :  { %203 = vmatprep.subr.bf16.mxu0 %v557_v0  ;;  %385 = vmatprep.subr.bf16.mxu1 %v557_v0 }
  0x5e   :  { %204 = vmatpush1.bf16.msra.mxu0 %v413_v7  ;;  %394 = vmatpush1.bf16.msra.mxu1 %v413_v7 }
  0x5f   :  { %205 = vmatprep.subr.bf16.mxu0 %v557_v0  ;;  %386 = vmatprep.subr.bf16.mxu1 %v557_v0 }
  0x62   :  { %206 = vmatpush1.bf16.msra.mxu0 %v414_v8  ;;  %395 = vmatpush1.bf16.msra.mxu1 %v414_v8 }
  0x63   :  { %207 = vmatprep.subr.bf16.mxu0 %v557_v0  ;;  %387 = vmatprep.subr.bf16.mxu1 %v557_v0 }
  0x66   :  { %208 = vmatpush1.bf16.msra.mxu0 %v415_v9  ;;  %396 = vmatpush1.bf16.msra.mxu1 %v415_v9 }
  0x67   :  { %209 = vmatprep.subr.bf16.mxu0 %v557_v0  ;;  %388 = vmatprep.subr.bf16.mxu1 %v557_v0 }
  0x6a   :  { %210 = vmatpush1.bf16.msra.mxu0 %v416_v10  ;;  %397 = vmatpush1.bf16.msra.mxu1 %v416_v10 }
  0x6b   :  { %211 = vmatprep.subr.bf16.mxu0 %v557_v0  ;;  %389 = vmatprep.subr.bf16.mxu1 %v557_v0 }
  0x6e   :  { %212 = vmatpush1.bf16.msra.mxu0 %v417_v11  ;;  %398 = vmatpush1.bf16.msra.mxu1 %v417_v11 }
  0x71   :  { %228 = vmatmul.mubr.bf16.vlgmr.msra.gmra.mrb[0].mxu0 %v418_v13  ;;  %244 = vmatmul.mubr.bf16.vlgmr.msra.gmra.mrb[0].mxu1 %v421_v14 }
  0x72   :  { %378 = vmatprep.mubr.msk.bf16.mxu0 %vm182_vm0, %v424_v15  ;;  %380 = vmatprep.mubr.msk.bf16.mxu1 %vm182_vm0, %v367_v16 }
  0x79   :  { %236 = vmatmul.mubr.bf16.gmra.mrb[4].mxu0 %v426_v17  ;;  %252 = vmatmul.mubr.bf16.gmra.mrb[4].mxu1 %v366_v18 }
 0x144   :  { %v229_v19 = vpop.f32.mrb[0].mxu0  ;;  %v245_v20 = vpop.f32.mrb[0].mxu1 }
 0x145   :  { %v281_v21 = vmul.f32 %v229_v19, %v229_v19  ;;  %v231_v22 = vpop.f32.mrb[1].mxu0  ;;  %v247_v23 = vpop.f32.mrb[1].mxu1  ;;  %v262_v26 = vsel %vm261_vm1, %v229_v19, 0.0  ;;  %v285_v43 = vmul.f32 %v245_v20, %v245_v20  ;;  %v269_v53 = vsel %vm261_vm1, %v245_v20, 0.0 }
 0x146   :  { %v232_v24 = vpop.f32.mrb[2].mxu0  ;;  %v248_v25 = vpop.f32.mrb[2].mxu1 }
 0x147   :  { %v263_v27 = vsel %vm261_vm1, %v232_v24, 0.0  ;;  %v282_v28 = vmul.f32 %v232_v24, %v232_v24  ;;  %v317_v29 = vmax.f32 %v229_v19, %v232_v24  ;;  %v234_v30 = vpop.f32.mrb[3].mxu0  ;;  %v250_v31 = vpop.f32.mrb[3].mxu1  ;;  %v320_v33 = vmin.f32 %v229_v19, %v232_v24 }
 0x148   :  { %v264_v32 = vadd.f32 %v263_v27, %v262_v26  ;;  %v288_v34 = vsel %vm261_vm1, %v281_v21, 0.0  ;;  %v286_v57 = vmul.f32 %v248_v25, %v248_v25  ;;  %v295_v0 = vsel %vm261_vm1, %v285_v43, 0.0  ;;  %v259_v30 = vld [vmem:[#allocation7] sm:$0x1] }
 0x149   :  { %v289_v35 = vsel %vm261_vm1, %v282_v28, 0.0  ;;  %v271_v1 = vsel %vm261_vm1, %v248_v25, 0.0  ;;  %v324_v28 = vlaneseq }
 0x14a   :  { %v290_v36 = vadd.f32 %v289_v35, %v288_v34  ;;  %v297_v5 = vsel %vm261_vm1, %v286_v57, 0.0  ;;  %v260_v34 = vld [vmem:[#allocation8] sm:$0x1] }
 0x14c   :  { %v237_v37 = vpop.f32.mrb[4].mxu0  ;;  %v253_v38 = vpop.f32.mrb[4].mxu1 }
 0x14d   :  { %v265_v39 = vsel %vm261_vm1, %v237_v37, 0.0  ;;  %v283_v40 = vmul.f32 %v237_v37, %v237_v37  ;;  %v239_v41 = vpop.f32.mrb[5].mxu0  ;;  %v255_v42 = vpop.f32.mrb[5].mxu1  ;;  %v287_v60 = vmul.f32 %v253_v38, %v253_v38  ;;  %v273_v2 = vsel %vm261_vm1, %v253_v38, 0.0 }
 0x14e   :  { %v266_v44 = vadd.f32 %v265_v39, %v264_v32  ;;  %v240_v45 = vpop.f32.mrb[6].mxu0  ;;  %v256_v46 = vpop.f32.mrb[6].mxu1 }
 0x14f   :  { %v291_v47 = vsel %vm261_vm1, %v283_v40, 0.0  ;;  %v267_v48 = vsel %vm261_vm1, %v240_v45, 0.0  ;;  %v284_v49 = vmul.f32 %v240_v45, %v240_v45  ;;  %v318_v50 = vmax.f32 %v237_v37, %v240_v45  ;;  %v242_v51 = vpop.f32.mrb[7].mxu0  ;;  %v257_v52 = vpop.f32.mrb[7].mxu1 }
 0x150   :  { %v292_v54 = vadd.f32 %v291_v47, %v290_v36  ;;  %v268_v55 = vadd.f32 %v267_v48, %v266_v44  ;;  %v321_v56 = vmin.f32 %v237_v37, %v240_v45  ;;  %v299_v6 = vsel %vm261_vm1, %v287_v60, 0.0 }
 0x151   :  { %v293_v58 = vsel %vm261_vm1, %v284_v49, 0.0  ;;  %v319_v59 = vmax.f32 %v317_v29, %v318_v50  ;;  %v325_v29 = vshrl.u32 %v324_v28, 7 }
 0x152   :  { %v294_v61 = vadd.f32 %v293_v58, %v292_v54  ;;  %v322_v62 = vmin.f32 %v320_v33, %v321_v56  ;;  %v270_v63 = vadd.f32 %v269_v53, %v268_v55 }
 0x153   :  { %v326_v31 = vsub.s32 0, %v325_v29 }
 0x154   :  { %v272_v3 = vadd.f32 %v271_v1, %v270_v63  ;;  %v296_v4 = vadd.f32 %v295_v0, %v294_v61 }
 0x156   :  { %v274_v7 = vadd.f32 %v273_v2, %v272_v3  ;;  %v298_v8 = vadd.f32 %v297_v5, %v296_v4 }
 0x158   :  { %v275_v9 = vrot.slane %v274_v7, 4  ;;  %v300_v10 = vadd.f32 %v299_v6, %v298_v8 }
 0x15a   :  { %v276_v11 = vadd.f32 %v275_v9, %v274_v7  ;;  %v301_v12 = vrot.slane %v300_v10, 4 }
 0x15c   :  { %v277_v13 = vrot.slane %v276_v11, 2  ;;  %v302_v14 = vadd.f32 %v301_v12, %v300_v10 }
 0x15e   :  { %v278_v15 = vadd.f32 %v277_v13, %v276_v11  ;;  %v303_v16 = vrot.slane %v302_v14, 2 }
 0x160   :  { %v279_v17 = vrot.slane %v278_v15, 1  ;;  %v304_v18 = vadd.f32 %v303_v16, %v302_v14 }
 0x162   :  { %v280_v19 = vadd.f32 %v279_v17, %v278_v15  ;;  %v305_v20 = vrot.slane %v304_v18, 1 }
 0x164   :  { %v306_v21 = vadd.f32 %v305_v20, %v304_v18  ;;  %v307_v22 = vmul.f32 0.02, %v280_v19 }
 0x166   :  { %v308_v23 = vmul.f32 0.02, %v306_v21  ;;  %v309_v24 = vmul.f32 %v307_v22, %v307_v22 }
 0x168   :  { %v310_v25 = vsub.f32 %v308_v23, %v309_v24 }
 0x16a   :  { %v311_v26 = vmax.f32 %v310_v25, 0.0 }
 0x16c   :  { %v312_v27 = vadd.f32 1e-05, %v311_v26 }
 0x16e   :  { %429 = vrsqrt.f32 %v312_v27 }
 0x178   :  { %v430_v32 = vpop.eup %429 }
 0x179   :  { %v314_v33 = vmul.f32 %v430_v32, %v259_v30 }
 0x17b   :  { %v315_v35 = vmul.f32 %v314_v33, %v307_v22  ;;  %v327_v36 = vrot.slane %v314_v33, %v326_v31 }
 0x17d   :  { %v316_v37 = vsub.f32 %v260_v34, %v315_v35  ;;  %v329_v38 = vmul.f32 %v327_v36, %v319_v59  ;;  %v330_v39 = vmul.f32 %v327_v36, %v322_v62 }
 0x17f   :  { %v331_v40 = vmax.f32 %v329_v38, %v330_v39  ;;  %v336_v41 = vrot.slane %v316_v37, %v326_v31 }
 0x181   :  { %v338_v42 = vadd.f32 %v336_v41, %v331_v40 }
 0x183   :  { %v339_v43 = vmax.f32 %v338_v42, 0.0 }
 0x185   :  { %v340_v44 = vpack.c.bf16 %v339_v43, %v339_v43 }
 0x187   :  { %342 = vst.msk [vmem:[#allocation10] sm:$0xf] %vm341_vm2, %v340_v44 }
 0x188   :  { %530 = shalt.err (!%p527_p8)
}
 0x189   :  { %s531_s17 = scalar_lea.hbm %s666_s4, 64 }
 0x18a   :  { %p532_p9 = scmp.ne.s32.totalorder %s666_s4, %s531_s17  ;;  %p535_p10 = scmp.lt.u32.totalorder %s531_s17, %s666_s4 }
 0x18c   :  { %p537_p11 = pnand %p535_p10, %p532_p9 }
 0x18e   :  { %540 = shalt.err (!%p537_p11)
}
 0x18f   :  { %352 = dma.vmem_to_hbm [thread:$0]  %s350_s13, 64, %s666_s4, [#allocation4]  }
 0x190   :  { %547 = dma.done.wait [#allocation4], 64  }
 0x191   :  { %548 = vsyncadd [#allocation4], 4294967232 }
 0x192   :  { %356 = vsyncpa [#allocation3], 1 }
 0x193   :  { %357 = vsyncpa [#allocation6], 1 }
 0x194   :  { %358 = vsyncpa [#allocation9], 1 }
 0x195   :  { %359 = vsyncpa [#allocation4], 1 }

// kernel: lenet_forward.7
= control target key start
LH: loop header
LB: loop body
LE: loop exit
PB: predicated region body
PF: predicated region fallthrough
CT: control target
= control target key end

     0   :  { %15 = vsyncpa [#allocation3], 0  ;;  %s1601_s0 = inlined_call_operand.hbm [shape: bf16[32,288], index: 0, kind: input, shape index: {}]   ;;  %s1602_s1 = inlined_call_operand.hbm [shape: bf16[288,64], index: 1, kind: input, shape index: {}]   ;;  %s1603_s2 = inlined_call_operand.hbm [shape: f32[1,64], index: 2, kind: input, shape index: {}]   ;;  %s1604_s3 = inlined_call_operand.hbm [shape: f32[1,64], index: 3, kind: input, shape index: {}]   ;;  %s1605_s4 = inlined_call_operand.hbm [shape: bf16[64,128], index: 4, kind: input, shape index: {}]   ;;  %s1606_s5 = inlined_call_operand.hbm [shape: f32[1,128], index: 5, kind: input, shape index: {}]   ;;  %s1607_s6 = inlined_call_operand.hbm [shape: bf16[128,128], index: 6, kind: input, shape index: {}]   ;;  %s1608_s7 = inlined_call_operand.hbm [shape: f32[1,128], index: 7, kind: input, shape index: {}]   ;;  %s1609_s8 = inlined_call_operand.hbm [shape: bf16[128,128], index: 8, kind: input, shape index: {}]   ;;  %s1610_s9 = inlined_call_operand.hbm [shape: f32[1,128], index: 9, kind: input, shape index: {}]   ;;  %s1611_s10 = inlined_call_operand.hbm [shape: f32[2,128], index: 10, kind: output, shape index: {}]  }
   0x1   :  { %16 = vsyncpa [#allocation6], 0 }
   0x2   :  { %17 = vsyncpa [#allocation9], 0 }
   0x3   :  { %18 = vsyncpa [#allocation12], 0 }
   0x4   :  { %19 = vsyncpa [#allocation15], 0 }
   0x5   :  { %20 = vsyncpa [#allocation18], 0 }
   0x6   :  { %21 = vsyncpa [#allocation4], 0  ;;  %s1350_s13 = smov [#allocation5]   ;;  %s1094_s17 = scalar_lea.hbm %s1602_s1, 2304 }
   0x7   :  { %s39_s14 = sshll.u32 %s1350_s13, 4  ;;  %p1095_p0 = scmp.ne.s32.totalorder %s1602_s1, %s1094_s17  ;;  %s40_s14 = int_to_ptr.vmem [resolvable:$true] %s39_s14 }
   0x8   :  { %p1098_p1 = scmp.lt.u32.totalorder %s1094_s17, %s1602_s1 }
   0xa   :  { %p1100_p2 = pnand %p1098_p1, %p1095_p0 }
   0xc   :  { %1103 = shalt.err (!%p1100_p2)
}
   0xd   :  { %s1104_s22 = scalar_lea.vmem %s40_s14, 2304  ;;  %p1109_p4 = scmp.lt.s32.totalorder %s40_s14, %s40_s14 }
   0xe   :  { %p1105_p3 = scmp.ne.s32.totalorder %s40_s14, %s1104_s22  ;;  %p1110_p5 = scmp.lt.s32.totalorder %s1104_s22, %s1104_s22 }
  0x10   :  { %p1111_p6 = por %p1110_p5, %p1109_p4 }
  0x12   :  { %p1112_p7 = pnand %p1111_p6, %p1105_p3 }
  0x14   :  { %1115 = shalt.err (!%p1112_p7)
}
  0x15   :  { %s1351_s23 = smov 64   ;;  %s1352_s24 = smov 4  }
  0x16   :  { %45 = dma.hbm_to_vmem [thread:$0]  %s1602_s1, 2304, %s40_s14, [#allocation6], %s1351_s23, %s1351_s23, %s1352_s24  }
  0x17   :  { %s1353_s27 = smov [#allocation8]   ;;  %s1354_s29 = smov [#allocation11]  }
  0x18   :  { %s62_s28 = sshll.u32 %s1353_s27, 4  ;;  %s84_s30 = sshll.u32 %s1354_s29, 4  ;;  %s63_s28 = int_to_ptr.vmem [resolvable:$true] %s62_s28  ;;  %s85_s30 = int_to_ptr.vmem [resolvable:$true] %s84_s30 }
  0x19   :  { %s1116_s13 = scalar_lea.hbm %s1604_s3, 16 }
  0x1a   :  { %p1117_p8 = scmp.ne.s32.totalorder %s1604_s3, %s1116_s13  ;;  %p1120_p9 = scmp.lt.u32.totalorder %s1116_s13, %s1604_s3 }
  0x1c   :  { %p1122_p10 = pnand %p1120_p9, %p1117_p8 }
  0x1e   :  { %1125 = shalt.err (!%p1122_p10)
}
  0x1f   :  { %s1126_s1 = scalar_lea.vmem %s63_s28, 16  ;;  %s1130_s14 = scalar_lea.vmem %s63_s28, 32 }
  0x20   :  { %p1127_p11 = scmp.ne.s32.totalorder %s63_s28, %s1126_s1  ;;  %p1131_p12 = scmp.lt.s32.totalorder %s63_s28, %s63_s28 }
  0x21   :  { %p1132_p13 = scmp.lt.s32.totalorder %s1130_s14, %s1126_s1 }
  0x23   :  { %p1133_p0 = por %p1132_p13, %p1131_p12 }
  0x25   :  { %p1134_p1 = pnand %p1133_p0, %p1127_p11 }
  0x27   :  { %1137 = shalt.err (!%p1134_p1)
}
  0x28   :  { %65 = dma.hbm_to_vmem [thread:$0]  %s1604_s3, 16, %s63_s28, [#allocation9]  }
  0x29   :  { %s1138_s25 = scalar_lea.hbm %s1606_s5, 16 }
  0x2a   :  { %p1139_p2 = scmp.ne.s32.totalorder %s1606_s5, %s1138_s25  ;;  %p1142_p3 = scmp.lt.u32.totalorder %s1138_s25, %s1606_s5 }
  0x2c   :  { %p1144_p4 = pnand %p1142_p3, %p1139_p2 }
  0x2e   :  { %1147 = shalt.err (!%p1144_p4)
}
  0x2f   :  { %s1148_s12 = scalar_lea.vmem %s85_s30, 16  ;;  %s1152_s13 = scalar_lea.vmem %s85_s30, 32 }
  0x30   :  { %p1149_p5 = scmp.ne.s32.totalorder %s85_s30, %s1148_s12  ;;  %p1153_p6 = scmp.lt.s32.totalorder %s85_s30, %s85_s30 }
  0x31   :  { %p1154_p7 = scmp.lt.s32.totalorder %s1152_s13, %s1148_s12 }
  0x33   :  { %p1155_p8 = por %p1154_p7, %p1153_p6 }
  0x35   :  { %p1156_p9 = pnand %p1155_p8, %p1149_p5 }
  0x37   :  { %1159 = shalt.err (!%p1156_p9)
}
  0x38   :  { %87 = dma.hbm_to_vmem [thread:$0]  %s1606_s5, 16, %s85_s30, [#allocation12]  }
  0x39   :  { %s1355_s15 = smov [#allocation14]   ;;  %s1356_s17 = smov [#allocation2]  }
  0x3a   :  { %s106_s16 = sshll.u32 %s1355_s15, 4  ;;  %s27_s18 = sshll.u32 %s1356_s17, 4  ;;  %s107_s16 = int_to_ptr.vmem [resolvable:$true] %s106_s16  ;;  %s28_s18 = int_to_ptr.vmem [resolvable:$true] %s27_s18 }
  0x3b   :  { %s1160_s19 = scalar_lea.hbm %s1608_s7, 16 }
  0x3c   :  { %p1161_p10 = scmp.ne.s32.totalorder %s1608_s7, %s1160_s19  ;;  %p1164_p11 = scmp.lt.u32.totalorder %s1160_s19, %s1608_s7 }
  0x3e   :  { %p1166_p12 = pnand %p1164_p11, %p1161_p10 }
  0x40   :  { %1169 = shalt.err (!%p1166_p12)
}
  0x41   :  { %s1170_s5 = scalar_lea.vmem %s107_s16, 16  ;;  %s1174_s30 = scalar_lea.vmem %s107_s16, 32 }
  0x42   :  { %p1171_p13 = scmp.ne.s32.totalorder %s107_s16, %s1170_s5  ;;  %p1175_p0 = scmp.lt.s32.totalorder %s107_s16, %s107_s16 }
  0x43   :  { %p1176_p1 = scmp.lt.s32.totalorder %s1174_s30, %s1170_s5 }
  0x45   :  { %p1177_p2 = por %p1176_p1, %p1175_p0 }
  0x47   :  { %p1178_p3 = pnand %p1177_p2, %p1171_p13 }
  0x49   :  { %1181 = shalt.err (!%p1178_p3)
}
  0x4a   :  { %109 = dma.hbm_to_vmem [thread:$0]  %s1608_s7, 16, %s107_s16, [#allocation15]  }
  0x4b   :  { %s1182_s12 = scalar_lea.hbm %s1601_s0, 768 }
  0x4c   :  { %p1183_p4 = scmp.ne.s32.totalorder %s1601_s0, %s1182_s12  ;;  %p1186_p5 = scmp.lt.u32.totalorder %s1182_s12, %s1601_s0 }
  0x4e   :  { %p1188_p6 = pnand %p1186_p5, %p1183_p4 }
  0x50   :  { %1191 = shalt.err (!%p1188_p6)
}
  0x51   :  { %s1192_s17 = scalar_lea.vmem %s28_s18, 768  ;;  %p1197_p8 = scmp.lt.s32.totalorder %s28_s18, %s28_s18 }
  0x52   :  { %p1193_p7 = scmp.ne.s32.totalorder %s28_s18, %s1192_s17  ;;  %p1198_p9 = scmp.lt.s32.totalorder %s1192_s17, %s1192_s17 }
  0x54   :  { %p1199_p10 = por %p1198_p9, %p1197_p8 }
  0x56   :  { %p1200_p11 = pnand %p1199_p10, %p1193_p7 }
  0x58   :  { %1203 = shalt.err (!%p1200_p11)
}
  0x59   :  { %s1357_s7 = smov 192   ;;  %s1358_s16 = smov 12  }
  0x5a   :  { %33 = dma.hbm_to_vmem [thread:$0]  %s1601_s0, 768, %s28_s18, [#allocation3], %s1357_s7, %s1357_s7, %s1358_s16  }
  0x5b   :  { %s1359_s19 = smov [#allocation7]   ;;  %s1360_s21 = smov [#allocation10]  }
  0x5c   :  { %s52_s20 = sshll.u32 %s1359_s19, 4  ;;  %s71_s22 = sshll.u32 %s1360_s21, 4  ;;  %s53_s20 = int_to_ptr.vmem [resolvable:$true] %s52_s20  ;;  %s72_s22 = int_to_ptr.vmem [resolvable:$true] %s71_s22 }
  0x5d   :  { %s1204_s30 = scalar_lea.hbm %s1603_s2, 16 }
  0x5e   :  { %p1205_p12 = scmp.ne.s32.totalorder %s1603_s2, %s1204_s30  ;;  %p1208_p13 = scmp.lt.u32.totalorder %s1204_s30, %s1603_s2 }
  0x60   :  { %p1210_p0 = pnand %p1208_p13, %p1205_p12 }
  0x62   :  { %1213 = shalt.err (!%p1210_p0)
}
  0x63   :  { %s1214_s0 = scalar_lea.vmem %s53_s20, 16  ;;  %s1218_s18 = scalar_lea.vmem %s53_s20, 32 }
  0x64   :  { %p1215_p1 = scmp.ne.s32.totalorder %s53_s20, %s1214_s0  ;;  %p1219_p2 = scmp.lt.s32.totalorder %s53_s20, %s53_s20 }
  0x65   :  { %p1220_p3 = scmp.lt.s32.totalorder %s1218_s18, %s1214_s0 }
  0x67   :  { %p1221_p4 = por %p1220_p3, %p1219_p2 }
  0x69   :  { %p1222_p5 = pnand %p1221_p4, %p1215_p1 }
  0x6b   :  { %1225 = shalt.err (!%p1222_p5)
}
  0x6c   :  { %55 = dma.hbm_to_vmem [thread:$0]  %s1603_s2, 16, %s53_s20, [#allocation6]  }
  0x6d   :  { %s1226_s15 = scalar_lea.hbm %s1605_s4, 512 }
  0x6e   :  { %p1227_p6 = scmp.ne.s32.totalorder %s1605_s4, %s1226_s15  ;;  %p1230_p7 = scmp.lt.u32.totalorder %s1226_s15, %s1605_s4 }
  0x70   :  { %p1232_p8 = pnand %p1230_p7, %p1227_p6 }
  0x72   :  { %1235 = shalt.err (!%p1232_p8)
}
  0x73   :  { %s1236_s14 = scalar_lea.vmem %s72_s22, 512  ;;  %p1241_p10 = scmp.lt.s32.totalorder %s72_s22, %s72_s22 }
  0x74   :  { %p1237_p9 = scmp.ne.s32.totalorder %s72_s22, %s1236_s14  ;;  %p1242_p11 = scmp.lt.s32.totalorder %s1236_s14, %s1236_s14 }
  0x76   :  { %p1243_p12 = por %p1242_p11, %p1241_p10 }
  0x78   :  { %p1244_p13 = pnand %p1243_p12, %p1237_p9 }
  0x7a   :  { %1247 = shalt.err (!%p1244_p13)
}
  0x7b   :  { %77 = dma.hbm_to_vmem [thread:$0]  %s1605_s4, 512, %s72_s22, [#allocation9], %s1351_s23, %s1351_s23, %s1352_s24  }
  0x7c   :  { %s1361_s20 = smov [#allocation13]   ;;  %s1362_s25 = smov [#allocation16]  }
  0x7d   :  { %s93_s21 = sshll.u32 %s1361_s20, 4  ;;  %s115_s5 = sshll.u32 %s1362_s25, 4  ;;  %s94_s21 = int_to_ptr.vmem [resolvable:$true] %s93_s21  ;;  %s116_s5 = int_to_ptr.vmem [resolvable:$true] %s115_s5 }
  0x7e   :  { %s1248_s27 = scalar_lea.hbm %s1607_s6, 1024 }
  0x7f   :  { %p1249_p0 = scmp.ne.s32.totalorder %s1607_s6, %s1248_s27  ;;  %p1252_p1 = scmp.lt.u32.totalorder %s1248_s27, %s1607_s6 }
  0x81   :  { %p1254_p2 = pnand %p1252_p1, %p1249_p0 }
  0x83   :  { %1257 = shalt.err (!%p1254_p2)
}
  0x84   :  { %s1258_s4 = scalar_lea.vmem %s94_s21, 1024  ;;  %p1263_p4 = scmp.lt.s32.totalorder %s94_s21, %s94_s21 }
  0x85   :  { %p1259_p3 = scmp.ne.s32.totalorder %s94_s21, %s1258_s4  ;;  %p1264_p5 = scmp.lt.s32.totalorder %s1258_s4, %s1258_s4 }
  0x87   :  { %p1265_p6 = por %p1264_p5, %p1263_p4 }
  0x89   :  { %p1266_p7 = pnand %p1265_p6, %p1259_p3 }
  0x8b   :  { %1269 = shalt.err (!%p1266_p7)
}
  0x8c   :  { %99 = dma.hbm_to_vmem [thread:$0]  %s1607_s6, 1024, %s94_s21, [#allocation12], %s1351_s23, %s1351_s23, %s1352_s24  }
  0x8d   :  { %s1270_s28 = scalar_lea.hbm %s1609_s8, 1024 }
  0x8e   :  { %p1271_p8 = scmp.ne.s32.totalorder %s1609_s8, %s1270_s28  ;;  %p1274_p9 = scmp.lt.u32.totalorder %s1270_s28, %s1609_s8 }
  0x90   :  { %p1276_p10 = pnand %p1274_p9, %p1271_p8 }
  0x92   :  { %1279 = shalt.err (!%p1276_p10)
}
  0x93   :  { %s1280_s1 = scalar_lea.vmem %s116_s5, 1024  ;;  %p1285_p12 = scmp.lt.s32.totalorder %s116_s5, %s116_s5 }
  0x94   :  { %p1281_p11 = scmp.ne.s32.totalorder %s116_s5, %s1280_s1  ;;  %p1286_p13 = scmp.lt.s32.totalorder %s1280_s1, %s1280_s1 }
  0x96   :  { %p1287_p0 = por %p1286_p13, %p1285_p12 }
  0x98   :  { %p1288_p1 = pnand %p1287_p0, %p1281_p11 }
  0x9a   :  { %1291 = shalt.err (!%p1288_p1)
}
  0x9b   :  { %121 = dma.hbm_to_vmem [thread:$0]  %s1609_s8, 1024, %s116_s5, [#allocation15], %s1351_s23, %s1351_s23, %s1352_s24  }
  0x9c   :  { %s1363_s2 = smov [#allocation17]   ;;  %s1292_s25 = scalar_lea.hbm %s1610_s9, 16 }
  0x9d   :  { %s128_s19 = sshll.u32 %s1363_s2, 4  ;;  %p1293_p2 = scmp.ne.s32.totalorder %s1610_s9, %s1292_s25  ;;  %s129_s19 = int_to_ptr.vmem [resolvable:$true] %s128_s19 }
  0x9e   :  { %p1296_p3 = scmp.lt.u32.totalorder %s1292_s25, %s1610_s9 }
  0xa0   :  { %p1298_p4 = pnand %p1296_p3, %p1293_p2 }
  0xa2   :  { %1301 = shalt.err (!%p1298_p4)
}
  0xa3   :  { %s1302_s11 = scalar_lea.vmem %s129_s19, 16  ;;  %s1306_s8 = scalar_lea.vmem %s129_s19, 32 }
  0xa4   :  { %p1303_p5 = scmp.ne.s32.totalorder %s129_s19, %s1302_s11  ;;  %p1307_p6 = scmp.lt.s32.totalorder %s129_s19, %s129_s19 }
  0xa5   :  { %p1308_p7 = scmp.lt.s32.totalorder %s1306_s8, %s1302_s11 }
  0xa7   :  { %p1309_p8 = por %p1308_p7, %p1307_p6 }
  0xa9   :  { %p1310_p9 = pnand %p1309_p8, %p1303_p5 }
  0xab   :  { %1313 = shalt.err (!%p1310_p9)
}
  0xac   :  { %131 = dma.hbm_to_vmem [thread:$0]  %s1610_s9, 16, %s129_s19, [#allocation18]  }
  0xad   :  { %1336 = dma.done.wait [#allocation3], 768  }
  0xae   :  { %1337 = vsyncadd [#allocation3], 4294966528 }
  0xaf   :  { %1338 = dma.done.wait [#allocation6], 2320  }
  0xb0   :  { %1339 = vsyncadd [#allocation6], 4294964976 }
  0xb1   :  { %1340 = dma.done.wait [#allocation9], 528  }
  0xb2   :  { %1341 = vsyncadd [#allocation9], 4294966768 }
  0xb3   :  { %1342 = dma.done.wait [#allocation12], 1040  }
  0xb4   :  { %1343 = vsyncadd [#allocation12], 4294966256 }
  0xb5   :  { %1344 = dma.done.wait [#allocation15], 1040  }
  0xb6   :  { %1345 = vsyncadd [#allocation15], 4294966256 }
  0xb7   :  { %1346 = dma.done.wait [#allocation18], 16  }
  0xb8   :  { %1347 = vsyncadd [#allocation18], 4294967280  ;;  %v1042_v0 = vld [vmem:[#allocation5 + $0x40] sm:$0xff]   ;;  %v1044_v2 = vld [vmem:[#allocation5 + $0x48] sm:$0xff]   ;;  %vm345_vm0 = vcmask 261120   ;;  %v1364_v25 = vmov 0.0  }
  0xb9   :  { %v1043_v1 = vld [vmem:[#allocation5] sm:$0xff]   ;;  %910 = vmatprep.subr.bf16.mxu0 %v1042_v0  ;;  %v1045_v3 = vld [vmem:[#allocation5 + $0x8] sm:$0xff]   ;;  %v1046_v4 = vld [vmem:[#allocation5 + $0x50] sm:$0xff]   ;;  %vm1365_vm1 = vmmov 0   ;;  %vm452_vm2 = vcmask 523264   ;;  %vm825_vm3 = vcmask 1041408  }
  0xba   :  { %911 = vmatpush3.bf16.msra.mxu0 %v1043_v1  ;;  %v1047_v5 = vld [vmem:[#allocation5 + $0x10] sm:$0xff]   ;;  %v1048_v6 = vld [vmem:[#allocation5 + $0x58] sm:$0xff]   ;;  %v1050_v8 = vld [vmem:[#allocation5 + $0x60] sm:$0xff]   ;;  %s1366_s9 = smov [#allocation19]  }
  0xbb   :  { %912 = vmatprep.subr.bf16.mxu0 %v1044_v2  ;;  %v1049_v7 = vld [vmem:[#allocation5 + $0x18] sm:$0xff]   ;;  %v1056_v9 = vld [vmem:[#allocation5 + $0x80] sm:$0xff]   ;;  %v1052_v11 = vld [vmem:[#allocation5 + $0x68] sm:$0xff]   ;;  %s846_s5 = sshll.u32 %s1366_s9, 4  ;;  %s847_s5 = int_to_ptr.vmem [resolvable:$true] %s846_s5 }
  0xbc   :  { %v1051_v10 = vld [vmem:[#allocation5 + $0x20] sm:$0xff]   ;;  %965 = vmatprep.subr.bf16.mxu1 %v1056_v9  ;;  %v1053_v12 = vld [vmem:[#allocation5 + $0x28] sm:$0xff]   ;;  %v1054_v14 = vld [vmem:[#allocation5 + $0x70] sm:$0xff]   ;;  %s1314_s0 = scalar_lea.vmem %s847_s5, 32  ;;  %p1319_p11 = scmp.lt.s32.totalorder %s847_s5, %s847_s5 }
  0xbd   :  { %966 = vmatpush3.bf16.msra.mxu1 %v1056_v9  ;;  %v1059_v13 = vld [vmem:[#allocation5 + $0x88] sm:$0xff]   ;;  %v1062_v15 = vld [vmem:[#allocation2 + $0x4] ss:$12 sps:$4 sm:$0xff]   ;;  %v1063_v16 = vld [vmem:[#allocation2 + $0x8] ss:$12 sps:$4 sm:$0xff]   ;;  %p1315_p10 = scmp.ne.s32.totalorder %s847_s5, %s1314_s0  ;;  %p1320_p12 = scmp.lt.s32.totalorder %s1314_s0, %s1314_s0 }
  0xbe   :  { %913 = vmatpush3.bf16.msra.mxu0 %v1045_v3  ;;  %967 = vmatprep.subr.bf16.mxu1 %v1059_v13  ;;  %v1064_v17 = vld [vmem:[#allocation2 + $0x20] ss:$12 sps:$4 sm:$0xff]   ;;  %v1065_v22 = vld [vmem:[#allocation2 + $0x1c] ss:$12 sps:$4 sm:$0xff]   ;;  %v1067_v23 = vld [vmem:[#allocation2 + $0x18] ss:$12 sps:$4 sm:$0xff]  }
  0xbf   :  { %914 = vmatprep.subr.bf16.mxu0 %v1046_v4  ;;  %384 = vmatprep.mubr.bf16.mxu0 %v1062_v15  ;;  %v1055_v18 = vld [vmem:[#allocation5 + $0x30] sm:$0xff]   ;;  %v1057_v19 = vld [vmem:[#allocation5 + $0x78] sm:$0xff]   ;;  %v1070_v27 = vld [vmem:[#allocation10 + $0x10] sm:$0xff]   ;;  %p1321_p13 = por %p1320_p12, %p1319_p11 }
  0xc0   :  { %969 = vmatprep.mubr.msk.bf16.mxu1 %vm345_vm0, %v1063_v16  ;;  %v1058_v20 = vld [vmem:[#allocation5 + $0x38] sm:$0xff]   ;;  %v1071_v28 = vld [vmem:[#allocation10 + $0x18] sm:$0xff]  }
  0xc1   :  { %968 = vmatpush3.bf16.msra.mxu1 %v1059_v13  ;;  %v1060_v21 = vld [vmem:[#allocation2] ss:$12 sps:$4 sm:$0xff]   ;;  %v1068_v24 = vld [vmem:[#allocation10] sm:$0xff]   ;;  %p1322_p0 = pnand %p1321_p13, %p1315_p10 }
  0xc2   :  { %915 = vmatpush3.bf16.msra.mxu0 %v1047_v5  ;;  %973 = vmatprep.subr.bf16.mxu1 %v1364_v25  ;;  %v1069_v26 = vld [vmem:[#allocation10 + $0x8] sm:$0xff]  }
  0xc3   :  { %916 = vmatprep.subr.bf16.mxu0 %v1048_v6 }
  0xc4   :  { %970 = vmatmul.mubr.msk.bf16.vlgmr.msra.gmra.mrb[0].mxu1 %vm345_vm0, %v1064_v17 }
  0xc5   :  { %974 = vmatpush3.bf16.msra.mxu1 %v1068_v24  ;;  %981 = vmatprep.mubr.msk.bf16.mxu1 %vm1365_vm1, %v1364_v25 }
  0xc6   :  { %917 = vmatpush3.bf16.msra.mxu0 %v1049_v7  ;;  %975 = vmatprep.subr.bf16.mxu1 %v1364_v25 }
  0xc7   :  { %918 = vmatprep.subr.bf16.mxu0 %v1050_v8 }
  0xc9   :  { %976 = vmatpush3.bf16.msra.mxu1 %v1069_v26 }
  0xca   :  { %919 = vmatpush3.bf16.msra.mxu0 %v1051_v10  ;;  %977 = vmatprep.subr.bf16.mxu1 %v1364_v25 }
  0xcb   :  { %920 = vmatprep.subr.bf16.mxu0 %v1052_v11 }
  0xcd   :  { %978 = vmatpush3.bf16.msra.mxu1 %v1070_v27 }
  0xce   :  { %921 = vmatpush3.bf16.msra.mxu0 %v1053_v12  ;;  %979 = vmatprep.subr.bf16.mxu1 %v1364_v25 }
  0xcf   :  { %922 = vmatprep.subr.bf16.mxu0 %v1054_v14 }
  0xd1   :  { %980 = vmatpush3.bf16.msra.mxu1 %v1071_v28  ;;  %v500_v28 = vlaneseq }
  0xd2   :  { %923 = vmatpush3.bf16.msra.mxu0 %v1055_v18  ;;  %985 = vmatprep.subr.bf16.mxu1 %v1364_v25 }
  0xd3   :  { %924 = vmatprep.subr.bf16.mxu0 %v1057_v19 }
  0xd6   :  { %925 = vmatpush3.bf16.msra.mxu0 %v1058_v20 }
  0xd7   :  { %1005 = vmatprep.subr.bf16.mxu0 %v1364_v25 }
  0xd9   :  { %385 = vmatmul.mubr.bf16.vlgmr.msra.gmra.mrb[0].mxu0 %v1060_v21 }
  0xda   :  { %392 = vmatprep.mubr.bf16.mxu0 %v1065_v22 }
  0xe1   :  { %393 = vmatmul.mubr.bf16.gmra.mrb[4].mxu0 %v1067_v23 }
  0xe2   :  { %1021 = vmatprep.mubr.msk.bf16.mxu0 %vm1365_vm1, %v1364_v25 }
 0x197   :  { %v971_v29 = vpop.f32.mrb[0].mxu1 }
 0x198   :  { %v435_v30 = vpop.f32.mrb[1].mxu1 }
 0x199   :  { %v972_v31 = vpop.f32.mrb[2].mxu1 }
 0x19a   :  { %v438_v32 = vpop.f32.mrb[3].mxu1 }
 0x1ac   :  { %v926_v33 = vpop.f32.mrb[0].mxu0 }
 0x1ad   :  { %v927_v34 = vpop.f32.mrb[1].mxu0 }
 0x1ae   :  { %v928_v35 = vadd.f32 %v927_v34, %v926_v33  ;;  %v929_v36 = vpop.f32.mrb[2].mxu0  ;;  %v451_v34 = vld [vmem:[#allocation8] sm:$0x1] }
 0x1af   :  { %v930_v37 = vpop.f32.mrb[3].mxu0 }
 0x1b0   :  { %v931_v38 = vadd.f32 %v930_v37, %v929_v36  ;;  %v436_v39 = vadd.f32 %v928_v35, %v435_v30  ;;  %v450_v30 = vld [vmem:[#allocation7] sm:$0x1] }
 0x1b2   :  { %v466_v40 = vmul.f32 %v436_v39, %v436_v39  ;;  %v439_v41 = vadd.f32 %v931_v38, %v438_v32  ;;  %v453_v42 = vsel %vm452_vm2, %v436_v39, 0.0 }
 0x1b4   :  { %v454_v43 = vsel %vm452_vm2, %v439_v41, 0.0  ;;  %v467_v44 = vmul.f32 %v439_v41, %v439_v41  ;;  %v493_v45 = vmax.f32 %v436_v39, %v439_v41  ;;  %v932_v46 = vpop.f32.mrb[4].mxu0  ;;  %v496_v48 = vmin.f32 %v436_v39, %v439_v41 }
 0x1b5   :  { %v455_v47 = vadd.f32 %v454_v43, %v453_v42  ;;  %v933_v49 = vpop.f32.mrb[5].mxu0  ;;  %v470_v50 = vsel %vm452_vm2, %v466_v40, 0.0 }
 0x1b6   :  { %v471_v51 = vsel %vm452_vm2, %v467_v44, 0.0  ;;  %v934_v52 = vadd.f32 %v933_v49, %v932_v46  ;;  %v935_v53 = vpop.f32.mrb[6].mxu0  ;;  %v1072_v44 = vld [vmem:[#allocation13] sm:$0xff]   ;;  %v1073_v46 = vld [vmem:[#allocation13 + $0x8] sm:$0xff]  }
 0x1b7   :  { %v472_v54 = vadd.f32 %v471_v51, %v470_v50  ;;  %v936_v55 = vpop.f32.mrb[7].mxu0  ;;  %v1076_v49 = vld [vmem:[#allocation13 + $0x20] sm:$0xff]   ;;  %v1077_v50 = vld [vmem:[#allocation13 + $0x28] sm:$0xff]   ;;  %v1078_v51 = vld [vmem:[#allocation13 + $0x30] sm:$0xff]  }
 0x1b8   :  { %v444_v56 = vadd.f32 %v971_v29, %v934_v52  ;;  %v937_v57 = vadd.f32 %v936_v55, %v935_v53  ;;  %v501_v29 = vshrl.u32 %v500_v28, 7  ;;  %v1079_v52 = vld [vmem:[#allocation13 + $0x38] sm:$0xff]   ;;  %v1080_v53 = vld [vmem:[#allocation16] sm:$0xff]  }
 0x1b9   :  { %1006 = vmatpush3.bf16.msra.mxu0 %v1080_v53  ;;  %v1082_v55 = vld [vmem:[#allocation16 + $0x10] sm:$0xff]  }
 0x1ba   :  { %v456_v58 = vsel %vm452_vm2, %v444_v56, 0.0  ;;  %v468_v59 = vmul.f32 %v444_v56, %v444_v56  ;;  %v447_v60 = vadd.f32 %v972_v31, %v937_v57  ;;  %v502_v31 = vsub.s32 0, %v501_v29  ;;  %1007 = vmatprep.subr.bf16.mxu0 %v1364_v25  ;;  %v1084_v57 = vld [vmem:[#allocation16 + $0x20] sm:$0xff]  }
 0x1bb   :  { %v457_v61 = vadd.f32 %v456_v58, %v455_v47  ;;  %v1074_v47 = vld [vmem:[#allocation13 + $0x10] sm:$0xff]  }
 0x1bc   :  { %v473_v62 = vsel %vm452_vm2, %v468_v59, 0.0  ;;  %v458_v63 = vsel %vm452_vm2, %v447_v60, 0.0  ;;  %v469_v0 = vmul.f32 %v447_v60, %v447_v60  ;;  %v494_v1 = vmax.f32 %v444_v56, %v447_v60  ;;  %v1085_v58 = vld [vmem:[#allocation16 + $0x28] sm:$0xff]   ;;  %v886_v59 = vld [vmem:[#allocation11] ss:$0 sm:$0xff] }
 0x1bd   :  { %v474_v2 = vadd.f32 %v473_v62, %v472_v54  ;;  %v459_v3 = vadd.f32 %v458_v63, %v457_v61  ;;  %v497_v4 = vmin.f32 %v444_v56, %v447_v60  ;;  %v1081_v54 = vld [vmem:[#allocation16 + $0x8] sm:$0xff]   ;;  %v1083_v56 = vld [vmem:[#allocation16 + $0x18] sm:$0xff]  }
 0x1be   :  { %v475_v5 = vsel %vm452_vm2, %v469_v0, 0.0  ;;  %v495_v6 = vmax.f32 %v493_v45, %v494_v1  ;;  %1008 = vmatpush3.bf16.msra.mxu0 %v1081_v54 }
 0x1bf   :  { %v460_v7 = vrot.slane %v459_v3, 4  ;;  %v476_v8 = vadd.f32 %v475_v5, %v474_v2  ;;  %v498_v9 = vmin.f32 %v496_v48, %v497_v4  ;;  %v1075_v48 = vld [vmem:[#allocation13 + $0x18] sm:$0xff]   ;;  %1009 = vmatprep.subr.bf16.mxu0 %v1364_v25  ;;  %v892_v5 = vld [vmem:[#allocation14] ss:$0 sm:$0xff] }
 0x1c0   :  { %v1087_v4 = vld [vmem:[#allocation16 + $0x38] sm:$0xff]  }
 0x1c1   :  { %v461_v10 = vadd.f32 %v460_v7, %v459_v3  ;;  %v477_v11 = vrot.slane %v476_v8, 4  ;;  %v1086_v3 = vld [vmem:[#allocation16 + $0x30] sm:$0xff]  }
 0x1c2   :  { %1010 = vmatpush3.bf16.msra.mxu0 %v1082_v55 }
 0x1c3   :  { %v462_v12 = vrot.slane %v461_v10, 2  ;;  %v478_v13 = vadd.f32 %v477_v11, %v476_v8  ;;  %1011 = vmatprep.subr.bf16.mxu0 %v1364_v25 }
 0x1c5   :  { %v463_v14 = vadd.f32 %v462_v12, %v461_v10  ;;  %v479_v15 = vrot.slane %v478_v13, 2 }
 0x1c6   :  { %1012 = vmatpush3.bf16.msra.mxu0 %v1083_v56 }
 0x1c7   :  { %v464_v16 = vrot.slane %v463_v14, 1  ;;  %v480_v17 = vadd.f32 %v479_v15, %v478_v13  ;;  %1013 = vmatprep.subr.bf16.mxu0 %v1364_v25  ;;  %v901_v13 = vld [vmem:[#allocation17] ss:$0 sm:$0xff] }
 0x1c9   :  { %v465_v18 = vadd.f32 %v464_v16, %v463_v14  ;;  %v481_v19 = vrot.slane %v480_v17, 1 }
 0x1ca   :  { %1014 = vmatpush3.bf16.msra.mxu0 %v1084_v57 }
 0x1cb   :  { %v482_v20 = vadd.f32 %v481_v19, %v480_v17  ;;  %v483_v21 = vmul.f32 0.125, %v465_v18  ;;  %1015 = vmatprep.subr.bf16.mxu0 %v1364_v25 }
 0x1cd   :  { %v484_v22 = vmul.f32 0.125, %v482_v20  ;;  %v485_v23 = vmul.f32 %v483_v21, %v483_v21 }
 0x1ce   :  { %1016 = vmatpush3.bf16.msra.mxu0 %v1085_v58 }
 0x1cf   :  { %v486_v24 = vsub.f32 %v484_v22, %v485_v23  ;;  %1017 = vmatprep.subr.bf16.mxu0 %v1364_v25 }
 0x1d1   :  { %v487_v26 = vmax.f32 %v486_v24, 0.0 }
 0x1d2   :  { %1018 = vmatpush3.bf16.msra.mxu0 %v1086_v3 }
 0x1d3   :  { %v488_v27 = vadd.f32 1e-05, %v487_v26  ;;  %1019 = vmatprep.subr.bf16.mxu0 %v1364_v25 }
 0x1d5   :  { %1088 = vrsqrt.f32 %v488_v27 }
 0x1d6   :  { %1020 = vmatpush3.bf16.msra.mxu0 %v1087_v4 }
 0x1df   :  { %v1089_v32 = vpop.eup %1088 }
 0x1e0   :  { %v490_v33 = vmul.f32 %v1089_v32, %v450_v30 }
 0x1e2   :  { %v503_v35 = vrot.slane %v490_v33, %v502_v31  ;;  %v491_v36 = vmul.f32 %v490_v33, %v483_v21 }
 0x1e4   :  { %v505_v37 = vmul.f32 %v503_v35, %v495_v6  ;;  %v506_v38 = vmul.f32 %v503_v35, %v498_v9  ;;  %v492_v39 = vsub.f32 %v451_v34, %v491_v36 }
 0x1e6   :  { %v507_v40 = vmax.f32 %v505_v37, %v506_v38  ;;  %v512_v41 = vrot.slane %v492_v39, %v502_v31 }
 0x1e8   :  { %v514_v42 = vadd.f32 %v512_v41, %v507_v40 }
 0x1ea   :  { %v515_v43 = vmax.f32 %v514_v42, 0.0 }
 0x1ec   :  { %v516_v45 = vpack.c.bf16 %v515_v43, %v515_v43 }
 0x1ee   :  { %982 = vmatmul.mubr.msk.bf16.vlgmr.msra.gmra.mrb[4].mxu1 %vm452_vm2, %v516_v45 }
 0x1ef   :  { %986 = vmatpush3.bf16.msra.mxu1 %v1072_v44  ;;  %1001 = vmatprep.mubr.msk.bf16.mxu1 %vm1365_vm1, %v1364_v25 }
 0x1f0   :  { %987 = vmatprep.subr.bf16.mxu1 %v1364_v25 }
 0x1f3   :  { %988 = vmatpush3.bf16.msra.mxu1 %v1073_v46 }
 0x1f4   :  { %989 = vmatprep.subr.bf16.mxu1 %v1364_v25 }
 0x1f7   :  { %990 = vmatpush3.bf16.msra.mxu1 %v1074_v47 }
 0x1f8   :  { %991 = vmatprep.subr.bf16.mxu1 %v1364_v25 }
 0x1fb   :  { %992 = vmatpush3.bf16.msra.mxu1 %v1075_v48 }
 0x1fc   :  { %993 = vmatprep.subr.bf16.mxu1 %v1364_v25 }
 0x1ff   :  { %994 = vmatpush3.bf16.msra.mxu1 %v1076_v49 }
 0x200   :  { %995 = vmatprep.subr.bf16.mxu1 %v1364_v25 }
 0x203   :  { %996 = vmatpush3.bf16.msra.mxu1 %v1077_v50 }
 0x204   :  { %997 = vmatprep.subr.bf16.mxu1 %v1364_v25 }
 0x207   :  { %998 = vmatpush3.bf16.msra.mxu1 %v1078_v51 }
 0x208   :  { %999 = vmatprep.subr.bf16.mxu1 %v1364_v25 }
 0x20b   :  { %1000 = vmatpush3.bf16.msra.mxu1 %v1079_v52 }
 0x2c1   :  { %v593_v60 = vpop.f32.mrb[4].mxu1 }
 0x2c2   :  { %v594_v61 = vadd.f32 %v886_v59, %v593_v60  ;;  %v983_v62 = vpop.f32.mrb[5].mxu1 }
 0x2c3   :  { %v596_v63 = vpop.f32.mrb[6].mxu1 }
 0x2c4   :  { %v599_v0 = vmax.f32 %v594_v61, 0.0  ;;  %v984_v1 = vpop.f32.mrb[7].mxu1 }
 0x2c6   :  { %v600_v2 = vpack.c.bf16 %v599_v0, %v599_v0 }
 0x2c8   :  { %1002 = vmatmul.mubr.bf16.vlgmr.msra.gmra.mrb[8].mxu1 %v600_v2 }
 0x39b   :  { %v706_v6 = vpop.f32.mrb[8].mxu1 }
 0x39c   :  { %v707_v7 = vadd.f32 %v892_v5, %v706_v6  ;;  %v1003_v8 = vpop.f32.mrb[9].mxu1 }
 0x39d   :  { %v709_v9 = vpop.f32.mrb[10].mxu1 }
 0x39e   :  { %v712_v10 = vmax.f32 %v707_v7, 0.0  ;;  %v1004_v11 = vpop.f32.mrb[11].mxu1 }
 0x3a0   :  { %v713_v12 = vpack.c.bf16 %v712_v10, %v712_v10 }
 0x3a2   :  { %1022 = vmatmul.mubr.bf16.vlgmr.msra.gmra.mrb[8].mxu0 %v713_v12 }
 0x475   :  { %v819_v14 = vpop.f32.mrb[8].mxu0 }
 0x476   :  { %v820_v15 = vadd.f32 %v901_v13, %v819_v14  ;;  %v1023_v16 = vpop.f32.mrb[9].mxu0 }
 0x477   :  { %v822_v17 = vpop.f32.mrb[10].mxu0 }
 0x478   :  { %v1024_v18 = vpop.f32.mrb[11].mxu0  ;;  %v826_v19 = vsel %vm825_vm3, %v820_v15, -inf }
 0x479   :  { %827 = vmax.xlane.f32.xlu0 %v826_v19 }
 0x506   :  { %v828_v25 = vpop.xlane.xlu0 %827 }
 0x507   :  { %v829_v20 = vsub.f32 %v820_v15, %v828_v25 }
 0x509   :  { %v830_v21 = vmul.f32 1.442695, %v829_v20 }
 0x50b   :  { %1090 = vpow2.f32 %v830_v21 }
 0x515   :  { %v1091_v22 = vpop.eup %1090 }
 0x516   :  { %v832_v23 = vsel %vm825_vm3, %v1091_v22, 0.0 }
 0x517   :  { %833 = vadd.xlane.f32.xlu0 %v832_v23 }
 0x5a4   :  { %v834_v24 = vpop.xlane.xlu0 %833 }
 0x5a5   :  { %1092 = vlog2.f32 %v834_v24 }
 0x5af   :  { %v1093_v26 = vpop.eup %1092 }
 0x5b0   :  { %v836_v27 = vmul.f32 0.6931472, %v1093_v26 }
 0x5b2   :  { %v837_v28 = vadd.f32 %v836_v27, %v828_v25 }
 0x5b4   :  { %v838_v29 = vsub.f32 %v820_v15, %v837_v28 }
 0x5b6   :  { %839 = vst [vmem:[#allocation19] sm:$0x3] %v838_v29 }
 0x5b7   :  { %1325 = shalt.err (!%p1322_p0)
}
 0x5b8   :  { %s1326_s22 = scalar_lea.hbm %s1611_s10, 32 }
 0x5b9   :  { %p1327_p1 = scmp.ne.s32.totalorder %s1611_s10, %s1326_s22  ;;  %p1330_p2 = scmp.lt.u32.totalorder %s1326_s22, %s1611_s10 }
 0x5bb   :  { %p1332_p3 = pnand %p1330_p2, %p1327_p1 }
 0x5bd   :  { %1335 = shalt.err (!%p1332_p3)
}
 0x5be   :  { %849 = dma.vmem_to_hbm [thread:$0]  %s847_s5, 32, %s1611_s10, [#allocation4]  }
 0x5bf   :  { %1348 = dma.done.wait [#allocation4], 32  }
 0x5c0   :  { %1349 = vsyncadd [#allocation4], 4294967264 }
 0x5c1   :  { %853 = vsyncpa [#allocation3], 1 }
 0x5c2   :  { %854 = vsyncpa [#allocation6], 1 }
 0x5c3   :  { %855 = vsyncpa [#allocation9], 1 }
 0x5c4   :  { %856 = vsyncpa [#allocation12], 1 }
 0x5c5   :  { %857 = vsyncpa [#allocation15], 1 }
 0x5c6   :  { %858 = vsyncpa [#allocation18], 1 }
 0x5c7   :  { %859 = vsyncpa [#allocation4], 1 }

</bundles_post_ra>
